<compile_context>
chip_gen: v6e
topology: v6e:2x2x1
jax: 0.10.0
libtpu: 0.0.40
codegen_flags: <defaults>
</compile_context>

<pallas_src>
import functools

import jax
import jax.numpy as jnp
from jax.experimental import pallas as pl
from jax.experimental.pallas import tpu as pltpu


def msff_kernel(x_ref, hw_ref, hb_ref, ww_ref, wwb_ref, mpw_ref, mpb_ref,
                w1_ref, b1_ref, w2_ref, b2_ref, out_ref, bd_ref, *, C, W):
    """One grid step: BB images in a lane-dense (BB, H, W*C) layout."""
    BB, H, WC = x_ref.shape
    NEG = jnp.finfo(jnp.float32).min             # maxpool pad value

    # --- Expand the (C, W*C) lane-tiled 1x1 maxpool-conv weight into the block-diagonal
    # (W*C, W*C) matrix in VMEM scratch. Guarded on the *inner* (arbitrary) grid axis so
    # it also runs on the second TensorCore when the outer (parallel) axis is sharded.
    @pl.when(pl.program_id(1) == 0)
    def _():
        wt_rows = mpw_ref[...]                                   # (C, W*C)
        lane = jax.lax.broadcasted_iota(jnp.int32, (C, WC), 1)
        for i in range(W):
            blk = (lane >= i * C) & (lane < (i + 1) * C)
            bd_ref[i * C:(i + 1) * C, :] = jnp.where(blk, wt_rows, 0.0)

    x = x_ref[...]                               # (BB, H, W*C) f32
    hidx = jax.lax.broadcasted_iota(jnp.int32, (H, 1), 0)    # sublane (row) index
    widx = jax.lax.broadcasted_iota(jnp.int32, (1, WC), 1)   # lane index = w*C + c

    # --- (K,1) depthwise convs (K = 3, 5, 7), streamed: each H-shifted copy of x is
    # built once and folded immediately into the three accumulators (and the maxpool
    # row-max for |d|<=1), bounding live full-size arrays / vreg pressure.
    # hw rows: branch b tap (3+d) lives at row 7*b + 3 + d.
    t3 = x * hw_ref[3]
    t5 = x * hw_ref[10]
    t7 = x * hw_ref[17]
    rmax = x
    for d in (-1, 1, -2, 2, -3, 3):
        rolled = pltpu.roll(x, shift=(-d) % H, axis=1)
        valid = (hidx < H - d) if d > 0 else (hidx >= -d)
        xs = jnp.where(valid, rolled, 0.0)
        t7 = t7 + xs * hw_ref[17 + d]
        if abs(d) <= 2:
            t5 = t5 + xs * hw_ref[10 + d]
        if abs(d) <= 1:
            t3 = t3 + xs * hw_ref[3 + d]
            rmax = jnp.maximum(rmax, jnp.where(valid, rolled, NEG))
    t3 = t3 + hb_ref[0]
    t5 = t5 + hb_ref[1]
    t7 = t7 + hb_ref[2]

    # --- max_pool branch first (frees rmax early): horizontal 3-max, then the 1x1 conv
    # as one MXU matmul against the block-diagonal scratch -> result stays lane-dense.
    right = pltpu.roll(rmax, shift=(-C) % WC, axis=2)        # rmax at w+1
    left = pltpu.roll(rmax, shift=C, axis=2)                 # rmax at w-1
    mp = jnp.maximum(rmax, jnp.where(widx < (W - 1) * C, right, NEG))
    mp = jnp.maximum(mp, jnp.where(widx >= C, left, NEG))
    mp2 = jnp.dot(mp.reshape(BB * H, WC), bd_ref[...],
                  preferred_element_type=jnp.float32,
                  precision=jax.lax.Precision.HIGHEST) + mpb_ref[...]
    acc = mp2.reshape(BB, H, WC)

    # --- (1,K) depthwise convs of the three branches fused by linearity:
    #   sum_i conv_w(t_i, v_i) = sum_d shift_w(sum_i t_i * v_i[d], d)
    # streamed directly into the branch-sum accumulator (7 lane rolls total).
    acc = acc + t3 * ww_ref[3] + t5 * ww_ref[10] + t7 * ww_ref[17]
    for d in (-1, 1, -2, 2, -3, 3):
        u = t7 * ww_ref[17 + d]
        if abs(d) <= 2:
            u = u + t5 * ww_ref[10 + d]
        if abs(d) <= 1:
            u = u + t3 * ww_ref[3 + d]
        rolled = pltpu.roll(u, shift=(-d * C) % WC, axis=2)
        valid = (widx < (W - d) * C) if d > 0 else (widx >= (-d) * C)
        acc = acc + jnp.where(valid, rolled, 0.0)
    acc = acc + wwb_ref[...]                     # summed (1,K)-conv biases, (1, W*C)

    # --- mean of the 4 branches + identity.
    mix = acc * 0.25 + x

    # --- channel attention entirely on VPU/XLU: GAP -> 1x1 -> relu -> 1x1 -> sigmoid.
    # The W-row-tiled squeeze weight folds the W-part of the GAP into the lane reduce;
    # the W-col-tiled excite weight yields the gate already in the lane-dense layout.
    s = jnp.sum(mix, axis=1)                     # (BB, W*C) sublane reduce
    inv_hw = 1.0 / (H * W)
    mid = w1_ref.shape[0]
    att = b2_ref[...]                            # (1, W*C)
    for m in range(mid):
        ym = jnp.sum(s * w1_ref[m], axis=-1, keepdims=True) * inv_hw + b1_ref[m]
        ym = jnp.maximum(ym, 0.0)                # relu
        att = att + ym * w2_ref[m]
    gate = jax.nn.sigmoid(att)                   # (BB, W*C)

    # identity + channel_attention(mix)
    out_ref[...] = x + mix * gate[:, None, :]


def _num_tensorcores():
    """v7x has 2 TensorCores/chip (megacore); v5e/v6e have 1."""
    # TODO(synk): switch to pltpu.get_tpu_info() once a stable core-count field exists.
    try:
        kind = jax.devices()[0].device_kind.lower()
    except Exception:
        return 1
    return 2 if "v7" in kind else 1


def _choose_blocking(batch, two_tensorcores):
    """Pick the batch block BB and the (outer, inner) grid split.

    BB <= 4 bounds intermediate live-array size (vreg pressure) and keeps grid >= 2 for
    larger batches so the next x block / previous out block DMA overlaps compute.  On
    2-TensorCore chips BB is also capped so both cores get at least one block; the
    outer axis is the megacore-parallel one.
    """
    bb = min(batch, 4)
    if two_tensorcores and batch >= 2:
        bb = min(bb, max(1, batch // 2))
    while batch % bb:
        bb -= 1
    nblk = batch // bb
    if two_tensorcores and nblk % 2 == 0:
        return bb, 2, nblk // 2
    return bb, 1, nblk


def _pack_params(params, W):
    """Tile per-channel parameters to lane width W*C (done once, outside the kernel)."""
    def tile_last(a):
        return jnp.tile(a, (1,) * (a.ndim - 1) + (W,))

    return dict(
        hw=tile_last(params["dwh_w"]).reshape(21, -1),                    # (21, W*C)
        hb=tile_last(params["dwh_b"]),                                    # (3, W*C)
        ww=tile_last(params["dww_w"]).reshape(21, -1),                    # (21, W*C)
        wwb=tile_last(jnp.sum(params["dww_b"], axis=0, keepdims=True)),   # (1, W*C)
        mpw=tile_last(params["mp_w_t"]),                                  # (C, W*C)
        mpb=tile_last(params["mp_b"]),                                    # (1, W*C)
        w1=tile_last(jnp.transpose(params["ca_w1t"])),                    # (mid, W*C)
        b1=params["ca_b1"][0],                                            # (mid,) -> SMEM
        w2=tile_last(params["ca_w2t"]),                                   # (mid, W*C)
        b2=tile_last(params["ca_b2"]),                                    # (1, W*C)
    )


def multi_scale_feed_forward(x_nhwc, params, *, batch_per_block=None, two_tensorcores=None):
    B, H, W, C = x_nhwc.shape
    WC = W * C
    mid = params["ca_w1t"].shape[1]

    if two_tensorcores is None:
        two_tensorcores = _num_tensorcores() >= 2
    if batch_per_block is None:
        bb, outer, inner = _choose_blocking(B, two_tensorcores)
    else:
        bb = int(max(1, min(B, batch_per_block)))
        while B % bb:
            bb -= 1
        nblk = B // bb
        if two_tensorcores and nblk % 2 == 0:
            outer, inner = 2, nblk // 2
        else:
            outer, inner = 1, nblk

    p = _pack_params(params, W)
    x_dense = x_nhwc.reshape(B, H, WC)           # lane-dense view (free metadata reshape)

    kernel = functools.partial(msff_kernel, C=C, W=W)
    xmap = lambda o, i: (o * inner + i, 0, 0)
    cmap2 = lambda o, i: (0, 0)
    in_specs = [
        pl.BlockSpec((bb, H, WC), xmap),                       # x, lane-dense
        pl.BlockSpec((21, WC), cmap2),                         # (K,1) taps (tiled)
        pl.BlockSpec((3, WC), cmap2),                          # (K,1) biases (tiled)
        pl.BlockSpec((21, WC), cmap2),                         # (1,K) taps (tiled)
        pl.BlockSpec((1, WC), cmap2),                          # summed (1,K) biases
        pl.BlockSpec((C, WC), cmap2),                          # 1x1 maxpool weight (lane-tiled)
        pl.BlockSpec((1, WC), cmap2),                          # 1x1 maxpool bias (tiled)
        pl.BlockSpec((mid, WC), cmap2),                        # CA squeeze weight (row-tiled)
        pl.BlockSpec(memory_space=pltpu.MemorySpace.SMEM),     # CA squeeze bias (mid,)
        pl.BlockSpec((mid, WC), cmap2),                        # CA excite weight (col-tiled)
        pl.BlockSpec((1, WC), cmap2),                          # CA excite bias (tiled)
    ]

    # VMEM budget: double-buffered x/out blocks + (once-fetched) weights + the (WC,WC)
    # block-diagonal scratch + margin for compiler temporaries.
    block_bytes = bb * H * WC * 4
    weight_bytes = 4 * ((2 * 21 + 3 + 3 + C + 2 * mid) * WC + mid)
    vmem_limit = int(min(64 << 20,
                         max(16 << 20,
                             4 * block_bytes + 2 * weight_bytes + 4 * WC * WC + (6 << 20))))

    elem = B * H * WC
    cost = pl.CostEstimate(
        flops=int(150 * elem + 2 * B * H * WC * WC + 4 * B * WC * mid),
        transcendentals=int(B * WC),                 # sigmoid
        bytes_accessed=int(8 * elem + weight_bytes),
    )

    out = pl.pallas_call(
        kernel,
        out_shape=jax.ShapeDtypeStruct((B, H, WC), x_nhwc.dtype),
        grid=(outer, inner),
        in_specs=in_specs,
        out_specs=pl.BlockSpec((bb, H, WC), xmap),
        scratch_shapes=[pltpu.VMEM((WC, WC), jnp.float32)],
        compiler_params=pltpu.CompilerParams(
            dimension_semantics=("parallel", "arbitrary"),
            vmem_limit_bytes=vmem_limit),
        cost_estimate=cost,
    )(x_dense, p["hw"], p["hb"], p["ww"], p["wwb"], p["mpw"], p["mpb"],
      p["w1"], p["b1"], p["w2"], p["b2"])
    return out.reshape(B, H, W, C)


def make_params(key, C):
    # ChannelAttention(num_feat=C, squeeze_factor=C//8) -> mid = C // (C//8)
    mid = C // (C // 8)
    ks = jax.random.split(key, 16)
    s = 0.1

    def rnd(k, shape):
        return s * jax.random.normal(k, shape, dtype=jnp.float32)

    dwh_w = jnp.zeros((3, 7, C), jnp.float32)
    dww_w = jnp.zeros((3, 7, C), jnp.float32)
    for i, K in enumerate((3, 5, 7)):
        off = (7 - K) // 2
        dwh_w = dwh_w.at[i, off:off + K].set(rnd(ks[2 * i], (K, C)))
        dww_w = dww_w.at[i, off:off + K].set(rnd(ks[2 * i + 1], (K, C)))
    dwh_b = rnd(ks[6], (3, C))
    dww_b = rnd(ks[7], (3, C))

    return dict(
        dwh_w=dwh_w, dwh_b=dwh_b, dww_w=dww_w, dww_b=dww_b,
        mp_w_t=rnd(ks[8], (C, C)),      # 1x1 conv weight, stored (C_in, C_out)
        mp_b=rnd(ks[9], (1, C)),
        ca_w1t=rnd(ks[10], (C, mid)),   # squeeze conv, stored (C_in, mid)
        ca_b1=rnd(ks[11], (1, mid)),
        ca_w2t=rnd(ks[12], (mid, C)),   # excite conv, stored (mid, C_out)
        ca_b2=rnd(ks[13], (1, C)),
    )


def ref_forward(x_nhwc, params):
    """Pure-JAX reference (same math, true f32 matmuls), used to validate the kernel."""
    B, H, W, C = x_nhwc.shape
    NEG = jnp.finfo(jnp.float32).min
    HI = jax.lax.Precision.HIGHEST

    def conv_h(a, w, b):
        ap = jnp.pad(a, ((0, 0), (3, 3), (0, 0), (0, 0)))
        acc = sum(ap[:, k:k + H] * w[k][None, None, None, :] for k in range(7))
        return acc + b[None, None, None, :]

    def conv_w(a, w, b):
        ap = jnp.pad(a, ((0, 0), (0, 0), (3, 3), (0, 0)))
        acc = sum(ap[:, :, k:k + W] * w[k][None, None, None, :] for k in range(7))
        return acc + b[None, None, None, :]

    branch = jnp.zeros_like(x_nhwc)
    for i in range(3):
        t = conv_h(x_nhwc, params["dwh_w"][i], params["dwh_b"][i])
        t = conv_w(t, params["dww_w"][i], params["dww_b"][i])
        branch = branch + t

    xp = jnp.pad(x_nhwc, ((0, 0), (1, 1), (1, 1), (0, 0)), constant_values=NEG)
    mp = xp[:, 0:H, 0:W]
    for di in range(3):
        for dj in range(3):
            mp = jnp.maximum(mp, xp[:, di:di + H, dj:dj + W])
    mp2 = jnp.einsum("bhwc,cd->bhwd", mp, params["mp_w_t"],
                     precision=HI) + params["mp_b"][0]

    mix = (branch + mp2) * 0.25 + x_nhwc

    avg = jnp.mean(mix, axis=(1, 2))                                      # (B, C)
    y1 = jnp.maximum(jnp.dot(avg, params["ca_w1t"], precision=HI)
                     + params["ca_b1"], 0.0)
    y2 = jax.nn.sigmoid(jnp.dot(y1, params["ca_w2t"], precision=HI)
                        + params["ca_b2"])                                # (B, C)
    return x_nhwc + mix * y2[:, None, None, :]


if __name__ == "__main__":
    B, C, H, W = 2, 32, 16, 16           # in_features=32 -> squeeze_factor=4, mid=8
    key = jax.random.PRNGKey(0)
    kx, kp = jax.random.split(key)

    # PyTorch-style NCHW input, transposed to the kernel's NHWC layout.
    x_nchw = jax.random.normal(kx, (B, C, H, W), dtype=jnp.float32)
    x_nhwc = jnp.transpose(x_nchw, (0, 2, 3, 1))

    params = make_params(kp, C)

    out = multi_scale_feed_forward(x_nhwc, params)
    out = jax.block_until_ready(out)

    ref = jax.block_until_ready(ref_forward(x_nhwc, params))
    assert out.shape == (B, H, W, C)
    err = float(jnp.max(jnp.abs(out - ref)))
    assert jnp.allclose(out, ref, rtol=1e-4, atol=1e-4), err

    print("KERNEL_OK")
</pallas_src>

<mosaic_0001>
module attributes {stable_mosaic.version = 11 : i64} {
  func.func @msff_kernel(%arg0: i32, %arg1: i32, %arg2: memref<2x16x512xf32, #tpu.memory_space<vmem>>, %arg3: memref<21x512xf32, #tpu.memory_space<vmem>>, %arg4: memref<3x512xf32, #tpu.memory_space<vmem>>, %arg5: memref<21x512xf32, #tpu.memory_space<vmem>>, %arg6: memref<1x512xf32, #tpu.memory_space<vmem>>, %arg7: memref<32x512xf32, #tpu.memory_space<vmem>>, %arg8: memref<1x512xf32, #tpu.memory_space<vmem>>, %arg9: memref<8x512xf32, #tpu.memory_space<vmem>>, %arg10: memref<8xf32, #tpu.memory_space<smem>>, %arg11: memref<8x512xf32, #tpu.memory_space<vmem>>, %arg12: memref<1x512xf32, #tpu.memory_space<vmem>>, %arg13: memref<2x16x512xf32, #tpu.memory_space<vmem>>, %arg14: memref<512x512xf32, #tpu.memory_space<vmem>>) attributes {dimension_semantics = [#tpu.dimension_semantics<parallel>, #tpu.dimension_semantics<arbitrary>], iteration_bounds = array<i64: 1, 1>, scalar_prefetch = 0 : i64, scratch_operands = 1 : i64, tpu.core_type = #tpu.core_type<tc>, window_params = [{transform_indices = @transform_0, window_bounds = array<i64: 2, 16, 512>}, {pipeline_mode = #tpu.pipeline_mode<synchronous>, transform_indices = @transform_1, window_bounds = array<i64: 21, 512>}, {pipeline_mode = #tpu.pipeline_mode<synchronous>, transform_indices = @transform_2, window_bounds = array<i64: 3, 512>}, {pipeline_mode = #tpu.pipeline_mode<synchronous>, transform_indices = @transform_3, window_bounds = array<i64: 21, 512>}, {pipeline_mode = #tpu.pipeline_mode<synchronous>, transform_indices = @transform_4, window_bounds = array<i64: 1, 512>}, {pipeline_mode = #tpu.pipeline_mode<synchronous>, transform_indices = @transform_5, window_bounds = array<i64: 32, 512>}, {pipeline_mode = #tpu.pipeline_mode<synchronous>, transform_indices = @transform_6, window_bounds = array<i64: 1, 512>}, {pipeline_mode = #tpu.pipeline_mode<synchronous>, transform_indices = @transform_7, window_bounds = array<i64: 8, 512>}, {transform_indices = @transform_8, window_bounds = array<i64: 8>}, {pipeline_mode = #tpu.pipeline_mode<synchronous>, transform_indices = @transform_9, window_bounds = array<i64: 8, 512>}, {pipeline_mode = #tpu.pipeline_mode<synchronous>, transform_indices = @transform_10, window_bounds = array<i64: 1, 512>}, {transform_indices = @transform_11, window_bounds = array<i64: 2, 16, 512>}]} {
    %c0_i32 = arith.constant 0 : i32
    %0 = arith.cmpi eq, %arg1, %c0_i32 : i32
    %1 = arith.extui %0 : i1 to i32
    %c0_i32_0 = arith.constant 0 : i32
    %2 = arith.cmpi ne, %1, %c0_i32_0 : i32
    scf.if %2 {
      %c0_160 = arith.constant 0 : index
      %c0_161 = arith.constant 0 : index
      %503 = vector.load %arg7[%c0_160, %c0_161] : memref<32x512xf32, #tpu.memory_space<vmem>>, vector<32x512xf32>
      %504 = tpu.iota {dimensions = array<i32: 1>} : vector<32x512xi32>
      %c0_i32_162 = arith.constant 0 : i32
      %505 = vector.broadcast %c0_i32_162 : i32 to vector<32x512xi32>
      %506 = arith.cmpi sge, %504, %505 : vector<32x512xi32>
      %c32_i32_163 = arith.constant 32 : i32
      %507 = vector.broadcast %c32_i32_163 : i32 to vector<32x512xi32>
      %508 = arith.cmpi slt, %504, %507 : vector<32x512xi32>
      %509 = arith.andi %506, %508 : vector<32x512xi1>
      %cst_164 = arith.constant 0.000000e+00 : f32
      %510 = vector.broadcast %cst_164 : f32 to vector<32x512xf32>
      %511 = arith.select %509, %503, %510 : vector<32x512xi1>, vector<32x512xf32>
      %c0_165 = arith.constant 0 : index
      %c0_166 = arith.constant 0 : index
      %512 = vector.load %arg14[%c0_165, %c0_166] : memref<512x512xf32, #tpu.memory_space<vmem>>, vector<32x512xf32>
      tpu.vector_store %arg14[%c0_165, %c0_166], %511 {strides = array<i32>} : memref<512x512xf32, #tpu.memory_space<vmem>>, vector<32x512xf32>,
      %c32_i32_167 = arith.constant 32 : i32
      %513 = vector.broadcast %c32_i32_167 : i32 to vector<32x512xi32>
      %514 = arith.cmpi sge, %504, %513 : vector<32x512xi32>
      %c64_i32_168 = arith.constant 64 : i32
      %515 = vector.broadcast %c64_i32_168 : i32 to vector<32x512xi32>
      %516 = arith.cmpi slt, %504, %515 : vector<32x512xi32>
      %517 = arith.andi %514, %516 : vector<32x512xi1>
      %cst_169 = arith.constant 0.000000e+00 : f32
      %518 = vector.broadcast %cst_169 : f32 to vector<32x512xf32>
      %519 = arith.select %517, %503, %518 : vector<32x512xi1>, vector<32x512xf32>
      %c32 = arith.constant 32 : index
      %c0_170 = arith.constant 0 : index
      %520 = vector.load %arg14[%c32, %c0_170] : memref<512x512xf32, #tpu.memory_space<vmem>>, vector<32x512xf32>
      tpu.vector_store %arg14[%c32, %c0_170], %519 {strides = array<i32>} : memref<512x512xf32, #tpu.memory_space<vmem>>, vector<32x512xf32>,
      %c64_i32_171 = arith.constant 64 : i32
      %521 = vector.broadcast %c64_i32_171 : i32 to vector<32x512xi32>
      %522 = arith.cmpi sge, %504, %521 : vector<32x512xi32>
      %c96_i32_172 = arith.constant 96 : i32
      %523 = vector.broadcast %c96_i32_172 : i32 to vector<32x512xi32>
      %524 = arith.cmpi slt, %504, %523 : vector<32x512xi32>
      %525 = arith.andi %522, %524 : vector<32x512xi1>
      %cst_173 = arith.constant 0.000000e+00 : f32
      %526 = vector.broadcast %cst_173 : f32 to vector<32x512xf32>
      %527 = arith.select %525, %503, %526 : vector<32x512xi1>, vector<32x512xf32>
      %c64 = arith.constant 64 : index
      %c0_174 = arith.constant 0 : index
      %528 = vector.load %arg14[%c64, %c0_174] : memref<512x512xf32, #tpu.memory_space<vmem>>, vector<32x512xf32>
      tpu.vector_store %arg14[%c64, %c0_174], %527 {strides = array<i32>} : memref<512x512xf32, #tpu.memory_space<vmem>>, vector<32x512xf32>,
      %c96_i32_175 = arith.constant 96 : i32
      %529 = vector.broadcast %c96_i32_175 : i32 to vector<32x512xi32>
      %530 = arith.cmpi sge, %504, %529 : vector<32x512xi32>
      %c128_i32 = arith.constant 128 : i32
      %531 = vector.broadcast %c128_i32 : i32 to vector<32x512xi32>
      %532 = arith.cmpi slt, %504, %531 : vector<32x512xi32>
      %533 = arith.andi %530, %532 : vector<32x512xi1>
      %cst_176 = arith.constant 0.000000e+00 : f32
      %534 = vector.broadcast %cst_176 : f32 to vector<32x512xf32>
      %535 = arith.select %533, %503, %534 : vector<32x512xi1>, vector<32x512xf32>
      %c96 = arith.constant 96 : index
      %c0_177 = arith.constant 0 : index
      %536 = vector.load %arg14[%c96, %c0_177] : memref<512x512xf32, #tpu.memory_space<vmem>>, vector<32x512xf32>
      tpu.vector_store %arg14[%c96, %c0_177], %535 {strides = array<i32>} : memref<512x512xf32, #tpu.memory_space<vmem>>, vector<32x512xf32>,
      %c128_i32_178 = arith.constant 128 : i32
      %537 = vector.broadcast %c128_i32_178 : i32 to vector<32x512xi32>
      %538 = arith.cmpi sge, %504, %537 : vector<32x512xi32>
      %c160_i32 = arith.constant 160 : i32
      %539 = vector.broadcast %c160_i32 : i32 to vector<32x512xi32>
      %540 = arith.cmpi slt, %504, %539 : vector<32x512xi32>
      %541 = arith.andi %538, %540 : vector<32x512xi1>
      %cst_179 = arith.constant 0.000000e+00 : f32
      %542 = vector.broadcast %cst_179 : f32 to vector<32x512xf32>
      %543 = arith.select %541, %503, %542 : vector<32x512xi1>, vector<32x512xf32>
      %c128 = arith.constant 128 : index
      %c0_180 = arith.constant 0 : index
      %544 = vector.load %arg14[%c128, %c0_180] : memref<512x512xf32, #tpu.memory_space<vmem>>, vector<32x512xf32>
      tpu.vector_store %arg14[%c128, %c0_180], %543 {strides = array<i32>} : memref<512x512xf32, #tpu.memory_space<vmem>>, vector<32x512xf32>,
      %c160_i32_181 = arith.constant 160 : i32
      %545 = vector.broadcast %c160_i32_181 : i32 to vector<32x512xi32>
      %546 = arith.cmpi sge, %504, %545 : vector<32x512xi32>
      %c192_i32 = arith.constant 192 : i32
      %547 = vector.broadcast %c192_i32 : i32 to vector<32x512xi32>
      %548 = arith.cmpi slt, %504, %547 : vector<32x512xi32>
      %549 = arith.andi %546, %548 : vector<32x512xi1>
      %cst_182 = arith.constant 0.000000e+00 : f32
      %550 = vector.broadcast %cst_182 : f32 to vector<32x512xf32>
      %551 = arith.select %549, %503, %550 : vector<32x512xi1>, vector<32x512xf32>
      %c160 = arith.constant 160 : index
      %c0_183 = arith.constant 0 : index
      %552 = vector.load %arg14[%c160, %c0_183] : memref<512x512xf32, #tpu.memory_space<vmem>>, vector<32x512xf32>
      tpu.vector_store %arg14[%c160, %c0_183], %551 {strides = array<i32>} : memref<512x512xf32, #tpu.memory_space<vmem>>, vector<32x512xf32>,
      %c192_i32_184 = arith.constant 192 : i32
      %553 = vector.broadcast %c192_i32_184 : i32 to vector<32x512xi32>
      %554 = arith.cmpi sge, %504, %553 : vector<32x512xi32>
      %c224_i32 = arith.constant 224 : i32
      %555 = vector.broadcast %c224_i32 : i32 to vector<32x512xi32>
      %556 = arith.cmpi slt, %504, %555 : vector<32x512xi32>
      %557 = arith.andi %554, %556 : vector<32x512xi1>
      %cst_185 = arith.constant 0.000000e+00 : f32
      %558 = vector.broadcast %cst_185 : f32 to vector<32x512xf32>
      %559 = arith.select %557, %503, %558 : vector<32x512xi1>, vector<32x512xf32>
      %c192 = arith.constant 192 : index
      %c0_186 = arith.constant 0 : index
      %560 = vector.load %arg14[%c192, %c0_186] : memref<512x512xf32, #tpu.memory_space<vmem>>, vector<32x512xf32>
      tpu.vector_store %arg14[%c192, %c0_186], %559 {strides = array<i32>} : memref<512x512xf32, #tpu.memory_space<vmem>>, vector<32x512xf32>,
      %c224_i32_187 = arith.constant 224 : i32
      %561 = vector.broadcast %c224_i32_187 : i32 to vector<32x512xi32>
      %562 = arith.cmpi sge, %504, %561 : vector<32x512xi32>
      %c256_i32 = arith.constant 256 : i32
      %563 = vector.broadcast %c256_i32 : i32 to vector<32x512xi32>
      %564 = arith.cmpi slt, %504, %563 : vector<32x512xi32>
      %565 = arith.andi %562, %564 : vector<32x512xi1>
      %cst_188 = arith.constant 0.000000e+00 : f32
      %566 = vector.broadcast %cst_188 : f32 to vector<32x512xf32>
      %567 = arith.select %565, %503, %566 : vector<32x512xi1>, vector<32x512xf32>
      %c224 = arith.constant 224 : index
      %c0_189 = arith.constant 0 : index
      %568 = vector.load %arg14[%c224, %c0_189] : memref<512x512xf32, #tpu.memory_space<vmem>>, vector<32x512xf32>
      tpu.vector_store %arg14[%c224, %c0_189], %567 {strides = array<i32>} : memref<512x512xf32, #tpu.memory_space<vmem>>, vector<32x512xf32>,
      %c256_i32_190 = arith.constant 256 : i32
      %569 = vector.broadcast %c256_i32_190 : i32 to vector<32x512xi32>
      %570 = arith.cmpi sge, %504, %569 : vector<32x512xi32>
      %c288_i32 = arith.constant 288 : i32
      %571 = vector.broadcast %c288_i32 : i32 to vector<32x512xi32>
      %572 = arith.cmpi slt, %504, %571 : vector<32x512xi32>
      %573 = arith.andi %570, %572 : vector<32x512xi1>
      %cst_191 = arith.constant 0.000000e+00 : f32
      %574 = vector.broadcast %cst_191 : f32 to vector<32x512xf32>
      %575 = arith.select %573, %503, %574 : vector<32x512xi1>, vector<32x512xf32>
      %c256 = arith.constant 256 : index
      %c0_192 = arith.constant 0 : index
      %576 = vector.load %arg14[%c256, %c0_192] : memref<512x512xf32, #tpu.memory_space<vmem>>, vector<32x512xf32>
      tpu.vector_store %arg14[%c256, %c0_192], %575 {strides = array<i32>} : memref<512x512xf32, #tpu.memory_space<vmem>>, vector<32x512xf32>,
      %c288_i32_193 = arith.constant 288 : i32
      %577 = vector.broadcast %c288_i32_193 : i32 to vector<32x512xi32>
      %578 = arith.cmpi sge, %504, %577 : vector<32x512xi32>
      %c320_i32 = arith.constant 320 : i32
      %579 = vector.broadcast %c320_i32 : i32 to vector<32x512xi32>
      %580 = arith.cmpi slt, %504, %579 : vector<32x512xi32>
      %581 = arith.andi %578, %580 : vector<32x512xi1>
      %cst_194 = arith.constant 0.000000e+00 : f32
      %582 = vector.broadcast %cst_194 : f32 to vector<32x512xf32>
      %583 = arith.select %581, %503, %582 : vector<32x512xi1>, vector<32x512xf32>
      %c288 = arith.constant 288 : index
      %c0_195 = arith.constant 0 : index
      %584 = vector.load %arg14[%c288, %c0_195] : memref<512x512xf32, #tpu.memory_space<vmem>>, vector<32x512xf32>
      tpu.vector_store %arg14[%c288, %c0_195], %583 {strides = array<i32>} : memref<512x512xf32, #tpu.memory_space<vmem>>, vector<32x512xf32>,
      %c320_i32_196 = arith.constant 320 : i32
      %585 = vector.broadcast %c320_i32_196 : i32 to vector<32x512xi32>
      %586 = arith.cmpi sge, %504, %585 : vector<32x512xi32>
      %c352_i32 = arith.constant 352 : i32
      %587 = vector.broadcast %c352_i32 : i32 to vector<32x512xi32>
      %588 = arith.cmpi slt, %504, %587 : vector<32x512xi32>
      %589 = arith.andi %586, %588 : vector<32x512xi1>
      %cst_197 = arith.constant 0.000000e+00 : f32
      %590 = vector.broadcast %cst_197 : f32 to vector<32x512xf32>
      %591 = arith.select %589, %503, %590 : vector<32x512xi1>, vector<32x512xf32>
      %c320 = arith.constant 320 : index
      %c0_198 = arith.constant 0 : index
      %592 = vector.load %arg14[%c320, %c0_198] : memref<512x512xf32, #tpu.memory_space<vmem>>, vector<32x512xf32>
      tpu.vector_store %arg14[%c320, %c0_198], %591 {strides = array<i32>} : memref<512x512xf32, #tpu.memory_space<vmem>>, vector<32x512xf32>,
      %c352_i32_199 = arith.constant 352 : i32
      %593 = vector.broadcast %c352_i32_199 : i32 to vector<32x512xi32>
      %594 = arith.cmpi sge, %504, %593 : vector<32x512xi32>
      %c384_i32 = arith.constant 384 : i32
      %595 = vector.broadcast %c384_i32 : i32 to vector<32x512xi32>
      %596 = arith.cmpi slt, %504, %595 : vector<32x512xi32>
      %597 = arith.andi %594, %596 : vector<32x512xi1>
      %cst_200 = arith.constant 0.000000e+00 : f32
      %598 = vector.broadcast %cst_200 : f32 to vector<32x512xf32>
      %599 = arith.select %597, %503, %598 : vector<32x512xi1>, vector<32x512xf32>
      %c352 = arith.constant 352 : index
      %c0_201 = arith.constant 0 : index
      %600 = vector.load %arg14[%c352, %c0_201] : memref<512x512xf32, #tpu.memory_space<vmem>>, vector<32x512xf32>
      tpu.vector_store %arg14[%c352, %c0_201], %599 {strides = array<i32>} : memref<512x512xf32, #tpu.memory_space<vmem>>, vector<32x512xf32>,
      %c384_i32_202 = arith.constant 384 : i32
      %601 = vector.broadcast %c384_i32_202 : i32 to vector<32x512xi32>
      %602 = arith.cmpi sge, %504, %601 : vector<32x512xi32>
      %c416_i32_203 = arith.constant 416 : i32
      %603 = vector.broadcast %c416_i32_203 : i32 to vector<32x512xi32>
      %604 = arith.cmpi slt, %504, %603 : vector<32x512xi32>
      %605 = arith.andi %602, %604 : vector<32x512xi1>
      %cst_204 = arith.constant 0.000000e+00 : f32
      %606 = vector.broadcast %cst_204 : f32 to vector<32x512xf32>
      %607 = arith.select %605, %503, %606 : vector<32x512xi1>, vector<32x512xf32>
      %c384 = arith.constant 384 : index
      %c0_205 = arith.constant 0 : index
      %608 = vector.load %arg14[%c384, %c0_205] : memref<512x512xf32, #tpu.memory_space<vmem>>, vector<32x512xf32>
      tpu.vector_store %arg14[%c384, %c0_205], %607 {strides = array<i32>} : memref<512x512xf32, #tpu.memory_space<vmem>>, vector<32x512xf32>,
      %c416_i32_206 = arith.constant 416 : i32
      %609 = vector.broadcast %c416_i32_206 : i32 to vector<32x512xi32>
      %610 = arith.cmpi sge, %504, %609 : vector<32x512xi32>
      %c448_i32_207 = arith.constant 448 : i32
      %611 = vector.broadcast %c448_i32_207 : i32 to vector<32x512xi32>
      %612 = arith.cmpi slt, %504, %611 : vector<32x512xi32>
      %613 = arith.andi %610, %612 : vector<32x512xi1>
      %cst_208 = arith.constant 0.000000e+00 : f32
      %614 = vector.broadcast %cst_208 : f32 to vector<32x512xf32>
      %615 = arith.select %613, %503, %614 : vector<32x512xi1>, vector<32x512xf32>
      %c416 = arith.constant 416 : index
      %c0_209 = arith.constant 0 : index
      %616 = vector.load %arg14[%c416, %c0_209] : memref<512x512xf32, #tpu.memory_space<vmem>>, vector<32x512xf32>
      tpu.vector_store %arg14[%c416, %c0_209], %615 {strides = array<i32>} : memref<512x512xf32, #tpu.memory_space<vmem>>, vector<32x512xf32>,
      %c448_i32_210 = arith.constant 448 : i32
      %617 = vector.broadcast %c448_i32_210 : i32 to vector<32x512xi32>
      %618 = arith.cmpi sge, %504, %617 : vector<32x512xi32>
      %c480_i32_211 = arith.constant 480 : i32
      %619 = vector.broadcast %c480_i32_211 : i32 to vector<32x512xi32>
      %620 = arith.cmpi slt, %504, %619 : vector<32x512xi32>
      %621 = arith.andi %618, %620 : vector<32x512xi1>
      %cst_212 = arith.constant 0.000000e+00 : f32
      %622 = vector.broadcast %cst_212 : f32 to vector<32x512xf32>
      %623 = arith.select %621, %503, %622 : vector<32x512xi1>, vector<32x512xf32>
      %c448 = arith.constant 448 : index
      %c0_213 = arith.constant 0 : index
      %624 = vector.load %arg14[%c448, %c0_213] : memref<512x512xf32, #tpu.memory_space<vmem>>, vector<32x512xf32>
      tpu.vector_store %arg14[%c448, %c0_213], %623 {strides = array<i32>} : memref<512x512xf32, #tpu.memory_space<vmem>>, vector<32x512xf32>,
      %c480_i32_214 = arith.constant 480 : i32
      %625 = vector.broadcast %c480_i32_214 : i32 to vector<32x512xi32>
      %626 = arith.cmpi sge, %504, %625 : vector<32x512xi32>
      %c512_i32 = arith.constant 512 : i32
      %627 = vector.broadcast %c512_i32 : i32 to vector<32x512xi32>
      %628 = arith.cmpi slt, %504, %627 : vector<32x512xi32>
      %629 = arith.andi %626, %628 : vector<32x512xi1>
      %cst_215 = arith.constant 0.000000e+00 : f32
      %630 = vector.broadcast %cst_215 : f32 to vector<32x512xf32>
      %631 = arith.select %629, %503, %630 : vector<32x512xi1>, vector<32x512xf32>
      %c480 = arith.constant 480 : index
      %c0_216 = arith.constant 0 : index
      %632 = vector.load %arg14[%c480, %c0_216] : memref<512x512xf32, #tpu.memory_space<vmem>>, vector<32x512xf32>
      tpu.vector_store %arg14[%c480, %c0_216], %631 {strides = array<i32>} : memref<512x512xf32, #tpu.memory_space<vmem>>, vector<32x512xf32>,
    } else {
    }
    %c0 = arith.constant 0 : index
    %c0_1 = arith.constant 0 : index
    %c0_2 = arith.constant 0 : index
    %3 = vector.load %arg2[%c0, %c0_1, %c0_2] : memref<2x16x512xf32, #tpu.memory_space<vmem>>, vector<2x16x512xf32>
    %4 = tpu.iota {dimensions = array<i32: 0>} : vector<16x1xi32>
    %5 = tpu.iota {dimensions = array<i32: 1>} : vector<1x512xi32>
    %c3 = arith.constant 3 : index
    %c0_3 = arith.constant 0 : index
    %6 = vector.load %arg3[%c3, %c0_3] : memref<21x512xf32, #tpu.memory_space<vmem>>, vector<1x512xf32>
    %7 = vector.shape_cast %6 : vector<1x512xf32> to vector<512xf32>
    %8 = vector.shape_cast %7 : vector<512xf32> to vector<1x1x512xf32>
    %9 = vector.broadcast %8 : vector<1x1x512xf32> to vector<2x16x512xf32>
    %10 = arith.mulf %3, %9 : vector<2x16x512xf32>
    %c10 = arith.constant 10 : index
    %c0_4 = arith.constant 0 : index
    %11 = vector.load %arg3[%c10, %c0_4] : memref<21x512xf32, #tpu.memory_space<vmem>>, vector<1x512xf32>
    %12 = vector.shape_cast %11 : vector<1x512xf32> to vector<512xf32>
    %13 = vector.shape_cast %12 : vector<512xf32> to vector<1x1x512xf32>
    %14 = vector.broadcast %13 : vector<1x1x512xf32> to vector<2x16x512xf32>
    %15 = arith.mulf %3, %14 : vector<2x16x512xf32>
    %c17 = arith.constant 17 : index
    %c0_5 = arith.constant 0 : index
    %16 = vector.load %arg3[%c17, %c0_5] : memref<21x512xf32, #tpu.memory_space<vmem>>, vector<1x512xf32>
    %17 = vector.shape_cast %16 : vector<1x512xf32> to vector<512xf32>
    %18 = vector.shape_cast %17 : vector<512xf32> to vector<1x1x512xf32>
    %19 = vector.broadcast %18 : vector<1x1x512xf32> to vector<2x16x512xf32>
    %20 = arith.mulf %3, %19 : vector<2x16x512xf32>
    %c1_i32 = arith.constant 1 : i32
    %21 = tpu.dynamic_rotate %3 by %c1_i32 dim 1 : vector<2x16x512xf32>, i32 -> vector<2x16x512xf32>
    %c1_i32_6 = arith.constant 1 : i32
    %22 = vector.broadcast %c1_i32_6 : i32 to vector<16x1xi32>
    %23 = arith.cmpi sge, %4, %22 : vector<16x1xi32>
    %cst = arith.constant 0.000000e+00 : f32
    %24 = vector.shape_cast %23 : vector<16x1xi1> to vector<1x16x1xi1>
    %25 = vector.broadcast %24 : vector<1x16x1xi1> to vector<2x16x512xi1>
    %26 = vector.broadcast %cst : f32 to vector<2x16x512xf32>
    %27 = arith.select %25, %21, %26 : vector<2x16x512xi1>, vector<2x16x512xf32>
    %c16 = arith.constant 16 : index
    %c0_7 = arith.constant 0 : index
    %28 = vector.load %arg3[%c16, %c0_7] : memref<21x512xf32, #tpu.memory_space<vmem>>, vector<1x512xf32>
    %29 = vector.shape_cast %28 : vector<1x512xf32> to vector<512xf32>
    %30 = vector.shape_cast %29 : vector<512xf32> to vector<1x1x512xf32>
    %31 = vector.broadcast %30 : vector<1x1x512xf32> to vector<2x16x512xf32>
    %32 = arith.mulf %27, %31 : vector<2x16x512xf32>
    %33 = arith.addf %20, %32 : vector<2x16x512xf32>
    %c9 = arith.constant 9 : index
    %c0_8 = arith.constant 0 : index
    %34 = vector.load %arg3[%c9, %c0_8] : memref<21x512xf32, #tpu.memory_space<vmem>>, vector<1x512xf32>
    %35 = vector.shape_cast %34 : vector<1x512xf32> to vector<512xf32>
    %36 = vector.shape_cast %35 : vector<512xf32> to vector<1x1x512xf32>
    %37 = vector.broadcast %36 : vector<1x1x512xf32> to vector<2x16x512xf32>
    %38 = arith.mulf %27, %37 : vector<2x16x512xf32>
    %39 = arith.addf %15, %38 : vector<2x16x512xf32>
    %c2 = arith.constant 2 : index
    %c0_9 = arith.constant 0 : index
    %40 = vector.load %arg3[%c2, %c0_9] : memref<21x512xf32, #tpu.memory_space<vmem>>, vector<1x512xf32>
    %41 = vector.shape_cast %40 : vector<1x512xf32> to vector<512xf32>
    %42 = vector.shape_cast %41 : vector<512xf32> to vector<1x1x512xf32>
    %43 = vector.broadcast %42 : vector<1x1x512xf32> to vector<2x16x512xf32>
    %44 = arith.mulf %27, %43 : vector<2x16x512xf32>
    %45 = arith.addf %10, %44 : vector<2x16x512xf32>
    %cst_10 = arith.constant -3.40282347E+38 : f32
    %46 = vector.shape_cast %23 : vector<16x1xi1> to vector<1x16x1xi1>
    %47 = vector.broadcast %46 : vector<1x16x1xi1> to vector<2x16x512xi1>
    %48 = vector.broadcast %cst_10 : f32 to vector<2x16x512xf32>
    %49 = arith.select %47, %21, %48 : vector<2x16x512xi1>, vector<2x16x512xf32>
    %50 = arith.maximumf %3, %49 : vector<2x16x512xf32>
    %c15_i32 = arith.constant 15 : i32
    %51 = tpu.dynamic_rotate %3 by %c15_i32 dim 1 : vector<2x16x512xf32>, i32 -> vector<2x16x512xf32>
    %c15_i32_11 = arith.constant 15 : i32
    %52 = vector.broadcast %c15_i32_11 : i32 to vector<16x1xi32>
    %53 = arith.cmpi slt, %4, %52 : vector<16x1xi32>
    %cst_12 = arith.constant 0.000000e+00 : f32
    %54 = vector.shape_cast %53 : vector<16x1xi1> to vector<1x16x1xi1>
    %55 = vector.broadcast %54 : vector<1x16x1xi1> to vector<2x16x512xi1>
    %56 = vector.broadcast %cst_12 : f32 to vector<2x16x512xf32>
    %57 = arith.select %55, %51, %56 : vector<2x16x512xi1>, vector<2x16x512xf32>
    %c18 = arith.constant 18 : index
    %c0_13 = arith.constant 0 : index
    %58 = vector.load %arg3[%c18, %c0_13] : memref<21x512xf32, #tpu.memory_space<vmem>>, vector<1x512xf32>
    %59 = vector.shape_cast %58 : vector<1x512xf32> to vector<512xf32>
    %60 = vector.shape_cast %59 : vector<512xf32> to vector<1x1x512xf32>
    %61 = vector.broadcast %60 : vector<1x1x512xf32> to vector<2x16x512xf32>
    %62 = arith.mulf %57, %61 : vector<2x16x512xf32>
    %63 = arith.addf %33, %62 : vector<2x16x512xf32>
    %c11 = arith.constant 11 : index
    %c0_14 = arith.constant 0 : index
    %64 = vector.load %arg3[%c11, %c0_14] : memref<21x512xf32, #tpu.memory_space<vmem>>, vector<1x512xf32>
    %65 = vector.shape_cast %64 : vector<1x512xf32> to vector<512xf32>
    %66 = vector.shape_cast %65 : vector<512xf32> to vector<1x1x512xf32>
    %67 = vector.broadcast %66 : vector<1x1x512xf32> to vector<2x16x512xf32>
    %68 = arith.mulf %57, %67 : vector<2x16x512xf32>
    %69 = arith.addf %39, %68 : vector<2x16x512xf32>
    %c4 = arith.constant 4 : index
    %c0_15 = arith.constant 0 : index
    %70 = vector.load %arg3[%c4, %c0_15] : memref<21x512xf32, #tpu.memory_space<vmem>>, vector<1x512xf32>
    %71 = vector.shape_cast %70 : vector<1x512xf32> to vector<512xf32>
    %72 = vector.shape_cast %71 : vector<512xf32> to vector<1x1x512xf32>
    %73 = vector.broadcast %72 : vector<1x1x512xf32> to vector<2x16x512xf32>
    %74 = arith.mulf %57, %73 : vector<2x16x512xf32>
    %75 = arith.addf %45, %74 : vector<2x16x512xf32>
    %cst_16 = arith.constant -3.40282347E+38 : f32
    %76 = vector.shape_cast %53 : vector<16x1xi1> to vector<1x16x1xi1>
    %77 = vector.broadcast %76 : vector<1x16x1xi1> to vector<2x16x512xi1>
    %78 = vector.broadcast %cst_16 : f32 to vector<2x16x512xf32>
    %79 = arith.select %77, %51, %78 : vector<2x16x512xi1>, vector<2x16x512xf32>
    %80 = arith.maximumf %50, %79 : vector<2x16x512xf32>
    %c2_i32 = arith.constant 2 : i32
    %81 = tpu.dynamic_rotate %3 by %c2_i32 dim 1 : vector<2x16x512xf32>, i32 -> vector<2x16x512xf32>
    %c2_i32_17 = arith.constant 2 : i32
    %82 = vector.broadcast %c2_i32_17 : i32 to vector<16x1xi32>
    %83 = arith.cmpi sge, %4, %82 : vector<16x1xi32>
    %cst_18 = arith.constant 0.000000e+00 : f32
    %84 = vector.shape_cast %83 : vector<16x1xi1> to vector<1x16x1xi1>
    %85 = vector.broadcast %84 : vector<1x16x1xi1> to vector<2x16x512xi1>
    %86 = vector.broadcast %cst_18 : f32 to vector<2x16x512xf32>
    %87 = arith.select %85, %81, %86 : vector<2x16x512xi1>, vector<2x16x512xf32>
    %c15 = arith.constant 15 : index
    %c0_19 = arith.constant 0 : index
    %88 = vector.load %arg3[%c15, %c0_19] : memref<21x512xf32, #tpu.memory_space<vmem>>, vector<1x512xf32>
    %89 = vector.shape_cast %88 : vector<1x512xf32> to vector<512xf32>
    %90 = vector.shape_cast %89 : vector<512xf32> to vector<1x1x512xf32>
    %91 = vector.broadcast %90 : vector<1x1x512xf32> to vector<2x16x512xf32>
    %92 = arith.mulf %87, %91 : vector<2x16x512xf32>
    %93 = arith.addf %63, %92 : vector<2x16x512xf32>
    %c8 = arith.constant 8 : index
    %c0_20 = arith.constant 0 : index
    %94 = vector.load %arg3[%c8, %c0_20] : memref<21x512xf32, #tpu.memory_space<vmem>>, vector<1x512xf32>
    %95 = vector.shape_cast %94 : vector<1x512xf32> to vector<512xf32>
    %96 = vector.shape_cast %95 : vector<512xf32> to vector<1x1x512xf32>
    %97 = vector.broadcast %96 : vector<1x1x512xf32> to vector<2x16x512xf32>
    %98 = arith.mulf %87, %97 : vector<2x16x512xf32>
    %99 = arith.addf %69, %98 : vector<2x16x512xf32>
    %c14_i32 = arith.constant 14 : i32
    %100 = tpu.dynamic_rotate %3 by %c14_i32 dim 1 : vector<2x16x512xf32>, i32 -> vector<2x16x512xf32>
    %c14_i32_21 = arith.constant 14 : i32
    %101 = vector.broadcast %c14_i32_21 : i32 to vector<16x1xi32>
    %102 = arith.cmpi slt, %4, %101 : vector<16x1xi32>
    %cst_22 = arith.constant 0.000000e+00 : f32
    %103 = vector.shape_cast %102 : vector<16x1xi1> to vector<1x16x1xi1>
    %104 = vector.broadcast %103 : vector<1x16x1xi1> to vector<2x16x512xi1>
    %105 = vector.broadcast %cst_22 : f32 to vector<2x16x512xf32>
    %106 = arith.select %104, %100, %105 : vector<2x16x512xi1>, vector<2x16x512xf32>
    %c19 = arith.constant 19 : index
    %c0_23 = arith.constant 0 : index
    %107 = vector.load %arg3[%c19, %c0_23] : memref<21x512xf32, #tpu.memory_space<vmem>>, vector<1x512xf32>
    %108 = vector.shape_cast %107 : vector<1x512xf32> to vector<512xf32>
    %109 = vector.shape_cast %108 : vector<512xf32> to vector<1x1x512xf32>
    %110 = vector.broadcast %109 : vector<1x1x512xf32> to vector<2x16x512xf32>
    %111 = arith.mulf %106, %110 : vector<2x16x512xf32>
    %112 = arith.addf %93, %111 : vector<2x16x512xf32>
    %c12 = arith.constant 12 : index
    %c0_24 = arith.constant 0 : index
    %113 = vector.load %arg3[%c12, %c0_24] : memref<21x512xf32, #tpu.memory_space<vmem>>, vector<1x512xf32>
    %114 = vector.shape_cast %113 : vector<1x512xf32> to vector<512xf32>
    %115 = vector.shape_cast %114 : vector<512xf32> to vector<1x1x512xf32>
    %116 = vector.broadcast %115 : vector<1x1x512xf32> to vector<2x16x512xf32>
    %117 = arith.mulf %106, %116 : vector<2x16x512xf32>
    %118 = arith.addf %99, %117 : vector<2x16x512xf32>
    %c3_i32 = arith.constant 3 : i32
    %119 = tpu.dynamic_rotate %3 by %c3_i32 dim 1 : vector<2x16x512xf32>, i32 -> vector<2x16x512xf32>
    %c3_i32_25 = arith.constant 3 : i32
    %120 = vector.broadcast %c3_i32_25 : i32 to vector<16x1xi32>
    %121 = arith.cmpi sge, %4, %120 : vector<16x1xi32>
    %cst_26 = arith.constant 0.000000e+00 : f32
    %122 = vector.shape_cast %121 : vector<16x1xi1> to vector<1x16x1xi1>
    %123 = vector.broadcast %122 : vector<1x16x1xi1> to vector<2x16x512xi1>
    %124 = vector.broadcast %cst_26 : f32 to vector<2x16x512xf32>
    %125 = arith.select %123, %119, %124 : vector<2x16x512xi1>, vector<2x16x512xf32>
    %c14 = arith.constant 14 : index
    %c0_27 = arith.constant 0 : index
    %126 = vector.load %arg3[%c14, %c0_27] : memref<21x512xf32, #tpu.memory_space<vmem>>, vector<1x512xf32>
    %127 = vector.shape_cast %126 : vector<1x512xf32> to vector<512xf32>
    %128 = vector.shape_cast %127 : vector<512xf32> to vector<1x1x512xf32>
    %129 = vector.broadcast %128 : vector<1x1x512xf32> to vector<2x16x512xf32>
    %130 = arith.mulf %125, %129 : vector<2x16x512xf32>
    %131 = arith.addf %112, %130 : vector<2x16x512xf32>
    %c13_i32 = arith.constant 13 : i32
    %132 = tpu.dynamic_rotate %3 by %c13_i32 dim 1 : vector<2x16x512xf32>, i32 -> vector<2x16x512xf32>
    %c13_i32_28 = arith.constant 13 : i32
    %133 = vector.broadcast %c13_i32_28 : i32 to vector<16x1xi32>
    %134 = arith.cmpi slt, %4, %133 : vector<16x1xi32>
    %cst_29 = arith.constant 0.000000e+00 : f32
    %135 = vector.shape_cast %134 : vector<16x1xi1> to vector<1x16x1xi1>
    %136 = vector.broadcast %135 : vector<1x16x1xi1> to vector<2x16x512xi1>
    %137 = vector.broadcast %cst_29 : f32 to vector<2x16x512xf32>
    %138 = arith.select %136, %132, %137 : vector<2x16x512xi1>, vector<2x16x512xf32>
    %c20 = arith.constant 20 : index
    %c0_30 = arith.constant 0 : index
    %139 = vector.load %arg3[%c20, %c0_30] : memref<21x512xf32, #tpu.memory_space<vmem>>, vector<1x512xf32>
    %140 = vector.shape_cast %139 : vector<1x512xf32> to vector<512xf32>
    %141 = vector.shape_cast %140 : vector<512xf32> to vector<1x1x512xf32>
    %142 = vector.broadcast %141 : vector<1x1x512xf32> to vector<2x16x512xf32>
    %143 = arith.mulf %138, %142 : vector<2x16x512xf32>
    %144 = arith.addf %131, %143 : vector<2x16x512xf32>
    %c0_31 = arith.constant 0 : index
    %c0_32 = arith.constant 0 : index
    %145 = vector.load %arg4[%c0_31, %c0_32] : memref<3x512xf32, #tpu.memory_space<vmem>>, vector<1x512xf32>
    %146 = vector.shape_cast %145 : vector<1x512xf32> to vector<512xf32>
    %147 = vector.shape_cast %146 : vector<512xf32> to vector<1x1x512xf32>
    %148 = vector.broadcast %147 : vector<1x1x512xf32> to vector<2x16x512xf32>
    %149 = arith.addf %75, %148 : vector<2x16x512xf32>
    %c1 = arith.constant 1 : index
    %c0_33 = arith.constant 0 : index
    %150 = vector.load %arg4[%c1, %c0_33] : memref<3x512xf32, #tpu.memory_space<vmem>>, vector<1x512xf32>
    %151 = vector.shape_cast %150 : vector<1x512xf32> to vector<512xf32>
    %152 = vector.shape_cast %151 : vector<512xf32> to vector<1x1x512xf32>
    %153 = vector.broadcast %152 : vector<1x1x512xf32> to vector<2x16x512xf32>
    %154 = arith.addf %118, %153 : vector<2x16x512xf32>
    %c2_34 = arith.constant 2 : index
    %c0_35 = arith.constant 0 : index
    %155 = vector.load %arg4[%c2_34, %c0_35] : memref<3x512xf32, #tpu.memory_space<vmem>>, vector<1x512xf32>
    %156 = vector.shape_cast %155 : vector<1x512xf32> to vector<512xf32>
    %157 = vector.shape_cast %156 : vector<512xf32> to vector<1x1x512xf32>
    %158 = vector.broadcast %157 : vector<1x1x512xf32> to vector<2x16x512xf32>
    %159 = arith.addf %144, %158 : vector<2x16x512xf32>
    %c480_i32 = arith.constant 480 : i32
    %160 = tpu.dynamic_rotate %80 by %c480_i32 dim 2 : vector<2x16x512xf32>, i32 -> vector<2x16x512xf32>
    %c32_i32 = arith.constant 32 : i32
    %161 = tpu.dynamic_rotate %80 by %c32_i32 dim 2 : vector<2x16x512xf32>, i32 -> vector<2x16x512xf32>
    %c480_i32_36 = arith.constant 480 : i32
    %162 = vector.broadcast %c480_i32_36 : i32 to vector<1x512xi32>
    %163 = arith.cmpi slt, %5, %162 : vector<1x512xi32>
    %cst_37 = arith.constant -3.40282347E+38 : f32
    %164 = vector.shape_cast %163 : vector<1x512xi1> to vector<1x1x512xi1>
    %165 = vector.broadcast %164 : vector<1x1x512xi1> to vector<2x16x512xi1>
    %166 = vector.broadcast %cst_37 : f32 to vector<2x16x512xf32>
    %167 = arith.select %165, %160, %166 : vector<2x16x512xi1>, vector<2x16x512xf32>
    %168 = arith.maximumf %80, %167 : vector<2x16x512xf32>
    %c32_i32_38 = arith.constant 32 : i32
    %169 = vector.broadcast %c32_i32_38 : i32 to vector<1x512xi32>
    %170 = arith.cmpi sge, %5, %169 : vector<1x512xi32>
    %cst_39 = arith.constant -3.40282347E+38 : f32
    %171 = vector.shape_cast %170 : vector<1x512xi1> to vector<1x1x512xi1>
    %172 = vector.broadcast %171 : vector<1x1x512xi1> to vector<2x16x512xi1>
    %173 = vector.broadcast %cst_39 : f32 to vector<2x16x512xf32>
    %174 = arith.select %172, %161, %173 : vector<2x16x512xi1>, vector<2x16x512xf32>
    %175 = arith.maximumf %168, %174 : vector<2x16x512xf32>
    %176 = vector.shape_cast %175 : vector<2x16x512xf32> to vector<32x512xf32>
    %c0_40 = arith.constant 0 : index
    %c0_41 = arith.constant 0 : index
    %177 = vector.load %arg14[%c0_40, %c0_41] : memref<512x512xf32, #tpu.memory_space<vmem>>, vector<512x512xf32>
    %cst_42 = arith.constant dense<0.000000e+00> : vector<32x512xf32>
    %178 = tpu.matmul %176, %177, %cst_42 {dimension_numbers = #tpu.dot_dimension_numbers<[1], [0], [0], [1], [0, 0, 1, 1], [], []>, precision = #tpu.contract_precision<fp32>} : vector<32x512xf32>, vector<512x512xf32>, vector<32x512xf32> -> vector<32x512xf32>
    %c0_43 = arith.constant 0 : index
    %c0_44 = arith.constant 0 : index
    %179 = vector.load %arg8[%c0_43, %c0_44] : memref<1x512xf32, #tpu.memory_space<vmem>>, vector<1x512xf32>
    %180 = vector.broadcast %179 : vector<1x512xf32> to vector<32x512xf32>
    %181 = arith.addf %178, %180 : vector<32x512xf32>
    %182 = vector.shape_cast %181 : vector<32x512xf32> to vector<2x16x512xf32>
    %c3_45 = arith.constant 3 : index
    %c0_46 = arith.constant 0 : index
    %183 = vector.load %arg5[%c3_45, %c0_46] : memref<21x512xf32, #tpu.memory_space<vmem>>, vector<1x512xf32>
    %184 = vector.shape_cast %183 : vector<1x512xf32> to vector<512xf32>
    %185 = vector.shape_cast %184 : vector<512xf32> to vector<1x1x512xf32>
    %186 = vector.broadcast %185 : vector<1x1x512xf32> to vector<2x16x512xf32>
    %187 = arith.mulf %149, %186 : vector<2x16x512xf32>
    %188 = arith.addf %182, %187 : vector<2x16x512xf32>
    %c10_47 = arith.constant 10 : index
    %c0_48 = arith.constant 0 : index
    %189 = vector.load %arg5[%c10_47, %c0_48] : memref<21x512xf32, #tpu.memory_space<vmem>>, vector<1x512xf32>
    %190 = vector.shape_cast %189 : vector<1x512xf32> to vector<512xf32>
    %191 = vector.shape_cast %190 : vector<512xf32> to vector<1x1x512xf32>
    %192 = vector.broadcast %191 : vector<1x1x512xf32> to vector<2x16x512xf32>
    %193 = arith.mulf %154, %192 : vector<2x16x512xf32>
    %194 = arith.addf %188, %193 : vector<2x16x512xf32>
    %c17_49 = arith.constant 17 : index
    %c0_50 = arith.constant 0 : index
    %195 = vector.load %arg5[%c17_49, %c0_50] : memref<21x512xf32, #tpu.memory_space<vmem>>, vector<1x512xf32>
    %196 = vector.shape_cast %195 : vector<1x512xf32> to vector<512xf32>
    %197 = vector.shape_cast %196 : vector<512xf32> to vector<1x1x512xf32>
    %198 = vector.broadcast %197 : vector<1x1x512xf32> to vector<2x16x512xf32>
    %199 = arith.mulf %159, %198 : vector<2x16x512xf32>
    %200 = arith.addf %194, %199 : vector<2x16x512xf32>
    %c16_51 = arith.constant 16 : index
    %c0_52 = arith.constant 0 : index
    %201 = vector.load %arg5[%c16_51, %c0_52] : memref<21x512xf32, #tpu.memory_space<vmem>>, vector<1x512xf32>
    %202 = vector.shape_cast %201 : vector<1x512xf32> to vector<512xf32>
    %203 = vector.shape_cast %202 : vector<512xf32> to vector<1x1x512xf32>
    %204 = vector.broadcast %203 : vector<1x1x512xf32> to vector<2x16x512xf32>
    %205 = arith.mulf %159, %204 : vector<2x16x512xf32>
    %c9_53 = arith.constant 9 : index
    %c0_54 = arith.constant 0 : index
    %206 = vector.load %arg5[%c9_53, %c0_54] : memref<21x512xf32, #tpu.memory_space<vmem>>, vector<1x512xf32>
    %207 = vector.shape_cast %206 : vector<1x512xf32> to vector<512xf32>
    %208 = vector.shape_cast %207 : vector<512xf32> to vector<1x1x512xf32>
    %209 = vector.broadcast %208 : vector<1x1x512xf32> to vector<2x16x512xf32>
    %210 = arith.mulf %154, %209 : vector<2x16x512xf32>
    %211 = arith.addf %205, %210 : vector<2x16x512xf32>
    %c2_55 = arith.constant 2 : index
    %c0_56 = arith.constant 0 : index
    %212 = vector.load %arg5[%c2_55, %c0_56] : memref<21x512xf32, #tpu.memory_space<vmem>>, vector<1x512xf32>
    %213 = vector.shape_cast %212 : vector<1x512xf32> to vector<512xf32>
    %214 = vector.shape_cast %213 : vector<512xf32> to vector<1x1x512xf32>
    %215 = vector.broadcast %214 : vector<1x1x512xf32> to vector<2x16x512xf32>
    %216 = arith.mulf %149, %215 : vector<2x16x512xf32>
    %217 = arith.addf %211, %216 : vector<2x16x512xf32>
    %c32_i32_57 = arith.constant 32 : i32
    %218 = tpu.dynamic_rotate %217 by %c32_i32_57 dim 2 : vector<2x16x512xf32>, i32 -> vector<2x16x512xf32>
    %c32_i32_58 = arith.constant 32 : i32
    %219 = vector.broadcast %c32_i32_58 : i32 to vector<1x512xi32>
    %220 = arith.cmpi sge, %5, %219 : vector<1x512xi32>
    %cst_59 = arith.constant 0.000000e+00 : f32
    %221 = vector.shape_cast %220 : vector<1x512xi1> to vector<1x1x512xi1>
    %222 = vector.broadcast %221 : vector<1x1x512xi1> to vector<2x16x512xi1>
    %223 = vector.broadcast %cst_59 : f32 to vector<2x16x512xf32>
    %224 = arith.select %222, %218, %223 : vector<2x16x512xi1>, vector<2x16x512xf32>
    %225 = arith.addf %200, %224 : vector<2x16x512xf32>
    %c18_60 = arith.constant 18 : index
    %c0_61 = arith.constant 0 : index
    %226 = vector.load %arg5[%c18_60, %c0_61] : memref<21x512xf32, #tpu.memory_space<vmem>>, vector<1x512xf32>
    %227 = vector.shape_cast %226 : vector<1x512xf32> to vector<512xf32>
    %228 = vector.shape_cast %227 : vector<512xf32> to vector<1x1x512xf32>
    %229 = vector.broadcast %228 : vector<1x1x512xf32> to vector<2x16x512xf32>
    %230 = arith.mulf %159, %229 : vector<2x16x512xf32>
    %c11_62 = arith.constant 11 : index
    %c0_63 = arith.constant 0 : index
    %231 = vector.load %arg5[%c11_62, %c0_63] : memref<21x512xf32, #tpu.memory_space<vmem>>, vector<1x512xf32>
    %232 = vector.shape_cast %231 : vector<1x512xf32> to vector<512xf32>
    %233 = vector.shape_cast %232 : vector<512xf32> to vector<1x1x512xf32>
    %234 = vector.broadcast %233 : vector<1x1x512xf32> to vector<2x16x512xf32>
    %235 = arith.mulf %154, %234 : vector<2x16x512xf32>
    %236 = arith.addf %230, %235 : vector<2x16x512xf32>
    %c4_64 = arith.constant 4 : index
    %c0_65 = arith.constant 0 : index
    %237 = vector.load %arg5[%c4_64, %c0_65] : memref<21x512xf32, #tpu.memory_space<vmem>>, vector<1x512xf32>
    %238 = vector.shape_cast %237 : vector<1x512xf32> to vector<512xf32>
    %239 = vector.shape_cast %238 : vector<512xf32> to vector<1x1x512xf32>
    %240 = vector.broadcast %239 : vector<1x1x512xf32> to vector<2x16x512xf32>
    %241 = arith.mulf %149, %240 : vector<2x16x512xf32>
    %242 = arith.addf %236, %241 : vector<2x16x512xf32>
    %c480_i32_66 = arith.constant 480 : i32
    %243 = tpu.dynamic_rotate %242 by %c480_i32_66 dim 2 : vector<2x16x512xf32>, i32 -> vector<2x16x512xf32>
    %c480_i32_67 = arith.constant 480 : i32
    %244 = vector.broadcast %c480_i32_67 : i32 to vector<1x512xi32>
    %245 = arith.cmpi slt, %5, %244 : vector<1x512xi32>
    %cst_68 = arith.constant 0.000000e+00 : f32
    %246 = vector.shape_cast %245 : vector<1x512xi1> to vector<1x1x512xi1>
    %247 = vector.broadcast %246 : vector<1x1x512xi1> to vector<2x16x512xi1>
    %248 = vector.broadcast %cst_68 : f32 to vector<2x16x512xf32>
    %249 = arith.select %247, %243, %248 : vector<2x16x512xi1>, vector<2x16x512xf32>
    %250 = arith.addf %225, %249 : vector<2x16x512xf32>
    %c15_69 = arith.constant 15 : index
    %c0_70 = arith.constant 0 : index
    %251 = vector.load %arg5[%c15_69, %c0_70] : memref<21x512xf32, #tpu.memory_space<vmem>>, vector<1x512xf32>
    %252 = vector.shape_cast %251 : vector<1x512xf32> to vector<512xf32>
    %253 = vector.shape_cast %252 : vector<512xf32> to vector<1x1x512xf32>
    %254 = vector.broadcast %253 : vector<1x1x512xf32> to vector<2x16x512xf32>
    %255 = arith.mulf %159, %254 : vector<2x16x512xf32>
    %c8_71 = arith.constant 8 : index
    %c0_72 = arith.constant 0 : index
    %256 = vector.load %arg5[%c8_71, %c0_72] : memref<21x512xf32, #tpu.memory_space<vmem>>, vector<1x512xf32>
    %257 = vector.shape_cast %256 : vector<1x512xf32> to vector<512xf32>
    %258 = vector.shape_cast %257 : vector<512xf32> to vector<1x1x512xf32>
    %259 = vector.broadcast %258 : vector<1x1x512xf32> to vector<2x16x512xf32>
    %260 = arith.mulf %154, %259 : vector<2x16x512xf32>
    %261 = arith.addf %255, %260 : vector<2x16x512xf32>
    %c64_i32 = arith.constant 64 : i32
    %262 = tpu.dynamic_rotate %261 by %c64_i32 dim 2 : vector<2x16x512xf32>, i32 -> vector<2x16x512xf32>
    %c64_i32_73 = arith.constant 64 : i32
    %263 = vector.broadcast %c64_i32_73 : i32 to vector<1x512xi32>
    %264 = arith.cmpi sge, %5, %263 : vector<1x512xi32>
    %cst_74 = arith.constant 0.000000e+00 : f32
    %265 = vector.shape_cast %264 : vector<1x512xi1> to vector<1x1x512xi1>
    %266 = vector.broadcast %265 : vector<1x1x512xi1> to vector<2x16x512xi1>
    %267 = vector.broadcast %cst_74 : f32 to vector<2x16x512xf32>
    %268 = arith.select %266, %262, %267 : vector<2x16x512xi1>, vector<2x16x512xf32>
    %269 = arith.addf %250, %268 : vector<2x16x512xf32>
    %c19_75 = arith.constant 19 : index
    %c0_76 = arith.constant 0 : index
    %270 = vector.load %arg5[%c19_75, %c0_76] : memref<21x512xf32, #tpu.memory_space<vmem>>, vector<1x512xf32>
    %271 = vector.shape_cast %270 : vector<1x512xf32> to vector<512xf32>
    %272 = vector.shape_cast %271 : vector<512xf32> to vector<1x1x512xf32>
    %273 = vector.broadcast %272 : vector<1x1x512xf32> to vector<2x16x512xf32>
    %274 = arith.mulf %159, %273 : vector<2x16x512xf32>
    %c12_77 = arith.constant 12 : index
    %c0_78 = arith.constant 0 : index
    %275 = vector.load %arg5[%c12_77, %c0_78] : memref<21x512xf32, #tpu.memory_space<vmem>>, vector<1x512xf32>
    %276 = vector.shape_cast %275 : vector<1x512xf32> to vector<512xf32>
    %277 = vector.shape_cast %276 : vector<512xf32> to vector<1x1x512xf32>
    %278 = vector.broadcast %277 : vector<1x1x512xf32> to vector<2x16x512xf32>
    %279 = arith.mulf %154, %278 : vector<2x16x512xf32>
    %280 = arith.addf %274, %279 : vector<2x16x512xf32>
    %c448_i32 = arith.constant 448 : i32
    %281 = tpu.dynamic_rotate %280 by %c448_i32 dim 2 : vector<2x16x512xf32>, i32 -> vector<2x16x512xf32>
    %c448_i32_79 = arith.constant 448 : i32
    %282 = vector.broadcast %c448_i32_79 : i32 to vector<1x512xi32>
    %283 = arith.cmpi slt, %5, %282 : vector<1x512xi32>
    %cst_80 = arith.constant 0.000000e+00 : f32
    %284 = vector.shape_cast %283 : vector<1x512xi1> to vector<1x1x512xi1>
    %285 = vector.broadcast %284 : vector<1x1x512xi1> to vector<2x16x512xi1>
    %286 = vector.broadcast %cst_80 : f32 to vector<2x16x512xf32>
    %287 = arith.select %285, %281, %286 : vector<2x16x512xi1>, vector<2x16x512xf32>
    %288 = arith.addf %269, %287 : vector<2x16x512xf32>
    %c14_81 = arith.constant 14 : index
    %c0_82 = arith.constant 0 : index
    %289 = vector.load %arg5[%c14_81, %c0_82] : memref<21x512xf32, #tpu.memory_space<vmem>>, vector<1x512xf32>
    %290 = vector.shape_cast %289 : vector<1x512xf32> to vector<512xf32>
    %291 = vector.shape_cast %290 : vector<512xf32> to vector<1x1x512xf32>
    %292 = vector.broadcast %291 : vector<1x1x512xf32> to vector<2x16x512xf32>
    %293 = arith.mulf %159, %292 : vector<2x16x512xf32>
    %c96_i32 = arith.constant 96 : i32
    %294 = tpu.dynamic_rotate %293 by %c96_i32 dim 2 : vector<2x16x512xf32>, i32 -> vector<2x16x512xf32>
    %c96_i32_83 = arith.constant 96 : i32
    %295 = vector.broadcast %c96_i32_83 : i32 to vector<1x512xi32>
    %296 = arith.cmpi sge, %5, %295 : vector<1x512xi32>
    %cst_84 = arith.constant 0.000000e+00 : f32
    %297 = vector.shape_cast %296 : vector<1x512xi1> to vector<1x1x512xi1>
    %298 = vector.broadcast %297 : vector<1x1x512xi1> to vector<2x16x512xi1>
    %299 = vector.broadcast %cst_84 : f32 to vector<2x16x512xf32>
    %300 = arith.select %298, %294, %299 : vector<2x16x512xi1>, vector<2x16x512xf32>
    %301 = arith.addf %288, %300 : vector<2x16x512xf32>
    %c20_85 = arith.constant 20 : index
    %c0_86 = arith.constant 0 : index
    %302 = vector.load %arg5[%c20_85, %c0_86] : memref<21x512xf32, #tpu.memory_space<vmem>>, vector<1x512xf32>
    %303 = vector.shape_cast %302 : vector<1x512xf32> to vector<512xf32>
    %304 = vector.shape_cast %303 : vector<512xf32> to vector<1x1x512xf32>
    %305 = vector.broadcast %304 : vector<1x1x512xf32> to vector<2x16x512xf32>
    %306 = arith.mulf %159, %305 : vector<2x16x512xf32>
    %c416_i32 = arith.constant 416 : i32
    %307 = tpu.dynamic_rotate %306 by %c416_i32 dim 2 : vector<2x16x512xf32>, i32 -> vector<2x16x512xf32>
    %c416_i32_87 = arith.constant 416 : i32
    %308 = vector.broadcast %c416_i32_87 : i32 to vector<1x512xi32>
    %309 = arith.cmpi slt, %5, %308 : vector<1x512xi32>
    %cst_88 = arith.constant 0.000000e+00 : f32
    %310 = vector.shape_cast %309 : vector<1x512xi1> to vector<1x1x512xi1>
    %311 = vector.broadcast %310 : vector<1x1x512xi1> to vector<2x16x512xi1>
    %312 = vector.broadcast %cst_88 : f32 to vector<2x16x512xf32>
    %313 = arith.select %311, %307, %312 : vector<2x16x512xi1>, vector<2x16x512xf32>
    %314 = arith.addf %301, %313 : vector<2x16x512xf32>
    %c0_89 = arith.constant 0 : index
    %c0_90 = arith.constant 0 : index
    %315 = vector.load %arg6[%c0_89, %c0_90] : memref<1x512xf32, #tpu.memory_space<vmem>>, vector<1x512xf32>
    %316 = vector.shape_cast %315 : vector<1x512xf32> to vector<1x1x512xf32>
    %317 = vector.broadcast %316 : vector<1x1x512xf32> to vector<2x16x512xf32>
    %318 = arith.addf %314, %317 : vector<2x16x512xf32>
    %cst_91 = arith.constant 2.500000e-01 : f32
    %319 = vector.broadcast %cst_91 : f32 to vector<2x16x512xf32>
    %320 = arith.mulf %318, %319 : vector<2x16x512xf32>
    %321 = arith.addf %320, %3 : vector<2x16x512xf32>
    %cst_92 = arith.constant dense<0.000000e+00> : vector<2x512xf32>
    %322 = vector.multi_reduction <add>, %321, %cst_92 [1] : vector<2x16x512xf32> to vector<2x512xf32>
    %c0_93 = arith.constant 0 : index
    %c0_94 = arith.constant 0 : index
    %323 = vector.load %arg12[%c0_93, %c0_94] : memref<1x512xf32, #tpu.memory_space<vmem>>, vector<1x512xf32>
    %c0_95 = arith.constant 0 : index
    %c0_96 = arith.constant 0 : index
    %324 = vector.load %arg9[%c0_95, %c0_96] : memref<8x512xf32, #tpu.memory_space<vmem>>, vector<1x512xf32>
    %325 = vector.shape_cast %324 : vector<1x512xf32> to vector<512xf32>
    %326 = vector.shape_cast %325 : vector<512xf32> to vector<1x512xf32>
    %327 = vector.broadcast %326 : vector<1x512xf32> to vector<2x512xf32>
    %328 = arith.mulf %322, %327 : vector<2x512xf32>
    %cst_97 = arith.constant dense<0.000000e+00> : vector<2xf32>
    %329 = vector.multi_reduction <add>, %328, %cst_97 [1] : vector<2x512xf32> to vector<2xf32>
    %330 = vector.shape_cast %329 : vector<2xf32> to vector<2x1xf32>
    %cst_98 = arith.constant 3.906250e-03 : f32
    %331 = vector.broadcast %cst_98 : f32 to vector<2x1xf32>
    %332 = arith.mulf %330, %331 : vector<2x1xf32>
    %c0_99 = arith.constant 0 : index
    %333 = memref.load %arg10[%c0_99] : memref<8xf32, #tpu.memory_space<smem>>
    %334 = vector.broadcast %333 : f32 to vector<2x1xf32>
    %335 = arith.addf %332, %334 : vector<2x1xf32>
    %cst_100 = arith.constant 0.000000e+00 : f32
    %336 = vector.broadcast %cst_100 : f32 to vector<2x1xf32>
    %337 = arith.maximumf %335, %336 : vector<2x1xf32>
    %c0_101 = arith.constant 0 : index
    %c0_102 = arith.constant 0 : index
    %338 = vector.load %arg11[%c0_101, %c0_102] : memref<8x512xf32, #tpu.memory_space<vmem>>, vector<1x512xf32>
    %339 = vector.shape_cast %338 : vector<1x512xf32> to vector<512xf32>
    %340 = vector.shape_cast %339 : vector<512xf32> to vector<1x512xf32>
    %341 = vector.broadcast %337 : vector<2x1xf32> to vector<2x512xf32>
    %342 = vector.broadcast %340 : vector<1x512xf32> to vector<2x512xf32>
    %343 = arith.mulf %341, %342 : vector<2x512xf32>
    %344 = vector.broadcast %323 : vector<1x512xf32> to vector<2x512xf32>
    %345 = arith.addf %344, %343 : vector<2x512xf32>
    %c1_103 = arith.constant 1 : index
    %c0_104 = arith.constant 0 : index
    %346 = vector.load %arg9[%c1_103, %c0_104] : memref<8x512xf32, #tpu.memory_space<vmem>>, vector<1x512xf32>
    %347 = vector.shape_cast %346 : vector<1x512xf32> to vector<512xf32>
    %348 = vector.shape_cast %347 : vector<512xf32> to vector<1x512xf32>
    %349 = vector.broadcast %348 : vector<1x512xf32> to vector<2x512xf32>
    %350 = arith.mulf %322, %349 : vector<2x512xf32>
    %cst_105 = arith.constant dense<0.000000e+00> : vector<2xf32>
    %351 = vector.multi_reduction <add>, %350, %cst_105 [1] : vector<2x512xf32> to vector<2xf32>
    %352 = vector.shape_cast %351 : vector<2xf32> to vector<2x1xf32>
    %cst_106 = arith.constant 3.906250e-03 : f32
    %353 = vector.broadcast %cst_106 : f32 to vector<2x1xf32>
    %354 = arith.mulf %352, %353 : vector<2x1xf32>
    %c1_107 = arith.constant 1 : index
    %355 = memref.load %arg10[%c1_107] : memref<8xf32, #tpu.memory_space<smem>>
    %356 = vector.broadcast %355 : f32 to vector<2x1xf32>
    %357 = arith.addf %354, %356 : vector<2x1xf32>
    %cst_108 = arith.constant 0.000000e+00 : f32
    %358 = vector.broadcast %cst_108 : f32 to vector<2x1xf32>
    %359 = arith.maximumf %357, %358 : vector<2x1xf32>
    %c1_109 = arith.constant 1 : index
    %c0_110 = arith.constant 0 : index
    %360 = vector.load %arg11[%c1_109, %c0_110] : memref<8x512xf32, #tpu.memory_space<vmem>>, vector<1x512xf32>
    %361 = vector.shape_cast %360 : vector<1x512xf32> to vector<512xf32>
    %362 = vector.shape_cast %361 : vector<512xf32> to vector<1x512xf32>
    %363 = vector.broadcast %359 : vector<2x1xf32> to vector<2x512xf32>
    %364 = vector.broadcast %362 : vector<1x512xf32> to vector<2x512xf32>
    %365 = arith.mulf %363, %364 : vector<2x512xf32>
    %366 = arith.addf %345, %365 : vector<2x512xf32>
    %c2_111 = arith.constant 2 : index
    %c0_112 = arith.constant 0 : index
    %367 = vector.load %arg9[%c2_111, %c0_112] : memref<8x512xf32, #tpu.memory_space<vmem>>, vector<1x512xf32>
    %368 = vector.shape_cast %367 : vector<1x512xf32> to vector<512xf32>
    %369 = vector.shape_cast %368 : vector<512xf32> to vector<1x512xf32>
    %370 = vector.broadcast %369 : vector<1x512xf32> to vector<2x512xf32>
    %371 = arith.mulf %322, %370 : vector<2x512xf32>
    %cst_113 = arith.constant dense<0.000000e+00> : vector<2xf32>
    %372 = vector.multi_reduction <add>, %371, %cst_113 [1] : vector<2x512xf32> to vector<2xf32>
    %373 = vector.shape_cast %372 : vector<2xf32> to vector<2x1xf32>
    %cst_114 = arith.constant 3.906250e-03 : f32
    %374 = vector.broadcast %cst_114 : f32 to vector<2x1xf32>
    %375 = arith.mulf %373, %374 : vector<2x1xf32>
    %c2_115 = arith.constant 2 : index
    %376 = memref.load %arg10[%c2_115] : memref<8xf32, #tpu.memory_space<smem>>
    %377 = vector.broadcast %376 : f32 to vector<2x1xf32>
    %378 = arith.addf %375, %377 : vector<2x1xf32>
    %cst_116 = arith.constant 0.000000e+00 : f32
    %379 = vector.broadcast %cst_116 : f32 to vector<2x1xf32>
    %380 = arith.maximumf %378, %379 : vector<2x1xf32>
    %c2_117 = arith.constant 2 : index
    %c0_118 = arith.constant 0 : index
    %381 = vector.load %arg11[%c2_117, %c0_118] : memref<8x512xf32, #tpu.memory_space<vmem>>, vector<1x512xf32>
    %382 = vector.shape_cast %381 : vector<1x512xf32> to vector<512xf32>
    %383 = vector.shape_cast %382 : vector<512xf32> to vector<1x512xf32>
    %384 = vector.broadcast %380 : vector<2x1xf32> to vector<2x512xf32>
    %385 = vector.broadcast %383 : vector<1x512xf32> to vector<2x512xf32>
    %386 = arith.mulf %384, %385 : vector<2x512xf32>
    %387 = arith.addf %366, %386 : vector<2x512xf32>
    %c3_119 = arith.constant 3 : index
    %c0_120 = arith.constant 0 : index
    %388 = vector.load %arg9[%c3_119, %c0_120] : memref<8x512xf32, #tpu.memory_space<vmem>>, vector<1x512xf32>
    %389 = vector.shape_cast %388 : vector<1x512xf32> to vector<512xf32>
    %390 = vector.shape_cast %389 : vector<512xf32> to vector<1x512xf32>
    %391 = vector.broadcast %390 : vector<1x512xf32> to vector<2x512xf32>
    %392 = arith.mulf %322, %391 : vector<2x512xf32>
    %cst_121 = arith.constant dense<0.000000e+00> : vector<2xf32>
    %393 = vector.multi_reduction <add>, %392, %cst_121 [1] : vector<2x512xf32> to vector<2xf32>
    %394 = vector.shape_cast %393 : vector<2xf32> to vector<2x1xf32>
    %cst_122 = arith.constant 3.906250e-03 : f32
    %395 = vector.broadcast %cst_122 : f32 to vector<2x1xf32>
    %396 = arith.mulf %394, %395 : vector<2x1xf32>
    %c3_123 = arith.constant 3 : index
    %397 = memref.load %arg10[%c3_123] : memref<8xf32, #tpu.memory_space<smem>>
    %398 = vector.broadcast %397 : f32 to vector<2x1xf32>
    %399 = arith.addf %396, %398 : vector<2x1xf32>
    %cst_124 = arith.constant 0.000000e+00 : f32
    %400 = vector.broadcast %cst_124 : f32 to vector<2x1xf32>
    %401 = arith.maximumf %399, %400 : vector<2x1xf32>
    %c3_125 = arith.constant 3 : index
    %c0_126 = arith.constant 0 : index
    %402 = vector.load %arg11[%c3_125, %c0_126] : memref<8x512xf32, #tpu.memory_space<vmem>>, vector<1x512xf32>
    %403 = vector.shape_cast %402 : vector<1x512xf32> to vector<512xf32>
    %404 = vector.shape_cast %403 : vector<512xf32> to vector<1x512xf32>
    %405 = vector.broadcast %401 : vector<2x1xf32> to vector<2x512xf32>
    %406 = vector.broadcast %404 : vector<1x512xf32> to vector<2x512xf32>
    %407 = arith.mulf %405, %406 : vector<2x512xf32>
    %408 = arith.addf %387, %407 : vector<2x512xf32>
    %c4_127 = arith.constant 4 : index
    %c0_128 = arith.constant 0 : index
    %409 = vector.load %arg9[%c4_127, %c0_128] : memref<8x512xf32, #tpu.memory_space<vmem>>, vector<1x512xf32>
    %410 = vector.shape_cast %409 : vector<1x512xf32> to vector<512xf32>
    %411 = vector.shape_cast %410 : vector<512xf32> to vector<1x512xf32>
    %412 = vector.broadcast %411 : vector<1x512xf32> to vector<2x512xf32>
    %413 = arith.mulf %322, %412 : vector<2x512xf32>
    %cst_129 = arith.constant dense<0.000000e+00> : vector<2xf32>
    %414 = vector.multi_reduction <add>, %413, %cst_129 [1] : vector<2x512xf32> to vector<2xf32>
    %415 = vector.shape_cast %414 : vector<2xf32> to vector<2x1xf32>
    %cst_130 = arith.constant 3.906250e-03 : f32
    %416 = vector.broadcast %cst_130 : f32 to vector<2x1xf32>
    %417 = arith.mulf %415, %416 : vector<2x1xf32>
    %c4_131 = arith.constant 4 : index
    %418 = memref.load %arg10[%c4_131] : memref<8xf32, #tpu.memory_space<smem>>
    %419 = vector.broadcast %418 : f32 to vector<2x1xf32>
    %420 = arith.addf %417, %419 : vector<2x1xf32>
    %cst_132 = arith.constant 0.000000e+00 : f32
    %421 = vector.broadcast %cst_132 : f32 to vector<2x1xf32>
    %422 = arith.maximumf %420, %421 : vector<2x1xf32>
    %c4_133 = arith.constant 4 : index
    %c0_134 = arith.constant 0 : index
    %423 = vector.load %arg11[%c4_133, %c0_134] : memref<8x512xf32, #tpu.memory_space<vmem>>, vector<1x512xf32>
    %424 = vector.shape_cast %423 : vector<1x512xf32> to vector<512xf32>
    %425 = vector.shape_cast %424 : vector<512xf32> to vector<1x512xf32>
    %426 = vector.broadcast %422 : vector<2x1xf32> to vector<2x512xf32>
    %427 = vector.broadcast %425 : vector<1x512xf32> to vector<2x512xf32>
    %428 = arith.mulf %426, %427 : vector<2x512xf32>
    %429 = arith.addf %408, %428 : vector<2x512xf32>
    %c5 = arith.constant 5 : index
    %c0_135 = arith.constant 0 : index
    %430 = vector.load %arg9[%c5, %c0_135] : memref<8x512xf32, #tpu.memory_space<vmem>>, vector<1x512xf32>
    %431 = vector.shape_cast %430 : vector<1x512xf32> to vector<512xf32>
    %432 = vector.shape_cast %431 : vector<512xf32> to vector<1x512xf32>
    %433 = vector.broadcast %432 : vector<1x512xf32> to vector<2x512xf32>
    %434 = arith.mulf %322, %433 : vector<2x512xf32>
    %cst_136 = arith.constant dense<0.000000e+00> : vector<2xf32>
    %435 = vector.multi_reduction <add>, %434, %cst_136 [1] : vector<2x512xf32> to vector<2xf32>
    %436 = vector.shape_cast %435 : vector<2xf32> to vector<2x1xf32>
    %cst_137 = arith.constant 3.906250e-03 : f32
    %437 = vector.broadcast %cst_137 : f32 to vector<2x1xf32>
    %438 = arith.mulf %436, %437 : vector<2x1xf32>
    %c5_138 = arith.constant 5 : index
    %439 = memref.load %arg10[%c5_138] : memref<8xf32, #tpu.memory_space<smem>>
    %440 = vector.broadcast %439 : f32 to vector<2x1xf32>
    %441 = arith.addf %438, %440 : vector<2x1xf32>
    %cst_139 = arith.constant 0.000000e+00 : f32
    %442 = vector.broadcast %cst_139 : f32 to vector<2x1xf32>
    %443 = arith.maximumf %441, %442 : vector<2x1xf32>
    %c5_140 = arith.constant 5 : index
    %c0_141 = arith.constant 0 : index
    %444 = vector.load %arg11[%c5_140, %c0_141] : memref<8x512xf32, #tpu.memory_space<vmem>>, vector<1x512xf32>
    %445 = vector.shape_cast %444 : vector<1x512xf32> to vector<512xf32>
    %446 = vector.shape_cast %445 : vector<512xf32> to vector<1x512xf32>
    %447 = vector.broadcast %443 : vector<2x1xf32> to vector<2x512xf32>
    %448 = vector.broadcast %446 : vector<1x512xf32> to vector<2x512xf32>
    %449 = arith.mulf %447, %448 : vector<2x512xf32>
    %450 = arith.addf %429, %449 : vector<2x512xf32>
    %c6 = arith.constant 6 : index
    %c0_142 = arith.constant 0 : index
    %451 = vector.load %arg9[%c6, %c0_142] : memref<8x512xf32, #tpu.memory_space<vmem>>, vector<1x512xf32>
    %452 = vector.shape_cast %451 : vector<1x512xf32> to vector<512xf32>
    %453 = vector.shape_cast %452 : vector<512xf32> to vector<1x512xf32>
    %454 = vector.broadcast %453 : vector<1x512xf32> to vector<2x512xf32>
    %455 = arith.mulf %322, %454 : vector<2x512xf32>
    %cst_143 = arith.constant dense<0.000000e+00> : vector<2xf32>
    %456 = vector.multi_reduction <add>, %455, %cst_143 [1] : vector<2x512xf32> to vector<2xf32>
    %457 = vector.shape_cast %456 : vector<2xf32> to vector<2x1xf32>
    %cst_144 = arith.constant 3.906250e-03 : f32
    %458 = vector.broadcast %cst_144 : f32 to vector<2x1xf32>
    %459 = arith.mulf %457, %458 : vector<2x1xf32>
    %c6_145 = arith.constant 6 : index
    %460 = memref.load %arg10[%c6_145] : memref<8xf32, #tpu.memory_space<smem>>
    %461 = vector.broadcast %460 : f32 to vector<2x1xf32>
    %462 = arith.addf %459, %461 : vector<2x1xf32>
    %cst_146 = arith.constant 0.000000e+00 : f32
    %463 = vector.broadcast %cst_146 : f32 to vector<2x1xf32>
    %464 = arith.maximumf %462, %463 : vector<2x1xf32>
    %c6_147 = arith.constant 6 : index
    %c0_148 = arith.constant 0 : index
    %465 = vector.load %arg11[%c6_147, %c0_148] : memref<8x512xf32, #tpu.memory_space<vmem>>, vector<1x512xf32>
    %466 = vector.shape_cast %465 : vector<1x512xf32> to vector<512xf32>
    %467 = vector.shape_cast %466 : vector<512xf32> to vector<1x512xf32>
    %468 = vector.broadcast %464 : vector<2x1xf32> to vector<2x512xf32>
    %469 = vector.broadcast %467 : vector<1x512xf32> to vector<2x512xf32>
    %470 = arith.mulf %468, %469 : vector<2x512xf32>
    %471 = arith.addf %450, %470 : vector<2x512xf32>
    %c7 = arith.constant 7 : index
    %c0_149 = arith.constant 0 : index
    %472 = vector.load %arg9[%c7, %c0_149] : memref<8x512xf32, #tpu.memory_space<vmem>>, vector<1x512xf32>
    %473 = vector.shape_cast %472 : vector<1x512xf32> to vector<512xf32>
    %474 = vector.shape_cast %473 : vector<512xf32> to vector<1x512xf32>
    %475 = vector.broadcast %474 : vector<1x512xf32> to vector<2x512xf32>
    %476 = arith.mulf %322, %475 : vector<2x512xf32>
    %cst_150 = arith.constant dense<0.000000e+00> : vector<2xf32>
    %477 = vector.multi_reduction <add>, %476, %cst_150 [1] : vector<2x512xf32> to vector<2xf32>
    %478 = vector.shape_cast %477 : vector<2xf32> to vector<2x1xf32>
    %cst_151 = arith.constant 3.906250e-03 : f32
    %479 = vector.broadcast %cst_151 : f32 to vector<2x1xf32>
    %480 = arith.mulf %478, %479 : vector<2x1xf32>
    %c7_152 = arith.constant 7 : index
    %481 = memref.load %arg10[%c7_152] : memref<8xf32, #tpu.memory_space<smem>>
    %482 = vector.broadcast %481 : f32 to vector<2x1xf32>
    %483 = arith.addf %480, %482 : vector<2x1xf32>
    %cst_153 = arith.constant 0.000000e+00 : f32
    %484 = vector.broadcast %cst_153 : f32 to vector<2x1xf32>
    %485 = arith.maximumf %483, %484 : vector<2x1xf32>
    %c7_154 = arith.constant 7 : index
    %c0_155 = arith.constant 0 : index
    %486 = vector.load %arg11[%c7_154, %c0_155] : memref<8x512xf32, #tpu.memory_space<vmem>>, vector<1x512xf32>
    %487 = vector.shape_cast %486 : vector<1x512xf32> to vector<512xf32>
    %488 = vector.shape_cast %487 : vector<512xf32> to vector<1x512xf32>
    %489 = vector.broadcast %485 : vector<2x1xf32> to vector<2x512xf32>
    %490 = vector.broadcast %488 : vector<1x512xf32> to vector<2x512xf32>
    %491 = arith.mulf %489, %490 : vector<2x512xf32>
    %492 = arith.addf %471, %491 : vector<2x512xf32>
    %493 = arith.negf %492 : vector<2x512xf32>
    %494 = math.exp %493 : vector<2x512xf32>
    %cst_156 = arith.constant 1.000000e+00 : f32
    %495 = vector.broadcast %cst_156 : f32 to vector<2x512xf32>
    %496 = arith.addf %495, %494 : vector<2x512xf32>
    %497 = arith.divf %495, %496 : vector<2x512xf32>
    %498 = vector.shape_cast %497 : vector<2x512xf32> to vector<2x1x512xf32>
    %499 = vector.broadcast %498 : vector<2x1x512xf32> to vector<2x16x512xf32>
    %500 = arith.mulf %321, %499 : vector<2x16x512xf32>
    %501 = arith.addf %3, %500 : vector<2x16x512xf32>
    %c0_157 = arith.constant 0 : index
    %c0_158 = arith.constant 0 : index
    %c0_159 = arith.constant 0 : index
    %502 = vector.load %arg13[%c0_157, %c0_158, %c0_159] : memref<2x16x512xf32, #tpu.memory_space<vmem>>, vector<2x16x512xf32>
    tpu.vector_store %arg13[%c0_157, %c0_158, %c0_159], %501 {strides = array<i32>} : memref<2x16x512xf32, #tpu.memory_space<vmem>>, vector<2x16x512xf32>,
    return
  }
  func.func @transform_0(%arg0: i32, %arg1: i32) -> (i32, i32, i32) {
    %c1_i32 = arith.constant 1 : i32
    %0 = arith.muli %arg0, %c1_i32 : i32
    %1 = arith.addi %0, %arg1 : i32
    %c0_i32 = arith.constant 0 : i32
    %c0_i32_0 = arith.constant 0 : i32
    %c0_i32_1 = arith.constant 0 : i32
    return %1, %c0_i32, %c0_i32_0 : i32, i32, i32
  }
  func.func @transform_1(%arg0: i32, %arg1: i32) -> (i32, i32) {
    %c0_i32 = arith.constant 0 : i32
    %c0_i32_0 = arith.constant 0 : i32
    %c0_i32_1 = arith.constant 0 : i32
    return %c0_i32, %c0_i32_0 : i32, i32
  }
  func.func @transform_2(%arg0: i32, %arg1: i32) -> (i32, i32) {
    %c0_i32 = arith.constant 0 : i32
    %c0_i32_0 = arith.constant 0 : i32
    %c0_i32_1 = arith.constant 0 : i32
    return %c0_i32, %c0_i32_0 : i32, i32
  }
  func.func @transform_3(%arg0: i32, %arg1: i32) -> (i32, i32) {
    %c0_i32 = arith.constant 0 : i32
    %c0_i32_0 = arith.constant 0 : i32
    %c0_i32_1 = arith.constant 0 : i32
    return %c0_i32, %c0_i32_0 : i32, i32
  }
  func.func @transform_4(%arg0: i32, %arg1: i32) -> (i32, i32) {
    %c0_i32 = arith.constant 0 : i32
    %c0_i32_0 = arith.constant 0 : i32
    %c0_i32_1 = arith.constant 0 : i32
    return %c0_i32, %c0_i32_0 : i32, i32
  }
  func.func @transform_5(%arg0: i32, %arg1: i32) -> (i32, i32) {
    %c0_i32 = arith.constant 0 : i32
    %c0_i32_0 = arith.constant 0 : i32
    %c0_i32_1 = arith.constant 0 : i32
    return %c0_i32, %c0_i32_0 : i32, i32
  }
  func.func @transform_6(%arg0: i32, %arg1: i32) -> (i32, i32) {
    %c0_i32 = arith.constant 0 : i32
    %c0_i32_0 = arith.constant 0 : i32
    %c0_i32_1 = arith.constant 0 : i32
    return %c0_i32, %c0_i32_0 : i32, i32
  }
  func.func @transform_7(%arg0: i32, %arg1: i32) -> (i32, i32) {
    %c0_i32 = arith.constant 0 : i32
    %c0_i32_0 = arith.constant 0 : i32
    %c0_i32_1 = arith.constant 0 : i32
    return %c0_i32, %c0_i32_0 : i32, i32
  }
  func.func @transform_8(%arg0: i32, %arg1: i32) -> i32 {
    %c0_i32 = arith.constant 0 : i32
    %c0_i32_0 = arith.constant 0 : i32
    return %c0_i32 : i32
  }
  func.func @transform_9(%arg0: i32, %arg1: i32) -> (i32, i32) {
    %c0_i32 = arith.constant 0 : i32
    %c0_i32_0 = arith.constant 0 : i32
    %c0_i32_1 = arith.constant 0 : i32
    return %c0_i32, %c0_i32_0 : i32, i32
  }
  func.func @transform_10(%arg0: i32, %arg1: i32) -> (i32, i32) {
    %c0_i32 = arith.constant 0 : i32
    %c0_i32_0 = arith.constant 0 : i32
    %c0_i32_1 = arith.constant 0 : i32
    return %c0_i32, %c0_i32_0 : i32, i32
  }
  func.func @transform_11(%arg0: i32, %arg1: i32) -> (i32, i32, i32) {
    %c1_i32 = arith.constant 1 : i32
    %0 = arith.muli %arg0, %c1_i32 : i32
    %1 = arith.addi %0, %arg1 : i32
    %c0_i32 = arith.constant 0 : i32
    %c0_i32_0 = arith.constant 0 : i32
    %c0_i32_1 = arith.constant 0 : i32
    return %1, %c0_i32, %c0_i32_0 : i32, i32, i32
  }
}

</mosaic_0001>

<bundles_post_ra>
// kernel: tpu_custom_call.1
= control target key start
LH: loop header
LB: loop body
LE: loop exit
PB: predicated region body
PF: predicated region fallthrough
CT: control target
= control target key end

     0   :  { %16 = vsyncpa [#allocation4], 0  ;;  %s18450_s0 = inlined_call_operand.hbm [shape: f32[2,16,512], index: 0, kind: input, shape index: {}]   ;;  %s18451_s1 = inlined_call_operand.hbm [shape: f32[21,512], index: 1, kind: input, shape index: {}]   ;;  %s18452_s2 = inlined_call_operand.hbm [shape: f32[3,512], index: 2, kind: input, shape index: {}]   ;;  %s18453_s3 = inlined_call_operand.hbm [shape: f32[21,512], index: 3, kind: input, shape index: {}]   ;;  %s18454_s4 = inlined_call_operand.vmem [shape: f32[1,512], index: 4, kind: input, shape index: {}]   ;;  %s18455_s5 = inlined_call_operand.hbm [shape: f32[32,512], index: 5, kind: input, shape index: {}]   ;;  %s18456_s6 = inlined_call_operand.vmem [shape: f32[1,512], index: 6, kind: input, shape index: {}]   ;;  %s18457_s7 = inlined_call_operand.hbm [shape: f32[8,512], index: 7, kind: input, shape index: {}]   ;;  %s18458_s8 = inlined_call_operand.vmem [shape: f32[8], index: 8, kind: input, shape index: {}]   ;;  %s18459_s9 = inlined_call_operand.hbm [shape: f32[8,512], index: 9, kind: input, shape index: {}]   ;;  %s18460_s10 = inlined_call_operand.vmem [shape: f32[1,512], index: 10, kind: input, shape index: {}]   ;;  %s18461_s11 = inlined_call_operand.hbm [shape: f32[2,16,512], index: 11, kind: output, shape index: {}]  }
   0x1   :  { %17 = vsyncpa [#allocation8], 0 }
   0x2   :  { %18 = vsyncpa [#allocation11], 0 }
   0x3   :  { %19 = vsyncpa [#allocation14], 0 }
   0x4   :  { %20 = vsyncpa [#allocation6], 0 }
   0x5   :  { %21 = vsyncpa [#allocation5], 0  ;;  %s11160_s17 = smov [#allocation7]   ;;  %s11161_s19 = smov [#allocation10]  }
   0x6   :  { %s44_s18 = sshll.u32 %s11160_s17, 4  ;;  %s66_s20 = sshll.u32 %s11161_s19, 4  ;;  %s45_s18 = int_to_ptr.vmem [resolvable:$true] %s44_s18  ;;  %s67_s20 = int_to_ptr.vmem [resolvable:$true] %s66_s20 }
   0x7   :  { %s10982_s21 = scalar_lea.vmem %s45_s18, 1536  ;;  %p10987_p1 = scmp.lt.s32.totalorder %s45_s18, %s45_s18 }
   0x8   :  { %p10983_p0 = scmp.ne.s32.totalorder %s45_s18, %s10982_s21  ;;  %p10988_p2 = scmp.lt.s32.totalorder %s10982_s21, %s10982_s21 }
   0xa   :  { %p10989_p3 = por %p10988_p2, %p10987_p1 }
   0xc   :  { %p10990_p4 = pnand %p10989_p3, %p10983_p0 }
   0xe   :  { %10993 = shalt.err (!%p10990_p4)
}
   0xf   :  { %s11162_s22 = smov 512   ;;  %s11163_s23 = smov 32  }
  0x10   :  { %50 = dma.hbm_to_vmem [thread:$0]  %s18451_s1, 1536, %s45_s18, [#allocation8], %s11162_s22, %s11162_s22, %s11163_s23  }
  0x11   :  { %s11002_s26 = scalar_lea.vmem %s67_s20, 1536  ;;  %p11007_p6 = scmp.lt.s32.totalorder %s67_s20, %s67_s20 }
  0x12   :  { %p11003_p5 = scmp.ne.s32.totalorder %s67_s20, %s11002_s26  ;;  %p11008_p7 = scmp.lt.s32.totalorder %s11002_s26, %s11002_s26 }
  0x14   :  { %p11009_p8 = por %p11008_p7, %p11007_p6 }
  0x16   :  { %p11010_p9 = pnand %p11009_p8, %p11003_p5 }
  0x18   :  { %11013 = shalt.err (!%p11010_p9)
}
  0x19   :  { %72 = dma.hbm_to_vmem [thread:$0]  %s18453_s3, 1536, %s67_s20, [#allocation11], %s11162_s22, %s11162_s22, %s11163_s23  }
  0x1a   :  { %s11164_s29 = smov [#allocation13]   ;;  %s11165_s12 = smov [#allocation3]  }
  0x1b   :  { %s95_s30 = sshll.u32 %s11164_s29, 4  ;;  %s32_s13 = sshll.u32 %s11165_s12, 4  ;;  %s96_s30 = int_to_ptr.vmem [resolvable:$true] %s95_s30  ;;  %s33_s13 = int_to_ptr.vmem [resolvable:$true] %s32_s13 }
  0x1c   :  { %s11022_s1 = scalar_lea.vmem %s96_s30, 512  ;;  %p11027_p11 = scmp.lt.s32.totalorder %s96_s30, %s96_s30 }
  0x1d   :  { %p11023_p10 = scmp.ne.s32.totalorder %s96_s30, %s11022_s1  ;;  %p11028_p12 = scmp.lt.s32.totalorder %s11022_s1, %s11022_s1 }
  0x1f   :  { %p11029_p13 = por %p11028_p12, %p11027_p11 }
  0x21   :  { %p11030_p0 = pnand %p11029_p13, %p11023_p10 }
  0x23   :  { %11033 = shalt.err (!%p11030_p0)
}
  0x24   :  { %98 = dma.hbm_to_vmem [thread:$0]  %s18457_s7, 512, %s96_s30, [#allocation14]  }
  0x25   :  { %s11042_s16 = scalar_lea.vmem %s33_s13, 2048  ;;  %p11047_p2 = scmp.lt.s32.totalorder %s33_s13, %s33_s13 }
  0x26   :  { %p11043_p1 = scmp.ne.s32.totalorder %s33_s13, %s11042_s16  ;;  %p11048_p3 = scmp.lt.s32.totalorder %s11042_s16, %s11042_s16 }
  0x28   :  { %p11049_p4 = por %p11048_p3, %p11047_p2 }
  0x2a   :  { %p11050_p5 = pnand %p11049_p4, %p11043_p1 }
  0x2c   :  { %11053 = shalt.err (!%p11050_p5)
}
  0x2d   :  { %38 = dma.hbm_to_vmem [thread:$0]  %s18450_s0, 2048, %s33_s13, [#allocation4], %s11162_s22, %s11162_s22, %s11163_s23  }
  0x2e   :  { %s11166_s18 = smov [#allocation9]   ;;  %s11167_s20 = smov [#allocation12]  }
  0x2f   :  { %s57_s19 = sshll.u32 %s11166_s18, 4  ;;  %s80_s21 = sshll.u32 %s11167_s20, 4  ;;  %s58_s19 = int_to_ptr.vmem [resolvable:$true] %s57_s19  ;;  %s81_s21 = int_to_ptr.vmem [resolvable:$true] %s80_s21 }
  0x30   :  { %s11062_s7 = scalar_lea.vmem %s58_s19, 256  ;;  %p11067_p7 = scmp.lt.s32.totalorder %s58_s19, %s58_s19 }
  0x31   :  { %p11063_p6 = scmp.ne.s32.totalorder %s58_s19, %s11062_s7  ;;  %p11068_p8 = scmp.lt.s32.totalorder %s11062_s7, %s11062_s7 }
  0x33   :  { %p11069_p9 = por %p11068_p8, %p11067_p7 }
  0x35   :  { %p11070_p10 = pnand %p11069_p9, %p11063_p6 }
  0x37   :  { %11073 = shalt.err (!%p11070_p10)
}
  0x38   :  { %60 = dma.hbm_to_vmem [thread:$0]  %s18452_s2, 256, %s58_s19, [#allocation8]  }
  0x39   :  { %s11082_s26 = scalar_lea.vmem %s81_s21, 2048  ;;  %p11087_p12 = scmp.lt.s32.totalorder %s81_s21, %s81_s21 }
  0x3a   :  { %p11083_p11 = scmp.ne.s32.totalorder %s81_s21, %s11082_s26  ;;  %p11088_p13 = scmp.lt.s32.totalorder %s11082_s26, %s11082_s26 }
  0x3c   :  { %p11089_p0 = por %p11088_p13, %p11087_p12 }
  0x3e   :  { %p11090_p1 = pnand %p11089_p0, %p11083_p11 }
  0x40   :  { %11093 = shalt.err (!%p11090_p1)
}
  0x41   :  { %86 = dma.hbm_to_vmem [thread:$0]  %s18455_s5, 2048, %s81_s21, [#allocation11], %s11162_s22, %s11162_s22, %s11163_s23  }
  0x42   :  { %s105_s30 = sshll.u32 %s18458_s8, 4  ;;  %s106_s30 = int_to_ptr.vmem [resolvable:$true] %s105_s30 }
  0x43   :  { %s11094_s2 = scalar_lea.vmem %s106_s30, 16  ;;  %p11099_p3 = scmp.lt.s32.totalorder %s106_s30, %s106_s30 }
  0x44   :  { %p11095_p2 = scmp.ne.s32.totalorder %s106_s30, %s11094_s2  ;;  %p11100_p4 = scmp.lt.s32.totalorder %s11094_s2, %s11094_s2 }
  0x46   :  { %p11101_p5 = por %p11100_p4, %p11099_p3 }
  0x48   :  { %p11102_p6 = pnand %p11101_p5, %p11095_p2 }
  0x4a   :  { %11105 = shalt.err (!%p11102_p6)
}
  0x4b   :  { %s11168_s12 = smov [#allocation15]   ;;  %s11169_s13 = smov [#allocation16]  }
  0x4c   :  { %108 = dma.vmem_to_smem %s106_s30, 16, %s11168_s12, [#allocation6]  }
  0x4d   :  { %s115_s1 = sshll.u32 %s11169_s13, 4  ;;  %s116_s1 = int_to_ptr.vmem [resolvable:$true] %s115_s1 }
  0x4e   :  { %s11114_s14 = scalar_lea.vmem %s116_s1, 512  ;;  %p11119_p8 = scmp.lt.s32.totalorder %s116_s1, %s116_s1 }
  0x4f   :  { %p11115_p7 = scmp.ne.s32.totalorder %s116_s1, %s11114_s14  ;;  %p11120_p9 = scmp.lt.s32.totalorder %s11114_s14, %s11114_s14 }
  0x51   :  { %p11121_p10 = por %p11120_p9, %p11119_p8 }
  0x53   :  { %p11122_p11 = pnand %p11121_p10, %p11115_p7 }
  0x55   :  { %11125 = shalt.err (!%p11122_p11)
}
  0x56   :  { %118 = dma.hbm_to_vmem [thread:$0]  %s18459_s9, 512, %s116_s1, [#allocation14]  }
  0x57   :  { %11146 = dma.done.wait [#allocation4], 2048  }
  0x58   :  { %11147 = vsyncadd [#allocation4], 4294965248 }
  0x59   :  { %11148 = dma.done.wait [#allocation8], 1792  }
  0x5a   :  { %11149 = vsyncadd [#allocation8], 4294965504 }
  0x5b   :  { %11150 = dma.done.wait [#allocation11], 3584  }
  0x5c   :  { %11151 = vsyncadd [#allocation11], 4294963712 }
  0x5d   :  { %11152 = dma.done.wait [#allocation14], 512  }
  0x5e   :  { %11153 = vsyncadd [#allocation14], 4294966784 }
  0x5f   :  { %11154 = dma.done.wait [#allocation6], 16  }
  0x60   :  { %11155 = vsyncadd [#allocation6], 4294967280 }
  0x61   :  { %11156 = dma.done.wait [#allocation14], 512  }
  0x62   :  { %11157 = vsyncadd [#allocation14], 4294966784 }
  0x63   :  { %145 = sfence }
  0x64   :  { %v18462_v0 = vlaneseq  ;;  %v11271_v1 = vld [vmem:[#allocation3 + $0x8] sm:$0xff]  ;;  %s11170_s9 = smov 96   ;;  %v11310_v15 = vld [vmem:[#allocation3] sm:$0xff]  ;;  %v11343_v26 = vld [vmem:[#allocation3 + $0x10] sm:$0xff]  ;;  %s11172_s15 = smov 64  }
  0x65   :  { %v11273_v2 = vld [vmem:[#allocation3 + $0x28] sm:$0xff]  ;;  %v1021_v3 = vrot.slane %v11271_v1, 7  ;;  %v1273_v6 = vrot.slane %v11271_v1, 1  ;;  %v11312_v16 = vld [vmem:[#allocation3 + $0x20] sm:$0xff]  ;;  %v18471_v17 = vrot.slane %v11310_v15, 7  ;;  %v18470_v21 = vrot.slane %v11310_v15, 1 }
  0x66   :  { %v1029_v4 = vrot.slane %v11273_v2, 7  ;;  %v11278_v5 = vshrl.u32 %v18462_v0, 7  ;;  %v1281_v7 = vrot.slane %v11273_v2, 1  ;;  %v18472_v18 = vrot.slane %v11312_v16, 7  ;;  %19288 = vst [vmem:[#allocation33_spill] sm:$0xff] %v11343_v26  ;;  %v11347_v27 = vld [vmem:[#allocation3 + $0x30] sm:$0xff] }
  0x67   :  { %v18469_v23 = vrot.slane %v11312_v16, 1  ;;  %19289 = vst [vmem:[#allocation34_spill] sm:$0xff] %v11347_v27  ;;  %v18475_v28 = vrot.slane %v11343_v26, 7  ;;  %v18476_v29 = vrot.slane %v11347_v27, 7  ;;  %v18474_v30 = vrot.slane %v11343_v26, 1  ;;  %v11378_v37 = vld [vmem:[#allocation3 + $0x18] sm:$0xff] }
  0x68   :  { %19280 = vst [vmem:[#allocation25_spill] sm:$0xff] %v11278_v5  ;;  %vm1036_vm0 = vcmp.lt.s32.totalorder %v11278_v5, 1  ;;  %vm1053_vm1 = vcmp.ge.s32.totalorder %v11278_v5, 1  ;;  %vm1288_vm2 = vcmp.lt.s32.totalorder %v11278_v5, 7  ;;  %v18473_v31 = vrot.slane %v11347_v27, 1  ;;  %19293 = vst [vmem:[#allocation38_spill] sm:$0xff] %v11378_v37 }
  0x69   :  { %v11287_v8 = vsel %vm1036_vm0, %v1029_v4, %v1021_v3  ;;  %v11294_v10 = vsel %vm1288_vm2, %v1273_v6, %v1281_v7  ;;  %v11298_v11 = vsel %vm1036_vm0, %v1021_v3, %v1029_v4  ;;  %v11302_v12 = vsel %vm1288_vm2, %v1281_v7, %v1273_v6  ;;  %v11380_v38 = vld [vmem:[#allocation3 + $0x38] sm:$0xff]  ;;  %s18257_s20 = sld [smem:[#allocation15]]  ;;  %s11174_s28 = smov [#allocation17]  }
  0x6a   :  { %19281 = vst [vmem:[#allocation26_spill] sm:$0xff] %v11287_v8  ;;  %v1241_v9 = vsel %vm1053_vm1, %v11287_v8, -3.4028235e+38  ;;  %19282 = vst [vmem:[#allocation27_spill] sm:$0xff] %v11294_v10  ;;  %v11322_v19 = vsel %vm1036_vm0, %v18472_v18, %v18471_v17  ;;  %v11336_v24 = vsel %vm1288_vm2, %v18470_v21, %v18469_v23  ;;  %v11359_v32 = vsel %vm1036_vm0, %v18476_v29, %v18475_v28  ;;  %s18266_s24 = sld [smem:[#allocation15 + $0x4]]  ;;  %s10866_s29 = sshll.u32 %s11174_s28, 4  ;;  %s10867_s29 = int_to_ptr.vmem [resolvable:$true] %s10866_s29 }
  0x6b   :  { %19283 = vst [vmem:[#allocation28_spill] sm:$0xff] %v11298_v11  ;;  %v1257_v13 = vmax.f32 %v11271_v1, %v1241_v9  ;;  %19285 = vst [vmem:[#allocation30_spill] sm:$0xff] %v11322_v19  ;;  %v1240_v20 = vsel %vm1053_vm1, %v11322_v19, -3.4028235e+38  ;;  %v1242_v33 = vsel %vm1053_vm1, %v11359_v32, -3.4028235e+38  ;;  %v11370_v34 = vsel %vm1288_vm2, %v18474_v30, %v18473_v31  ;;  %p11131_p13 = scmp.lt.s32.totalorder %s10867_s29, %s10867_s29 }
  0x6c   :  { %v1256_v22 = vmax.f32 %v11310_v15, %v1240_v20  ;;  %19286 = vst [vmem:[#allocation31_spill] sm:$0xff] %v11336_v24  ;;  %19290 = vst [vmem:[#allocation35_spill] sm:$0xff] %v11359_v32  ;;  %v1258_v35 = vmax.f32 %v11343_v26, %v1242_v33  ;;  %v18467_v39 = vrot.slane %v11378_v37, 7  ;;  %v18468_v40 = vrot.slane %v11380_v38, 7  ;;  %s18287_s25 = sld [smem:[#allocation15 + $0x6]]  ;;  %s11126_s30 = scalar_lea.vmem %s10867_s29, 2048 }
  0x6d   :  { %v11306_v14 = vmax.f32 %v1257_v13, %v11294_v10  ;;  %19291 = vst [vmem:[#allocation36_spill] sm:$0xff] %v11370_v34  ;;  %19294 = vst [vmem:[#allocation39_spill] sm:$0xff] %v11380_v38  ;;  %v18466_v41 = vrot.slane %v11378_v37, 1  ;;  %v18464_v42 = vrot.slane %v11271_v1, 6  ;;  %v18465_v44 = vrot.slane %v11380_v38, 1  ;;  %s18296_s26 = sld [smem:[#allocation15 + $0x3]]  ;;  %p11127_p12 = scmp.ne.s32.totalorder %s10867_s29, %s11126_s30 }
  0x6e   :  { %v11339_v25 = vmax.f32 %v1256_v22, %v11336_v24  ;;  %v11374_v36 = vmax.f32 %v1258_v35, %v11370_v34  ;;  %v11394_v43 = vsel %vm1036_vm0, %v18468_v40, %v18467_v39  ;;  %v11397_v45 = vld [vmem:[#allocation7 + $0x22] ss:$8 sm:$0xf]  ;;  %v18463_v46 = vrot.slane %v11273_v2, 6  ;;  %s18331_s0 = sld [smem:[#allocation15 + $0x5]]  ;;  %p11132_p0 = scmp.lt.s32.totalorder %s11126_s30, %s11126_s30 }
  0x6f   :  { %19284 = vst [vmem:[#allocation29_spill] sm:$0xff] %v11306_v14  ;;  %2198 = vrot.lane.b32.xlu0 %v11306_v14, %s11170_s9  ;;  %19295 = vst [vmem:[#allocation40_spill] sm:$0xff] %v11394_v43  ;;  %vm1540_vm3 = vcmp.lt.s32.totalorder %v11278_v5, 2  ;;  %v11402_v47 = vsub.s32 1, %v11278_v5  ;;  %v1243_v48 = vsel %vm1053_vm1, %v11394_v43, -3.4028235e+38  ;;  %v11424_v56 = vsel %vm1288_vm2, %v18466_v41, %v18465_v44 }
  0x70   :  { %19287 = vst [vmem:[#allocation32_spill] sm:$0xff] %v11339_v25  ;;  %2190 = vrot.lane.b32.xlu1 %v11339_v25, %s11170_s9  ;;  %19292 = vst [vmem:[#allocation37_spill] sm:$0xff] %v11374_v36  ;;  %v11407_v49 = vld [vmem:[#allocation7 + $0x41] ss:$8 sm:$0xf]  ;;  %v1259_v55 = vmax.f32 %v11378_v37, %v1243_v48  ;;  %v11453_v9 = vsel %vm1540_vm3, %v18464_v42, %v18463_v46  ;;  %v11490_v44 = vsub.s32 0, %v11278_v5  ;;  %p11133_p1 = por %p11132_p0, %p11131_p13 }
  0x71   :  { %19296 = vst [vmem:[#allocation41_spill] sm:$0xff] %v11402_v47  ;;  %v11409_v50 = vld [vmem:[#allocation7 + $0x40] ss:$8 sm:$0xf]  ;;  %19297 = vst [vmem:[#allocation42_spill] sm:$0xff] %v11424_v56  ;;  %v11442_v6 = vrot.slane %v11397_v45, %v11402_v47  ;;  %v11461_v22 = vrot.slane %v11407_v49, %v11402_v47  ;;  %v11547_v4 = vsub.s32 2, %v11278_v5 }
  0x72   :  { %v11411_v51 = vld [vmem:[#allocation7 + $0x21] ss:$8 sm:$0xf]  ;;  %v11413_v52 = vld [vmem:[#allocation7 + $0x42] ss:$8 sm:$0xf]  ;;  %v11445_v7 = vmax.f32 %v1259_v55, %v11424_v56  ;;  %v11465_v33 = vrot.slane %v11409_v50, %v11402_v47  ;;  %v11520_v53 = vrot.slane %v11397_v45, %v11490_v44  ;;  %v11524_v21 = vrot.slane %v11407_v49, %v11490_v44  ;;  %p11134_p2 = pnand %p11133_p1, %p11127_p12 }
  0x73   :  { %2206 = vrot.lane.b32.xlu0 %v11374_v36, %s11170_s9  ;;  %v11426_v57 = vld [vmem:[#allocation7 + $0x23] ss:$8 sm:$0xf]  ;;  %v11428_v58 = vld [vmem:[#allocation7 + $0x27] ss:$8 sm:$0xf]  ;;  %v11469_v35 = vrot.slane %v11411_v51, %v11402_v47  ;;  %v11473_v48 = vrot.slane %v11413_v52, %v11402_v47  ;;  %v11528_v18 = vrot.slane %v11409_v50, %v11490_v44  ;;  %v11532_v62 = vrot.slane %v11411_v51, %v11490_v44 }
  0x74   :  { %2239 = vrot.lane.b32.xlu1 %v11339_v25, %s11163_s23  ;;  %19298 = vst [vmem:[#allocation43_spill] sm:$0xff] %v11426_v57  ;;  %19299 = vst [vmem:[#allocation44_spill] sm:$0xff] %v11428_v58  ;;  %v11430_v59 = vld [vmem:[#allocation7 + $0x20] ss:$8 sm:$0xf]  ;;  %v11479_v0 = vrot.slane %v11426_v57, %v11402_v47  ;;  %v11483_v46 = vrot.slane %v11428_v58, %v11402_v47  ;;  %v11536_v61 = vrot.slane %v11413_v52, %v11490_v44  ;;  %s18350_s27 = sld [smem:[#allocation15 + $0x7]] }
  0x75   :  { %19300 = vst [vmem:[#allocation45_spill] sm:$0xff] %v11430_v59  ;;  %v11437_v3 = vld [vmem:[#allocation7 + $0x43] ss:$8 sm:$0xf]  ;;  %19302 = vst [vmem:[#allocation47_spill] sm:$0xff] %v11442_v6  ;;  %v11487_v42 = vrot.slane %v11430_v59, %v11402_v47  ;;  %v11540_v54 = vrot.slane %v11426_v57, %v11490_v44  ;;  %v11544_v60 = vrot.slane %v11428_v58, %v11490_v44  ;;  %vm1705_vm4 = vcmp.lt.s32.totalorder %v11278_v5, 6 }
  0x76   :  { %19301 = vst [vmem:[#allocation46_spill] sm:$0xff] %v11437_v3  ;;  %19303 = vst [vmem:[#allocation48_spill] sm:$0xff] %v11445_v7  ;;  %v11455_v13 = vld [vmem:[#allocation7 + $0x24] ss:$8 sm:$0xf]  ;;  %v11496_v41 = vrot.slane %v11437_v3, %v11402_v47  ;;  %v11552_v17 = vrot.slane %v11430_v59, %v11490_v44  ;;  %v11556_v63 = vrot.slane %v11437_v3, %v11490_v44  ;;  %vm1980_vm5 = vcmp.lt.s32.totalorder %v11278_v5, 5 }
  0x77   :  { %2247 = vrot.lane.b32.xlu0 %v11306_v14, %s11163_s23  ;;  %19304 = vst [vmem:[#allocation49_spill] sm:$0xff] %v11455_v13  ;;  %v11457_v20 = vld [vmem:[#allocation7 + $0x26] ss:$8 sm:$0xf]  ;;  %19306 = vst [vmem:[#allocation51_spill] sm:$0xff] %v11461_v22  ;;  %v11500_v39 = vrot.slane %v11455_v13, %v11402_v47  ;;  %v11560_v31 = vrot.slane %v11455_v13, %v11490_v44  ;;  %v11578_v25 = vadd.s32 8, %v11278_v5 }
  0x78   :  { %19305 = vst [vmem:[#allocation50_spill] sm:$0xff] %v11457_v20  ;;  %19307 = vst [vmem:[#allocation52_spill] sm:$0xff] %v11465_v33  ;;  %v11475_v55 = vld [vmem:[#allocation7 + $0x44] ss:$8 sm:$0xf]  ;;  %2263 = vrot.lane.b32.xlu1 %v11445_v7, %s11163_s23  ;;  %v11504_v40 = vrot.slane %v11457_v20, %v11402_v47  ;;  %v11564_v30 = vrot.slane %v11457_v20, %v11490_v44  ;;  %vm1870_vm6 = vcmp.lt.s32.totalorder %v11278_v5, 3 }
  0x79   :  { %19308 = vst [vmem:[#allocation53_spill] sm:$0xff] %v11469_v35  ;;  %19309 = vst [vmem:[#allocation54_spill] sm:$0xff] %v11473_v48  ;;  %v11508_v23 = vrot.slane %v11475_v55, %v11402_v47  ;;  %v11569_v28 = vrot.slane %v11475_v55, %v11490_v44  ;;  %v11585_v29 = vrot.slane %v11397_v45, %v11547_v4  ;;  %v19336_v36 = vrot.slane %v11347_v27, 7 }
  0x7a   :  { %19310 = vst [vmem:[#allocation55_spill] sm:$0xff] %v11475_v55  ;;  %19311 = vst [vmem:[#allocation56_spill] sm:$0xff] %v11479_v0  ;;  %v11589_v43 = vrot.slane %v11407_v49, %v11547_v4  ;;  %v11593_v32 = vrot.slane %v11409_v50, %v11547_v4  ;;  %v11597_v14 = vrot.slane %v11411_v51, %v11547_v4  ;;  %v19337_v7 = vrot.slane %v11343_v26, 7 }
  0x7b   :  { %19312 = vst [vmem:[#allocation57_spill] sm:$0xff] %v11483_v46  ;;  %19313 = vst [vmem:[#allocation58_spill] sm:$0xff] %v11487_v42  ;;  %v19339_v56 = vrot.slane %v11343_v26, 1  ;;  %v19340_v24 = vrot.slane %v11347_v27, 1  ;;  %v11615_v47 = vrot.slane %v11413_v52, %v11547_v4  ;;  %v11619_v19 = vrot.slane %v11426_v57, %v11547_v4 }
  0x7c   :  { %19314 = vst [vmem:[#allocation59_spill] sm:$0xff] %v11490_v44  ;;  %19315 = vst [vmem:[#allocation60_spill] sm:$0xff] %v11496_v41  ;;  %v11605_v34 = vsel %vm1036_vm0, %v19337_v7, %v19336_v36  ;;  %v11623_v10 = vrot.slane %v11428_v58, %v11547_v4  ;;  %v11629_v7 = vrot.slane %v11430_v59, %v11547_v4  ;;  %vm1306_vm7 = vcmp.lt.s32.totalorder %v11578_v25, 15 }
  0x7d   :  { %19316 = vst [vmem:[#allocation61_spill] sm:$0xff] %v11500_v39  ;;  %19317 = vst [vmem:[#allocation62_spill] sm:$0xff] %v11504_v40  ;;  %v1299_v44 = vsel %vm1288_vm2, %v19340_v24, %v19339_v56  ;;  %v1262_v36 = vmax.f32 %v11347_v27, %v11605_v34  ;;  %v11633_v24 = vrot.slane %v11437_v3, %v11547_v4  ;;  %vm1723_vm8 = vcmp.lt.s32.totalorder %v11578_v25, 14 }
  0x7e   :  { %19318 = vst [vmem:[#allocation63_spill] sm:$0xff] %v11508_v23  ;;  %19319 = vst [vmem:[#allocation64_spill] sm:$0xff] %v11520_v53  ;;  %v971_v56 = vmul.f32 %v11585_v29, %v11347_v27  ;;  %v1010_v8 = vmul.f32 %v11589_v43, %v11347_v27  ;;  %v1159_v58 = vmul.f32 %v11597_v14, %v11605_v34  ;;  %v1498_v59 = vsel %vm1306_vm7, %v1299_v44, -3.4028235e+38 }
  0x7f   :  { %19320 = vst [vmem:[#allocation65_spill] sm:$0xff] %v11524_v21  ;;  %19321 = vst [vmem:[#allocation66_spill] sm:$0xff] %v11528_v18  ;;  %v11648_v3 = vrot.slane %v11455_v13, %v11547_v4  ;;  %v11654_v57 = vmax.f32 %v1262_v36, %v1498_v59  ;;  %v19353_v13 = vrot.slane %v11347_v27, 3  ;;  %vm1998_vm9 = vcmp.lt.s32.totalorder %v11578_v25, 13  ;;  %v12593_v25 = vld [vmem:[#allocation12 + $0x40] sm:$0xff] }
  0x80   :  { %19322 = vst [vmem:[#allocation67_spill] sm:$0xff] %v11532_v62  ;;  %19323 = vst [vmem:[#allocation68_spill] sm:$0xff] %v11536_v61  ;;  %vm1557_vm10 = vcmp.ge.s32.totalorder %v11278_v5, 2  ;;  %vm1887_vm11 = vcmp.ge.s32.totalorder %v11278_v5, 3 }
  0x81   :  { %19324 = vst [vmem:[#allocation69_spill] sm:$0xff] %v11540_v54  ;;  %19325 = vst [vmem:[#allocation70_spill] sm:$0xff] %v11544_v60  ;;  %2208 = vrot.lane.b32.xlu1 %v11654_v57, %s11170_s9 }
  0x82   :  { %19326 = vst [vmem:[#allocation71_spill] sm:$0xff] %v11547_v4  ;;  %19327 = vst [vmem:[#allocation72_spill] sm:$0xff] %v11552_v17 }
  0x83   :  { %19328 = vst [vmem:[#allocation73_spill] sm:$0xff] %v11556_v63  ;;  %19329 = vst [vmem:[#allocation74_spill] sm:$0xff] %v11560_v31  ;;  %v19350_v31 = vrot.slane %v11343_v26, 2  ;;  %v19355_v63 = vrot.slane %v11343_v26, 5 }
  0x84   :  { %19330 = vst [vmem:[#allocation75_spill] sm:$0xff] %v11564_v30  ;;  %19331 = vst [vmem:[#allocation76_spill] sm:$0xff] %v11569_v28  ;;  %v1104_v28 = vmul.f32 %v11593_v32, %v11605_v34 }
  0x85   :  { %19332 = vst [vmem:[#allocation77_spill] sm:$0xff] %v11585_v29  ;;  %19333 = vst [vmem:[#allocation78_spill] sm:$0xff] %v11589_v43  ;;  %v11652_v29 = vrot.slane %v11457_v20, %v11547_v4  ;;  %v19347_v43 = vrot.slane %v11347_v27, 6  ;;  %v19351_v20 = vrot.slane %v11347_v27, 2 }
  0x86   :  { %19334 = vst [vmem:[#allocation79_spill] sm:$0xff] %v11593_v32  ;;  %19335 = vst [vmem:[#allocation80_spill] sm:$0xff] %v11597_v14  ;;  %v19348_v32 = vrot.slane %v11343_v26, 6  ;;  %v11664_v14 = vrot.slane %v11475_v55, %v11547_v4 }
  0x87   :  { %19338 = vst [vmem:[#allocation81_spill] sm:$0xff] %v11605_v34  ;;  %19341 = vst [vmem:[#allocation82_spill] sm:$0xff] %v11615_v47  ;;  %v1716_v59 = vsel %vm1705_vm4, %v19351_v20, %v19350_v31  ;;  %v1120_v31 = vadd.f32 %v1104_v28, %v1010_v8  ;;  %v1175_v20 = vadd.f32 %v1159_v58, %v971_v56 }
  0x88   :  { %19342 = vst [vmem:[#allocation83_spill] sm:$0xff] %v11619_v19  ;;  %19343 = vst [vmem:[#allocation84_spill] sm:$0xff] %v11629_v7  ;;  %v1543_v34 = vsel %vm1540_vm3, %v19348_v32, %v19347_v43  ;;  %v1734_v32 = vsel %vm1723_vm8, %v1716_v59, 0.0  ;;  %v19352_v43 = vrot.slane %v11343_v26, 3  ;;  %v19354_v59 = vrot.slane %v11347_v27, 5 }
  0x89   :  { %19344 = vst [vmem:[#allocation85_spill] sm:$0xff] %v11633_v24  ;;  %19345 = vst [vmem:[#allocation86_spill] sm:$0xff] %v11648_v3  ;;  %v1608_v55 = vmul.f32 %v11623_v10, %v1543_v34  ;;  %v1663_v36 = vmul.f32 %v11629_v7, %v1543_v34  ;;  %v1773_v30 = vmul.f32 %v11633_v24, %v1734_v32 }
  0x8a   :  { %19346 = vst [vmem:[#allocation87_spill] sm:$0xff] %v11654_v57  ;;  %19349 = vst [vmem:[#allocation88_spill] sm:$0xff] %v11664_v14  ;;  %v1991_v4 = vsel %vm1980_vm5, %v19353_v13, %v19352_v43  ;;  %v1873_v54 = vsel %vm1870_vm6, %v19355_v63, %v19354_v59  ;;  %v11698_v13 = vsel %vm1306_vm7, %v1299_v44, 0.0  ;;  %v1828_v8 = vmul.f32 %v11648_v3, %v1734_v32 }
  0x8b   :  { %19356 = vst [vmem:[#allocation89_spill] sm:$0xff] %v11698_v13  ;;  %v2009_v28 = vsel %vm1998_vm9, %v1991_v4, 0.0  ;;  %v1356_v34 = vmul.f32 %v11615_v47, %v11698_v13  ;;  %v1411_v58 = vmul.f32 %v11619_v19, %v11698_v13  ;;  %v970_v63 = vmul.f32 %v11442_v6, %v11273_v2 }
  0x8c   :  { %v1009_v56 = vmul.f32 %v11461_v22, %v11273_v2  ;;  %v1103_v44 = vmul.f32 %v11465_v33, %v11298_v11  ;;  %v1497_v32 = vsel %vm1306_vm7, %v11302_v12, -3.4028235e+38  ;;  %v1158_v59 = vmul.f32 %v11469_v35, %v11298_v11 }
  0x8d   :  { %v1372_v4 = vadd.f32 %v1356_v34, %v1120_v31  ;;  %v1427_v43 = vadd.f32 %v1411_v58, %v1175_v20  ;;  %v19357_v13 = vmax.f32 %v11273_v2, %v11298_v11  ;;  %v19359_v47 = vrot.slane %v11271_v1, 2 }
  0x8e   :  { %v19360_v3 = vrot.slane %v11273_v2, 2  ;;  %v1938_v34 = vmul.f32 %v11652_v29, %v1873_v54  ;;  %v2048_v57 = vmul.f32 %v11664_v14, %v2009_v28  ;;  %v1119_v19 = vadd.f32 %v1103_v44, %v1009_v56 }
  0x8f   :  { %v11721_v27 = vmax.f32 %v19357_v13, %v1497_v32  ;;  %v1624_v58 = vadd.f32 %v1608_v55, %v1372_v4  ;;  %v1679_v13 = vadd.f32 %v1663_v36, %v1427_v43  ;;  %v11737_v32 = vsub.s32 3, %v11278_v5 }
  0x90   :  { %v1715_v31 = vsel %vm1705_vm4, %v19360_v3, %v19359_v47  ;;  %v1174_v3 = vadd.f32 %v1158_v59, %v970_v63  ;;  %v19363_v54 = vrot.slane %v11273_v2, 5  ;;  %v19364_v55 = vrot.slane %v11271_v1, 5 }
  0x91   :  { %19358 = vst [vmem:[#allocation90_spill] sm:$0xff] %v11721_v27  ;;  %2200 = vrot.lane.b32.xlu0 %v11721_v27, %s11170_s9  ;;  %19361 = vst [vmem:[#allocation91_spill] sm:$0xff] %v11737_v32  ;;  %v1733_v26 = vsel %vm1723_vm8, %v1715_v31, 0.0  ;;  %v1789_v11 = vadd.f32 %v1773_v30, %v1624_v58  ;;  %v11742_v47 = vadd.f32 %v1828_v8, %v1679_v13  ;;  %v19365_v56 = vrot.slane %v11271_v1, 3 }
  0x92   :  { %v1872_v36 = vsel %vm1870_vm6, %v19364_v55, %v19363_v54  ;;  %v1607_v4 = vmul.f32 %v11483_v46, %v11453_v9  ;;  %v1662_v28 = vmul.f32 %v11487_v42, %v11453_v9  ;;  %v19366_v30 = vrot.slane %v11273_v2, 3 }
  0x93   :  { %19362 = vst [vmem:[#allocation92_spill] sm:$0xff] %v11742_v47  ;;  %v11763_v63 = vsel %vm1306_vm7, %v11302_v12, 0.0  ;;  %v1954_v44 = vadd.f32 %v1938_v34, %v1789_v11  ;;  %v1772_v43 = vmul.f32 %v11496_v41, %v1733_v26  ;;  %v1827_v31 = vmul.f32 %v11500_v39, %v1733_v26 }
  0x94   :  { %v1990_v8 = vsel %vm1980_vm5, %v19366_v30, %v19365_v56  ;;  %19367 = vst [vmem:[#allocation93_spill] sm:$0xff] %v11763_v63  ;;  %v1355_v59 = vmul.f32 %v11473_v48, %v11763_v63  ;;  %v1410_v9 = vmul.f32 %v11479_v0, %v11763_v63  ;;  %v1937_v58 = vmul.f32 %v11504_v40, %v1872_v36 }
  0x95   :  { %v19368_v13 = vrot.slane %v11312_v16, 7  ;;  %v19369_v54 = vrot.slane %v11310_v15, 7  ;;  %v19371_v11 = vrot.slane %v11310_v15, 1  ;;  %v19372_v34 = vrot.slane %v11312_v16, 1 }
  0x96   :  { %v11786_v56 = vadd.f32 %v2048_v57, %v1954_v44  ;;  %v2008_v26 = vsel %vm1998_vm9, %v1990_v8, 0.0  ;;  %v1371_v36 = vadd.f32 %v1355_v59, %v1119_v19  ;;  %v1426_v30 = vadd.f32 %v1410_v9, %v1174_v3 }
  0x97   :  { %v11778_v12 = vsel %vm1036_vm0, %v19369_v54, %v19368_v13  ;;  %v1297_v55 = vsel %vm1288_vm2, %v19372_v34, %v19371_v11  ;;  %v1008_v20 = vmul.f32 %v11524_v21, %v11312_v16  ;;  %v969_v44 = vmul.f32 %v11520_v53, %v11312_v16 }
  0x98   :  { %19370 = vst [vmem:[#allocation94_spill] sm:$0xff] %v11778_v12  ;;  %19373 = vst [vmem:[#allocation95_spill] sm:$0xff] %v11786_v56  ;;  %v1102_v13 = vmul.f32 %v11528_v18, %v11778_v12  ;;  %v1260_v54 = vmax.f32 %v11312_v16, %v11778_v12  ;;  %v1496_v63 = vsel %vm1306_vm7, %v1297_v55, -3.4028235e+38  ;;  %v1623_v11 = vadd.f32 %v1607_v4, %v1371_v36 }
  0x99   :  { %v1678_v57 = vadd.f32 %v1662_v28, %v1426_v30  ;;  %v1157_v19 = vmul.f32 %v11532_v62, %v11778_v12  ;;  %v11804_v3 = vrot.slane %v11397_v45, %v11737_v32  ;;  %v11808_v8 = vrot.slane %v11407_v49, %v11737_v32 }
  0x9a   :  { %v2047_v59 = vmul.f32 %v11508_v23, %v2008_v26  ;;  %v11811_v9 = vmax.f32 %v1260_v54, %v1496_v63  ;;  %v1788_v4 = vadd.f32 %v1772_v43, %v1623_v11  ;;  %v19378_v34 = vrot.slane %v11312_v16, 6  ;;  %v19393_v63 = vld [vmem:[#allocation75_spill] sm:$0xff] }
  0x9b   :  { %19374 = vst [vmem:[#allocation96_spill] sm:$0xff] %v11804_v3  ;;  %19375 = vst [vmem:[#allocation97_spill] sm:$0xff] %v11808_v8  ;;  %v11813_v28 = vadd.f32 %v1827_v31, %v1678_v57  ;;  %v19379_v36 = vrot.slane %v11310_v15, 6  ;;  %v19380_v45 = vrot.slane %v11310_v15, 2  ;;  %v19381_v12 = vrot.slane %v11312_v16, 2 }
  0x9c   :  { %19376 = vst [vmem:[#allocation98_spill] sm:$0xff] %v11811_v9  ;;  %v11830_v43 = vrot.slane %v11409_v50, %v11737_v32  ;;  %v11834_v31 = vrot.slane %v11411_v51, %v11737_v32  ;;  %v1118_v26 = vadd.f32 %v1102_v13, %v1008_v20  ;;  %2241 = vrot.lane.b32.xlu1 %v11811_v9, %s11163_s23  ;;  %v19384_v57 = vrot.slane %v11312_v16, 5 }
  0x9d   :  { %19377 = vst [vmem:[#allocation99_spill] sm:$0xff] %v11813_v28  ;;  %v1541_v30 = vsel %vm1540_vm3, %v19379_v36, %v19378_v34  ;;  %v1714_v49 = vsel %vm1705_vm4, %v19381_v12, %v19380_v45  ;;  %2192 = vrot.lane.b32.xlu0 %v11811_v9, %s11170_s9  ;;  %v1953_v54 = vadd.f32 %v1937_v58, %v1788_v4  ;;  %v19385_v50 = vrot.slane %v11310_v15, 5  ;;  %v19391_v45 = vld [vmem:[#allocation69_spill] sm:$0xff] }
  0x9e   :  { %19382 = vst [vmem:[#allocation100_spill] sm:$0xff] %v11830_v43  ;;  %19383 = vst [vmem:[#allocation101_spill] sm:$0xff] %v11834_v31  ;;  %v1173_v11 = vadd.f32 %v1157_v19, %v969_v44  ;;  %v1732_v12 = vsel %vm1723_vm8, %v1714_v49, 0.0  ;;  %v11850_v20 = vrot.slane %v11413_v52, %v11737_v32  ;;  %v1606_v13 = vmul.f32 %v11544_v60, %v1541_v30 }
  0x9f   :  { %v1871_v51 = vsel %vm1870_vm6, %v19385_v50, %v19384_v57  ;;  %v19387_v34 = vrot.slane %v11310_v15, 3  ;;  %v19388_v58 = vrot.slane %v11312_v16, 3  ;;  %v11861_v19 = vsel %vm1306_vm7, %v1297_v55, 0.0  ;;  %v19392_v57 = vld [vmem:[#allocation73_spill] sm:$0xff] }
  0xa0   :  { %19386 = vst [vmem:[#allocation102_spill] sm:$0xff] %v11850_v20  ;;  %19389 = vst [vmem:[#allocation103_spill] sm:$0xff] %v11861_v19  ;;  %v11863_v4 = vadd.f32 %v2047_v59, %v1953_v54  ;;  %v1661_v36 = vmul.f32 %v11552_v17, %v1541_v30  ;;  %v1354_v52 = vmul.f32 %v11536_v61, %v11861_v19  ;;  %v19397_v59 = vrot.slane %v11378_v37, 1 }
  0xa1   :  { %v1989_v44 = vsel %vm1980_vm5, %v19388_v58, %v19387_v34  ;;  %v1409_v49 = vmul.f32 %v19391_v45, %v11861_v19  ;;  %v1771_v50 = vmul.f32 %v19392_v57, %v1732_v12  ;;  %v1936_v28 = vmul.f32 %v19393_v63, %v1871_v51  ;;  %2249 = vrot.lane.b32.xlu0 %v11721_v27, %s11163_s23 }
  0xa2   :  { %19390 = vst [vmem:[#allocation104_spill] sm:$0xff] %v11863_v4  ;;  %v19394_v34 = vrot.slane %v11380_v38, 7  ;;  %v19395_v58 = vrot.slane %v11378_v37, 7  ;;  %v19398_v30 = vrot.slane %v11380_v38, 1  ;;  %v19399_v4 = vld [vmem:[#allocation74_spill] sm:$0xff]  ;;  %v2007_v19 = vsel %vm1998_vm9, %v1989_v44, 0.0 }
  0xa3   :  { %v1826_v51 = vmul.f32 %v19399_v4, %v1732_v12  ;;  %v1370_v56 = vadd.f32 %v1354_v52, %v1118_v26  ;;  %v1425_v47 = vadd.f32 %v1409_v49, %v1173_v11  ;;  %v19400_v11 = vld [vmem:[#allocation43_spill] sm:$0xff]  ;;  %v19402_v52 = vld [vmem:[#allocation44_spill] sm:$0xff] }
  0xa4   :  { %v11878_v55 = vsel %vm1036_vm0, %v19395_v58, %v19394_v34  ;;  %v1300_v54 = vsel %vm1288_vm2, %v19398_v30, %v19397_v59  ;;  %v972_v34 = vmul.f32 %v11804_v3, %v11380_v38  ;;  %v1011_v58 = vmul.f32 %v11808_v8, %v11380_v38  ;;  %v19413_v3 = vld [vmem:[#allocation46_spill] sm:$0xff] }
  0xa5   :  { %19396 = vst [vmem:[#allocation105_spill] sm:$0xff] %v11878_v55  ;;  %v1263_v9 = vmax.f32 %v11380_v38, %v11878_v55  ;;  %v1499_v59 = vsel %vm1306_vm7, %v1300_v54, -3.4028235e+38  ;;  %v1622_v30 = vadd.f32 %v1606_v13, %v1370_v56  ;;  %v1677_v27 = vadd.f32 %v1661_v36, %v1425_v47  ;;  %v19407_v13 = vld [vmem:[#allocation76_spill] sm:$0xff] }
  0xa6   :  { %v1105_v12 = vmul.f32 %v11830_v43, %v11878_v55  ;;  %v1160_v26 = vmul.f32 %v11834_v31, %v11878_v55  ;;  %v11905_v44 = vrot.slane %v19400_v11, %v11737_v32  ;;  %v11909_v49 = vrot.slane %v19402_v52, %v11737_v32 }
  0xa7   :  { %v11911_v63 = vmax.f32 %v1263_v9, %v1499_v59  ;;  %v19405_v8 = vrot.slane %v11380_v38, 6  ;;  %v19406_v47 = vrot.slane %v11378_v37, 6  ;;  %v2046_v36 = vmul.f32 %v19407_v13, %v2007_v19  ;;  %v19411_v59 = vld [vmem:[#allocation45_spill] sm:$0xff] }
  0xa8   :  { %19401 = vst [vmem:[#allocation43_spill] sm:$0xff] %v11905_v44  ;;  %19403 = vst [vmem:[#allocation44_spill] sm:$0xff] %v11909_v49  ;;  %v1787_v55 = vadd.f32 %v1771_v50, %v1622_v30  ;;  %v11920_v31 = vadd.f32 %v1826_v51, %v1677_v27  ;;  %v19409_v11 = vrot.slane %v11378_v37, 2  ;;  %v19410_v43 = vrot.slane %v11380_v38, 2  ;;  %v19416_v27 = vld [vmem:[#allocation50_spill] sm:$0xff] }
  0xa9   :  { %19404 = vst [vmem:[#allocation106_spill] sm:$0xff] %v11911_v63  ;;  %v1544_v56 = vsel %vm1540_vm3, %v19406_v47, %v19405_v8  ;;  %v11930_v52 = vrot.slane %v19411_v59, %v11737_v32  ;;  %v11934_v4 = vrot.slane %v19413_v3, %v11737_v32  ;;  %v19414_v8 = vld [vmem:[#allocation49_spill] sm:$0xff]  ;;  %v11942_v50 = vrot.slane %v19416_v27, %v11737_v32 }
  0xaa   :  { %19408 = vst [vmem:[#allocation107_spill] sm:$0xff] %v11920_v31  ;;  %v1717_v9 = vsel %vm1705_vm4, %v19410_v43, %v19409_v11  ;;  %v11938_v19 = vrot.slane %v19414_v8, %v11737_v32  ;;  %2265 = vrot.lane.b32.xlu1 %v11911_v63, %s11163_s23  ;;  %v1952_v43 = vadd.f32 %v1936_v28, %v1787_v55  ;;  %v11947_v11 = vld [vmem:[#allocation3 + $0x50] sm:$0xff]  ;;  %v19420_v27 = vrot.slane %v11380_v38, 5 }
  0xab   :  { %19412 = vst [vmem:[#allocation45_spill] sm:$0xff] %v11930_v52  ;;  %19417 = vst [vmem:[#allocation49_spill] sm:$0xff] %v11942_v50  ;;  %v1121_v51 = vadd.f32 %v1105_v12, %v1011_v58  ;;  %v1176_v30 = vadd.f32 %v1160_v26, %v972_v34  ;;  %v1609_v47 = vmul.f32 %v11909_v49, %v1544_v56  ;;  %v11949_v3 = vld [vmem:[#allocation3 + $0x70] sm:$0xff]  ;;  %v1735_v8 = vsel %vm1723_vm8, %v1717_v9, 0.0 }
  0xac   :  { %19415 = vst [vmem:[#allocation46_spill] sm:$0xff] %v11938_v19  ;;  %19418 = vst [vmem:[#allocation50_spill] sm:$0xff] %v11947_v11  ;;  %v1664_v59 = vmul.f32 %v11930_v52, %v1544_v56  ;;  %v19421_v31 = vrot.slane %v11378_v37, 5  ;;  %v11962_v55 = vsel %vm1306_vm7, %v1300_v54, 0.0  ;;  %v11964_v34 = vadd.f32 %v2046_v36, %v1952_v43 }
  0xad   :  { %19419 = vst [vmem:[#allocation108_spill] sm:$0xff] %v11949_v3  ;;  %19422 = vst [vmem:[#allocation109_spill] sm:$0xff] %v11962_v55  ;;  %v19424_v58 = vrot.slane %v11378_v37, 3  ;;  %v19425_v12 = vrot.slane %v11380_v38, 3  ;;  %v1357_v56 = vmul.f32 %v11850_v20, %v11962_v55  ;;  %v1412_v9 = vmul.f32 %v11905_v44, %v11962_v55 }
  0xae   :  { %v1874_v28 = vsel %vm1870_vm6, %v19421_v31, %v19420_v27  ;;  %19423 = vst [vmem:[#allocation110_spill] sm:$0xff] %v11964_v34  ;;  %v1774_v27 = vmul.f32 %v11934_v4, %v1735_v8  ;;  %v1829_v34 = vmul.f32 %v11938_v19, %v1735_v8  ;;  %v19428_v54 = vrot.slane %v11947_v11, 7 }
  0xaf   :  { %v1992_v26 = vsel %vm1980_vm5, %v19425_v12, %v19424_v58  ;;  %v1373_v38 = vadd.f32 %v1357_v56, %v1121_v51  ;;  %v1428_v58 = vadd.f32 %v1412_v9, %v1176_v30  ;;  %v19426_v12 = vld [vmem:[#allocation55_spill] sm:$0xff]  ;;  %v1939_v55 = vmul.f32 %v11942_v50, %v1874_v28 }
  0xb0   :  { %v11984_v37 = vrot.slane %v19426_v12, %v11737_v32  ;;  %v2010_v31 = vsel %vm1998_vm9, %v1992_v26, 0.0  ;;  %v19429_v36 = vrot.slane %v11949_v3, 7  ;;  %v19431_v56 = vrot.slane %v11949_v3, 1  ;;  %v12072_v32 = vld [vmem:[#allocation3 + $0x60] sm:$0xff] }
  0xb1   :  { %v1625_v8 = vadd.f32 %v1609_v47, %v1373_v38  ;;  %v1680_v51 = vadd.f32 %v1664_v59, %v1428_v58  ;;  %v19432_v28 = vrot.slane %v11947_v11, 1  ;;  %v12019_v58 = vld [vmem:[#allocation3 + $0x48] sm:$0xff]  ;;  %19447 = vst [vmem:[#allocation121_spill] sm:$0xff] %v12072_v32  ;;  %v18583_v63 = vrot.slane %v12072_v32, 1 }
  0xb2   :  { %19427 = vst [vmem:[#allocation55_spill] sm:$0xff] %v11984_v37  ;;  %v11995_v43 = vsel %vm1036_vm0, %v19429_v36, %v19428_v54  ;;  %v2049_v12 = vmul.f32 %v11984_v37, %v2010_v31  ;;  %19437 = vst [vmem:[#allocation116_spill] sm:$0xff] %v12019_v58  ;;  %v19458_v20 = vrot.slane %v11271_v1, 3 }
  0xb3   :  { %19430 = vst [vmem:[#allocation111_spill] sm:$0xff] %v11995_v43  ;;  %v1250_v30 = vsel %vm1053_vm1, %v11995_v43, -3.4028235e+38  ;;  %v12006_v26 = vsel %vm1288_vm2, %v19432_v28, %v19431_v56  ;;  %v1790_v54 = vadd.f32 %v1774_v27, %v1625_v8  ;;  %v12010_v36 = vadd.f32 %v1829_v34, %v1680_v51  ;;  %v12021_v56 = vld [vmem:[#allocation3 + $0x68] sm:$0xff]  ;;  %v19439_v28 = vld [vmem:[#allocation26_spill] sm:$0xff] }
  0xb4   :  { %19433 = vst [vmem:[#allocation112_spill] sm:$0xff] %v12006_v26  ;;  %v1266_v9 = vmax.f32 %v11947_v11, %v1250_v30  ;;  %19438 = vst [vmem:[#allocation117_spill] sm:$0xff] %v12021_v56  ;;  %v12026_v31 = vsel %vm1053_vm1, %v19439_v28, 0.0  ;;  %v18555_v34 = vrot.slane %v12019_v58, 7  ;;  %v18556_v27 = vrot.slane %v12021_v56, 7 }
  0xb5   :  { %19434 = vst [vmem:[#allocation113_spill] sm:$0xff] %v12010_v36  ;;  %v1955_v47 = vadd.f32 %v1939_v55, %v1790_v54  ;;  %v18563_v55 = vrot.slane %v12019_v58, 1  ;;  %v18562_v8 = vrot.slane %v12021_v56, 1  ;;  %v1005_v51 = vmul.f32 %v11461_v22, %v11271_v1  ;;  %v19444_v36 = vld [vmem:[#allocation27_spill] sm:$0xff] }
  0xb6   :  { %v12013_v38 = vmax.f32 %v1266_v9, %v12006_v26  ;;  %v1099_v30 = vmul.f32 %v11465_v33, %v12026_v31  ;;  %v12042_v9 = vsel %vm1036_vm0, %v18556_v27, %v18555_v34  ;;  %v19442_v54 = vrot.slane %v11273_v2, 6  ;;  %v12070_v26 = vld [vmem:[#allocation3 + $0x40] sm:$0xff] }
  0xb7   :  { %v12017_v59 = vadd.f32 %v2049_v12, %v1955_v47  ;;  %19440 = vst [vmem:[#allocation26_spill] sm:$0xff] %v12042_v9  ;;  %v19441_v12 = vrot.slane %v11271_v1, 6  ;;  %v1249_v28 = vsel %vm1053_vm1, %v12042_v9, -3.4028235e+38  ;;  %19446 = vst [vmem:[#allocation120_spill] sm:$0xff] %v12070_v26  ;;  %v19452_v37 = vrot.slane %v12070_v26, 7 }
  0xb8   :  { %19435 = vst [vmem:[#allocation114_spill] sm:$0xff] %v12013_v38  ;;  %2210 = vrot.lane.b32.xlu1 %v12013_v38, %s11170_s9  ;;  %v1265_v34 = vmax.f32 %v12019_v58, %v1249_v28  ;;  %v1115_v27 = vadd.f32 %v1099_v30, %v1005_v51  ;;  %v19448_v30 = vrot.slane %v11273_v2, 2  ;;  %v1154_v51 = vmul.f32 %v11469_v35, %v12026_v31 }
  0xb9   :  { %19436 = vst [vmem:[#allocation115_spill] sm:$0xff] %v12017_v59  ;;  %v1550_v47 = vsel %vm1540_vm3, %v19442_v54, %v19441_v12  ;;  %v12059_v59 = vsel %vm1288_vm2, %v18563_v55, %v18562_v8  ;;  %v1351_v12 = vmul.f32 %v11473_v48, %v19444_v36  ;;  %v19449_v55 = vrot.slane %v11271_v1, 2 }
  0xba   :  { %19443 = vst [vmem:[#allocation118_spill] sm:$0xff] %v12059_v59  ;;  %v1564_v54 = vsel %vm1557_vm10, %v1550_v47, 0.0  ;;  %v12068_v9 = vmax.f32 %v1265_v34, %v12059_v59  ;;  %v19450_v47 = vrot.slane %v11271_v1, 5  ;;  %v19451_v59 = vrot.slane %v11273_v2, 5 }
  0xbb   :  { %v1367_v28 = vadd.f32 %v1351_v12, %v1115_v27  ;;  %v1603_v8 = vmul.f32 %v11483_v46, %v1564_v54  ;;  %v1707_v34 = vsel %vm1705_vm4, %v19449_v55, %v19448_v30  ;;  %v18575_v27 = vrot.slane %v12072_v32, 7 }
  0xbc   :  { %19445 = vst [vmem:[#allocation119_spill] sm:$0xff] %v12068_v9  ;;  %2202 = vrot.lane.b32.xlu0 %v12068_v9, %s11170_s9  ;;  %v1880_v43 = vsel %vm1870_vm6, %v19451_v59, %v19450_v47  ;;  %v966_v12 = vmul.f32 %v11442_v6, %v11271_v1  ;;  %v1768_v30 = vmul.f32 %v11496_v41, %v1707_v34  ;;  %v2152_v1 = vld [vmem:[#allocation9 + $0x2] ss:$4 sm:$0xf] }
  0xbd   :  { %v1619_v55 = vadd.f32 %v1603_v8, %v1367_v28  ;;  %v12105_v59 = vsel %vm1036_vm0, %v18575_v27, %v19452_v37  ;;  %v1894_v47 = vsel %vm1887_vm11, %v1880_v43, 0.0  ;;  %v19454_v8 = vrot.slane %v12070_v26, 1 }
  0xbe   :  { %19453 = vst [vmem:[#allocation122_spill] sm:$0xff] %v12105_v59  ;;  %v1248_v38 = vsel %vm1053_vm1, %v12105_v59, -3.4028235e+38  ;;  %v1170_v50 = vadd.f32 %v1154_v51, %v966_v12  ;;  %v1406_v37 = vmul.f32 %v11479_v0, %v19444_v36  ;;  %v1933_v43 = vmul.f32 %v11504_v40, %v1894_v47 }
  0xbf   :  { %v12118_v28 = vsel %vm1288_vm2, %v19454_v8, %v18583_v63  ;;  %v1264_v27 = vmax.f32 %v12070_v26, %v1248_v38  ;;  %v1784_v19 = vadd.f32 %v1768_v30, %v1619_v55  ;;  %v19457_v59 = vrot.slane %v11273_v2, 3  ;;  %v12138_v38 = vld [vmem:[#allocation3 + $0x58] sm:$0xff] }
  0xc0   :  { %19455 = vst [vmem:[#allocation123_spill] sm:$0xff] %v12118_v28  ;;  %v1422_v63 = vadd.f32 %v1406_v37, %v1170_v50  ;;  %v1658_v51 = vmul.f32 %v11487_v42, %v1564_v54  ;;  %19459 = vst [vmem:[#allocation125_spill] sm:$0xff] %v12138_v38  ;;  %v12141_v2 = vld [vmem:[#allocation3 + $0x78] sm:$0xff]  ;;  %v19463_v37 = vld [vmem:[#allocation41_spill] sm:$0xff] }
  0xc1   :  { %v12125_v44 = vmax.f32 %v1264_v27, %v12118_v28  ;;  %v1982_v8 = vsel %vm1980_vm5, %v19458_v20, %v19457_v59  ;;  %v1949_v27 = vadd.f32 %v1933_v43, %v1784_v19  ;;  %19460 = vst [vmem:[#allocation126_spill] sm:$0xff] %v12141_v2  ;;  %v1823_v20 = vmul.f32 %v11500_v39, %v1707_v34  ;;  %v19461_v50 = vld [vmem:[#allocation30_spill] sm:$0xff] }
  0xc2   :  { %v2043_v12 = vmul.f32 %v11508_v23, %v1982_v8  ;;  %v1674_v55 = vadd.f32 %v1658_v51, %v1422_v63  ;;  %v12148_v54 = vsel %vm1053_vm1, %v19461_v50, 0.0  ;;  %v1186_v30 = vld [vmem:[#allocation7 + $0x2] ss:$8 sm:$0xf]  ;;  %v18589_v19 = vrot.slane %v12141_v2, 7 }
  0xc3   :  { %19456 = vst [vmem:[#allocation124_spill] sm:$0xff] %v12125_v44  ;;  %2243 = vrot.lane.b32.xlu1 %v12125_v44, %s11163_s23  ;;  %2194 = vrot.lane.b32.xlu0 %v12125_v44, %s11170_s9  ;;  %19462 = vst [vmem:[#allocation30_spill] sm:$0xff] %v12148_v54  ;;  %v12156_v43 = vrot.slane %v1186_v30, %v19463_v37  ;;  %v19465_v34 = vrot.slane %v11310_v15, 6  ;;  %v19466_v8 = vrot.slane %v11312_v16, 6 }
  0xc4   :  { %v2059_v63 = vadd.f32 %v2043_v12, %v1949_v27  ;;  %v965_v50 = vmul.f32 %v11520_v53, %v11310_v15  ;;  %v1004_v59 = vmul.f32 %v11524_v21, %v11310_v15  ;;  %v1098_v47 = vmul.f32 %v11528_v18, %v12148_v54 }
  0xc5   :  { %19464 = vst [vmem:[#allocation127_spill] sm:$0xff] %v12156_v43  ;;  %v1549_v51 = vsel %vm1540_vm3, %v19466_v8, %v19465_v34  ;;  %v1153_v27 = vmul.f32 %v11532_v62, %v12148_v54  ;;  %v19467_v12 = vrot.slane %v12138_v38, 7  ;;  %v12182_v8 = vmul.f32 %v12156_v43, %v12026_v31 }
  0xc6   :  { %v12184_v36 = vadd.f32 %v1823_v20, %v1674_v55  ;;  %v12187_v28 = vrot.slane %v2152_v1, %v19463_v37  ;;  %v19475_v55 = vrot.slane %v11310_v15, 5  ;;  %v19476_v1 = vrot.slane %v11312_v16, 5 }
  0xc7   :  { %2251 = vrot.lane.b32.xlu0 %v12068_v9, %s11163_s23  ;;  %v12178_v34 = vsel %vm1036_vm0, %v18589_v19, %v19467_v12  ;;  %19469 = vst [vmem:[#allocation129_spill] sm:$0xff] %v12182_v8  ;;  %v12194_v9 = vsel %vm1557_vm10, %v1549_v51, 0.0  ;;  %v19472_v12 = vrot.slane %v11312_v16, 2  ;;  %v19473_v19 = vrot.slane %v11310_v15, 2 }
  0xc8   :  { %19468 = vst [vmem:[#allocation128_spill] sm:$0xff] %v12178_v34  ;;  %19470 = vst [vmem:[#allocation130_spill] sm:$0xff] %v12184_v36  ;;  %v1251_v44 = vsel %vm1053_vm1, %v12178_v34, -3.4028235e+38  ;;  %v12210_v20 = vsel %vm1870_vm6, %v19476_v1, %v19475_v55  ;;  %v19477_v36 = vrot.slane %v12141_v2, 1  ;;  %v19478_v51 = vrot.slane %v12138_v38, 1 }
  0xc9   :  { %19471 = vst [vmem:[#allocation131_spill] sm:$0xff] %v12187_v28  ;;  %v12202_v31 = vsel %vm1705_vm4, %v19473_v19, %v19472_v12  ;;  %v12221_v43 = vadd.f32 %v12187_v28, %v2059_v63  ;;  %v19481_v19 = vrot.slane %v11312_v16, 3  ;;  %v19482_v12 = vrot.slane %v11310_v15, 3  ;;  %v19484_v55 = vld [vmem:[#allocation59_spill] sm:$0xff] }
  0xca   :  { %19474 = vst [vmem:[#allocation132_spill] sm:$0xff] %v12202_v31  ;;  %v12218_v8 = vsel %vm1288_vm2, %v19478_v51, %v19477_v36  ;;  %v12232_v1 = vrot.slane %v1186_v30, %v19484_v55  ;;  %v1267_v37 = vmax.f32 %v12138_v38, %v1251_v44  ;;  %v12235_v54 = vadd.f32 %v1098_v47, %v1004_v59  ;;  %v19488_v51 = vld [vmem:[#allocation31_spill] sm:$0xff]  ;;  %v19498_v30 = vld [vmem:[#allocation78_spill] sm:$0xff] }
  0xcb   :  { %19479 = vst [vmem:[#allocation133_spill] sm:$0xff] %v12218_v8  ;;  %19480 = vst [vmem:[#allocation134_spill] sm:$0xff] %v12221_v43  ;;  %v12229_v34 = vsel %vm1980_vm5, %v19482_v12, %v19481_v19  ;;  %v12237_v36 = vadd.f32 %v1153_v27, %v965_v50  ;;  %v12241_v63 = vmul.f32 %v11536_v61, %v19488_v51  ;;  %v19492_v43 = vrot.slane %v11949_v3, 7  ;;  %v19497_v27 = vld [vmem:[#allocation77_spill] sm:$0xff] }
  0xcc   :  { %19483 = vst [vmem:[#allocation135_spill] sm:$0xff] %v12229_v34  ;;  %19485 = vst [vmem:[#allocation136_spill] sm:$0xff] %v12232_v1  ;;  %v12245_v15 = vmul.f32 %v19391_v45, %v19488_v51  ;;  %v12251_v44 = vmax.f32 %v1267_v37, %v12218_v8  ;;  %v19493_v16 = vrot.slane %v11947_v11, 7  ;;  %v19495_v37 = vrot.slane %v11947_v11, 1  ;;  %v19499_v8 = vld [vmem:[#allocation79_spill] sm:$0xff] }
  0xcd   :  { %19486 = vst [vmem:[#allocation137_spill] sm:$0xff] %v12235_v54  ;;  %19487 = vst [vmem:[#allocation138_spill] sm:$0xff] %v12237_v36  ;;  %v19496_v59 = vrot.slane %v11949_v3, 1  ;;  %v979_v12 = vmul.f32 %v19497_v27, %v11949_v3  ;;  %v1018_v51 = vmul.f32 %v19498_v30, %v11949_v3  ;;  %v19502_v50 = vrot.slane %v11947_v11, 6 }
  0xce   :  { %19489 = vst [vmem:[#allocation139_spill] sm:$0xff] %v12241_v63  ;;  %19490 = vst [vmem:[#allocation140_spill] sm:$0xff] %v12245_v15  ;;  %2267 = vrot.lane.b32.xlu1 %v12251_v44, %s11163_s23  ;;  %v12275_v19 = vsel %vm1036_vm0, %v19493_v16, %v19492_v43  ;;  %v19500_v43 = vld [vmem:[#allocation80_spill] sm:$0xff]  ;;  %v19506_v54 = vrot.slane %v11949_v3, 5 }
  0xcf   :  { %19491 = vst [vmem:[#allocation141_spill] sm:$0xff] %v12251_v44  ;;  %19494 = vst [vmem:[#allocation142_spill] sm:$0xff] %v12275_v19  ;;  %v1303_v47 = vsel %vm1288_vm2, %v19496_v59, %v19495_v37  ;;  %v1112_v28 = vmul.f32 %v19499_v8, %v12275_v19  ;;  %v1167_v16 = vmul.f32 %v19500_v43, %v12275_v19  ;;  %v19501_v37 = vrot.slane %v11949_v3, 6 }
  0xd0   :  { %v1270_v55 = vmax.f32 %v11949_v3, %v12275_v19  ;;  %v1506_v59 = vsel %vm1306_vm7, %v1303_v47, -3.4028235e+38  ;;  %v19503_v43 = vrot.slane %v11947_v11, 2  ;;  %v19504_v19 = vrot.slane %v11949_v3, 2 }
  0xd1   :  { %v1547_v27 = vsel %vm1540_vm3, %v19502_v50, %v19501_v37  ;;  %v1128_v8 = vadd.f32 %v1112_v28, %v1018_v51  ;;  %v1183_v1 = vadd.f32 %v1167_v16, %v979_v12  ;;  %v12336_v28 = vsel %vm1306_vm7, %v1303_v47, 0.0 }
  0xd2   :  { %v1720_v34 = vsel %vm1705_vm4, %v19504_v19, %v19503_v43  ;;  %v12313_v31 = vmax.f32 %v1270_v55, %v1506_v59  ;;  %v1616_v30 = vmul.f32 %v11623_v10, %v1547_v27  ;;  %v1671_v63 = vmul.f32 %v11629_v7, %v1547_v27  ;;  %19510 = vst [vmem:[#allocation144_spill] sm:$0xff] %v12336_v28  ;;  %v19511_v27 = vld [vmem:[#allocation86_spill] sm:$0xff] }
  0xd3   :  { %v1742_v50 = vsel %vm1723_vm8, %v1720_v34, 0.0  ;;  %v19507_v19 = vrot.slane %v11947_v11, 5  ;;  %v19508_v55 = vrot.slane %v11947_v11, 3  ;;  %v19509_v59 = vrot.slane %v11949_v3, 3 }
  0xd4   :  { %19505 = vst [vmem:[#allocation143_spill] sm:$0xff] %v12313_v31  ;;  %2212 = vrot.lane.b32.xlu1 %v12313_v31, %s11170_s9  ;;  %v1781_v51 = vmul.f32 %v11633_v24, %v1742_v50  ;;  %v1836_v12 = vmul.f32 %v19511_v27, %v1742_v50  ;;  %v19514_v37 = vrot.slane %v12021_v56, 7  ;;  %v19515_v47 = vrot.slane %v12019_v58, 7 }
  0xd5   :  { %v1877_v43 = vsel %vm1870_vm6, %v19507_v19, %v19506_v54  ;;  %v1995_v34 = vsel %vm1980_vm5, %v19509_v59, %v19508_v55  ;;  %v19512_v54 = vld [vmem:[#allocation82_spill] sm:$0xff]  ;;  %v19513_v19 = vld [vmem:[#allocation83_spill] sm:$0xff]  ;;  %v978_v55 = vmul.f32 %v11442_v6, %v12021_v56  ;;  %v1017_v59 = vmul.f32 %v11461_v22, %v12021_v56 }
  0xd6   :  { %v1364_v16 = vmul.f32 %v19512_v54, %v12336_v28  ;;  %v1419_v15 = vmul.f32 %v19513_v19, %v12336_v28  ;;  %v12354_v36 = vsel %vm1036_vm0, %v19515_v47, %v19514_v37  ;;  %v19517_v50 = vrot.slane %v12019_v58, 1 }
  0xd7   :  { %19516 = vst [vmem:[#allocation82_spill] sm:$0xff] %v12354_v36  ;;  %v19518_v3 = vrot.slane %v12021_v56, 1  ;;  %v2017_v6 = vsel %vm1998_vm9, %v1995_v34, 0.0  ;;  %v1111_v27 = vmul.f32 %v11465_v33, %v12354_v36  ;;  %v1166_v7 = vmul.f32 %v11469_v35, %v12354_v36 }
  0xd8   :  { %v1380_v11 = vadd.f32 %v1364_v16, %v1128_v8  ;;  %v1435_v22 = vadd.f32 %v1419_v15, %v1183_v1  ;;  %v1269_v37 = vmax.f32 %v12021_v56, %v12354_v36  ;;  %v19519_v24 = vrot.slane %v12019_v58, 2 }
  0xd9   :  { %v1302_v28 = vsel %vm1288_vm2, %v19518_v3, %v19517_v50  ;;  %v19520_v3 = vrot.slane %v12021_v56, 2  ;;  %v1946_v1 = vmul.f32 %v11652_v29, %v1877_v43  ;;  %v19521_v16 = vrot.slane %v12021_v56, 6 }
  0xda   :  { %v1505_v47 = vsel %vm1306_vm7, %v1302_v28, -3.4028235e+38  ;;  %v1632_v15 = vadd.f32 %v1616_v30, %v1380_v11  ;;  %v1687_v34 = vadd.f32 %v1671_v63, %v1435_v22  ;;  %v19522_v50 = vrot.slane %v12019_v58, 6 }
  0xdb   :  { %v1719_v8 = vsel %vm1705_vm4, %v19520_v3, %v19519_v24  ;;  %v12387_v19 = vmax.f32 %v1269_v37, %v1505_v47  ;;  %v2056_v22 = vmul.f32 %v11664_v14, %v2017_v6  ;;  %v1127_v30 = vadd.f32 %v1111_v27, %v1017_v59 }
  0xdc   :  { %v1546_v36 = vsel %vm1540_vm3, %v19522_v50, %v19521_v16  ;;  %v1741_v24 = vsel %vm1723_vm8, %v1719_v8, 0.0  ;;  %v1797_v11 = vadd.f32 %v1781_v51, %v1632_v15  ;;  %v12393_v63 = vadd.f32 %v1836_v12, %v1687_v34 }
  0xdd   :  { %19523 = vst [vmem:[#allocation145_spill] sm:$0xff] %v12387_v19  ;;  %v1182_v3 = vadd.f32 %v1166_v7, %v978_v55  ;;  %v1615_v16 = vmul.f32 %v11483_v46, %v1546_v36  ;;  %2204 = vrot.lane.b32.xlu0 %v12387_v19, %s11170_s9  ;;  %v12400_v37 = vsel %vm1306_vm7, %v1302_v28, 0.0  ;;  %v1670_v8 = vmul.f32 %v11487_v42, %v1546_v36  ;;  %v19580_v46 = vld [vmem:[#allocation37_spill] sm:$0xff] }
  0xde   :  { %19524 = vst [vmem:[#allocation146_spill] sm:$0xff] %v12393_v63  ;;  %19525 = vst [vmem:[#allocation147_spill] sm:$0xff] %v12400_v37  ;;  %v1962_v47 = vadd.f32 %v1946_v1, %v1797_v11  ;;  %v1780_v50 = vmul.f32 %v11496_v41, %v1741_v24  ;;  %v19526_v6 = vrot.slane %v12019_v58, 3  ;;  %v19527_v51 = vrot.slane %v12021_v56, 3 }
  0xdf   :  { %v1835_v27 = vmul.f32 %v11500_v39, %v1741_v24  ;;  %v19528_v12 = vrot.slane %v12021_v56, 5  ;;  %v19529_v55 = vrot.slane %v12019_v58, 5  ;;  %v1363_v36 = vmul.f32 %v11473_v48, %v12400_v37 }
  0xe0   :  { %v1994_v7 = vsel %vm1980_vm5, %v19527_v51, %v19526_v6  ;;  %v1418_v59 = vmul.f32 %v11479_v0, %v12400_v37  ;;  %v12421_v1 = vadd.f32 %v2056_v22, %v1962_v47  ;;  %v977_v15 = vmul.f32 %v11520_v53, %v12072_v32 }
  0xe1   :  { %v1876_v28 = vsel %vm1870_vm6, %v19529_v55, %v19528_v12  ;;  %v19531_v34 = vrot.slane %v12072_v32, 7  ;;  %v19532_v24 = vrot.slane %v12070_v26, 7  ;;  %v19534_v6 = vrot.slane %v12070_v26, 1 }
  0xe2   :  { %19530 = vst [vmem:[#allocation148_spill] sm:$0xff] %v12421_v1  ;;  %v19535_v51 = vrot.slane %v12072_v32, 1  ;;  %v2016_v22 = vsel %vm1998_vm9, %v1994_v7, 0.0  ;;  %v1379_v47 = vadd.f32 %v1363_v36, %v1127_v30  ;;  %v1434_v55 = vadd.f32 %v1418_v59, %v1182_v3 }
  0xe3   :  { %v12431_v11 = vsel %vm1036_vm0, %v19532_v24, %v19531_v34  ;;  %v1016_v43 = vmul.f32 %v11524_v21, %v12072_v32  ;;  %v1945_v30 = vmul.f32 %v11504_v40, %v1876_v28  ;;  %v19537_v33 = vrot.slane %v12072_v32, 6 }
  0xe4   :  { %19533 = vst [vmem:[#allocation149_spill] sm:$0xff] %v12431_v11  ;;  %v1301_v12 = vsel %vm1288_vm2, %v19535_v51, %v19534_v6  ;;  %v1110_v35 = vmul.f32 %v11528_v18, %v12431_v11  ;;  %v1165_v34 = vmul.f32 %v11532_v62, %v12431_v11  ;;  %v1268_v24 = vmax.f32 %v12072_v32, %v12431_v11 }
  0xe5   :  { %v1504_v6 = vsel %vm1306_vm7, %v1301_v12, -3.4028235e+38  ;;  %v1631_v3 = vadd.f32 %v1615_v16, %v1379_v47  ;;  %v1686_v7 = vadd.f32 %v1670_v8, %v1434_v55  ;;  %v19538_v1 = vrot.slane %v12070_v26, 6 }
  0xe6   :  { %v12454_v59 = vmax.f32 %v1268_v24, %v1504_v6  ;;  %v19539_v37 = vrot.slane %v12070_v26, 2  ;;  %v19540_v63 = vrot.slane %v12072_v32, 2  ;;  %v2055_v16 = vmul.f32 %v11508_v23, %v2016_v22 }
  0xe7   :  { %v1545_v11 = vsel %vm1540_vm3, %v19538_v1, %v19537_v33  ;;  %v1796_v8 = vadd.f32 %v1780_v50, %v1631_v3  ;;  %v12469_v47 = vadd.f32 %v1835_v27, %v1686_v7  ;;  %v1126_v6 = vadd.f32 %v1110_v35, %v1016_v43 }
  0xe8   :  { %19536 = vst [vmem:[#allocation150_spill] sm:$0xff] %v12454_v59  ;;  %v1718_v28 = vsel %vm1705_vm4, %v19540_v63, %v19539_v37  ;;  %v1181_v36 = vadd.f32 %v1165_v34, %v977_v15  ;;  %v19542_v33 = vrot.slane %v12070_v26, 3  ;;  %v19543_v1 = vrot.slane %v12072_v32, 3  ;;  %2245 = vrot.lane.b32.xlu1 %v12454_v59, %s11163_s23  ;;  %2196 = vrot.lane.b32.xlu0 %v12454_v59, %s11170_s9 }
  0xe9   :  { %19541 = vst [vmem:[#allocation151_spill] sm:$0xff] %v12469_v47  ;;  %v1740_v55 = vsel %vm1723_vm8, %v1718_v28, 0.0  ;;  %v1961_v63 = vadd.f32 %v1945_v30, %v1796_v8  ;;  %v1614_v37 = vmul.f32 %v11544_v60, %v1545_v11  ;;  %v1669_v50 = vmul.f32 %v11552_v17, %v1545_v11  ;;  %v19548_v30 = vld [vmem:[#allocation74_spill] sm:$0xff] }
  0xea   :  { %v1993_v51 = vsel %vm1980_vm5, %v19543_v1, %v19542_v33  ;;  %v12486_v27 = vsel %vm1306_vm7, %v1301_v12, 0.0  ;;  %v1779_v35 = vmul.f32 %v19392_v57, %v1740_v55  ;;  %v19545_v43 = vrot.slane %v12072_v32, 5 }
  0xeb   :  { %19544 = vst [vmem:[#allocation152_spill] sm:$0xff] %v12486_v27  ;;  %v19546_v15 = vrot.slane %v12070_v26, 5  ;;  %v1362_v34 = vmul.f32 %v11536_v61, %v12486_v27  ;;  %v1417_v11 = vmul.f32 %v19391_v45, %v12486_v27  ;;  %v12501_v12 = vadd.f32 %v2055_v16, %v1961_v63  ;;  %v19553_v16 = vld [vmem:[#allocation97_spill] sm:$0xff] }
  0xec   :  { %v1834_v3 = vmul.f32 %v19548_v30, %v1740_v55  ;;  %v2015_v7 = vsel %vm1998_vm9, %v1993_v51, 0.0  ;;  %v19549_v28 = vrot.slane %v12141_v2, 7  ;;  %v19550_v8 = vrot.slane %v12138_v38, 7  ;;  %v19554_v55 = vld [vmem:[#allocation100_spill] sm:$0xff]  ;;  %v19555_v51 = vld [vmem:[#allocation101_spill] sm:$0xff]  ;;  %2253 = vrot.lane.b32.xlu0 %v12387_v19, %s11163_s23 }
  0xed   :  { %v1875_v22 = vsel %vm1870_vm6, %v19546_v15, %v19545_v43  ;;  %19547 = vst [vmem:[#allocation153_spill] sm:$0xff] %v12501_v12  ;;  %v1378_v1 = vadd.f32 %v1362_v34, %v1126_v6  ;;  %v1433_v43 = vadd.f32 %v1417_v11, %v1181_v36  ;;  %v19552_v15 = vld [vmem:[#allocation96_spill] sm:$0xff]  ;;  %v1019_v63 = vmul.f32 %v19553_v16, %v12141_v2  ;;  %v19558_v11 = vld [vmem:[#allocation75_spill] sm:$0xff] }
  0xee   :  { %v12512_v33 = vsel %vm1036_vm0, %v19550_v8, %v19549_v28  ;;  %v980_v24 = vmul.f32 %v19552_v15, %v12141_v2  ;;  %v19556_v28 = vrot.slane %v12138_v38, 1  ;;  %v19557_v6 = vrot.slane %v12141_v2, 1 }
  0xef   :  { %19551 = vst [vmem:[#allocation154_spill] sm:$0xff] %v12512_v33  ;;  %v1113_v12 = vmul.f32 %v19554_v55, %v12512_v33  ;;  %v1168_v27 = vmul.f32 %v19555_v51, %v12512_v33  ;;  %v1271_v47 = vmax.f32 %v12141_v2, %v12512_v33  ;;  %v1944_v8 = vmul.f32 %v19558_v11, %v1875_v22 }
  0xf0   :  { %v1304_v36 = vsel %vm1288_vm2, %v19557_v6, %v19556_v28  ;;  %v1630_v39 = vadd.f32 %v1614_v37, %v1378_v1  ;;  %v1685_v23 = vadd.f32 %v1669_v50, %v1433_v43  ;;  %v19559_v45 = vrot.slane %v12141_v2, 6 }
  0xf1   :  { %v1507_v33 = vsel %vm1306_vm7, %v1304_v36, -3.4028235e+38  ;;  %v19560_v40 = vrot.slane %v12138_v38, 6  ;;  %v19561_v6 = vrot.slane %v12138_v38, 2  ;;  %v19562_v34 = vrot.slane %v12141_v2, 2 }
  0xf2   :  { %v2054_v50 = vmul.f32 %v19407_v13, %v2015_v7  ;;  %v1795_v22 = vadd.f32 %v1779_v35, %v1630_v39  ;;  %v12550_v1 = vadd.f32 %v1834_v3, %v1685_v23  ;;  %v12552_v43 = vmax.f32 %v1271_v47, %v1507_v33  ;;  %v12580_v7 = vld [vmem:[#allocation12 + $0x60] sm:$0xff] }
  0xf3   :  { %v1548_v28 = vsel %vm1540_vm3, %v19560_v40, %v19559_v45  ;;  %v1721_v37 = vsel %vm1705_vm4, %v19562_v34, %v19561_v6  ;;  %v1129_v42 = vadd.f32 %v1113_v12, %v1019_v63  ;;  %v1184_v62 = vadd.f32 %v1168_v27, %v980_v24  ;;  %v19567_v34 = vld [vmem:[#allocation48_spill] sm:$0xff] }
  0xf4   :  { %19563 = vst [vmem:[#allocation96_spill] sm:$0xff] %v12550_v1  ;;  %19564 = vst [vmem:[#allocation101_spill] sm:$0xff] %v12552_v43  ;;  %v1743_v53 = vsel %vm1723_vm8, %v1721_v37, 0.0  ;;  %v19565_v40 = vrot.slane %v12138_v38, 3  ;;  %v19566_v45 = vrot.slane %v12141_v2, 3  ;;  %2214 = vrot.lane.b32.xlu0 %v19567_v34, %s11170_s9  ;;  %v1960_v39 = vadd.f32 %v1944_v8, %v1795_v22  ;;  %2269 = vrot.lane.b32.xlu1 %v12552_v43, %s11163_s23  ;;  %v19575_v22 = vld [vmem:[#allocation43_spill] sm:$0xff] }
  0xf5   :  { %v1617_v23 = vmul.f32 %v11909_v49, %v1548_v28  ;;  %v19568_v47 = vrot.slane %v12141_v2, 5  ;;  %v19569_v24 = vrot.slane %v12138_v38, 5  ;;  %v1672_v12 = vmul.f32 %v11930_v52, %v1548_v28 }
  0xf6   :  { %v1996_v41 = vsel %vm1980_vm5, %v19566_v45, %v19565_v40  ;;  %v12578_v3 = vsel %vm1306_vm7, %v1304_v36, 0.0  ;;  %v19571_v33 = vlaneseq  ;;  %v12585_v8 = vadd.f32 %v2054_v50, %v1960_v39  ;;  %v12595_v36 = vld [vmem:[#allocation12 + $0x20] sm:$0xff] }
  0xf7   :  { %v1878_v27 = vsel %vm1870_vm6, %v19569_v24, %v19568_v47  ;;  %v2018_v35 = vsel %vm1998_vm9, %v1996_v41, 0.0  ;;  %19570 = vst [vmem:[#allocation155_spill] sm:$0xff] %v12578_v3  ;;  %v1782_v6 = vmul.f32 %v11934_v4, %v1743_v53  ;;  %v19574_v41 = vld [vmem:[#allocation102_spill] sm:$0xff]  ;;  %v1420_v40 = vmul.f32 %v19575_v22, %v12578_v3  ;;  %v12597_v45 = vld [vmem:[#allocation12] sm:$0xff] }
  0xf8   :  { %v12583_v63 = vand.u32 127, %v19571_v33  ;;  %19573 = vst [vmem:[#allocation157_spill] sm:$0xff] %v12585_v8  ;;  %v1365_v37 = vmul.f32 %v19574_v41, %v12578_v3  ;;  %v18632_v28 = vmov 0.0   ;;  %v19576_v47 = vld [vmem:[#allocation46_spill] sm:$0xff]  ;;  %v19577_v39 = vld [vmem:[#allocation49_spill] sm:$0xff]  ;;  %v19578_v33 = vld [vmem:[#allocation55_spill] sm:$0xff]  ;;  %2255 = vrot.lane.b32.xlu1 %v19580_v46, %s11163_s23 }
  0xf9   :  { %2852 = vmatprep.subr.mxu1 %v18632_v28  ;;  %v1837_v50 = vmul.f32 %v19576_v47, %v1743_v53  ;;  %v1947_v24 = vmul.f32 %v19577_v39, %v1878_v27  ;;  %v2057_v34 = vmul.f32 %v19578_v33, %v2018_v35  ;;  %v19579_v8 = vld [vmem:[#allocation106_spill] sm:$0xff]  ;;  %2655 = vmatprep.subr.mxu0 %v18632_v28 }
  0xfa   :  { %19572 = vst [vmem:[#allocation156_spill] sm:$0xff] %v12583_v63  ;;  %2216 = vrot.lane.b32.xlu0 %v19579_v8, %s11170_s9  ;;  %vm307_vm12 = vcmp.ge.s32.totalorder %v12583_v63, 96  ;;  %v1381_v3 = vadd.f32 %v1365_v37, %v1129_v42  ;;  %v1436_v1 = vadd.f32 %v1420_v40, %v1184_v62  ;;  %vm267_vm13 = vcmp.lt.s32.totalorder %v12583_v63, 96 }
  0xfb   :  { %v331_v53 = vsel %vm307_vm12, %v12580_v7, 0.0  ;;  %v327_v35 = vsel %vm307_vm12, %v12593_v25, 0.0  ;;  %v323_v42 = vsel %vm307_vm12, %v12595_v36, 0.0  ;;  %v319_v62 = vsel %vm307_vm12, %v12597_v45, 0.0 }
  0xfc   :  { %v12612_v27 = vand.u32 4294901760, %v331_v53  ;;  %v1633_v37 = vadd.f32 %v1617_v23, %v1381_v3  ;;  %v1688_v40 = vadd.f32 %v1672_v12, %v1436_v1  ;;  %v12623_v28 = vand.u32 4294901760, %v327_v35  ;;  %v19587_v12 = vld [vmem:[#allocation87_spill] sm:$0xff] }
  0xfd   :  { %v12625_v8 = vand.u32 4294901760, %v323_v42  ;;  %vm223_vm14 = vcmp.lt.s32.totalorder %v12583_v63, 64  ;;  %v12633_v0 = vand.u32 4294901760, %v319_v62  ;;  %vm263_vm15 = vcmp.ge.s32.totalorder %v12583_v63, 64  ;;  %2257 = vrot.lane.b32.xlu1 %v19587_v12, %s11163_s23 }
  0xfe   :  { %19581 = vst [vmem:[#allocation43_spill] sm:$0xff] %v12612_v27  ;;  %19582 = vst [vmem:[#allocation49_spill] sm:$0xff] %v12623_v28  ;;  %2218 = vrot.lane.b32.xlu0 %v12251_v44, %s11170_s9  ;;  %v12631_v46 = vsub.f32 %v331_v53, %v12612_v27  ;;  %2657 = vmatpush1.msra.mxu0 %v12612_v27  ;;  %v1798_v23 = vadd.f32 %v1782_v6, %v1633_v37  ;;  %v19593_v37 = vmov 0.0   ;;  %vm219_vm2 = vcmp.ge.s32.totalorder %v12583_v63, 32 }
  0xff   :  { %19583 = vst [vmem:[#allocation158_spill] sm:$0xff] %v12625_v8  ;;  %19585 = vst [vmem:[#allocation160_spill] sm:$0xff] %v12633_v0  ;;  %v12637_v1 = vadd.f32 %v1837_v50, %v1688_v40  ;;  %v12642_v3 = vsub.f32 %v327_v35, %v12623_v28  ;;  %v12645_v44 = vsub.f32 %v323_v42, %v12625_v8  ;;  %2659 = vmatprep.subr.mxu0 %v19593_v37 }
 0x100   :  { %19584 = vst [vmem:[#allocation159_spill] sm:$0xff] %v12631_v46  ;;  %vm12651_vm0 = vmand %vm263_vm15, %vm267_vm13  ;;  %v18643_v6 = vand.u32 4294901760, %v12631_v46  ;;  %v12657_v50 = vsub.f32 %v319_v62, %v12633_v0  ;;  %v1963_v40 = vadd.f32 %v1947_v24, %v1798_v23  ;;  %2661 = vmatpush1.msra.mxu0 %v12623_v28  ;;  %vm179_vm8 = vcmp.lt.s32.totalorder %v12583_v63, 32 }
 0x101   :  { %19586 = vst [vmem:[#allocation161_spill] sm:$0xff] %v12637_v1  ;;  %19588 = vst [vmem:[#allocation162_spill] sm:$0xff] %v12642_v3  ;;  %v287_v35 = vsel %vm12651_vm0, %v12580_v7, 0.0  ;;  %v283_v42 = vsel %vm12651_vm0, %v12593_v25, 0.0  ;;  %v18646_v12 = vand.u32 4294901760, %v12642_v3  ;;  %2663 = vmatprep.subr.mxu0 %v19593_v37  ;;  %v19597_v1 = vld [vmem:[#allocation114_spill] sm:$0xff] }
 0x102   :  { %19589 = vst [vmem:[#allocation163_spill] sm:$0xff] %v12645_v44  ;;  %19592 = vst [vmem:[#allocation164_spill] sm:$0xff] %v12657_v50  ;;  %2220 = vrot.lane.b32.xlu0 %v12552_v43, %s11170_s9  ;;  %v2856_v62 = vsub.f32 %v12631_v46, %v18643_v6  ;;  %v12676_v38 = vand.u32 4294901760, %v287_v35  ;;  %v12678_v24 = vand.u32 4294901760, %v283_v42  ;;  %v12681_v23 = vadd.f32 %v2057_v34, %v1963_v40 }
 0x103   :  { %2259 = vrot.lane.b32.xlu1 %v19597_v1, %s11163_s23  ;;  %v2868_v43 = vsub.f32 %v12642_v3, %v18646_v12  ;;  %v19598_v61 = vand.u32 4294901760, %v12645_v44  ;;  %2665 = vmatpush1.msra.mxu0 %v12625_v8  ;;  %v279_v2 = vsel %vm12651_vm0, %v12595_v36, 0.0  ;;  %v19599_v34 = vand.u32 4294901760, %v12657_v50  ;;  %vm12709_vm7 = vmand %vm219_vm2, %vm223_vm14 }
 0x104   :  { %19594 = vst [vmem:[#allocation165_spill] sm:$0xff] %v12676_v38  ;;  %19595 = vst [vmem:[#allocation166_spill] sm:$0xff] %v12678_v24  ;;  %v2857_v32 = vand.u32 4294901760, %v2856_v62  ;;  %v12699_v1 = vsub.f32 %v287_v35, %v12676_v38  ;;  %v12702_v12 = vsub.f32 %v283_v42, %v12678_v24  ;;  %2667 = vmatprep.subr.mxu0 %v19593_v37  ;;  %v275_v18 = vsel %vm12651_vm0, %v12597_v45, 0.0 }
 0x105   :  { %19596 = vst [vmem:[#allocation167_spill] sm:$0xff] %v12681_v23  ;;  %v2880_v6 = vsub.f32 %v12645_v44, %v19598_v61  ;;  %v2892_v40 = vsub.f32 %v12657_v50, %v19599_v34  ;;  %v2869_v62 = vand.u32 4294901760, %v2868_v43  ;;  %v12714_v23 = vand.u32 4294901760, %v279_v2  ;;  %2669 = vmatpush1.msra.mxu0 %v12633_v0 }
 0x106   :  { %19600 = vst [vmem:[#allocation168_spill] sm:$0xff] %v12699_v1  ;;  %19601 = vst [vmem:[#allocation169_spill] sm:$0xff] %v12702_v12  ;;  %2858 = vmatpush1.msra.mxu1 %v2857_v32  ;;  %v18655_v42 = vand.u32 4294901760, %v12699_v1  ;;  %v18656_v26 = vand.u32 4294901760, %v12702_v12  ;;  %2671 = vmatprep.subr.mxu0 %v19593_v37  ;;  %v12729_v32 = vand.u32 4294901760, %v275_v18  ;;  %v239_v53 = vsel %vm12709_vm7, %v12593_v25, 0.0 }
 0x107   :  { %v2881_v34 = vand.u32 4294901760, %v2880_v6  ;;  %19604 = vst [vmem:[#allocation170_spill] sm:$0xff] %v12714_v23  ;;  %v2893_v35 = vand.u32 4294901760, %v2892_v40  ;;  %2261 = vrot.lane.b32.xlu1 %v12313_v31, %s11163_s23  ;;  %2864 = vmatprep.subr.mxu1 %v19593_v37  ;;  %v12727_v43 = vsub.f32 %v279_v2, %v12714_v23  ;;  %v243_v6 = vsel %vm12709_vm7, %v12580_v7, 0.0 }
 0x108   :  { %19606 = vst [vmem:[#allocation172_spill] sm:$0xff] %v12729_v32  ;;  %2870 = vmatpush1.msra.mxu1 %v2869_v62  ;;  %v2904_v40 = vsub.f32 %v12699_v1, %v18655_v42  ;;  %v2916_v2 = vsub.f32 %v12702_v12, %v18656_v26  ;;  %2673 = vmatpush1.msra.mxu0 %v12676_v38  ;;  %v12744_v31 = vand.u32 4294901760, %v243_v6  ;;  %v12746_v21 = vand.u32 4294901760, %v239_v53 }
 0x109   :  { %19605 = vst [vmem:[#allocation171_spill] sm:$0xff] %v12727_v43  ;;  %2876 = vmatprep.subr.mxu1 %v19593_v37  ;;  %v18662_v56 = vand.u32 4294901760, %v12727_v43  ;;  %v12751_v62 = vsub.f32 %v275_v18, %v12729_v32  ;;  %2675 = vmatprep.subr.mxu0 %v19593_v37  ;;  %v235_v42 = vsel %vm12709_vm7, %v12595_v36, 0.0  ;;  %v231_v26 = vsel %vm12709_vm7, %v12597_v45, 0.0 }
 0x10a   :  { %19607 = vst [vmem:[#allocation173_spill] sm:$0xff] %v12744_v31  ;;  %19608 = vst [vmem:[#allocation174_spill] sm:$0xff] %v12746_v21  ;;  %2882 = vmatpush1.msra.mxu1 %v2881_v34  ;;  %v2905_v58 = vand.u32 4294901760, %v2904_v40  ;;  %v2917_v59 = vand.u32 4294901760, %v2916_v2  ;;  %v12761_v48 = vsub.f32 %v243_v6, %v12744_v31  ;;  %2677 = vmatpush1.msra.mxu0 %v12678_v24  ;;  %v12773_v34 = vand.u32 4294901760, %v235_v42 }
 0x10b   :  { %19609 = vst [vmem:[#allocation175_spill] sm:$0xff] %v12751_v62  ;;  %v12765_v18 = vsub.f32 %v239_v53, %v12746_v21  ;;  %2888 = vmatprep.subr.mxu1 %v19593_v37  ;;  %v2928_v19 = vsub.f32 %v12727_v43, %v18662_v56  ;;  %v18667_v61 = vand.u32 4294901760, %v12751_v62  ;;  %2679 = vmatprep.subr.mxu0 %v19593_v37  ;;  %v12775_v40 = vand.u32 4294901760, %v231_v26 }
 0x10c   :  { %19610 = vst [vmem:[#allocation176_spill] sm:$0xff] %v12761_v48  ;;  %19612 = vst [vmem:[#allocation178_spill] sm:$0xff] %v12773_v34  ;;  %2894 = vmatpush1.msra.mxu1 %v2893_v35  ;;  %2681 = vmatpush1.msra.mxu0 %v12714_v23  ;;  %v199_v2 = vsel %vm179_vm8, %v12580_v7, 0.0  ;;  %v195_v56 = vsel %vm179_vm8, %v12593_v25, 0.0  ;;  %v12791_v6 = vsub.f32 %v235_v42, %v12773_v34  ;;  %v19616_v23 = vand.u32 4294901760, %v12761_v48 }
 0x10d   :  { %19611 = vst [vmem:[#allocation177_spill] sm:$0xff] %v12765_v18  ;;  %19613 = vst [vmem:[#allocation179_spill] sm:$0xff] %v12775_v40  ;;  %2900 = vmatprep.subr.mxu1 %v19593_v37  ;;  %v2940_v35 = vsub.f32 %v12751_v62, %v18667_v61  ;;  %2683 = vmatprep.subr.mxu0 %v19593_v37  ;;  %v12795_v53 = vsub.f32 %v231_v26, %v12775_v40  ;;  %v2929_v7 = vand.u32 4294901760, %v2928_v19 }
 0x10e   :  { %19614 = vst [vmem:[#allocation180_spill] sm:$0xff] %v12791_v6  ;;  %2906 = vmatpush1.msra.mxu1 %v2905_v58  ;;  %v2952_v25 = vsub.f32 %v12761_v48, %v19616_v23  ;;  %2685 = vmatpush1.msra.mxu0 %v12729_v32  ;;  %v12801_v47 = vand.u32 4294901760, %v199_v2  ;;  %v12803_v43 = vand.u32 4294901760, %v195_v56  ;;  %v12807_v42 = vmul.f32 %v11544_v60, %v12194_v9  ;;  %v12846_v48 = vld [vmem:[#allocation12 + $0x48] sm:$0xff] }
 0x10f   :  { %19615 = vst [vmem:[#allocation181_spill] sm:$0xff] %v12795_v53  ;;  %2912 = vmatprep.subr.mxu1 %v19593_v37  ;;  %v19619_v26 = vand.u32 4294901760, %v12765_v18  ;;  %v18675_v19 = vand.u32 4294901760, %v12791_v6  ;;  %2687 = vmatprep.subr.mxu0 %v19593_v37  ;;  %v191_v23 = vsel %vm179_vm8, %v12595_v36, 0.0  ;;  %v2941_v61 = vand.u32 4294901760, %v2940_v35 }
 0x110   :  { %19617 = vst [vmem:[#allocation182_spill] sm:$0xff] %v12801_v47  ;;  %19618 = vst [vmem:[#allocation183_spill] sm:$0xff] %v12803_v43  ;;  %2918 = vmatpush1.msra.mxu1 %v2917_v59  ;;  %2689 = vmatpush1.msra.mxu0 %v12744_v31  ;;  %v12821_v60 = vsub.f32 %v199_v2, %v12801_v47  ;;  %v12824_v32 = vsub.f32 %v195_v56, %v12803_v43  ;;  %v12831_v59 = vand.u32 4294901760, %v191_v23  ;;  %v12836_v2 = vld [vmem:[#allocation12 + $0x68] sm:$0xff]  ;;  %v19625_v56 = vld [vmem:[#allocation139_spill] sm:$0xff] }
 0x111   :  { %v2964_v58 = vsub.f32 %v12765_v18, %v19619_v26  ;;  %2924 = vmatprep.subr.mxu1 %v19593_v37  ;;  %v2953_v26 = vand.u32 4294901760, %v2952_v25  ;;  %v2976_v18 = vsub.f32 %v12791_v6, %v18675_v19  ;;  %2691 = vmatprep.subr.mxu0 %v19593_v37  ;;  %v187_v36 = vsel %vm179_vm8, %v12597_v45, 0.0  ;;  %v12848_v6 = vld [vmem:[#allocation12 + $0x28] sm:$0xff] }
 0x112   :  { %19620 = vst [vmem:[#allocation184_spill] sm:$0xff] %v12821_v60  ;;  %19621 = vst [vmem:[#allocation185_spill] sm:$0xff] %v12824_v32  ;;  %2930 = vmatpush1.msra.mxu1 %v2929_v7  ;;  %2693 = vmatpush1.msra.mxu0 %v12746_v21  ;;  %v12841_v25 = vand.u32 4294901760, %v187_v36  ;;  %v12844_v19 = vadd.s32 128, %v12583_v63  ;;  %v12853_v45 = vsel %vm1887_vm11, %v12210_v20, 0.0  ;;  %v19624_v7 = vld [vmem:[#allocation137_spill] sm:$0xff]  ;;  %v12861_v35 = vmul.f32 %v11552_v17, %v12194_v9 }
 0x113   :  { %19622 = vst [vmem:[#allocation186_spill] sm:$0xff] %v12831_v59  ;;  %v12857_v31 = vadd.f32 %v19625_v56, %v19624_v7  ;;  %2936 = vmatprep.subr.mxu1 %v19593_v37  ;;  %2695 = vmatprep.subr.mxu0 %v19593_v37  ;;  %v12866_v21 = vsub.f32 %v191_v23, %v12831_v59  ;;  %v2965_v62 = vand.u32 4294901760, %v2964_v58  ;;  %v19627_v20 = vand.u32 4294901760, %v12795_v53  ;;  %v12876_v9 = vld [vmem:[#allocation12 + $0x8] sm:$0xff]  ;;  %v19891_v63 = vld [vmem:[#allocation123_spill] sm:$0xff] }
 0x114   :  { %19623 = vst [vmem:[#allocation187_spill] sm:$0xff] %v12841_v25  ;;  %2942 = vmatpush1.msra.mxu1 %v2941_v61  ;;  %2697 = vmatpush1.msra.mxu0 %v12773_v34  ;;  %v12873_v56 = vsub.f32 %v187_v36, %v12841_v25  ;;  %vm484_vm9 = vcmp.ge.s32.totalorder %v12844_v19, 224  ;;  %v19629_v23 = vand.u32 4294901760, %v12821_v60  ;;  %v19630_v17 = vand.u32 4294901760, %v12824_v32 }
 0x115   :  { %19626 = vst [vmem:[#allocation137_spill] sm:$0xff] %v12866_v21  ;;  %v2988_v24 = vsub.f32 %v12795_v53, %v19627_v20  ;;  %2948 = vmatprep.subr.mxu1 %v19593_v37  ;;  %2699 = vmatprep.subr.mxu0 %v19593_v37  ;;  %v508_v58 = vsel %vm484_vm9, %v12836_v2, 0.0  ;;  %v504_v36 = vsel %vm484_vm9, %v12846_v48, 0.0  ;;  %v500_v7 = vsel %vm484_vm9, %v12848_v6, 0.0 }
 0x116   :  { %19628 = vst [vmem:[#allocation139_spill] sm:$0xff] %v12873_v56  ;;  %v3000_v61 = vsub.f32 %v12821_v60, %v19629_v23  ;;  %2954 = vmatpush1.msra.mxu1 %v2953_v26  ;;  %v2977_v20 = vand.u32 4294901760, %v2976_v18  ;;  %v12895_v23 = vsub.f32 %v12824_v32, %v19630_v17  ;;  %2701 = vmatpush1.msra.mxu0 %v12775_v40  ;;  %v12899_v53 = vand.u32 4294901760, %v508_v58 }
 0x117   :  { %2960 = vmatprep.subr.mxu1 %v19593_v37  ;;  %2703 = vmatprep.subr.mxu0 %v19593_v37  ;;  %v12904_v12 = vand.u32 4294901760, %v504_v36  ;;  %v12906_v18 = vand.u32 4294901760, %v500_v7  ;;  %v496_v17 = vsel %vm484_vm9, %v12876_v9, 0.0  ;;  %v2989_v26 = vand.u32 4294901760, %v2988_v24  ;;  %v12927_v24 = vpop.permute.xlu0 %2198 }
 0x118   :  { %19631 = vst [vmem:[#allocation188_spill] sm:$0xff] %v12899_v53  ;;  %2966 = vmatpush1.msra.mxu1 %v2965_v62  ;;  %v12912_v60 = vsub.f32 %v508_v58, %v12899_v53  ;;  %2705 = vmatpush1.msra.mxu0 %v12801_v47  ;;  %v12915_v32 = vand.u32 4294901760, %v496_v17  ;;  %vm440_vm0 = vcmp.ge.s32.totalorder %v12844_v19, 192  ;;  %v3001_v34 = vand.u32 4294901760, %v3000_v61  ;;  %v12929_v58 = vpop.permute.xlu1 %2190 }
 0x119   :  { %19632 = vst [vmem:[#allocation189_spill] sm:$0xff] %v12904_v12  ;;  %19633 = vst [vmem:[#allocation190_spill] sm:$0xff] %v12906_v18  ;;  %2972 = vmatprep.subr.mxu1 %v19593_v37  ;;  %2707 = vmatprep.subr.mxu0 %v19593_v37  ;;  %v12921_v40 = vsub.f32 %v504_v36, %v12904_v12  ;;  %v12924_v62 = vsub.f32 %v500_v7, %v12906_v18  ;;  %vm444_vm7 = vcmp.lt.s32.totalorder %v12844_v19, 224 }
 0x11a   :  { %19634 = vst [vmem:[#allocation191_spill] sm:$0xff] %v12912_v60  ;;  %19635 = vst [vmem:[#allocation192_spill] sm:$0xff] %v12915_v32  ;;  %2978 = vmatpush1.msra.mxu1 %v2977_v20  ;;  %v3013_v47 = vand.u32 4294901760, %v12895_v23  ;;  %v19639_v38 = vand.u32 4294901760, %v12866_v21  ;;  %2709 = vmatpush1.msra.mxu0 %v12803_v43  ;;  %v12938_v36 = vsub.f32 %v496_v17, %v12915_v32  ;;  %v19643_v20 = vand.u32 4294901760, %v12873_v56 }
 0x11b   :  { %19636 = vst [vmem:[#allocation193_spill] sm:$0xff] %v12921_v40  ;;  %19637 = vst [vmem:[#allocation194_spill] sm:$0xff] %v12924_v62  ;;  %2984 = vmatprep.subr.mxu1 %v19593_v37  ;;  %2711 = vmatprep.subr.mxu0 %v19593_v37  ;;  %v13005_v7 = vpop.permute.xlu0 %2206 }
 0x11c   :  { %19638 = vst [vmem:[#allocation195_spill] sm:$0xff] %v12929_v58  ;;  %v3024_v61 = vsub.f32 %v12866_v21, %v19639_v38  ;;  %19640 = vst [vmem:[#allocation196_spill] sm:$0xff] %v12938_v36  ;;  %v3036_v23 = vsub.f32 %v12873_v56, %v19643_v20  ;;  %2990 = vmatpush1.msra.mxu1 %v2989_v26  ;;  %v19644_v21 = vand.u32 4294901760, %v12912_v60  ;;  %2713 = vmatpush1.msra.mxu0 %v12831_v59  ;;  %v19650_v26 = vld [vmem:[#allocation132_spill] sm:$0xff] }
 0x11d   :  { %vm12942_vm9 = vmand %vm440_vm0, %vm444_vm7  ;;  %2996 = vmatprep.subr.mxu1 %v19593_v37  ;;  %v19647_v56 = vand.u32 4294901760, %v12921_v40  ;;  %2715 = vmatprep.subr.mxu0 %v19593_v37  ;;  %vm396_vm0 = vcmp.ge.s32.totalorder %v12844_v19, 160  ;;  %19653 = vst [vmem:[#allocation202_spill] sm:$0xff] %v13005_v7  ;;  %vm400_vm7 = vcmp.lt.s32.totalorder %v12844_v19, 192  ;;  %v19655_v50 = vand.u32 4294901760, %v12938_v36 }
 0x11e   :  { %v464_v17 = vsel %vm12942_vm9, %v12836_v2, 0.0  ;;  %v460_v33 = vsel %vm12942_vm9, %v12846_v48, 0.0  ;;  %v3042_v43 = vsub.f32 %v12912_v60, %v19644_v21  ;;  %v456_v21 = vsel %vm12942_vm9, %v12848_v6, 0.0  ;;  %3002 = vmatpush1.msra.mxu1 %v3001_v34  ;;  %2717 = vmatpush1.msra.mxu0 %v12841_v25 }
 0x11f   :  { %v12963_v20 = vand.u32 4294901760, %v464_v17  ;;  %v12965_v38 = vand.u32 4294901760, %v460_v33  ;;  %v12971_v1 = vsub.f32 %v12921_v40, %v19647_v56  ;;  %v452_v52 = vsel %vm12942_vm9, %v12876_v9, 0.0  ;;  %3008 = vmatprep.subr.mxu1 %v19593_v37  ;;  %2719 = vmatprep.subr.mxu0 %v12899_v53  ;;  %vm13026_vm9 = vmand %vm396_vm0, %vm400_vm7 }
 0x120   :  { %v3025_v60 = vand.u32 4294901760, %v3024_v61  ;;  %v12991_v40 = vmul.f32 %v19392_v57, %v19650_v26  ;;  %v12995_v34 = vand.u32 4294901760, %v456_v21  ;;  %v12997_v61 = vand.u32 4294901760, %v452_v52  ;;  %3014 = vmatpush1.msra.mxu1 %v3013_v47  ;;  %2721 = vmatpush2.msra.mxu0 %v19593_v37 }
 0x121   :  { %19645 = vst [vmem:[#allocation197_spill] sm:$0xff] %v12963_v20  ;;  %19646 = vst [vmem:[#allocation198_spill] sm:$0xff] %v12965_v38  ;;  %v12983_v59 = vsub.f32 %v464_v17, %v12963_v20  ;;  %v12986_v56 = vsub.f32 %v460_v33, %v12965_v38  ;;  %v13003_v33 = vsel %vm267_vm13, %v12929_v58, %v12927_v24  ;;  %v13007_v17 = vpop.permute.xlu1 %2239  ;;  %v3037_v57 = vand.u32 4294901760, %v3036_v23 }
 0x122   :  { %19651 = vst [vmem:[#allocation132_spill] sm:$0xff] %v12995_v34  ;;  %19652 = vst [vmem:[#allocation201_spill] sm:$0xff] %v12997_v61  ;;  %v19654_v25 = vand.u32 4294901760, %v12924_v62  ;;  %3020 = vmatprep.subr.mxu1 %v19593_v37  ;;  %v3043_v58 = vand.u32 4294901760, %v3042_v43  ;;  %v3055_v14 = vand.u32 4294901760, %v12971_v1  ;;  %v3078_v47 = vsub.f32 %v12938_v36, %v19655_v50  ;;  %2723 = vmatprep.subr.mxu0 %v12904_v12 }
 0x123   :  { %19648 = vst [vmem:[#allocation199_spill] sm:$0xff] %v12983_v59  ;;  %19649 = vst [vmem:[#allocation200_spill] sm:$0xff] %v12986_v56  ;;  %v18735_v0 = vand.u32 4294901760, %v12983_v59  ;;  %v13022_v23 = vsub.f32 %v456_v21, %v12995_v34  ;;  %3026 = vmatpush1.msra.mxu1 %v3025_v60  ;;  %2725 = vmatpush2.msra.mxu0 %v19593_v37  ;;  %v13033_v1 = vsub.f32 %v452_v52, %v12997_v61 }
 0x124   :  { %v3066_v53 = vsub.f32 %v12924_v62, %v19654_v25  ;;  %v420_v50 = vsel %vm13026_vm9, %v12836_v2, 0.0  ;;  %v416_v21 = vsel %vm13026_vm9, %v12846_v48, 0.0  ;;  %3032 = vmatprep.subr.mxu1 %v19593_v37  ;;  %2727 = vmatprep.subr.mxu0 %v12906_v18  ;;  %vm356_vm0 = vcmp.lt.s32.totalorder %v12844_v19, 160 }
 0x125   :  { %19656 = vst [vmem:[#allocation203_spill] sm:$0xff] %v13022_v23  ;;  %19659 = vst [vmem:[#allocation204_spill] sm:$0xff] %v13033_v1  ;;  %v13045_v60 = vsub.f32 %v12983_v59, %v18735_v0  ;;  %v13048_v43 = vand.u32 4294901760, %v420_v50  ;;  %v13050_v52 = vand.u32 4294901760, %v416_v21  ;;  %v1618_v36 = vadd.f32 %v12807_v42, %v12857_v31  ;;  %3038 = vmatpush1.msra.mxu1 %v3037_v57  ;;  %v13070_v42 = vpop.permute.xlu0 %2247  ;;  %v13072_v62 = vpop.permute.xlu1 %2263 }
 0x126   :  { %2729 = vmatpush2.msra.mxu0 %v19593_v37  ;;  %v412_v0 = vsel %vm13026_vm9, %v12848_v6, 0.0  ;;  %v2227_v59 = vsel %vm267_vm13, %v12927_v24, %v13005_v7  ;;  %3044 = vmatprep.subr.mxu1 %v3043_v58  ;;  %v3067_v18 = vand.u32 4294901760, %v3066_v53  ;;  %v3079_v12 = vand.u32 4294901760, %v3078_v47  ;;  %19664 = vst [vmem:[#allocation209_spill] sm:$0xff] %v13070_v42  ;;  %19665 = vst [vmem:[#allocation210_spill] sm:$0xff] %v13072_v62  ;;  %v19666_v53 = vld [vmem:[#allocation32_spill] sm:$0xff] }
 0x127   :  { %19660 = vst [vmem:[#allocation205_spill] sm:$0xff] %v13048_v43  ;;  %19661 = vst [vmem:[#allocation206_spill] sm:$0xff] %v13050_v52  ;;  %2731 = vmatprep.subr.mxu0 %v12915_v32  ;;  %v13066_v57 = vsub.f32 %v420_v50, %v13048_v43  ;;  %v13068_v31 = vand.u32 4294901760, %v412_v0  ;;  %3050 = vmatpush2.msra.mxu1 %v19593_v37  ;;  %v2316_v24 = vmax.f32 %v19666_v53, %v13003_v33  ;;  %v19669_v33 = vld [vmem:[#allocation29_spill] sm:$0xff] }
 0x128   :  { %2733 = vmatpush2.msra.mxu0 %v19593_v37  ;;  %v408_v58 = vsel %vm13026_vm9, %v12876_v9, 0.0  ;;  %v376_v47 = vsel %vm356_vm0, %v12836_v2, 0.0  ;;  %3056 = vmatprep.subr.mxu1 %v3055_v14  ;;  %v3091_v50 = vand.u32 4294901760, %v13045_v60  ;;  %v19667_v7 = vand.u32 4294901760, %v12986_v56  ;;  %v19674_v14 = vld [vmem:[#allocation138_spill] sm:$0xff] }
 0x129   :  { %19662 = vst [vmem:[#allocation207_spill] sm:$0xff] %v13066_v57  ;;  %19663 = vst [vmem:[#allocation208_spill] sm:$0xff] %v13068_v31  ;;  %2735 = vmatprep.subr.mxu0 %v12963_v20  ;;  %v13091_v32 = vsub.f32 %v416_v21, %v13050_v52  ;;  %v2317_v53 = vmax.f32 %v19669_v33, %v2227_v59  ;;  %3062 = vmatpush2.msra.mxu1 %v19593_v37  ;;  %v19670_v25 = vand.u32 4294901760, %v13022_v23 }
 0x12a   :  { %v3102_v8 = vsub.f32 %v12986_v56, %v19667_v7  ;;  %2737 = vmatpush2.msra.mxu0 %v19593_v37  ;;  %v13100_v60 = vand.u32 4294901760, %v408_v58  ;;  %v2280_v7 = vsel %vm179_vm8, %v13007_v17, %v13070_v42  ;;  %3068 = vmatprep.subr.mxu1 %v3067_v18  ;;  %v13108_v59 = vsub.f32 %v412_v0, %v13068_v31 }
 0x12b   :  { %19668 = vst [vmem:[#allocation32_spill] sm:$0xff] %v13091_v32  ;;  %v3114_v2 = vsub.f32 %v13022_v23, %v19670_v25  ;;  %2739 = vmatprep.subr.mxu0 %v12965_v38  ;;  %v13110_v21 = vand.u32 4294901760, %v376_v47  ;;  %v2361_v33 = vmax.f32 %v2317_v53, %v2280_v7  ;;  %v2284_v25 = vsel %vm179_vm8, %v13072_v62, %v13007_v17  ;;  %v19675_v23 = vld [vmem:[#allocation140_spill] sm:$0xff] }
 0x12c   :  { %19671 = vst [vmem:[#allocation29_spill] sm:$0xff] %v13100_v60  ;;  %19672 = vst [vmem:[#allocation211_spill] sm:$0xff] %v13108_v59  ;;  %v13118_v56 = vadd.f32 %v19675_v23, %v19674_v14  ;;  %v1932_v18 = vmul.f32 %v19558_v11, %v12853_v45  ;;  %3074 = vmatpush2.msra.mxu1 %v19593_v37  ;;  %v19676_v0 = vand.u32 4294901760, %v13033_v1  ;;  %2741 = vmatpush2.msra.mxu0 %v19593_v37  ;;  %v13134_v14 = vpop.permute.xlu1 %2208 }
 0x12d   :  { %19673 = vst [vmem:[#allocation212_spill] sm:$0xff] %v13110_v21  ;;  %v2344_v53 = vsel %vm219_vm2, %v2284_v25, -3.4028235e+38  ;;  %3080 = vmatprep.subr.mxu1 %v3079_v12  ;;  %v3103_v17 = vand.u32 4294901760, %v3102_v8  ;;  %2743 = vmatprep.subr.mxu0 %v12995_v34  ;;  %v13132_v23 = vsub.f32 %v408_v58, %v13100_v60  ;;  %19678 = vst [vmem:[#allocation140_spill] sm:$0xff] %v13134_v14  ;;  %v13142_v8 = vand.u32 4294901760, %v2361_v33  ;;  %v13147_v58 = vpop.permute.xlu0 %2200 }
 0x12e   :  { %v3126_v42 = vsub.f32 %v13033_v1, %v19676_v0  ;;  %v2360_v45 = vmax.f32 %v2316_v24, %v2344_v53  ;;  %v1783_v62 = vadd.f32 %v12991_v40, %v1618_v36  ;;  %3086 = vmatpush2.msra.mxu1 %v19593_v37  ;;  %v19679_v0 = vand.u32 4294901760, %v13066_v57  ;;  %2745 = vmatpush2.msra.mxu0 %v19593_v37 }
 0x12f   :  { %19677 = vst [vmem:[#allocation138_spill] sm:$0xff] %v13132_v23  ;;  %19680 = vst [vmem:[#allocation213_spill] sm:$0xff] %v13142_v8  ;;  %v372_v12 = vsel %vm356_vm0, %v12846_v48, 0.0  ;;  %3092 = vmatprep.subr.mxu1 %v3091_v50  ;;  %v3115_v24 = vand.u32 4294901760, %v3114_v2  ;;  %2747 = vmatprep.subr.mxu0 %v12997_v61  ;;  %v13152_v36 = vsub.f32 %v376_v47, %v13110_v21  ;;  %v368_v50 = vsel %vm356_vm0, %v12848_v6, 0.0  ;;  %v19712_v61 = vld [vmem:[#allocation90_spill] sm:$0xff] }
 0x130   :  { %v3138_v25 = vsub.f32 %v13066_v57, %v19679_v0  ;;  %v13154_v53 = vand.u32 4294901760, %v372_v12  ;;  %v19683_v0 = vld [vmem:[#allocation135_spill] sm:$0xff]  ;;  %3098 = vmatpush2.msra.mxu1 %v19593_v37  ;;  %v3127_v57 = vand.u32 4294901760, %v3126_v42  ;;  %2749 = vmatpush2.msra.mxu0 %v19593_v37  ;;  %v13160_v48 = vand.u32 4294901760, %v2360_v45 }
 0x131   :  { %19681 = vst [vmem:[#allocation214_spill] sm:$0xff] %v13152_v36  ;;  %v2042_v7 = vmul.f32 %v19407_v13, %v19683_v0  ;;  %3104 = vmatprep.subr.mxu1 %v3103_v17  ;;  %v19685_v47 = vand.u32 4294901760, %v13091_v32  ;;  %2751 = vmatprep.subr.mxu0 %v13048_v43  ;;  %v13173_v42 = vand.u32 4294901760, %v368_v50  ;;  %v1948_v1 = vadd.f32 %v1932_v18, %v1783_v62 }
 0x132   :  { %19682 = vst [vmem:[#allocation215_spill] sm:$0xff] %v13154_v53  ;;  %19684 = vst [vmem:[#allocation135_spill] sm:$0xff] %v13160_v48  ;;  %v13171_v0 = vsub.f32 %v372_v12, %v13154_v53  ;;  %3110 = vmatpush2.msra.mxu1 %v19593_v37  ;;  %v3139_v13 = vand.u32 4294901760, %v3138_v25  ;;  %2753 = vmatpush2.msra.mxu0 %v19593_v37  ;;  %v13178_v6 = vsub.f32 %v2361_v33, %v13142_v8  ;;  %v2242_v33 = vpop.permute.xlu1 %2241  ;;  %v19692_v25 = vld [vmem:[#allocation30_spill] sm:$0xff] }
 0x133   :  { %v3150_v2 = vsub.f32 %v13091_v32, %v19685_v47  ;;  %19687 = vst [vmem:[#allocation217_spill] sm:$0xff] %v13173_v42  ;;  %v364_v17 = vsel %vm356_vm0, %v12876_v9, 0.0  ;;  %3116 = vmatprep.subr.mxu1 %v3115_v24  ;;  %v19689_v47 = vand.u32 4294901760, %v13108_v59  ;;  %2755 = vmatprep.subr.mxu0 %v13050_v52  ;;  %v13189_v62 = vsub.f32 %v368_v50, %v13173_v42  ;;  %v19693_v32 = vld [vmem:[#allocation136_spill] sm:$0xff]  ;;  %v19695_v9 = vld [vmem:[#allocation35_spill] sm:$0xff] }
 0x134   :  { %19686 = vst [vmem:[#allocation216_spill] sm:$0xff] %v13171_v0  ;;  %19688 = vst [vmem:[#allocation218_spill] sm:$0xff] %v13178_v6  ;;  %v13191_v18 = vand.u32 4294901760, %v364_v17  ;;  %v13195_v11 = vmul.f32 %v19693_v32, %v19692_v25  ;;  %v13199_v19 = vmul.f32 %v19548_v30, %v19650_v26  ;;  %v13204_v24 = vsel %vm1053_vm1, %v19695_v9, 0.0  ;;  %3122 = vmatpush2.msra.mxu1 %v19593_v37  ;;  %v19700_v32 = vld [vmem:[#allocation33_spill] sm:$0xff] }
 0x135   :  { %v3162_v12 = vsub.f32 %v13108_v59, %v19689_v47  ;;  %19690 = vst [vmem:[#allocation219_spill] sm:$0xff] %v13189_v62  ;;  %v13208_v50 = vsub.f32 %v2360_v45, %v13160_v48  ;;  %2757 = vmatpush2.msra.mxu0 %v19593_v37  ;;  %v13211_v47 = vpop.permute.xlu0 %2192  ;;  %3128 = vmatprep.subr.mxu1 %v3127_v57  ;;  %v3151_v25 = vand.u32 4294901760, %v3150_v2  ;;  %v19698_v40 = vand.u32 4294901760, %v13132_v23  ;;  %v19702_v57 = vld [vmem:[#allocation34_spill] sm:$0xff] }
 0x136   :  { %19691 = vst [vmem:[#allocation220_spill] sm:$0xff] %v13191_v18  ;;  %19694 = vst [vmem:[#allocation30_spill] sm:$0xff] %v13195_v11  ;;  %2759 = vmatprep.subr.mxu0 %v13068_v31  ;;  %v13219_v9 = vsub.f32 %v364_v17, %v13191_v18  ;;  %v1673_v45 = vadd.f32 %v12861_v35, %v13118_v56  ;;  %v13223_v59 = vadd.f32 %v2042_v7, %v1948_v1  ;;  %v13245_v7 = vld [vmem:[#allocation3 + $0x10] sm:$0xff]  ;;  %v13270_v43 = vpop.permute.xlu1 %2265 }
 0x137   :  { %19696 = vst [vmem:[#allocation35_spill] sm:$0xff] %v13208_v50  ;;  %19697 = vst [vmem:[#allocation221_spill] sm:$0xff] %v13211_v47  ;;  %v3174_v26 = vsub.f32 %v13132_v23, %v19698_v40  ;;  %v19701_v30 = vrot.slane %v19700_v32, 6  ;;  %v19703_v2 = vrot.slane %v19702_v57, 6  ;;  %3134 = vmatpush2.msra.mxu1 %v19593_v37  ;;  %2761 = vmatpush2.msra.mxu0 %v19593_v37  ;;  %v13234_v40 = vand.u32 4294901760, %v13178_v6  ;;  %v19708_v23 = vld [vmem:[#allocation40_spill] sm:$0xff] }
 0x138   :  { %19699 = vst [vmem:[#allocation222_spill] sm:$0xff] %v13219_v9  ;;  %3140 = vmatprep.subr.mxu1 %v3139_v13  ;;  %v3163_v17 = vand.u32 4294901760, %v3162_v12  ;;  %v19705_v35 = vand.u32 4294901760, %v13152_v36  ;;  %2763 = vmatprep.subr.mxu0 %v13100_v60  ;;  %v19707_v13 = vld [vmem:[#allocation79_spill] sm:$0xff]  ;;  %v13259_v1 = vand.u32 4294901760, %v13208_v50  ;;  %v19717_v34 = vand.u32 4294901760, %v13219_v9 }
 0x139   :  { %v1551_v52 = vsel %vm1540_vm3, %v19703_v2, %v19701_v30  ;;  %19704 = vst [vmem:[#allocation33_spill] sm:$0xff] %v13234_v40  ;;  %v2228_v30 = vsel %vm267_vm13, %v13147_v58, %v13134_v14  ;;  %v19706_v2 = vld [vmem:[#allocation78_spill] sm:$0xff]  ;;  %v1100_v12 = vmul.f32 %v19707_v13, %v13204_v24  ;;  %3146 = vmatpush2.msra.mxu1 %v19593_v37  ;;  %v3175_v14 = vand.u32 4294901760, %v3174_v26  ;;  %v13278_v26 = vpop.permute.xlu0 %2249 }
 0x13a   :  { %v3186_v56 = vsub.f32 %v13152_v36, %v19705_v35  ;;  %v1006_v11 = vmul.f32 %v13245_v7, %v19706_v2  ;;  %v13254_v35 = vsel %vm1053_vm1, %v19708_v23, 0.0  ;;  %2765 = vmatpush2.msra.mxu0 %v19593_v37  ;;  %19709 = vst [vmem:[#allocation34_spill] sm:$0xff] %v13259_v1  ;;  %3152 = vmatprep.subr.mxu1 %v3151_v25  ;;  %v19710_v36 = vand.u32 4294901760, %v13171_v0 }
 0x13b   :  { %2767 = vmatprep.subr.mxu0 %v13110_v21  ;;  %v2232_v23 = vsel %vm267_vm13, %v13211_v47, %v13147_v58  ;;  %19711 = vst [vmem:[#allocation78_spill] sm:$0xff] %v13270_v43  ;;  %3158 = vmatpush2.msra.mxu1 %v19593_v37  ;;  %v2321_v25 = vmax.f32 %v19712_v61, %v2228_v30  ;;  %19713 = vst [vmem:[#allocation79_spill] sm:$0xff] %v13278_v26  ;;  %v19714_v61 = vand.u32 4294901760, %v13189_v62  ;;  %v19715_v21 = vld [vmem:[#allocation98_spill] sm:$0xff] }
 0x13c   :  { %v3198_v60 = vsub.f32 %v13171_v0, %v19710_v36  ;;  %3232 = vmatprep.mubr.f32.mxu1 %v13142_v8  ;;  %v2285_v36 = vsel %vm179_vm8, %v13270_v43, %v2242_v33  ;;  %v2785_v31 = vsub.f32 %v13178_v6, %v13234_v40  ;;  %v13282_v0 = vld [vmem:[#allocation3 + $0x18] sm:$0xff]  ;;  %3164 = vmatprep.subr.mxu1 %v3163_v17  ;;  %v3187_v47 = vand.u32 4294901760, %v3186_v56  ;;  %v19716_v56 = vld [vmem:[#allocation36_spill] sm:$0xff]  ;;  %v19720_v40 = vld [vmem:[#allocation39_spill] sm:$0xff] }
 0x13d   :  { %v1007_v58 = vmul.f32 %v13282_v0, %v19553_v16  ;;  %v3210_v30 = vsub.f32 %v13189_v62, %v19714_v61  ;;  %2769 = vmatpush2.msra.mxu0 %v19593_v37  ;;  %v2281_v43 = vsel %vm179_vm8, %v2242_v33, %v13278_v26  ;;  %v1101_v8 = vmul.f32 %v19554_v55, %v13254_v35  ;;  %v19746_v55 = vld [vmem:[#allocation85_spill] sm:$0xff] }
 0x13e   :  { %3170 = vmatpush2.msra.mxu1 %v19593_v37  ;;  %v2320_v6 = vmax.f32 %v19715_v21, %v2232_v23  ;;  %2771 = vmatprep.subr.mxu0 %v13154_v53  ;;  %v2791_v17 = vsub.f32 %v13208_v50, %v13259_v1  ;;  %v1352_v61 = vmul.f32 %v19512_v54, %v19716_v56  ;;  %v3199_v62 = vand.u32 4294901760, %v3198_v60  ;;  %v19718_v23 = vld [vmem:[#allocation38_spill] sm:$0xff] }
 0x13f   :  { %3176 = vmatprep.subr.mxu1 %v3175_v14  ;;  %v3222_v33 = vsub.f32 %v13219_v9, %v19717_v34  ;;  %2773 = vmatpush2.msra.mxu0 %v19593_v37  ;;  %v2348_v26 = vsel %vm219_vm2, %v2285_v36, -3.4028235e+38  ;;  %v1116_v21 = vadd.f32 %v1100_v12, %v1006_v11  ;;  %v19719_v53 = vrot.slane %v19718_v23, 6  ;;  %v13321_v9 = vld [vmem:[#allocation9 + $0x2] ss:$4 sm:$0xf] }
 0x140   :  { %v19721_v38 = vrot.slane %v19720_v40, 6  ;;  %3182 = vmatpush2.msra.mxu1 %v19593_v37  ;;  %2775 = vmatprep.subr.mxu0 %v13173_v42  ;;  %v2365_v60 = vmax.f32 %v2321_v25, %v2281_v43  ;;  %v13316_v14 = vand.u32 4294901760, %v2785_v31  ;;  %v13319_v34 = vadd.f32 %v13199_v19, %v1673_v45  ;;  %v19724_v11 = vld [vmem:[#allocation59_spill] sm:$0xff]  ;;  %v19726_v31 = vld [vmem:[#allocation42_spill] sm:$0xff] }
 0x141   :  { %v13325_v12 = vrot.slane %v13321_v9, %v19724_v11  ;;  %v1565_v36 = vsel %vm1557_vm10, %v1551_v52, 0.0  ;;  %3188 = vmatprep.subr.mxu1 %v3187_v47  ;;  %2777 = vmatpush2.msra.mxu0 %v19593_v37  ;;  %v1117_v43 = vadd.f32 %v1101_v8, %v1007_v58  ;;  %v1353_v19 = vmul.f32 %v19574_v41, %v19726_v31 }
 0x142   :  { %v1552_v50 = vsel %vm1540_vm3, %v19721_v38, %v19719_v53  ;;  %19722 = vst [vmem:[#allocation40_spill] sm:$0xff] %v13316_v14  ;;  %19723 = vst [vmem:[#allocation90_spill] sm:$0xff] %v13319_v34  ;;  %v3211_v38 = vand.u32 4294901760, %v3210_v30  ;;  %v13330_v53 = vpop.permute.xlu1 %2210  ;;  %3194 = vmatpush2.msra.mxu1 %v19593_v37  ;;  %v2364_v45 = vmax.f32 %v2320_v6, %v2348_v26  ;;  %2779 = vmatprep.subr.mxu0 %v13191_v18  ;;  %v13338_v34 = vpop.permute.xlu0 %2202 }
 0x143   :  { %19725 = vst [vmem:[#allocation98_spill] sm:$0xff] %v13330_v53  ;;  %v13336_v25 = vand.u32 4294901760, %v2791_v17  ;;  %v19728_v52 = vrot.slane %v19702_v57, 2  ;;  %v19729_v47 = vrot.slane %v19700_v32, 2  ;;  %v19730_v8 = vrot.slane %v19700_v32, 5  ;;  %3200 = vmatprep.subr.mxu1 %v3199_v62  ;;  %2781 = vmatpush2.msra.mxu0 %v19593_v37 }
 0x144   :  { %v19731_v58 = vrot.slane %v19702_v57, 5  ;;  %v13356_v26 = vsel %vm1557_vm10, %v1552_v50, 0.0  ;;  %v3223_v17 = vand.u32 4294901760, %v3222_v33  ;;  %v13361_v1 = vadd.f32 %v13325_v12, %v13223_v59  ;;  %3206 = vmatpush2.msra.mxu1 %v19593_v37  ;;  %2787 = vmatprep.mubr.f32.mxu0 %v13316_v14 }
 0x145   :  { %19727 = vst [vmem:[#allocation38_spill] sm:$0xff] %v13336_v25  ;;  %v13346_v30 = vsel %vm1705_vm4, %v19729_v47, %v19728_v52  ;;  %v1368_v52 = vadd.f32 %v1352_v61, %v1116_v21  ;;  %v1604_v47 = vmul.f32 %v11623_v10, %v1565_v36  ;;  %v13365_v18 = vand.u32 4294901760, %v2365_v60  ;;  %v19737_v61 = vld [vmem:[#allocation80_spill] sm:$0xff]  ;;  %3212 = vmatprep.subr.mxu1 %v3211_v38 }
 0x146   :  { %v1881_v6 = vsel %vm1870_vm6, %v19731_v58, %v19730_v8  ;;  %19732 = vst [vmem:[#allocation39_spill] sm:$0xff] %v13361_v1  ;;  %v19734_v50 = vrot.slane %v19702_v57, 3  ;;  %v19735_v62 = vrot.slane %v19700_v32, 3  ;;  %v19736_v8 = vld [vmem:[#allocation77_spill] sm:$0xff]  ;;  %v1155_v21 = vmul.f32 %v19737_v61, %v13204_v24  ;;  %3266 = vmatprep.subr.mxu0 %v19593_v37  ;;  %v19738_v1 = vld [vmem:[#allocation71_spill] sm:$0xff]  ;;  %3218 = vmatpush2.msra.mxu1 %v19593_v37 }
 0x147   :  { %19733 = vst [vmem:[#allocation223_spill] sm:$0xff] %v13365_v18  ;;  %v967_v59 = vmul.f32 %v13245_v7, %v19736_v8  ;;  %v13379_v58 = vld [vmem:[#allocation7 + $0x2] ss:$8 sm:$0xf]  ;;  %v1369_v57 = vadd.f32 %v1353_v19, %v1117_v43  ;;  %v1605_v32 = vmul.f32 %v11909_v49, %v13356_v26  ;;  %2793 = vmatmul.mubr.f32.vlgmr.msra.gmra.mxu0 %v13336_v25  ;;  %v19743_v42 = vrot.slane %v19718_v23, 2  ;;  %v2244_v25 = vpop.permute.xlu1 %2243 }
 0x148   :  { %v1983_v33 = vsel %vm1980_vm5, %v19735_v62, %v19734_v50  ;;  %v13383_v14 = vrot.slane %v13379_v58, %v19738_v1  ;;  %v13388_v50 = vand.u32 4294901760, %v2364_v45  ;;  %v19741_v7 = vld [vmem:[#allocation83_spill] sm:$0xff]  ;;  %v19742_v62 = vrot.slane %v19720_v40, 2  ;;  %3224 = vmatprep.subr.mxu1 %v3223_v17  ;;  %3269 = vmatpush1.msra.mxu0 %v12631_v46 }
 0x149   :  { %v1407_v38 = vmul.f32 %v19741_v7, %v19716_v56  ;;  %v19744_v43 = vrot.slane %v19718_v23, 5  ;;  %v19745_v19 = vrot.slane %v19720_v40, 5  ;;  %v1895_v56 = vsel %vm1887_vm11, %v1881_v6, 0.0  ;;  %3230 = vmatpush2.msra.mxu1 %v19593_v37  ;;  %3272 = vmatprep.subr.mxu0 %v19593_v37 }
 0x14a   :  { %19739 = vst [vmem:[#allocation77_spill] sm:$0xff] %v13383_v14  ;;  %19740 = vst [vmem:[#allocation80_spill] sm:$0xff] %v13388_v50  ;;  %v13399_v41 = vsel %vm1705_vm4, %v19743_v42, %v19742_v62  ;;  %v1620_v20 = vadd.f32 %v1604_v47, %v1368_v52  ;;  %v1769_v16 = vmul.f32 %v19746_v55, %v13346_v30  ;;  %v13417_v62 = vpop.permute.xlu0 %2194  ;;  %3498 = vmatprep.subr.mxu1 %v19593_v37 }
 0x14b   :  { %v1882_v49 = vsel %vm1870_vm6, %v19745_v19, %v19744_v43  ;;  %v13414_v42 = vsub.f32 %v2365_v60, %v13365_v18  ;;  %19748 = vst [vmem:[#allocation85_spill] sm:$0xff] %v13417_v62  ;;  %v1171_v17 = vadd.f32 %v1155_v21, %v967_v59  ;;  %v968_v43 = vmul.f32 %v13282_v0, %v19552_v15  ;;  %v19750_v0 = vld [vmem:[#allocation84_spill] sm:$0xff] }
 0x14c   :  { %v1156_v6 = vmul.f32 %v19555_v51, %v13254_v35  ;;  %3234 = vmatmul.mubr.f32.vlgmr.msra.gmra.mxu1 %v13160_v48  ;;  %v1896_v52 = vsel %vm1887_vm11, %v1882_v49, 0.0  ;;  %v1621_v60 = vadd.f32 %v1605_v32, %v1369_v57  ;;  %v1770_v47 = vmul.f32 %v11934_v4, %v13399_v41  ;;  %3275 = vmatpush1.msra.mxu0 %v12642_v3 }
 0x14d   :  { %19747 = vst [vmem:[#allocation83_spill] sm:$0xff] %v13414_v42  ;;  %3500 = vmatpush1.msra.mxu1 %v12612_v27  ;;  %v13431_v59 = vsub.f32 %v2364_v45, %v13388_v50  ;;  %v1659_v21 = vmul.f32 %v19750_v0, %v1565_v36  ;;  %v1934_v19 = vmul.f32 %v11652_v29, %v1895_v56  ;;  %v19751_v32 = vrot.slane %v19720_v40, 3  ;;  %v13462_v40 = vpop.permute.xlu1 %2267  ;;  %v19895_v27 = vld [vmem:[#allocation126_spill] sm:$0xff] }
 0x14e   :  { %3502 = vmatprep.subr.mxu1 %v19593_v37  ;;  %v2229_v49 = vsel %vm267_vm13, %v13338_v34, %v13330_v53  ;;  %3278 = vmatprep.subr.mxu0 %v19593_v37  ;;  %v1785_v57 = vadd.f32 %v1769_v16, %v1620_v20  ;;  %v19752_v45 = vrot.slane %v19718_v23, 3  ;;  %v1408_v56 = vmul.f32 %v19575_v22, %v19726_v31 }
 0x14f   :  { %19749 = vst [vmem:[#allocation224_spill] sm:$0xff] %v13431_v59  ;;  %3504 = vmatpush1.msra.mxu1 %v12623_v28  ;;  %3281 = vmatpush1.msra.mxu0 %v12645_v44  ;;  %v13453_v36 = vand.u32 4294901760, %v13414_v42  ;;  %v1172_v53 = vadd.f32 %v1156_v6, %v968_v43  ;;  %v1935_v16 = vmul.f32 %v19577_v39, %v1896_v52  ;;  %19754 = vst [vmem:[#allocation225_spill] sm:$0xff] %v13462_v40  ;;  %v19757_v44 = vld [vmem:[#allocation164_spill] sm:$0xff]  ;;  %v13470_v6 = vpop.permute.xlu0 %2251 }
 0x150   :  { %v1984_v48 = vsel %vm1980_vm5, %v19752_v45, %v19751_v32  ;;  %3506 = vmatprep.subr.mxu1 %v19593_v37  ;;  %v2233_v20 = vsel %vm267_vm13, %v13417_v62, %v13338_v34  ;;  %3284 = vmatprep.subr.mxu0 %v19593_v37  ;;  %v1786_v23 = vadd.f32 %v1770_v47, %v1621_v60  ;;  %v19755_v32 = vld [vmem:[#allocation158_spill] sm:$0xff]  ;;  %v19756_v45 = vld [vmem:[#allocation119_spill] sm:$0xff]  ;;  %v13473_v52 = vand.u32 4294901760, %v13431_v59  ;;  %v19760_v62 = vld [vmem:[#allocation88_spill] sm:$0xff] }
 0x151   :  { %19753 = vst [vmem:[#allocation84_spill] sm:$0xff] %v13453_v36  ;;  %3508 = vmatpush1.msra.mxu1 %v19755_v32  ;;  %v2325_v31 = vmax.f32 %v19756_v45, %v2229_v49  ;;  %3287 = vmatpush1.msra.mxu0 %v19757_v44  ;;  %v2286_v43 = vsel %vm179_vm8, %v13462_v40, %v2244_v25  ;;  %19758 = vst [vmem:[#allocation119_spill] sm:$0xff] %v13470_v6  ;;  %v19761_v49 = vld [vmem:[#allocation160_spill] sm:$0xff]  ;;  %v19765_v32 = vld [vmem:[#allocation55_spill] sm:$0xff] }
 0x152   :  { %19759 = vst [vmem:[#allocation226_spill] sm:$0xff] %v13473_v52  ;;  %v1423_v34 = vadd.f32 %v1407_v38, %v1171_v17  ;;  %v2044_v3 = vmul.f32 %v19760_v62, %v1983_v33  ;;  %3510 = vmatprep.subr.mxu1 %v19593_v37  ;;  %3290 = vmatprep.subr.mxu0 %v19593_v37  ;;  %v19762_v45 = vld [vmem:[#allocation124_spill] sm:$0xff]  ;;  %v19764_v33 = vld [vmem:[#allocation45_spill] sm:$0xff] }
 0x153   :  { %v2282_v60 = vsel %vm179_vm8, %v2244_v25, %v13470_v6  ;;  %v1950_v47 = vadd.f32 %v1934_v19, %v1785_v57  ;;  %3512 = vmatpush1.msra.mxu1 %v19761_v49  ;;  %v2324_v40 = vmax.f32 %v19762_v45, %v2233_v20  ;;  %v19763_v44 = vld [vmem:[#allocation168_spill] sm:$0xff]  ;;  %v2801_v38 = vsub.f32 %v13414_v42, %v13453_v36  ;;  %v19766_v57 = vld [vmem:[#allocation165_spill] sm:$0xff]  ;;  %v13828_v49 = vld [vmem:[#allocation3 + $0x58] sm:$0xff] }
 0x154   :  { %3293 = vmatpush1.msra.mxu0 %v19763_v44  ;;  %v1424_v17 = vadd.f32 %v1408_v56, %v1172_v53  ;;  %v1660_v46 = vmul.f32 %v19764_v33, %v13356_v26  ;;  %v2045_v28 = vmul.f32 %v19765_v32, %v1984_v48  ;;  %3514 = vmatprep.subr.mxu1 %v19593_v37  ;;  %v2352_v25 = vsel %vm219_vm2, %v2286_v43, -3.4028235e+38  ;;  %v19767_v45 = vld [vmem:[#allocation169_spill] sm:$0xff]  ;;  %v19769_v56 = vld [vmem:[#allocation86_spill] sm:$0xff] }
 0x155   :  { %3296 = vmatprep.subr.mxu0 %v19593_v37  ;;  %v1951_v19 = vadd.f32 %v1935_v16, %v1786_v23  ;;  %3516 = vmatpush1.msra.mxu1 %v19766_v57  ;;  %v2369_v20 = vmax.f32 %v2325_v31, %v2282_v60  ;;  %v2807_v53 = vsub.f32 %v13431_v59, %v13473_v52  ;;  %v19770_v23 = vld [vmem:[#allocation111_spill] sm:$0xff]  ;;  %v19771_v43 = vld [vmem:[#allocation166_spill] sm:$0xff] }
 0x156   :  { %3299 = vmatpush1.msra.mxu0 %v19767_v45  ;;  %v13499_v26 = vmul.f32 %v13383_v14, %v13204_v24  ;;  %v1675_v48 = vadd.f32 %v1659_v21, %v1423_v34  ;;  %v1824_v6 = vmul.f32 %v19769_v56, %v13346_v30  ;;  %3518 = vmatprep.subr.mxu1 %v19593_v37  ;;  %v13508_v31 = vsel %vm1053_vm1, %v19770_v23, 0.0  ;;  %v19772_v45 = vld [vmem:[#allocation171_spill] sm:$0xff]  ;;  %v19774_v34 = vld [vmem:[#allocation46_spill] sm:$0xff] }
 0x157   :  { %3302 = vmatprep.subr.mxu0 %v19593_v37  ;;  %v2060_v16 = vadd.f32 %v2044_v3, %v1950_v47  ;;  %3520 = vmatpush1.msra.mxu1 %v19771_v43  ;;  %v2368_v60 = vmax.f32 %v2324_v40, %v2352_v25  ;;  %v13512_v24 = vand.u32 4294901760, %v2801_v38  ;;  %v13516_v30 = vrot.slane %v13321_v9, %v19738_v1  ;;  %v19775_v47 = vld [vmem:[#allocation91_spill] sm:$0xff]  ;;  %v19776_v25 = vld [vmem:[#allocation170_spill] sm:$0xff] }
 0x158   :  { %19768 = vst [vmem:[#allocation88_spill] sm:$0xff] %v13499_v26  ;;  %3305 = vmatpush1.msra.mxu0 %v19772_v45  ;;  %v1676_v21 = vadd.f32 %v1660_v46, %v1424_v17  ;;  %v1825_v3 = vmul.f32 %v19774_v34, %v13399_v41  ;;  %3522 = vmatprep.subr.mxu1 %v19593_v37  ;;  %v13527_v38 = vand.u32 4294901760, %v2369_v20  ;;  %v19778_v26 = vld [vmem:[#allocation175_spill] sm:$0xff]  ;;  %v13530_v45 = vand.u32 4294901760, %v2807_v53  ;;  %v10928_v41 = vld [vmem:[#allocation3 + $0x50] sm:$0xff] }
 0x159   :  { %19773 = vst [vmem:[#allocation124_spill] sm:$0xff] %v13512_v24  ;;  %3308 = vmatprep.subr.mxu0 %v19593_v37  ;;  %v13524_v23 = vrot.slane %v13379_v58, %v19775_v47  ;;  %v2061_v40 = vadd.f32 %v2045_v28, %v1951_v19  ;;  %3524 = vmatpush1.msra.mxu1 %v19776_v25  ;;  %v1438_v19 = vld [vmem:[#allocation7 + $0x4] ss:$8 sm:$0xf]  ;;  %v13551_v53 = vand.u32 4294901760, %v2368_v60 }
 0x15a   :  { %19777 = vst [vmem:[#allocation45_spill] sm:$0xff] %v13527_v38  ;;  %3311 = vmatpush1.msra.mxu0 %v19778_v26  ;;  %19779 = vst [vmem:[#allocation55_spill] sm:$0xff] %v13530_v45  ;;  %v13532_v46 = vadd.f32 %v1824_v6, %v1675_v48  ;;  %v1014_v17 = vmul.f32 %v10928_v41, %v19706_v2  ;;  %v1108_v44 = vmul.f32 %v19707_v13, %v13508_v31  ;;  %v19783_v2 = vld [vmem:[#allocation172_spill] sm:$0xff]  ;;  %v19817_v43 = vld [vmem:[#allocation179_spill] sm:$0xff] }
 0x15b   :  { %3526 = vmatprep.subr.mxu1 %v19593_v37  ;;  %3314 = vmatprep.subr.mxu0 %v19593_v37  ;;  %v13540_v28 = vadd.f32 %v13516_v30, %v2060_v16  ;;  %v13544_v58 = vmul.f32 %v13524_v23, %v13254_v35  ;;  %v13548_v6 = vrot.slane %v13321_v9, %v19775_v47  ;;  %v13559_v16 = vld [vmem:[#allocation9 + $0x1] ss:$4 sm:$0xf]  ;;  %v19787_v35 = vld [vmem:[#allocation50_spill] sm:$0xff] }
 0x15c   :  { %19780 = vst [vmem:[#allocation86_spill] sm:$0xff] %v13532_v46  ;;  %3528 = vmatpush1.msra.mxu1 %v19783_v2  ;;  %19784 = vst [vmem:[#allocation227_spill] sm:$0xff] %v13551_v53  ;;  %2803 = vmatprep.mubr.f32.mxu0 %v13512_v24  ;;  %v13554_v13 = vadd.f32 %v1825_v3, %v1676_v21  ;;  %v13557_v48 = vrot.slane %v1438_v19, %v19738_v1  ;;  %v19789_v46 = vld [vmem:[#allocation108_spill] sm:$0xff]  ;;  %v19794_v3 = vld [vmem:[#allocation173_spill] sm:$0xff] }
 0x15d   :  { %19781 = vst [vmem:[#allocation111_spill] sm:$0xff] %v13540_v28  ;;  %19782 = vst [vmem:[#allocation46_spill] sm:$0xff] %v13544_v58  ;;  %v19788_v28 = vrot.slane %v19787_v35, 6  ;;  %v19790_v26 = vrot.slane %v19789_v46, 6  ;;  %3530 = vmatprep.subr.mxu1 %v19593_v37  ;;  %v19791_v58 = vld [vmem:[#allocation176_spill] sm:$0xff]  ;;  %v13570_v24 = vadd.f32 %v13548_v6, %v2061_v40  ;;  %v13574_v21 = vrot.slane %v13559_v16, %v19738_v1  ;;  %v19796_v2 = vld [vmem:[#allocation41_spill] sm:$0xff] }
 0x15e   :  { %19785 = vst [vmem:[#allocation228_spill] sm:$0xff] %v13554_v13  ;;  %19786 = vst [vmem:[#allocation229_spill] sm:$0xff] %v13557_v48  ;;  %3317 = vmatpush1.msra.mxu0 %v19791_v58  ;;  %3532 = vmatpush1.msra.mxu1 %v19794_v3  ;;  %v13578_v13 = vsub.f32 %v2369_v20, %v13527_v38  ;;  %v19798_v25 = vld [vmem:[#allocation112_spill] sm:$0xff]  ;;  %v975_v40 = vmul.f32 %v10928_v41, %v19736_v8  ;;  %v19807_v41 = vld [vmem:[#allocation95_spill] sm:$0xff]  ;;  %v19816_v3 = vrot.slane %v19787_v35, 2 }
 0x15f   :  { %v1555_v9 = vsel %vm1540_vm3, %v19790_v26, %v19788_v28  ;;  %19792 = vst [vmem:[#allocation50_spill] sm:$0xff] %v13570_v24  ;;  %19793 = vst [vmem:[#allocation108_spill] sm:$0xff] %v13574_v21  ;;  %2809 = vmatmul.mubr.f32.gmra.mxu0 %v13530_v45  ;;  %v13582_v26 = vrot.slane %v1438_v19, %v19796_v2  ;;  %v1124_v28 = vadd.f32 %v1108_v44, %v1014_v17  ;;  %v19800_v24 = vld [vmem:[#allocation174_spill] sm:$0xff]  ;;  %v19801_v44 = vld [vmem:[#allocation89_spill] sm:$0xff] }
 0x160   :  { %19795 = vst [vmem:[#allocation230_spill] sm:$0xff] %v13578_v13  ;;  %v1360_v58 = vmul.f32 %v19512_v54, %v19798_v25  ;;  %3534 = vmatprep.subr.mxu1 %v19593_v37  ;;  %3320 = vmatprep.subr.mxu0 %v19593_v37  ;;  %v1163_v1 = vmul.f32 %v19737_v61, %v13508_v31  ;;  %v1573_v20 = vsel %vm1557_vm10, %v1555_v9, 0.0  ;;  %v19803_v17 = vld [vmem:[#allocation92_spill] sm:$0xff] }
 0x161   :  { %19797 = vst [vmem:[#allocation231_spill] sm:$0xff] %v13582_v26  ;;  %v13594_v45 = vsub.f32 %v2368_v60, %v13551_v53  ;;  %3536 = vmatpush1.msra.mxu1 %v19800_v24  ;;  %3240 = vmatprep.mubr.f32.mxu1 %v13365_v18  ;;  %v13600_v54 = vmul.f32 %v13557_v48, %v19801_v44  ;;  %v19806_v60 = vld [vmem:[#allocation177_spill] sm:$0xff]  ;;  %v13628_v24 = vand.u32 4294901760, %v13578_v13 }
 0x162   :  { %v13604_v8 = vadd.f32 %v13574_v21, %v19803_v17  ;;  %v13608_v61 = vrot.slane %v13559_v16, %v19796_v2  ;;  %3538 = vmatprep.subr.mxu1 %v19593_v37  ;;  %3323 = vmatpush1.msra.mxu0 %v19806_v60  ;;  %v13614_v9 = vadd.f32 %v13516_v30, %v19807_v41  ;;  %v19809_v18 = vld [vmem:[#allocation93_spill] sm:$0xff]  ;;  %v19812_v17 = vld [vmem:[#allocation178_spill] sm:$0xff] }
 0x163   :  { %19799 = vst [vmem:[#allocation232_spill] sm:$0xff] %v13594_v45  ;;  %19802 = vst [vmem:[#allocation89_spill] sm:$0xff] %v13600_v54  ;;  %v13618_v44 = vmul.f32 %v13582_v26, %v19809_v18  ;;  %v13621_v54 = vrot.slane %v1438_v19, %v19724_v11  ;;  %3540 = vmatpush1.msra.mxu1 %v19812_v17  ;;  %3326 = vmatprep.subr.mxu0 %v19593_v37  ;;  %v19815_v17 = vrot.slane %v19789_v46, 2 }
 0x164   :  { %19804 = vst [vmem:[#allocation92_spill] sm:$0xff] %v13604_v8  ;;  %19805 = vst [vmem:[#allocation233_spill] sm:$0xff] %v13608_v61  ;;  %v13624_v8 = vpop.permute.xlu0 %2204  ;;  %v13632_v41 = vrot.slane %v13559_v16, %v19724_v11  ;;  %v1612_v18 = vmul.f32 %v11623_v10, %v1573_v20  ;;  %3542 = vmatprep.subr.mxu1 %v19593_v37  ;;  %3242 = vmatmul.mubr.f32.gmra.mxu1 %v13388_v50  ;;  %v13648_v10 = vand.u32 4294901760, %v13594_v45 }
 0x165   :  { %19808 = vst [vmem:[#allocation95_spill] sm:$0xff] %v13614_v9  ;;  %19810 = vst [vmem:[#allocation93_spill] sm:$0xff] %v13618_v44  ;;  %v1376_v9 = vadd.f32 %v1360_v58, %v1124_v28  ;;  %v1179_v44 = vadd.f32 %v1163_v1, %v975_v40  ;;  %v1415_v60 = vmul.f32 %v19741_v7, %v19798_v25  ;;  %3544 = vmatpush1.msra.mxu1 %v19817_v43  ;;  %v19818_v58 = vld [vmem:[#allocation180_spill] sm:$0xff]  ;;  %v19820_v28 = vld [vmem:[#allocation99_spill] sm:$0xff] }
 0x166   :  { %19811 = vst [vmem:[#allocation234_spill] sm:$0xff] %v13621_v54  ;;  %19813 = vst [vmem:[#allocation235_spill] sm:$0xff] %v13628_v24  ;;  %v1712_v59 = vsel %vm1705_vm4, %v19816_v3, %v19815_v17  ;;  %3329 = vmatpush1.msra.mxu0 %v19818_v58  ;;  %v13652_v1 = vadd.f32 %v13608_v61, %v19820_v28  ;;  %v19822_v40 = vld [vmem:[#allocation103_spill] sm:$0xff]  ;;  %v19824_v50 = vrot.slane %v19787_v35, 5  ;;  %v19825_v25 = vrot.slane %v19789_v46, 5  ;;  %v13664_v17 = vpop.permute.xlu1 %2212  ;;  %v19827_v58 = vld [vmem:[#allocation104_spill] sm:$0xff] }
 0x167   :  { %19814 = vst [vmem:[#allocation236_spill] sm:$0xff] %v13632_v41  ;;  %19819 = vst [vmem:[#allocation237_spill] sm:$0xff] %v13648_v10  ;;  %v13656_v7 = vmul.f32 %v13621_v54, %v19822_v40  ;;  %3546 = vmatprep.subr.mxu1 %v19593_v37  ;;  %3332 = vmatprep.subr.mxu0 %v19593_v37  ;;  %v19828_v28 = vld [vmem:[#allocation131_spill] sm:$0xff]  ;;  %v13673_v40 = vrot.slane %v1438_v19, %v19775_v47  ;;  %v19832_v43 = vld [vmem:[#allocation181_spill] sm:$0xff] }
 0x168   :  { %19821 = vst [vmem:[#allocation99_spill] sm:$0xff] %v13652_v1  ;;  %v1885_v3 = vsel %vm1870_vm6, %v19825_v25, %v19824_v50  ;;  %19826 = vst [vmem:[#allocation238_spill] sm:$0xff] %v13664_v17  ;;  %v13670_v1 = vadd.f32 %v19828_v28, %v19827_v58  ;;  %3335 = vmatpush1.msra.mxu0 %v19832_v43  ;;  %v2817_v50 = vsub.f32 %v13578_v13, %v13628_v24  ;;  %v13689_v43 = vpop.permute.xlu0 %2196  ;;  %v19888_v24 = vld [vmem:[#allocation53_spill] sm:$0xff]  ;;  %v19905_v61 = vld [vmem:[#allocation102_spill] sm:$0xff] }
 0x169   :  { %19823 = vst [vmem:[#allocation103_spill] sm:$0xff] %v13656_v7  ;;  %19830 = vst [vmem:[#allocation131_spill] sm:$0xff] %v13673_v40  ;;  %v19831_v7 = vld [vmem:[#allocation182_spill] sm:$0xff]  ;;  %v1628_v25 = vadd.f32 %v1612_v18, %v1376_v9  ;;  %v1777_v57 = vmul.f32 %v19746_v55, %v1712_v59  ;;  %v2230_v42 = vsel %vm267_vm13, %v13624_v8, %v13664_v17  ;;  %3248 = vmatprep.mubr.f32.mxu1 %v13527_v38  ;;  %v19834_v9 = vld [vmem:[#allocation183_spill] sm:$0xff] }
 0x16a   :  { %19829 = vst [vmem:[#allocation104_spill] sm:$0xff] %v13670_v1  ;;  %3548 = vmatpush1.msra.mxu1 %v19831_v7  ;;  %v1431_v19 = vadd.f32 %v1415_v60, %v1179_v44  ;;  %v1667_v58 = vmul.f32 %v19750_v0, %v1573_v20  ;;  %v1903_v1 = vsel %vm1887_vm11, %v1885_v3, 0.0  ;;  %19833 = vst [vmem:[#allocation239_spill] sm:$0xff] %v13689_v43  ;;  %3338 = vmatprep.subr.mxu0 %v19593_v37  ;;  %v19835_v18 = vld [vmem:[#allocation107_spill] sm:$0xff]  ;;  %v19838_v0 = vld [vmem:[#allocation109_spill] sm:$0xff] }
 0x16b   :  { %3550 = vmatprep.subr.mxu1 %v19593_v37  ;;  %v2823_v55 = vsub.f32 %v13594_v45, %v13648_v10  ;;  %v13697_v17 = vadd.f32 %v13632_v41, %v19835_v18  ;;  %v13701_v60 = vrot.slane %v13559_v16, %v19775_v47  ;;  %v13705_v20 = vmul.f32 %v13673_v40, %v19838_v0  ;;  %v19840_v44 = vld [vmem:[#allocation110_spill] sm:$0xff]  ;;  %v19843_v38 = vld [vmem:[#allocation145_spill] sm:$0xff] }
 0x16c   :  { %3552 = vmatpush1.msra.mxu1 %v19834_v9  ;;  %v13711_v3 = vadd.f32 %v13325_v12, %v19840_v44  ;;  %v13715_v18 = vmul.f32 %v13383_v14, %v13508_v31  ;;  %v19844_v16 = vld [vmem:[#allocation186_spill] sm:$0xff]  ;;  %v19845_v9 = vld [vmem:[#allocation184_spill] sm:$0xff]  ;;  %v13720_v0 = vand.u32 4294901760, %v2817_v50  ;;  %v1942_v44 = vmul.f32 %v11652_v29, %v1903_v1  ;;  %v2246_v14 = vpop.permute.xlu1 %2245  ;;  %v13745_v1 = vpop.permute.xlu0 %2253  ;;  %v19897_v40 = vld [vmem:[#allocation197_spill] sm:$0xff] }
 0x16d   :  { %19836 = vst [vmem:[#allocation107_spill] sm:$0xff] %v13697_v17  ;;  %19837 = vst [vmem:[#allocation240_spill] sm:$0xff] %v13701_v60  ;;  %3554 = vmatprep.subr.mxu1 %v19593_v37  ;;  %3250 = vmatmul.mubr.f32.gmra.mxu1 %v13551_v53  ;;  %v2329_v17 = vmax.f32 %v19843_v38, %v2230_v42  ;;  %v1793_v53 = vadd.f32 %v1777_v57, %v1628_v25  ;;  %v19850_v50 = vrot.slane %v19789_v46, 3  ;;  %v19853_v25 = vld [vmem:[#allocation187_spill] sm:$0xff]  ;;  %v19858_v46 = vld [vmem:[#allocation188_spill] sm:$0xff] }
 0x16e   :  { %19839 = vst [vmem:[#allocation109_spill] sm:$0xff] %v13705_v20  ;;  %19841 = vst [vmem:[#allocation110_spill] sm:$0xff] %v13711_v3  ;;  %3556 = vmatpush1.msra.mxu1 %v19844_v16  ;;  %3341 = vmatpush1.msra.mxu0 %v19845_v9  ;;  %v19847_v20 = vld [vmem:[#allocation113_spill] sm:$0xff]  ;;  %v19849_v3 = vld [vmem:[#allocation26_spill] sm:$0xff]  ;;  %v13734_v42 = vadd.f32 %v1667_v58, %v1431_v19  ;;  %v13737_v38 = vmul.f32 %v19769_v56, %v1712_v59  ;;  %v19851_v57 = vrot.slane %v19787_v35, 3 }
 0x16f   :  { %19842 = vst [vmem:[#allocation241_spill] sm:$0xff] %v13715_v18  ;;  %19846 = vst [vmem:[#allocation145_spill] sm:$0xff] %v13720_v0  ;;  %v13724_v7 = vadd.f32 %v13701_v60, %v19847_v20  ;;  %v13730_v31 = vsel %vm1053_vm1, %v19849_v3, 0.0  ;;  %3558 = vmatprep.subr.mxu1 %v19593_v37  ;;  %3344 = vmatprep.subr.mxu0 %v19593_v37  ;;  %v19854_v20 = vld [vmem:[#allocation185_spill] sm:$0xff]  ;;  %v13749_v3 = vand.u32 4294901760, %v2823_v55  ;;  %v19856_v19 = vld [vmem:[#allocation115_spill] sm:$0xff] }
 0x170   :  { %v1987_v29 = vsel %vm1980_vm5, %v19851_v57, %v19850_v50  ;;  %19852 = vst [vmem:[#allocation26_spill] sm:$0xff] %v13745_v1  ;;  %3560 = vmatpush1.msra.mxu1 %v19853_v25  ;;  %3347 = vmatpush1.msra.mxu0 %v19854_v20  ;;  %v13753_v58 = vadd.f32 %v13548_v6, %v19856_v19  ;;  %v13764_v35 = vld [vmem:[#allocation3 + $0x48] sm:$0xff]  ;;  %v19860_v55 = vld [vmem:[#allocation51_spill] sm:$0xff]  ;;  %v19862_v18 = vld [vmem:[#allocation122_spill] sm:$0xff]  ;;  %v13810_v16 = vpop.permute.xlu1 %2269 }
 0x171   :  { %19848 = vst [vmem:[#allocation113_spill] sm:$0xff] %v13724_v7  ;;  %19855 = vst [vmem:[#allocation242_spill] sm:$0xff] %v13749_v3  ;;  %v2234_v59 = vsel %vm267_vm13, %v13689_v43, %v13624_v8  ;;  %v2283_v56 = vsel %vm179_vm8, %v2246_v14, %v13745_v1  ;;  %3562 = vmatprep.subr.mxu1 %v19858_v46  ;;  %3350 = vmatprep.subr.mxu0 %v19593_v37  ;;  %v19861_v57 = vld [vmem:[#allocation52_spill] sm:$0xff]  ;;  %v13773_v8 = vsel %vm1053_vm1, %v19862_v18, 0.0  ;;  %v19864_v20 = vld [vmem:[#allocation189_spill] sm:$0xff] }
 0x172   :  { %19857 = vst [vmem:[#allocation115_spill] sm:$0xff] %v13753_v58  ;;  %19859 = vst [vmem:[#allocation243_spill] sm:$0xff] %v13764_v35  ;;  %v1013_v50 = vmul.f32 %v13764_v35, %v19860_v55  ;;  %v1107_v19 = vmul.f32 %v19861_v57, %v13730_v31  ;;  %v2373_v43 = vmax.f32 %v2329_v17, %v2283_v56  ;;  %3564 = vmatpush2.msra.mxu1 %v19593_v37  ;;  %v19863_v58 = vld [vmem:[#allocation47_spill] sm:$0xff]  ;;  %v19865_v57 = vld [vmem:[#allocation137_spill] sm:$0xff] }
 0x173   :  { %2819 = vmatprep.mubr.f32.mxu0 %v13720_v0  ;;  %v13777_v1 = vadd.f32 %v1942_v44, %v1793_v53  ;;  %v13780_v7 = vmul.f32 %v19760_v62, %v1987_v29  ;;  %v974_v55 = vmul.f32 %v13764_v35, %v19863_v58  ;;  %3566 = vmatprep.subr.mxu1 %v19864_v20  ;;  %v19866_v9 = vld [vmem:[#allocation118_spill] sm:$0xff]  ;;  %v19868_v17 = vld [vmem:[#allocation128_spill] sm:$0xff]  ;;  %v19873_v58 = vld [vmem:[#allocation117_spill] sm:$0xff] }
 0x174   :  { %3353 = vmatpush1.msra.mxu0 %v19865_v57  ;;  %v19867_v18 = vld [vmem:[#allocation54_spill] sm:$0xff]  ;;  %v13791_v56 = vsel %vm1053_vm1, %v19868_v17, 0.0  ;;  %v13794_v0 = vand.u32 4294901760, %v2373_v43  ;;  %3568 = vmatpush2.msra.mxu1 %v19593_v37  ;;  %v19871_v62 = vld [vmem:[#allocation116_spill] sm:$0xff]  ;;  %v19874_v57 = vrot.slane %v19873_v58, 6  ;;  %v13804_v20 = vld [vmem:[#allocation3 + $0x40] sm:$0xff]  ;;  %v2287_v13 = vsel %vm179_vm8, %v13810_v16, %v2246_v14 }
 0x175   :  { %v1359_v46 = vmul.f32 %v19867_v18, %v19866_v9  ;;  %v19869_v53 = vld [vmem:[#allocation150_spill] sm:$0xff]  ;;  %2825 = vmatmul.mubr.f32.gmra.mxu0 %v13749_v3  ;;  %v19872_v29 = vrot.slane %v19871_v62, 6  ;;  %v19875_v25 = vld [vmem:[#allocation65_spill] sm:$0xff]  ;;  %19877 = vst [vmem:[#allocation52_spill] sm:$0xff] %v13810_v16  ;;  %3356 = vmatprep.subr.mxu0 %v19593_v37  ;;  %v1123_v3 = vadd.f32 %v1107_v19, %v1013_v50  ;;  %v19885_v14 = vld [vmem:[#allocation100_spill] sm:$0xff]  ;;  %v19932_v54 = vrot.slane %v19871_v62, 3 }
 0x176   :  { %v2328_v44 = vmax.f32 %v19869_v53, %v2234_v59  ;;  %19870 = vst [vmem:[#allocation51_spill] sm:$0xff] %v13794_v0  ;;  %v1012_v17 = vmul.f32 %v13804_v20, %v19875_v25  ;;  %v19876_v59 = vld [vmem:[#allocation66_spill] sm:$0xff]  ;;  %3256 = vmatprep.mubr.f32.mxu1 %v13794_v0  ;;  %v19880_v25 = vld [vmem:[#allocation120_spill] sm:$0xff]  ;;  %v19884_v50 = vld [vmem:[#allocation97_spill] sm:$0xff]  ;;  %v1162_v60 = vmul.f32 %v19888_v24, %v13730_v31  ;;  %v19896_v24 = vrot.slane %v19895_v27, 6 }
 0x177   :  { %v1554_v18 = vsel %vm1540_vm3, %v19874_v57, %v19872_v29  ;;  %v1106_v53 = vmul.f32 %v19876_v59, %v13773_v8  ;;  %v19878_v45 = vld [vmem:[#allocation190_spill] sm:$0xff]  ;;  %v13818_v57 = vsub.f32 %v2373_v43, %v13794_v0  ;;  %v19881_v29 = vrot.slane %v19880_v25, 6  ;;  %v19882_v59 = vld [vmem:[#allocation121_spill] sm:$0xff]  ;;  %v19886_v16 = vld [vmem:[#allocation192_spill] sm:$0xff] }
 0x178   :  { %3570 = vmatprep.subr.mxu1 %v19878_v45  ;;  %v19883_v10 = vrot.slane %v19882_v59, 6  ;;  %v1015_v19 = vmul.f32 %v13828_v49, %v19884_v50  ;;  %v1109_v43 = vmul.f32 %v19885_v14, %v13791_v56  ;;  %v2356_v0 = vsel %vm219_vm2, %v2287_v13, -3.4028235e+38  ;;  %v19887_v35 = vld [vmem:[#allocation139_spill] sm:$0xff]  ;;  %v19904_v47 = vld [vmem:[#allocation133_spill] sm:$0xff] }
 0x179   :  { %19879 = vst [vmem:[#allocation122_spill] sm:$0xff] %v13818_v57  ;;  %3572 = vmatpush2.msra.mxu1 %v19593_v37  ;;  %3359 = vmatpush1.msra.mxu0 %v19887_v35  ;;  %v19889_v50 = vld [vmem:[#allocation191_spill] sm:$0xff]  ;;  %v13847_v14 = vand.u32 4294901760, %v13818_v57  ;;  %v1122_v13 = vadd.f32 %v1106_v53, %v1012_v17  ;;  %v19893_v35 = vld [vmem:[#allocation125_spill] sm:$0xff]  ;;  %v19899_v17 = vrot.slane %v19873_v58, 2  ;;  %v19900_v53 = vrot.slane %v19871_v62, 2 }
 0x17a   :  { %v1553_v45 = vsel %vm1540_vm3, %v19883_v10, %v19881_v29  ;;  %3574 = vmatprep.subr.mxu1 %v19886_v16  ;;  %v13842_v10 = vsel %vm1557_vm10, %v1554_v18, 0.0  ;;  %v2372_v29 = vmax.f32 %v2328_v44, %v2356_v0  ;;  %3362 = vmatprep.subr.mxu0 %v19889_v50  ;;  %v19892_v16 = vld [vmem:[#allocation68_spill] sm:$0xff]  ;;  %v19894_v2 = vrot.slane %v19893_v35, 6 }
 0x17b   :  { %3576 = vmatpush2.msra.mxu1 %v19593_v37  ;;  %19890 = vst [vmem:[#allocation47_spill] sm:$0xff] %v13847_v14  ;;  %v1358_v52 = vmul.f32 %v19892_v16, %v19891_v63  ;;  %3365 = vmatpush2.msra.mxu0 %v19593_v37  ;;  %v19898_v0 = vld [vmem:[#allocation56_spill] sm:$0xff]  ;;  %v13869_v16 = vsel %vm1705_vm4, %v19900_v53, %v19899_v17  ;;  %v13873_v50 = vsel %vm1557_vm10, %v1553_v45, 0.0  ;;  %v19906_v17 = vld [vmem:[#allocation198_spill] sm:$0xff]  ;;  %v19920_v21 = vrot.slane %v19880_v25, 5 }
 0x17c   :  { %v1556_v18 = vsel %vm1540_vm3, %v19896_v24, %v19894_v2  ;;  %3578 = vmatprep.subr.mxu1 %v19897_v40  ;;  %v13861_v44 = vmul.f32 %v19898_v0, %v19866_v9  ;;  %v13875_v2 = vand.u32 4294901760, %v2372_v29  ;;  %v19902_v24 = vld [vmem:[#allocation193_spill] sm:$0xff]  ;;  %v1375_v0 = vadd.f32 %v1359_v46, %v1123_v3  ;;  %v19908_v3 = vld [vmem:[#allocation60_spill] sm:$0xff] }
 0x17d   :  { %3580 = vmatpush2.msra.mxu1 %v19593_v37  ;;  %3368 = vmatprep.subr.mxu0 %v19902_v24  ;;  %v19903_v40 = vld [vmem:[#allocation57_spill] sm:$0xff]  ;;  %v1125_v36 = vadd.f32 %v1109_v43, %v1015_v19  ;;  %v1361_v41 = vmul.f32 %v19905_v61, %v19904_v47  ;;  %v1178_v53 = vadd.f32 %v1162_v60, %v974_v55  ;;  %v13886_v45 = vsel %vm1557_vm10, %v1556_v18, 0.0  ;;  %v19909_v60 = vld [vmem:[#allocation70_spill] sm:$0xff] }
 0x17e   :  { %19901 = vst [vmem:[#allocation54_spill] sm:$0xff] %v13875_v2  ;;  %v1611_v9 = vmul.f32 %v19903_v40, %v13842_v10  ;;  %3582 = vmatprep.subr.mxu1 %v19906_v17  ;;  %v13889_v26 = vsub.f32 %v2372_v29, %v13875_v2  ;;  %3258 = vmatmul.mubr.f32.gmra.mxu1 %v13875_v2  ;;  %v19910_v19 = vld [vmem:[#allocation33_spill] sm:$0xff]  ;;  %v19911_v43 = vrot.slane %v19871_v62, 5  ;;  %v19912_v29 = vrot.slane %v19873_v58, 5  ;;  %v19913_v2 = vld [vmem:[#allocation64_spill] sm:$0xff] }
 0x17f   :  { %3371 = vmatpush2.msra.mxu0 %v19593_v37  ;;  %v2833_v40 = vsub.f32 %v13818_v57, %v13847_v14  ;;  %v1776_v61 = vmul.f32 %v19908_v3, %v13869_v16  ;;  %v1374_v46 = vadd.f32 %v1358_v52, %v1122_v13  ;;  %v1610_v55 = vmul.f32 %v19909_v60, %v13873_v50  ;;  %v19916_v60 = vld [vmem:[#allocation194_spill] sm:$0xff]  ;;  %v19918_v57 = vld [vmem:[#allocation67_spill] sm:$0xff] }
 0x180   :  { %19907 = vst [vmem:[#allocation128_spill] sm:$0xff] %v13889_v26  ;;  %3628 = vmatprep.mubr.f32.mxu1 %v19910_v19  ;;  %3584 = vmatpush2.msra.mxu1 %v19593_v37  ;;  %v1884_v18 = vsel %vm1870_vm6, %v19912_v29, %v19911_v43  ;;  %v973_v17 = vmul.f32 %v13804_v20, %v19913_v2  ;;  %v19914_v3 = vrot.slane %v19882_v59, 2  ;;  %v19915_v52 = vrot.slane %v19880_v25, 2  ;;  %v19917_v19 = vld [vmem:[#allocation132_spill] sm:$0xff] }
 0x181   :  { %3374 = vmatprep.subr.mxu0 %v19916_v60  ;;  %3586 = vmatprep.subr.mxu1 %v19917_v19  ;;  %v1627_v24 = vadd.f32 %v1611_v9, %v1375_v0  ;;  %v1161_v14 = vmul.f32 %v19918_v57, %v13773_v8  ;;  %v1377_v43 = vadd.f32 %v1361_v41, %v1125_v36  ;;  %v19919_v29 = vld [vmem:[#allocation44_spill] sm:$0xff]  ;;  %v19921_v48 = vrot.slane %v19882_v59, 5 }
 0x182   :  { %v13915_v13 = vsel %vm1705_vm4, %v19915_v52, %v19914_v3  ;;  %v1613_v2 = vmul.f32 %v19919_v29, %v13886_v45  ;;  %3377 = vmatpush2.msra.mxu0 %v19593_v37  ;;  %v19922_v52 = vrot.slane %v19895_v27, 2  ;;  %v19923_v9 = vrot.slane %v19893_v35, 2  ;;  %3588 = vmatpush2.msra.mxu1 %v19593_v37  ;;  %v19926_v0 = vld [vmem:[#allocation196_spill] sm:$0xff]  ;;  %v19927_v29 = vld [vmem:[#allocation73_spill] sm:$0xff] }
 0x183   :  { %v1883_v3 = vsel %vm1870_vm6, %v19921_v48, %v19920_v21  ;;  %v13938_v36 = vand.u32 4294901760, %v2833_v40  ;;  %v13941_v41 = vand.u32 4294901760, %v13889_v26  ;;  %3380 = vmatprep.subr.mxu0 %v19926_v0  ;;  %v1902_v48 = vsel %vm1887_vm11, %v1884_v18, 0.0 }
 0x184   :  { %v13936_v57 = vsel %vm1705_vm4, %v19923_v9, %v19922_v52  ;;  %v1626_v21 = vadd.f32 %v1610_v55, %v1374_v46  ;;  %v1775_v19 = vmul.f32 %v19927_v29, %v13915_v13  ;;  %v19928_v60 = vrot.slane %v19893_v35, 5  ;;  %v19930_v9 = vld [vmem:[#allocation201_spill] sm:$0xff]  ;;  %3383 = vmatpush2.msra.mxu0 %v19593_v37 }
 0x185   :  { %19924 = vst [vmem:[#allocation150_spill] sm:$0xff] %v13938_v36  ;;  %19925 = vst [vmem:[#allocation116_spill] sm:$0xff] %v13941_v41  ;;  %v19929_v52 = vrot.slane %v19895_v27, 5  ;;  %3590 = vmatprep.subr.mxu1 %v19930_v9  ;;  %v19931_v0 = vrot.slane %v19873_v58, 3  ;;  %v976_v55 = vmul.f32 %v13828_v49, %v19552_v15  ;;  %v1164_v18 = vmul.f32 %v19555_v51, %v13791_v56 }
 0x186   :  { %2835 = vmatprep.mubr.f32.mxu0 %v13938_v36  ;;  %v1792_v29 = vadd.f32 %v1776_v61, %v1627_v24  ;;  %v1901_v58 = vsel %vm1887_vm11, %v1883_v3, 0.0  ;;  %v1778_v62 = vmul.f32 %v11934_v4, %v13936_v57  ;;  %3592 = vmatpush2.msra.mxu1 %v19593_v37  ;;  %v19936_v24 = vld [vmem:[#allocation199_spill] sm:$0xff]  ;;  %v19937_v61 = vld [vmem:[#allocation205_spill] sm:$0xff]  ;;  %v19938_v4 = vrot.slane %v19882_v59, 3 }
 0x187   :  { %v1886_v40 = vsel %vm1870_vm6, %v19929_v52, %v19928_v60  ;;  %v1986_v46 = vsel %vm1980_vm5, %v19932_v54, %v19931_v0  ;;  %v2839_v60 = vsub.f32 %v13889_v26, %v13941_v41  ;;  %v1629_v52 = vadd.f32 %v1613_v2, %v1377_v43  ;;  %v19933_v54 = vld [vmem:[#allocation62_spill] sm:$0xff]  ;;  %v19934_v0 = vld [vmem:[#allocation69_spill] sm:$0xff]  ;;  %3386 = vmatprep.subr.mxu0 %v19936_v24 }
 0x188   :  { %v1941_v15 = vmul.f32 %v19933_v54, %v1902_v48  ;;  %v1413_v51 = vmul.f32 %v19934_v0, %v19891_v63  ;;  %v1904_v36 = vsel %vm1887_vm11, %v1886_v40, 0.0  ;;  %3594 = vmatprep.subr.mxu1 %v19937_v61  ;;  %v1177_v43 = vadd.f32 %v1161_v14, %v973_v17  ;;  %3389 = vmatpush2.msra.mxu0 %v19593_v37  ;;  %v19940_v40 = vld [vmem:[#allocation75_spill] sm:$0xff]  ;;  %v19941_v14 = vld [vmem:[#allocation200_spill] sm:$0xff]  ;;  %v20027_v61 = vld [vmem:[#allocation165_spill] sm:$0xff] }
 0x189   :  { %v13980_v9 = vand.u32 4294901760, %v2839_v60  ;;  %v1791_v2 = vadd.f32 %v1775_v19, %v1626_v21  ;;  %v19939_v3 = vrot.slane %v19880_v25, 3  ;;  %3596 = vmatpush2.msra.mxu1 %v19593_v37  ;;  %v1940_v60 = vmul.f32 %v19940_v40, %v1901_v58  ;;  %3392 = vmatprep.subr.mxu0 %v19941_v14  ;;  %v19942_v25 = vld [vmem:[#allocation58_spill] sm:$0xff]  ;;  %v19944_v58 = vld [vmem:[#allocation63_spill] sm:$0xff] }
 0x18a   :  { %v1180_v54 = vadd.f32 %v1164_v18, %v976_v55  ;;  %v1416_v0 = vmul.f32 %v19575_v22, %v19904_v47  ;;  %v1430_v59 = vadd.f32 %v13861_v44, %v1178_v53  ;;  %v1666_v17 = vmul.f32 %v19942_v25, %v13842_v10  ;;  %3395 = vmatpush2.msra.mxu0 %v19593_v37  ;;  %v14011_v10 = vld [vmem:[#allocation7 + $0x3] ss:$8 sm:$0xf] }
 0x18b   :  { %19935 = vst [vmem:[#allocation117_spill] sm:$0xff] %v13980_v9  ;;  %v1985_v48 = vsel %vm1980_vm5, %v19939_v3, %v19938_v4  ;;  %2841 = vmatmul.mubr.f32.gmra.mxu0 %v13980_v9  ;;  %v1794_v19 = vadd.f32 %v1778_v62, %v1629_v52  ;;  %v1943_v21 = vmul.f32 %v19577_v39, %v1904_v36  ;;  %v19943_v4 = vld [vmem:[#allocation218_spill] sm:$0xff]  ;;  %v19945_v18 = vrot.slane %v19895_v27, 3  ;;  %v19948_v39 = vld [vmem:[#allocation72_spill] sm:$0xff]  ;;  %v19950_v27 = vld [vmem:[#allocation203_spill] sm:$0xff] }
 0x18c   :  { %3458 = vmatprep.mubr.f32.mxu0 %v19943_v4  ;;  %v1957_v3 = vadd.f32 %v1941_v15, %v1792_v29  ;;  %v2051_v55 = vmul.f32 %v19944_v58, %v1986_v46  ;;  %v19946_v22 = vrot.slane %v19893_v35, 3  ;;  %v19947_v9 = vld [vmem:[#allocation206_spill] sm:$0xff]  ;;  %v1429_v44 = vadd.f32 %v1413_v51, %v1177_v43  ;;  %v19949_v36 = vld [vmem:[#allocation76_spill] sm:$0xff]  ;;  %3398 = vmatprep.subr.mxu0 %v19950_v27  ;;  %v20011_v27 = vld [vmem:[#allocation167_spill] sm:$0xff] }
 0x18d   :  { %3598 = vmatprep.subr.mxu1 %v19947_v9  ;;  %v1665_v53 = vmul.f32 %v19948_v39, %v13873_v50  ;;  %v2050_v29 = vmul.f32 %v19949_v36, %v1985_v48  ;;  %v1956_v35 = vadd.f32 %v1940_v60, %v1791_v2  ;;  %v1432_v46 = vadd.f32 %v1416_v0, %v1180_v54  ;;  %v19951_v62 = vld [vmem:[#allocation208_spill] sm:$0xff]  ;;  %v19954_v60 = vld [vmem:[#allocation29_spill] sm:$0xff]  ;;  %v19955_v0 = vld [vmem:[#allocation74_spill] sm:$0xff] }
 0x18e   :  { %v1988_v40 = vsel %vm1980_vm5, %v19946_v22, %v19945_v18  ;;  %3600 = vmatpush2.msra.mxu1 %v19593_v37  ;;  %v1668_v52 = vmul.f32 %v19764_v33, %v13886_v45  ;;  %3401 = vmatpush2.msra.mxu0 %v19593_v37  ;;  %v1959_v15 = vadd.f32 %v1943_v21, %v1794_v19  ;;  %v19952_v50 = vld [vmem:[#allocation204_spill] sm:$0xff]  ;;  %v19953_v33 = vld [vmem:[#allocation61_spill] sm:$0xff]  ;;  %v19956_v19 = vld [vmem:[#allocation207_spill] sm:$0xff] }
 0x18f   :  { %3602 = vmatprep.subr.mxu1 %v19951_v62  ;;  %v2053_v51 = vmul.f32 %v19765_v32, %v1988_v40  ;;  %3404 = vmatprep.subr.mxu0 %v19952_v50  ;;  %v14027_v43 = vrot.slane %v14011_v10, %v19724_v11  ;;  %v2068_v2 = vadd.f32 %v13780_v7, %v13777_v1  ;;  %v19957_v1 = vld [vmem:[#allocation212_spill] sm:$0xff]  ;;  %v19967_v39 = vld [vmem:[#allocation217_spill] sm:$0xff]  ;;  %v19988_v4 = vld [vmem:[#allocation34_spill] sm:$0xff] }
 0x190   :  { %3604 = vmatpush2.msra.mxu1 %v19593_v37  ;;  %v1682_v48 = vadd.f32 %v1666_v17, %v1430_v59  ;;  %v1831_v45 = vmul.f32 %v19953_v33, %v13869_v16  ;;  %3407 = vmatpush2.msra.mxu0 %v19593_v37  ;;  %v2067_v32 = vadd.f32 %v2051_v55, %v1957_v3  ;;  %v19958_v16 = vld [vmem:[#allocation136_spill] sm:$0xff]  ;;  %v20021_v9 = vld [vmem:[#allocation154_spill] sm:$0xff] }
 0x191   :  { %3606 = vmatprep.subr.mxu1 %v19954_v60  ;;  %v1681_v54 = vadd.f32 %v1665_v53, %v1429_v44  ;;  %v1830_v25 = vmul.f32 %v19955_v0, %v13915_v13  ;;  %3410 = vmatprep.subr.mxu0 %v19956_v19  ;;  %v2066_v21 = vadd.f32 %v2050_v29, %v1956_v35  ;;  %v19959_v13 = vld [vmem:[#allocation32_spill] sm:$0xff]  ;;  %v19969_v35 = vld [vmem:[#allocation138_spill] sm:$0xff]  ;;  %v20008_v60 = vld [vmem:[#allocation161_spill] sm:$0xff] }
 0x192   :  { %3608 = vmatpush2.msra.mxu1 %v19593_v37  ;;  %v1684_v58 = vadd.f32 %v1668_v52, %v1432_v46  ;;  %v1833_v7 = vmul.f32 %v19774_v34, %v13936_v57  ;;  %3413 = vmatpush2.msra.mxu0 %v19593_v37  ;;  %v1216_v59 = vmul.f32 %v19958_v16, %v13773_v8  ;;  %v19962_v57 = vld [vmem:[#allocation127_spill] sm:$0xff]  ;;  %v19975_v33 = vld [vmem:[#allocation108_spill] sm:$0xff] }
 0x193   :  { %3610 = vmatprep.subr.mxu1 %v19957_v1  ;;  %v2069_v17 = vadd.f32 %v2053_v51, %v1959_v15  ;;  %3416 = vmatprep.subr.mxu0 %v19959_v13  ;;  %v934_v3 = vmul.f32 %v13804_v20, %v14027_v43  ;;  %v14051_v55 = vadd.f32 %v13737_v38, %v13734_v42  ;;  %v19963_v8 = vld [vmem:[#allocation215_spill] sm:$0xff]  ;;  %v19971_v15 = vld [vmem:[#allocation144_spill] sm:$0xff]  ;;  %v19972_v51 = vld [vmem:[#allocation229_spill] sm:$0xff] }
 0x194   :  { %3612 = vmatpush2.msra.mxu1 %v19593_v37  ;;  %v14054_v34 = vadd.f32 %v13516_v30, %v2068_v2  ;;  %v14058_v18 = vmul.f32 %v19962_v57, %v13730_v31  ;;  %3419 = vmatpush2.msra.mxu0 %v19593_v37  ;;  %v14062_v22 = vadd.f32 %v1831_v45, %v1682_v48  ;;  %v19965_v42 = vld [vmem:[#allocation211_spill] sm:$0xff]  ;;  %v19974_v48 = vld [vmem:[#allocation146_spill] sm:$0xff]  ;;  %v20009_v50 = vld [vmem:[#allocation240_spill] sm:$0xff] }
 0x195   :  { %19960 = vst [vmem:[#allocation65_spill] sm:$0xff] %v14051_v55  ;;  %3614 = vmatprep.subr.mxu1 %v19963_v8  ;;  %v14065_v40 = vadd.f32 %v19828_v28, %v2067_v32  ;;  %v1846_v20 = vadd.f32 %v1830_v25, %v1681_v54  ;;  %3422 = vmatprep.subr.mxu0 %v19965_v42  ;;  %v14080_v53 = vld [vmem:[#allocation10 + $0x40] ss:$8 sm:$0xf] }
 0x196   :  { %19961 = vst [vmem:[#allocation66_spill] sm:$0xff] %v14054_v34  ;;  %3616 = vmatpush2.msra.mxu1 %v19593_v37  ;;  %v14070_v38 = vadd.f32 %v13325_v12, %v2066_v21  ;;  %v14074_v31 = vmul.f32 %v13524_v23, %v13791_v56  ;;  %v14076_v44 = vadd.f32 %v1833_v7, %v1684_v58  ;;  %v14082_v36 = vld [vmem:[#allocation10 + $0x21] ss:$8 sm:$0xf] }
 0x197   :  { %19964 = vst [vmem:[#allocation120_spill] sm:$0xff] %v14065_v40  ;;  %3618 = vmatprep.subr.mxu1 %v19967_v39  ;;  %3425 = vmatpush2.msra.mxu0 %v19593_v37  ;;  %v14085_v29 = vadd.f32 %v13548_v6, %v2069_v17  ;;  %v1232_v46 = vadd.f32 %v1216_v59, %v934_v3  ;;  %v19970_v56 = vld [vmem:[#allocation234_spill] sm:$0xff]  ;;  %v19977_v32 = vld [vmem:[#allocation147_spill] sm:$0xff]  ;;  %v19979_v25 = vld [vmem:[#allocation220_spill] sm:$0xff] }
 0x198   :  { %19966 = vst [vmem:[#allocation121_spill] sm:$0xff] %v14070_v38  ;;  %3620 = vmatpush2.msra.mxu1 %v19593_v37  ;;  %3428 = vmatprep.subr.mxu0 %v19969_v35  ;;  %v1468_v52 = vmul.f32 %v19970_v56, %v19891_v63  ;;  %v14093_v2 = vmul.f32 %v19972_v51, %v19971_v15  ;;  %v19978_v54 = vld [vmem:[#allocation231_spill] sm:$0xff]  ;;  %v19980_v63 = vld [vmem:[#allocation214_spill] sm:$0xff]  ;;  %v19981_v58 = vld [vmem:[#allocation236_spill] sm:$0xff] }
 0x199   :  { %19968 = vst [vmem:[#allocation97_spill] sm:$0xff] %v14085_v29  ;;  %v14097_v45 = vadd.f32 %v19975_v33, %v19974_v48  ;;  %v14101_v0 = vmul.f32 %v19978_v54, %v19977_v32  ;;  %3622 = vmatprep.subr.mxu1 %v19979_v25  ;;  %3431 = vmatpush2.msra.mxu0 %v19593_v37  ;;  %v14105_v21 = vld [vmem:[#allocation9] ss:$4 sm:$0xf]  ;;  %v19986_v32 = vld [vmem:[#allocation233_spill] sm:$0xff] }
 0x19a   :  { %19973 = vst [vmem:[#allocation100_spill] sm:$0xff] %v14093_v2  ;;  %3624 = vmatpush2.msra.mxu1 %v19593_v37  ;;  %3434 = vmatprep.subr.mxu0 %v19980_v63  ;;  %v14110_v7 = vadd.f32 %v19981_v58, %v1846_v20  ;;  %v14114_v59 = vrot.slane %v14080_v53, %v19724_v11  ;;  %v19983_v3 = vld [vmem:[#allocation148_spill] sm:$0xff]  ;;  %v19985_v48 = vld [vmem:[#allocation151_spill] sm:$0xff]  ;;  %v19992_v39 = vld [vmem:[#allocation153_spill] sm:$0xff] }
 0x19b   :  { %19976 = vst [vmem:[#allocation53_spill] sm:$0xff] %v14097_v45  ;;  %v14118_v17 = vrot.slane %v14082_v36, %v19724_v11  ;;  %v14122_v15 = vadd.f32 %v13516_v30, %v19983_v3  ;;  %v14126_v5 = vadd.f32 %v19986_v32, %v19985_v48  ;;  %3632 = vmatmul.mubr.f32.vlgmr.msra.gmra.mxu1 %v19988_v4  ;;  %v19989_v20 = vld [vmem:[#allocation91_spill] sm:$0xff]  ;;  %v19990_v25 = vld [vmem:[#allocation152_spill] sm:$0xff] }
 0x19c   :  { %19982 = vst [vmem:[#allocation123_spill] sm:$0xff] %v14110_v7  ;;  %3964 = vmatprep.subr.mxu1 %v19593_v37  ;;  %v14132_v63 = vrot.slane %v14011_v10, %v19989_v20  ;;  %v14136_v35 = vmul.f32 %v19970_v56, %v19990_v25  ;;  %3437 = vmatpush2.msra.mxu0 %v19593_v37  ;;  %v19991_v30 = vld [vmem:[#allocation84_spill] sm:$0xff]  ;;  %v19996_v25 = vld [vmem:[#allocation155_spill] sm:$0xff] }
 0x19d   :  { %19984 = vst [vmem:[#allocation68_spill] sm:$0xff] %v14122_v15  ;;  %19987 = vst [vmem:[#allocation125_spill] sm:$0xff] %v14126_v5  ;;  %3640 = vmatprep.mubr.f32.mxu1 %v19991_v30  ;;  %v1484_v3 = vadd.f32 %v1468_v52, %v1232_v46  ;;  %v14142_v48 = vrot.slane %v14105_v21, %v19724_v11  ;;  %v14144_v4 = vld [vmem:[#allocation10 + $0x2] ss:$8 sm:$0xf]  ;;  %v14148_v42 = vadd.f32 %v19828_v28, %v19992_v39 }
 0x19e   :  { %v19994_v8 = vld [vmem:[#allocation96_spill] sm:$0xff]  ;;  %v19997_v1 = vld [vmem:[#allocation131_spill] sm:$0xff]  ;;  %v8730_v28 = vmul.f32 %v14114_v59, %v14070_v38  ;;  %v8769_v39 = vmul.f32 %v14118_v17, %v14110_v7  ;;  %v14178_v15 = vrot.slane %v14144_v4, %v19724_v11  ;;  %v937_v38 = vmul.f32 %v13828_v49, %v14132_v63  ;;  %v20005_v7 = vld [vmem:[#allocation226_spill] sm:$0xff] }
 0x19f   :  { %19993 = vst [vmem:[#allocation126_spill] sm:$0xff] %v14148_v42  ;;  %v14152_v13 = vadd.f32 %v19981_v58, %v19994_v8  ;;  %v14156_v19 = vmul.f32 %v19997_v1, %v19996_v25  ;;  %v19998_v30 = vld [vmem:[#allocation43_spill] sm:$0xff]  ;;  %v19999_v46 = vld [vmem:[#allocation216_spill] sm:$0xff]  ;;  %v20000_v8 = vld [vmem:[#allocation41_spill] sm:$0xff]  ;;  %3644 = vmatmul.mubr.f32.gmra.mxu1 %v20005_v7  ;;  %v14185_v2 = vadd.f32 %v14142_v48, %v1484_v3 }
 0x1a0   :  { %3966 = vmatpush1.msra.mxu1 %v19998_v30  ;;  %3440 = vmatprep.subr.mxu0 %v19999_v46  ;;  %v14168_v52 = vrot.slane %v14011_v10, %v20000_v8  ;;  %v20001_v25 = vld [vmem:[#allocation157_spill] sm:$0xff]  ;;  %v20004_v46 = vld [vmem:[#allocation219_spill] sm:$0xff]  ;;  %v14192_v62 = vadd.f32 %v20009_v50, %v20008_v60  ;;  %v14196_v49 = vadd.f32 %v13548_v6, %v20011_v27  ;;  %v20015_v11 = vld [vmem:[#allocation222_spill] sm:$0xff] }
 0x1a1   :  { %19995 = vst [vmem:[#allocation56_spill] sm:$0xff] %v14152_v13  ;;  %3968 = vmatprep.subr.mxu1 %v19593_v37  ;;  %3443 = vmatpush2.msra.mxu0 %v19593_v37  ;;  %v14172_v45 = vadd.f32 %v13325_v12, %v20001_v25  ;;  %v20003_v30 = vld [vmem:[#allocation49_spill] sm:$0xff]  ;;  %20006 = vst [vmem:[#allocation133_spill] sm:$0xff] %v14185_v2  ;;  %v10932_v12 = vld [vmem:[#allocation3 + $0x60] sm:$0xff]  ;;  %v14202_v3 = vrot.slane %v14080_v53, %v19989_v20 }
 0x1a2   :  { %3970 = vmatpush1.msra.mxu1 %v20003_v30  ;;  %3446 = vmatprep.subr.mxu0 %v20004_v46  ;;  %v938_v25 = vmul.f32 %v10932_v12, %v14027_v43  ;;  %v20007_v30 = vld [vmem:[#allocation149_spill] sm:$0xff]  ;;  %20010 = vst [vmem:[#allocation102_spill] sm:$0xff] %v14192_v62  ;;  %20012 = vst [vmem:[#allocation60_spill] sm:$0xff] %v14196_v49  ;;  %v20013_v7 = vld [vmem:[#allocation235_spill] sm:$0xff]  ;;  %v1471_v60 = vmul.f32 %v19997_v1, %v19904_v47 }
 0x1a3   :  { %20002 = vst [vmem:[#allocation57_spill] sm:$0xff] %v14172_v45  ;;  %3972 = vmatprep.subr.mxu1 %v19593_v37  ;;  %v1220_v46 = vmul.f32 %v19958_v16, %v20007_v30  ;;  %3449 = vmatpush2.msra.mxu0 %v19593_v37  ;;  %v20014_v12 = vld [vmem:[#allocation158_spill] sm:$0xff]  ;;  %v8785_v30 = vadd.f32 %v8769_v39, %v8730_v28  ;;  %v20016_v34 = vld [vmem:[#allocation243_spill] sm:$0xff]  ;;  %v20018_v28 = vld [vmem:[#allocation160_spill] sm:$0xff] }
 0x1a4   :  { %3652 = vmatprep.mubr.f32.mxu1 %v20013_v7  ;;  %3974 = vmatpush1.msra.mxu1 %v20014_v12  ;;  %v935_v6 = vmul.f32 %v20016_v34, %v14168_v52  ;;  %v1235_v27 = vadd.f32 %v14074_v31, %v937_v38  ;;  %v14215_v7 = vadd.f32 %v20009_v50, %v14076_v44  ;;  %v20019_v47 = vld [vmem:[#allocation35_spill] sm:$0xff]  ;;  %v20020_v31 = vld [vmem:[#allocation237_spill] sm:$0xff] }
 0x1a5   :  { %3452 = vmatprep.subr.mxu0 %v20015_v11  ;;  %3976 = vmatprep.subr.mxu1 %v19593_v37  ;;  %v14219_v12 = vrot.slane %v14082_v36, %v19989_v20  ;;  %v8824_v34 = vmul.f32 %v14178_v15, %v14185_v2  ;;  %v14227_v39 = vrot.slane %v14105_v21, %v19989_v20  ;;  %v10933_v11 = vld [vmem:[#allocation3 + $0x78] sm:$0xff]  ;;  %v20022_v2 = vld [vmem:[#allocation83_spill] sm:$0xff] }
 0x1a6   :  { %3455 = vmatpush2.msra.mxu0 %v19593_v37  ;;  %20017 = vst [vmem:[#allocation70_spill] sm:$0xff] %v14215_v7  ;;  %3978 = vmatpush1.msra.mxu1 %v20018_v28  ;;  %v1236_v38 = vadd.f32 %v1220_v46, %v938_v25  ;;  %v8733_v44 = vmul.f32 %v14202_v3, %v14085_v29  ;;  %v20024_v29 = vld [vmem:[#allocation47_spill] sm:$0xff] }
 0x1a7   :  { %3461 = vmatmul.mubr.f32.vlgmr.msra.gmra.mxu0 %v20019_v47  ;;  %3656 = vmatmul.mubr.f32.gmra.mxu1 %v20020_v31  ;;  %v941_v28 = vmul.f32 %v10933_v11, %v14132_v63  ;;  %v1223_v47 = vmul.f32 %v13524_v23, %v20021_v9  ;;  %v14240_v46 = vrot.slane %v14144_v4, %v19989_v20  ;;  %v20023_v31 = vld [vmem:[#allocation118_spill] sm:$0xff]  ;;  %v20025_v33 = vld [vmem:[#allocation159_spill] sm:$0xff] }
 0x1a8   :  { %3677 = vmatprep.subr.mxu0 %v19593_v37  ;;  %3980 = vmatprep.subr.mxu1 %v19593_v37  ;;  %v1233_v25 = vadd.f32 %v14058_v18, %v935_v6  ;;  %v1469_v14 = vmul.f32 %v19978_v54, %v20023_v31  ;;  %v20026_v11 = vand.u32 4294901760, %v20025_v33  ;;  %v1487_v55 = vadd.f32 %v1471_v60, %v1235_v27  ;;  %v20028_v60 = vld [vmem:[#allocation162_spill] sm:$0xff] }
 0x1a9   :  { %3468 = vmatprep.mubr.f32.mxu0 %v20022_v2  ;;  %3664 = vmatprep.mubr.f32.mxu1 %v20024_v29  ;;  %v8772_v9 = vmul.f32 %v14219_v12, %v14215_v7  ;;  %v8734_v2 = vmul.f32 %v14114_v59, %v14172_v45  ;;  %v1488_v18 = vadd.f32 %v14136_v35, %v1236_v38  ;;  %v20029_v27 = vand.u32 4294901760, %v20028_v60  ;;  %v20031_v38 = vld [vmem:[#allocation166_spill] sm:$0xff]  ;;  %v20032_v29 = vld [vmem:[#allocation224_spill] sm:$0xff] }
 0x1aa   :  { %3681 = vmatpush1.msra.mxu0 %v20026_v11  ;;  %3982 = vmatpush1.msra.mxu1 %v20027_v61  ;;  %v8773_v6 = vmul.f32 %v14118_v17, %v14152_v13  ;;  %v14259_v33 = vrot.slane %v14105_v21, %v20000_v8  ;;  %v14266_v31 = vadd.f32 %v19986_v32, %v14062_v22  ;;  %v10934_v11 = vld [vmem:[#allocation3] sm:$0xff]  ;;  %v10936_v13 = vld [vmem:[#allocation3 + $0x18] sm:$0xff] }
 0x1ab   :  { %3685 = vmatprep.subr.mxu0 %v19593_v37  ;;  %3984 = vmatprep.subr.mxu1 %v19593_v37  ;;  %v1239_v61 = vadd.f32 %v1223_v47, %v941_v28  ;;  %v926_v35 = vmul.f32 %v10934_v11, %v14027_v43  ;;  %v1485_v7 = vadd.f32 %v1469_v14, %v1233_v25  ;;  %v20034_v14 = vld [vmem:[#allocation230_spill] sm:$0xff] }
 0x1ac   :  { %3689 = vmatpush1.msra.mxu0 %v20029_v27  ;;  %20030 = vst [vmem:[#allocation64_spill] sm:$0xff] %v14266_v31  ;;  %3986 = vmatpush1.msra.mxu1 %v20031_v38  ;;  %v14273_v20 = vrot.slane %v14080_v53, %v20000_v8  ;;  %v14277_v60 = vrot.slane %v14082_v36, %v20000_v8  ;;  %v20036_v38 = vld [vmem:[#allocation163_spill] sm:$0xff] }
 0x1ad   :  { %3471 = vmatmul.mubr.f32.gmra.mxu0 %v20032_v29  ;;  %3668 = vmatmul.mubr.f32.gmra.mxu1 %v13941_v41  ;;  %v14281_v22 = vadd.f32 %v8824_v34, %v8785_v30  ;;  %v14284_v47 = vadd.f32 %v14227_v39, %v1487_v55  ;;  %v8788_v28 = vadd.f32 %v8772_v9, %v8733_v44  ;;  %v20037_v30 = vand.u32 4294901760, %v20036_v38  ;;  %v20038_v34 = vld [vmem:[#allocation170_spill] sm:$0xff]  ;;  %v20040_v41 = vld [vmem:[#allocation31_spill] sm:$0xff]  ;;  %v10935_v29 = vld [vmem:[#allocation3 + $0x68] sm:$0xff] }
 0x1ae   :  { %3693 = vmatprep.subr.mxu0 %v19593_v37  ;;  %3988 = vmatprep.subr.mxu1 %v19593_v37  ;;  %v14289_v25 = vadd.f32 %v14142_v48, %v1488_v18  ;;  %v14291_v27 = vadd.f32 %v8773_v6, %v8734_v2  ;;  %v14295_v11 = vrot.slane %v14144_v4, %v20000_v8  ;;  %v20039_v44 = vld [vmem:[#allocation30_spill] sm:$0xff]  ;;  %v20041_v18 = vld [vmem:[#allocation213_spill] sm:$0xff] }
 0x1af   :  { %20033 = vst [vmem:[#allocation67_spill] sm:$0xff] %v14284_v47  ;;  %3478 = vmatprep.mubr.f32.mxu0 %v20034_v14  ;;  %3697 = vmatpush1.msra.mxu0 %v20037_v30  ;;  %v1491_v55 = vadd.f32 %v14156_v19, %v1239_v61  ;;  %v1224_v9 = vadd.f32 %v20039_v44, %v926_v35  ;;  %v20043_v19 = vld [vmem:[#allocation164_spill] sm:$0xff] }
 0x1b0   :  { %20035 = vst [vmem:[#allocation44_spill] sm:$0xff] %v14289_v25  ;;  %3990 = vmatpush1.msra.mxu1 %v20038_v34  ;;  %v1460_v14 = vmul.f32 %v19970_v56, %v20040_v41  ;;  %4092 = vmatprep.mubr.f32.mxu1 %v20041_v18  ;;  %v14307_v2 = vadd.f32 %v14259_v33, %v1485_v7  ;;  %v20044_v61 = vand.u32 4294901760, %v20043_v19  ;;  %v20045_v35 = vld [vmem:[#allocation172_spill] sm:$0xff]  ;;  %v20047_v34 = vld [vmem:[#allocation90_spill] sm:$0xff] }
 0x1b1   :  { %3701 = vmatprep.subr.mxu0 %v19593_v37  ;;  %v8731_v6 = vmul.f32 %v14273_v20, %v14065_v40  ;;  %v8770_v38 = vmul.f32 %v14277_v60, %v14266_v31  ;;  %3992 = vmatprep.subr.mxu1 %v19593_v37  ;;  %v8827_v41 = vmul.f32 %v14240_v46, %v14284_v47  ;;  %v20046_v30 = vld [vmem:[#allocation232_spill] sm:$0xff]  ;;  %v20054_v31 = vld [vmem:[#allocation173_spill] sm:$0xff] }
 0x1b2   :  { %20042 = vst [vmem:[#allocation73_spill] sm:$0xff] %v14307_v2  ;;  %3705 = vmatpush1.msra.mxu0 %v20044_v61  ;;  %v8737_v56 = vmul.f32 %v14202_v3, %v14196_v49  ;;  %v8776_v7 = vmul.f32 %v14219_v12, %v14192_v62  ;;  %3994 = vmatpush1.msra.mxu1 %v20045_v35  ;;  %v20049_v61 = vld [vmem:[#allocation82_spill] sm:$0xff] }
 0x1b3   :  { %3481 = vmatmul.mubr.f32.gmra.mxu0 %v20046_v30  ;;  %v14326_v44 = vadd.f32 %v19981_v58, %v20047_v34  ;;  %v939_v19 = vmul.f32 %v10935_v29, %v14168_v52  ;;  %v1221_v47 = vmul.f32 %v19962_v57, %v20049_v61  ;;  %3709 = vmatprep.subr.mxu0 %v19593_v37  ;;  %v20051_v49 = vld [vmem:[#allocation122_spill] sm:$0xff]  ;;  %v20052_v58 = vld [vmem:[#allocation168_spill] sm:$0xff] }
 0x1b4   :  { %3996 = vmatprep.subr.mxu1 %v19593_v37  ;;  %v8828_v62 = vmul.f32 %v14178_v15, %v14289_v25  ;;  %v14336_v35 = vadd.f32 %v14227_v39, %v1491_v55  ;;  %v1476_v30 = vadd.f32 %v1460_v14, %v1224_v9  ;;  %3488 = vmatprep.mubr.f32.mxu0 %v20051_v49  ;;  %v20053_v34 = vand.u32 4294901760, %v20052_v58  ;;  %v10937_v55 = vld [vmem:[#allocation3 + $0x20] sm:$0xff]  ;;  %v20055_v9 = vld [vmem:[#allocation94_spill] sm:$0xff] }
 0x1b5   :  { %20048 = vst [vmem:[#allocation62_spill] sm:$0xff] %v14326_v44  ;;  %v8786_v29 = vadd.f32 %v8770_v38, %v8731_v6  ;;  %v8825_v61 = vmul.f32 %v14295_v11, %v14307_v2  ;;  %v929_v45 = vmul.f32 %v10936_v13, %v14132_v63  ;;  %3998 = vmatpush1.msra.mxu1 %v20054_v31  ;;  %v20056_v6 = vld [vmem:[#allocation169_spill] sm:$0xff]  ;;  %v20058_v58 = vld [vmem:[#allocation39_spill] sm:$0xff]  ;;  %v20059_v2 = vld [vmem:[#allocation174_spill] sm:$0xff] }
 0x1b6   :  { %20050 = vst [vmem:[#allocation69_spill] sm:$0xff] %v14336_v35  ;;  %3713 = vmatpush1.msra.mxu0 %v20053_v34  ;;  %v8792_v25 = vadd.f32 %v8776_v7, %v8737_v56  ;;  %v930_v14 = vmul.f32 %v10937_v55, %v14027_v43  ;;  %v1212_v49 = vmul.f32 %v19958_v16, %v20055_v9  ;;  %v20057_v38 = vand.u32 4294901760, %v20056_v6  ;;  %v20061_v7 = vld [vmem:[#allocation46_spill] sm:$0xff]  ;;  %v2215_v9 = vpop.permute.xlu0 %2214  ;;  %v20063_v6 = vld [vmem:[#allocation171_spill] sm:$0xff] }
 0x1b7   :  { %3717 = vmatprep.subr.mxu0 %v19593_v37  ;;  %4000 = vmatprep.subr.mxu1 %v19593_v37  ;;  %v8722_v34 = vmul.f32 %v14114_v59, %v20058_v58  ;;  %v8761_v13 = vmul.f32 %v14118_v17, %v14326_v44  ;;  %v1237_v31 = vadd.f32 %v1221_v47, %v939_v19  ;;  %v20062_v19 = vld [vmem:[#allocation42_spill] sm:$0xff] }
 0x1b8   :  { %3721 = vmatpush1.msra.mxu0 %v20057_v38  ;;  %4002 = vmatpush1.msra.mxu1 %v20059_v2  ;;  %v8831_v43 = vmul.f32 %v14240_v46, %v14336_v35  ;;  %v14361_v16 = vadd.f32 %v14142_v48, %v1476_v30  ;;  %v8735_v56 = vmul.f32 %v14273_v20, %v14148_v42  ;;  %v20064_v38 = vand.u32 4294901760, %v20063_v6  ;;  %v10938_v35 = vld [vmem:[#allocation3 + $0x8] sm:$0xff]  ;;  %v20065_v58 = vld [vmem:[#allocation178_spill] sm:$0xff] }
 0x1b9   :  { %3491 = vmatmul.mubr.f32.gmra.mxu0 %v13889_v26  ;;  %3725 = vmatprep.subr.mxu0 %v19593_v37  ;;  %v8774_v47 = vmul.f32 %v14277_v60, %v14126_v5  ;;  %v1227_v2 = vadd.f32 %v20061_v7, %v929_v45  ;;  %v1463_v55 = vmul.f32 %v19997_v1, %v20062_v19  ;;  %v20066_v7 = vld [vmem:[#allocation228_spill] sm:$0xff] }
 0x1ba   :  { %20060 = vst [vmem:[#allocation199_spill] sm:$0xff] %v14361_v16  ;;  %4004 = vmatprep.subr.mxu1 %v19593_v37  ;;  %3729 = vmatpush1.msra.mxu0 %v20064_v38  ;;  %v14375_v30 = vadd.f32 %v8827_v41, %v8788_v28  ;;  %v1228_v26 = vadd.f32 %v1212_v49, %v930_v14  ;;  %v20068_v28 = vld [vmem:[#allocation175_spill] sm:$0xff] }
 0x1bb   :  { %3931 = vmatprep.mubr.f32.mxu0 %v20041_v18  ;;  %v927_v44 = vmul.f32 %v10938_v35, %v14168_v52  ;;  %4006 = vmatpush1.msra.mxu1 %v20065_v58  ;;  %v14381_v45 = vadd.f32 %v8828_v62, %v14291_v27  ;;  %v1489_v1 = vadd.f32 %v14101_v0, %v1237_v31  ;;  %v20069_v49 = vand.u32 4294901760, %v20068_v28  ;;  %v20070_v58 = vld [vmem:[#allocation156_spill] sm:$0xff]  ;;  %v20072_v62 = vld [vmem:[#allocation179_spill] sm:$0xff]  ;;  %v2217_v28 = vpop.permute.xlu0 %2216  ;;  %v20095_v18 = vld [vmem:[#allocation186_spill] sm:$0xff] }
 0x1bc   :  { %3733 = vmatprep.subr.mxu0 %v19593_v37  ;;  %v14386_v19 = vadd.f32 %v20009_v50, %v20066_v7  ;;  %4008 = vmatprep.subr.mxu1 %v19593_v37  ;;  %v14391_v41 = vadd.f32 %v8825_v61, %v8786_v29  ;;  %v14393_v35 = vadd.f32 %v8831_v43, %v8792_v25  ;;  %v14396_v6 = vadd.s32 384, %v20070_v58  ;;  %v20073_v29 = vld [vmem:[#allocation176_spill] sm:$0xff]  ;;  %v20075_v25 = vld [vmem:[#allocation103_spill] sm:$0xff]  ;;  %v20078_v7 = vld [vmem:[#allocation182_spill] sm:$0xff] }
 0x1bd   :  { %3737 = vmatpush1.msra.mxu0 %v20069_v49  ;;  %v8777_v14 = vadd.f32 %v8761_v13, %v8722_v34  ;;  %4010 = vmatpush1.msra.mxu1 %v20072_v62  ;;  %v8816_v50 = vmul.f32 %v14178_v15, %v14361_v16  ;;  %v14402_v0 = vadd.f32 %v8774_v47, %v8735_v56  ;;  %v20074_v61 = vand.u32 4294901760, %v20073_v29  ;;  %v20076_v13 = vld [vmem:[#allocation129_spill] sm:$0xff]  ;;  %v20077_v43 = vld [vmem:[#allocation27_spill] sm:$0xff]  ;;  %v20080_v47 = vld [vmem:[#allocation50_spill] sm:$0xff] }
 0x1be   :  { %20067 = vst [vmem:[#allocation75_spill] sm:$0xff] %v14386_v19  ;;  %20071 = vst [vmem:[#allocation58_spill] sm:$0xff] %v14396_v6  ;;  %3741 = vmatprep.subr.mxu0 %v19593_v37  ;;  %v1479_v27 = vadd.f32 %v1463_v55, %v1227_v2  ;;  %4012 = vmatprep.subr.mxu1 %v19593_v37  ;;  %v1480_v34 = vadd.f32 %v20075_v25, %v1228_v26  ;;  %v20081_v26 = vld [vmem:[#allocation177_spill] sm:$0xff]  ;;  %v10939_v62 = vld [vmem:[#allocation3 + $0x38] sm:$0xff]  ;;  %vm798_vm1 = vcmp.lt.s32.totalorder %v14396_v6, 480 }
 0x1bf   :  { %3745 = vmatpush1.msra.mxu0 %v20074_v61  ;;  %v1225_v31 = vadd.f32 %v20076_v13, %v927_v44  ;;  %v1461_v38 = vmul.f32 %v19978_v54, %v20077_v43  ;;  %4014 = vmatpush1.msra.mxu1 %v20078_v7  ;;  %v14414_v56 = vadd.f32 %v14259_v33, %v1489_v1  ;;  %v20082_v44 = vand.u32 4294901760, %v20081_v26  ;;  %v20083_v54 = vld [vmem:[#allocation130_spill] sm:$0xff]  ;;  %v20085_v29 = vld [vmem:[#allocation105_spill] sm:$0xff]  ;;  %v20086_v25 = vld [vmem:[#allocation195_spill] sm:$0xff] }
 0x1c0   :  { %3749 = vmatprep.subr.mxu0 %v19593_v37  ;;  %v8725_v2 = vmul.f32 %v14202_v3, %v20080_v47  ;;  %v8764_v55 = vmul.f32 %v14219_v12, %v14386_v19  ;;  %4016 = vmatprep.subr.mxu1 %v19593_v37  ;;  %v14425_v49 = vadd.f32 %v19986_v32, %v20083_v54  ;;  %v20087_v43 = vld [vmem:[#allocation183_spill] sm:$0xff]  ;;  %v20089_v32 = vld [vmem:[#allocation110_spill] sm:$0xff]  ;;  %v20105_v47 = vld [vmem:[#allocation37_spill] sm:$0xff] }
 0x1c1   :  { %20079 = vst [vmem:[#allocation63_spill] sm:$0xff] %v14414_v56  ;;  %3753 = vmatpush1.msra.mxu0 %v20082_v44  ;;  %v933_v1 = vmul.f32 %v10939_v62, %v14132_v63  ;;  %v1215_v61 = vmul.f32 %v13524_v23, %v20085_v29  ;;  %v2235_v13 = vsel %vm267_vm13, %v2215_v9, %v20086_v25  ;;  %v20090_v63 = vld [vmem:[#allocation180_spill] sm:$0xff]  ;;  %v20093_v54 = vld [vmem:[#allocation107_spill] sm:$0xff]  ;;  %v2256_v25 = vpop.permute.xlu1 %2255 }
 0x1c2   :  { %20084 = vst [vmem:[#allocation72_spill] sm:$0xff] %v14425_v49  ;;  %4018 = vmatpush1.msra.mxu1 %v20087_v43  ;;  %3757 = vmatprep.subr.mxu0 %v19593_v37  ;;  %v14437_v7 = vadd.f32 %v14227_v39, %v1479_v27  ;;  %v8726_v26 = vmul.f32 %v14114_v59, %v20089_v32  ;;  %v20091_v23 = vand.u32 4294901760, %v20090_v63  ;;  %v20094_v43 = vld [vmem:[#allocation221_spill] sm:$0xff]  ;;  %v20096_v63 = vld [vmem:[#allocation134_spill] sm:$0xff]  ;;  %v20196_v16 = vld [vmem:[#allocation212_spill] sm:$0xff] }
 0x1c3   :  { %4020 = vmatprep.subr.mxu1 %v19593_v37  ;;  %v14445_v44 = vadd.f32 %v14142_v48, %v1480_v34  ;;  %v8765_v62 = vmul.f32 %v14118_v17, %v20093_v54  ;;  %v1477_v29 = vadd.f32 %v1461_v38, %v1225_v31  ;;  %v2236_v27 = vsel %vm267_vm13, %v2217_v28, %v20094_v43  ;;  %v20097_v48 = vld [vmem:[#allocation202_spill] sm:$0xff]  ;;  %v20098_v31 = vld [vmem:[#allocation181_spill] sm:$0xff] }
 0x1c4   :  { %20088 = vst [vmem:[#allocation76_spill] sm:$0xff] %v14437_v7  ;;  %3761 = vmatpush1.msra.mxu0 %v20091_v23  ;;  %4022 = vmatpush1.msra.mxu1 %v20095_v18  ;;  %v14454_v59 = vadd.f32 %v8816_v50, %v8777_v14  ;;  %v8723_v23 = vmul.f32 %v14273_v20, %v20096_v63  ;;  %v2303_v17 = vsel %vm798_vm1, %v2235_v13, -3.4028235e+38  ;;  %v20099_v38 = vand.u32 4294901760, %v20098_v31  ;;  %v20100_v50 = vld [vmem:[#allocation187_spill] sm:$0xff]  ;;  %v20101_v31 = vld [vmem:[#allocation188_spill] sm:$0xff] }
 0x1c5   :  { %20092 = vst [vmem:[#allocation61_spill] sm:$0xff] %v14445_v44  ;;  %3765 = vmatprep.subr.mxu0 %v19593_v37  ;;  %v2223_v34 = vsel %vm267_vm13, %v20097_v48, %v2215_v9  ;;  %4024 = vmatprep.subr.mxu1 %v19593_v37  ;;  %v8762_v18 = vmul.f32 %v14277_v60, %v14425_v49  ;;  %v2307_v48 = vsel %vm798_vm1, %v2236_v27, -3.4028235e+38  ;;  %v20122_v32 = vld [vmem:[#allocation85_spill] sm:$0xff] }
 0x1c6   :  { %3769 = vmatpush1.msra.mxu0 %v20099_v38  ;;  %v1231_v14 = vadd.f32 %v1215_v61, %v933_v1  ;;  %4026 = vmatpush1.msra.mxu1 %v20100_v50  ;;  %v8829_v43 = vmul.f32 %v14295_v11, %v14414_v56  ;;  %v8780_v9 = vadd.f32 %v8764_v55, %v8725_v2  ;;  %v20102_v38 = vld [vmem:[#allocation184_spill] sm:$0xff] }
 0x1c7   :  { %3773 = vmatprep.subr.mxu0 %v19593_v37  ;;  %v8819_v13 = vmul.f32 %v14240_v46, %v14437_v7  ;;  %4028 = vmatprep.subr.mxu1 %v20101_v31  ;;  %v20103_v19 = vand.u32 4294901760, %v20102_v38  ;;  %v8781_v1 = vadd.f32 %v8765_v62, %v8726_v26  ;;  %v8820_v61 = vmul.f32 %v14178_v15, %v14445_v44  ;;  %v20106_v55 = vld [vmem:[#allocation48_spill] sm:$0xff]  ;;  %v20108_v26 = vld [vmem:[#allocation189_spill] sm:$0xff] }
 0x1c8   :  { %v14482_v50 = vadd.f32 %v14259_v33, %v1477_v29  ;;  %v2318_v2 = vmax.f32 %v20105_v47, %v2223_v34  ;;  %v2319_v54 = vmax.f32 %v20106_v55, %v2303_v17  ;;  %v20107_v7 = vld [vmem:[#allocation140_spill] sm:$0xff]  ;;  %4030 = vmatpush2.msra.mxu1 %v19593_v37  ;;  %v20109_v62 = vld [vmem:[#allocation185_spill] sm:$0xff]  ;;  %v8778_v29 = vadd.f32 %v8762_v18, %v8723_v23  ;;  %v20112_v47 = vld [vmem:[#allocation115_spill] sm:$0xff]  ;;  %v2258_v17 = vpop.permute.xlu1 %2257 }
 0x1c9   :  { %3777 = vmatpush1.msra.mxu0 %v20103_v19  ;;  %v2224_v27 = vsel %vm267_vm13, %v20107_v7, %v2217_v28  ;;  %v2219_v19 = vpop.permute.xlu0 %2218  ;;  %4032 = vmatprep.subr.mxu1 %v20108_v26  ;;  %v20110_v15 = vand.u32 4294901760, %v20109_v62  ;;  %v20111_v31 = vld [vmem:[#allocation109_spill] sm:$0xff]  ;;  %v8729_v34 = vmul.f32 %v14202_v3, %v20112_v47  ;;  %v20113_v55 = vld [vmem:[#allocation106_spill] sm:$0xff]  ;;  %v20115_v26 = vld [vmem:[#allocation71_spill] sm:$0xff] }
 0x1ca   :  { %20104 = vst [vmem:[#allocation74_spill] sm:$0xff] %v14482_v50  ;;  %3781 = vmatprep.subr.mxu0 %v19593_v37  ;;  %v1483_v38 = vadd.f32 %v20111_v31, %v1231_v14  ;;  %v2323_v44 = vmax.f32 %v20113_v55, %v2307_v48  ;;  %4034 = vmatpush2.msra.mxu1 %v19593_v37  ;;  %v20114_v28 = vld [vmem:[#allocation113_spill] sm:$0xff]  ;;  %v20116_v23 = vld [vmem:[#allocation210_spill] sm:$0xff]  ;;  %v20118_v48 = vld [vmem:[#allocation87_spill] sm:$0xff] }
 0x1cb   :  { %3785 = vmatpush1.msra.mxu0 %v20110_v15  ;;  %v8768_v7 = vmul.f32 %v14219_v12, %v20114_v28  ;;  %v14504_v62 = vrot.slane %v14011_v10, %v20115_v26  ;;  %v2272_v18 = vsel %vm179_vm8, %v2256_v25, %v20116_v23  ;;  %v20117_v14 = vld [vmem:[#allocation209_spill] sm:$0xff]  ;;  %v2322_v15 = vmax.f32 %v20118_v48, %v2224_v27  ;;  %v20119_v31 = vld [vmem:[#allocation190_spill] sm:$0xff]  ;;  %v20124_v27 = vld [vmem:[#allocation192_spill] sm:$0xff] }
 0x1cc   :  { %3789 = vmatprep.subr.mxu0 %v19593_v37  ;;  %v2276_v3 = vsel %vm179_vm8, %v20117_v14, %v2256_v25  ;;  %4036 = vmatprep.subr.mxu1 %v20119_v31  ;;  %v20120_v55 = vld [vmem:[#allocation137_spill] sm:$0xff]  ;;  %v2363_v28 = vmax.f32 %v2319_v54, %v2272_v18  ;;  %v2237_v10 = vsel %vm267_vm13, %v2219_v19, %v20122_v32  ;;  %v20123_v23 = vld [vmem:[#allocation78_spill] sm:$0xff]  ;;  %v20126_v32 = vld [vmem:[#allocation79_spill] sm:$0xff] }
 0x1cd   :  { %v20121_v47 = vand.u32 4294901760, %v20120_v55  ;;  %v2362_v12 = vmax.f32 %v2318_v2, %v2276_v3  ;;  %4038 = vmatpush2.msra.mxu1 %v19593_v37  ;;  %v2273_v25 = vsel %vm179_vm8, %v2258_v17, %v20123_v23  ;;  %8852 = vrot.lane.b32.xlu0 %v14281_v22, %s11163_s23  ;;  %v8817_v54 = vmul.f32 %v14295_v11, %v14482_v50  ;;  %v20127_v14 = vld [vmem:[#allocation139_spill] sm:$0xff]  ;;  %v20129_v31 = vld [vmem:[#allocation98_spill] sm:$0xff]  ;;  %v10940_v23 = vld [vmem:[#allocation3 + $0x50] sm:$0xff] }
 0x1ce   :  { %4040 = vmatprep.subr.mxu1 %v20124_v27  ;;  %v14530_v2 = vadd.f32 %v14227_v39, %v1483_v38  ;;  %v2367_v18 = vmax.f32 %v2323_v44, %v2273_v25  ;;  %v20128_v3 = vand.u32 4294901760, %v20127_v14  ;;  %v14539_v48 = vadd.f32 %v8829_v43, %v14402_v0  ;;  %v20130_v38 = vld [vmem:[#allocation191_spill] sm:$0xff]  ;;  %v20132_v44 = vld [vmem:[#allocation197_spill] sm:$0xff]  ;;  %8854 = vrot.lane.b32.xlu1 %v14381_v45, %s11163_s23  ;;  %v20189_v50 = vld [vmem:[#allocation100_spill] sm:$0xff] }
 0x1cf   :  { %3793 = vmatpush1.msra.mxu0 %v20121_v47  ;;  %v2277_v47 = vsel %vm179_vm8, %v20126_v32, %v2258_v17  ;;  %4042 = vmatpush2.msra.mxu1 %v19593_v37  ;;  %v14544_v55 = vsel %vm267_vm13, %v20129_v31, %v2219_v19  ;;  %v2311_v39 = vsel %vm798_vm1, %v2237_v10, -3.4028235e+38  ;;  %v20131_v17 = vand.u32 4294901760, %v20130_v38  ;;  %v20135_v10 = vld [vmem:[#allocation193_spill] sm:$0xff] }
 0x1d0   :  { %3797 = vmatprep.subr.mxu0 %v19593_v37  ;;  %20125 = vst [vmem:[#allocation136_spill] sm:$0xff] %v14530_v2  ;;  %v2366_v22 = vmax.f32 %v2322_v15, %v2277_v47  ;;  %4044 = vmatprep.subr.mxu1 %v20132_v44  ;;  %v936_v25 = vmul.f32 %v10940_v23, %v14504_v62  ;;  %v14552_v27 = vand.u32 4294901760, %v2363_v28  ;;  %v14554_v0 = vand.u32 4294901760, %v2362_v12  ;;  %v2221_v15 = vpop.permute.xlu0 %2220  ;;  %v20137_v47 = vld [vmem:[#allocation198_spill] sm:$0xff]  ;;  %v20144_v44 = vld [vmem:[#allocation28_spill] sm:$0xff] }
 0x1d1   :  { %3801 = vmatpush1.msra.mxu0 %v20128_v3  ;;  %4046 = vmatpush2.msra.mxu1 %v19593_v37  ;;  %v14558_v43 = vadd.f32 %v8819_v13, %v8780_v9  ;;  %v14560_v19 = vadd.f32 %v8820_v61, %v8781_v1  ;;  %v20136_v32 = vand.u32 4294901760, %v20135_v10  ;;  %v14565_v14 = vadd.f32 %v8817_v54, %v8778_v29  ;;  %v20139_v9 = vld [vmem:[#allocation114_spill] sm:$0xff]  ;;  %v20140_v1 = vld [vmem:[#allocation141_spill] sm:$0xff]  ;;  %v20141_v29 = vld [vmem:[#allocation112_spill] sm:$0xff] }
 0x1d2   :  { %3805 = vmatprep.subr.mxu0 %v20131_v17  ;;  %20133 = vst [vmem:[#allocation127_spill] sm:$0xff] %v14552_v27  ;;  %20134 = vst [vmem:[#allocation234_spill] sm:$0xff] %v14554_v0  ;;  %4048 = vmatprep.subr.mxu1 %v20137_v47  ;;  %v8784_v3 = vadd.f32 %v8768_v7, %v8729_v34  ;;  %v8823_v31 = vmul.f32 %v14240_v46, %v14530_v2  ;;  %v14569_v38 = vand.u32 4294901760, %v2367_v18  ;;  %v2260_v17 = vpop.permute.xlu1 %2259  ;;  %v20143_v46 = vld [vmem:[#allocation241_spill] sm:$0xff]  ;;  %v20147_v10 = vld [vmem:[#allocation239_spill] sm:$0xff] }
 0x1d3   :  { %3809 = vmatpush2.msra.mxu0 %v19593_v37  ;;  %v2326_v13 = vmax.f32 %v20139_v9, %v14544_v55  ;;  %v2327_v61 = vmax.f32 %v20140_v1, %v2311_v39  ;;  %8876 = vrot.lane.b32.xlu0 %v14375_v30, %s11163_s23  ;;  %v1470_v34 = vmul.f32 %v19972_v51, %v20141_v29  ;;  %v14580_v7 = vand.u32 4294901760, %v2366_v22  ;;  %v10941_v55 = vld [vmem:[#allocation3 + $0x28] sm:$0xff]  ;;  %v20148_v47 = vld [vmem:[#allocation194_spill] sm:$0xff]  ;;  %v20151_v1 = vld [vmem:[#allocation225_spill] sm:$0xff] }
 0x1d4   :  { %3813 = vmatprep.subr.mxu0 %v20136_v32  ;;  %20138 = vst [vmem:[#allocation144_spill] sm:$0xff] %v14569_v38  ;;  %4050 = vmatpush2.msra.mxu1 %v19593_v37  ;;  %v1234_v54 = vadd.f32 %v20143_v46, %v936_v25  ;;  %v931_v39 = vmul.f32 %v10941_v55, %v14168_v52  ;;  %v20149_v9 = vand.u32 4294901760, %v20148_v47  ;;  %v20150_v25 = vld [vmem:[#allocation132_spill] sm:$0xff]  ;;  %v20154_v46 = vld [vmem:[#allocation119_spill] sm:$0xff] }
 0x1d5   :  { %20142 = vst [vmem:[#allocation229_spill] sm:$0xff] %v14580_v7  ;;  %3817 = vmatpush2.msra.mxu0 %v19593_v37  ;;  %v1213_v30 = vmul.f32 %v19962_v57, %v20144_v44  ;;  %v14589_v23 = vsub.f32 %v2363_v28, %v14552_v27  ;;  %v14592_v45 = vsub.f32 %v2362_v12, %v14554_v0  ;;  %v20152_v57 = vld [vmem:[#allocation238_spill] sm:$0xff]  ;;  %v20198_v0 = vld [vmem:[#allocation64_spill] sm:$0xff] }
 0x1d6   :  { %v2238_v32 = vsel %vm267_vm13, %v2221_v15, %v20147_v10  ;;  %3821 = vmatprep.subr.mxu0 %v20149_v9  ;;  %4052 = vmatprep.subr.mxu1 %v20150_v25  ;;  %v2274_v52 = vsel %vm179_vm8, %v2260_v17, %v20151_v1  ;;  %v14606_v28 = vsel %vm267_vm13, %v20152_v57, %v2221_v15  ;;  %v20155_v10 = vld [vmem:[#allocation196_spill] sm:$0xff]  ;;  %v20157_v9 = vld [vmem:[#allocation201_spill] sm:$0xff]  ;;  %v20159_v25 = vld [vmem:[#allocation142_spill] sm:$0xff] }
 0x1d7   :  { %20145 = vst [vmem:[#allocation146_spill] sm:$0xff] %v14589_v23  ;;  %20146 = vst [vmem:[#allocation147_spill] sm:$0xff] %v14592_v45  ;;  %3825 = vmatpush2.msra.mxu0 %v19593_v37  ;;  %4054 = vmatpush2.msra.mxu1 %v19593_v37  ;;  %v14610_v12 = vadd.f32 %v8823_v31, %v8784_v3  ;;  %v14613_v29 = vsub.f32 %v2367_v18, %v14569_v38  ;;  %v20156_v47 = vand.u32 4294901760, %v20155_v10  ;;  %v20160_v1 = vld [vmem:[#allocation77_spill] sm:$0xff] }
 0x1d8   :  { %v2278_v55 = vsel %vm179_vm8, %v20154_v46, %v2260_v17  ;;  %v2371_v44 = vmax.f32 %v2327_v61, %v2274_v52  ;;  %4056 = vmatprep.subr.mxu1 %v20157_v9  ;;  %v14622_v15 = vsub.f32 %v2366_v22, %v14580_v7  ;;  %v14626_v3 = vsel %vm798_vm1, %v2238_v32, -3.4028235e+38  ;;  %8860 = vrot.lane.b32.xlu0 %v14391_v41, %s11163_s23  ;;  %v2262_v17 = vpop.permute.xlu1 %2261  ;;  %v10942_v61 = vld [vmem:[#allocation3 + $0x70] sm:$0xff] }
 0x1d9   :  { %20153 = vst [vmem:[#allocation231_spill] sm:$0xff] %v14613_v29  ;;  %3829 = vmatprep.subr.mxu0 %v20156_v47  ;;  %8878 = vrot.lane.b32.xlu1 %v14393_v35, %s11163_s23  ;;  %v1486_v18 = vadd.f32 %v1470_v34, %v1234_v54  ;;  %v1229_v31 = vadd.f32 %v1213_v30, %v931_v39  ;;  %v20161_v52 = vand.u32 4294901760, %v19936_v24  ;;  %v20162_v35 = vld [vmem:[#allocation205_spill] sm:$0xff]  ;;  %v20164_v54 = vld [vmem:[#allocation108_spill] sm:$0xff]  ;;  %v20167_v24 = vld [vmem:[#allocation143_spill] sm:$0xff] }
 0x1da   :  { %20158 = vst [vmem:[#allocation236_spill] sm:$0xff] %v14622_v15  ;;  %3833 = vmatpush2.msra.mxu0 %v19593_v37  ;;  %4058 = vmatpush2.msra.mxu1 %v19593_v37  ;;  %v14636_v22 = vrot.slane %v14105_v21, %v20115_v26  ;;  %v940_v32 = vmul.f32 %v10942_v61, %v14504_v62  ;;  %v20163_v34 = vld [vmem:[#allocation65_spill] sm:$0xff]  ;;  %v14658_v46 = vand.u32 4294901760, %v2371_v44  ;;  %v20169_v61 = vld [vmem:[#allocation52_spill] sm:$0xff] }
 0x1db   :  { %v1222_v41 = vmul.f32 %v20160_v1, %v20159_v25  ;;  %3837 = vmatprep.subr.mxu0 %v20161_v52  ;;  %4060 = vmatprep.subr.mxu1 %v20162_v35  ;;  %v14646_v39 = vadd.f32 %v20164_v54, %v20163_v34  ;;  %v14650_v30 = vrot.slane %v14080_v53, %v20115_v26  ;;  %v20168_v47 = vld [vmem:[#allocation101_spill] sm:$0xff]  ;;  %v20171_v25 = vld [vmem:[#allocation200_spill] sm:$0xff]  ;;  %v20173_v35 = vld [vmem:[#allocation206_spill] sm:$0xff] }
 0x1dc   :  { %v14654_v21 = vrot.slane %v14082_v36, %v20115_v26  ;;  %v14656_v57 = vmax.f32 %v2326_v13, %v2278_v55  ;;  %20166 = vst [vmem:[#allocation151_spill] sm:$0xff] %v14658_v46  ;;  %3841 = vmatpush2.msra.mxu0 %v19593_v37  ;;  %4062 = vmatpush2.msra.mxu1 %v19593_v37  ;;  %v14666_v53 = vld [vmem:[#allocation10 + $0x42] ss:$8 sm:$0xf]  ;;  %v20172_v52 = vand.u32 4294901760, %v20171_v25 }
 0x1dd   :  { %20165 = vst [vmem:[#allocation148_spill] sm:$0xff] %v14646_v39  ;;  %v14671_v36 = vsel %vm179_vm8, %v2262_v17, %v20169_v61  ;;  %v20170_v13 = vld [vmem:[#allocation26_spill] sm:$0xff]  ;;  %4064 = vmatprep.subr.mxu1 %v20173_v35  ;;  %v20174_v34 = vld [vmem:[#allocation93_spill] sm:$0xff]  ;;  %8848 = vrot.lane.b32.xlu0 %v14454_v59, %s11163_s23  ;;  %v14689_v61 = vadd.f32 %v14636_v22, %v1486_v18  ;;  %v20204_v15 = vld [vmem:[#allocation56_spill] sm:$0xff] }
 0x1de   :  { %v14676_v55 = vsel %vm179_vm8, %v20170_v13, %v2262_v17  ;;  %3845 = vmatprep.subr.mxu0 %v20172_v52  ;;  %v1481_v9 = vadd.f32 %v20174_v34, %v1229_v31  ;;  %v14682_v10 = vld [vmem:[#allocation10 + $0x23] ss:$8 sm:$0xf]  ;;  %8862 = vrot.lane.b32.xlu1 %v14539_v48, %s11163_s23  ;;  %v14693_v17 = vrot.slane %v14144_v4, %v20115_v26  ;;  %v14717_v58 = vld [vmem:[#allocation10 + $0x4] ss:$8 sm:$0xf] }
 0x1df   :  { %20175 = vst [vmem:[#allocation233_spill] sm:$0xff] %v14682_v10  ;;  %20176 = vst [vmem:[#allocation152_spill] sm:$0xff] %v14689_v61  ;;  %v1238_v13 = vadd.f32 %v1222_v41, %v940_v32  ;;  %3849 = vmatpush2.msra.mxu0 %v19593_v37  ;;  %4066 = vmatpush2.msra.mxu1 %v19593_v37  ;;  %v20177_v31 = vld [vmem:[#allocation66_spill] sm:$0xff]  ;;  %v8771_v59 = vmul.f32 %v14654_v21, %v14646_v39  ;;  %v20178_v52 = vld [vmem:[#allocation59_spill] sm:$0xff] }
 0x1e0   :  { %v8732_v25 = vmul.f32 %v14650_v30, %v20177_v31  ;;  %v14703_v48 = vrot.slane %v14666_v53, %v20178_v52  ;;  %v14706_v18 = vsub.f32 %v2371_v44, %v14658_v46  ;;  %v20180_v4 = vld [vmem:[#allocation203_spill] sm:$0xff]  ;;  %v20182_v32 = vld [vmem:[#allocation208_spill] sm:$0xff]  ;;  %v14715_v6 = vrot.slane %v14682_v10, %v20178_v52 }
 0x1e1   :  { %v20181_v35 = vand.u32 4294901760, %v20180_v4  ;;  %4068 = vmatprep.subr.mxu1 %v20182_v32  ;;  %v20183_v41 = vld [vmem:[#allocation104_spill] sm:$0xff]  ;;  %v14722_v44 = vadd.f32 %v14259_v33, %v1481_v9  ;;  %v20185_v4 = vld [vmem:[#allocation99_spill] sm:$0xff]  ;;  %v14728_v32 = vrot.slane %v14666_v53, %v20000_v8  ;;  %v8826_v46 = vmul.f32 %v14693_v17, %v14689_v61  ;;  %8872 = vrot.lane.b32.xlu0 %v14558_v43, %s11163_s23  ;;  %v20190_v9 = vld [vmem:[#allocation121_spill] sm:$0xff] }
 0x1e2   :  { %20179 = vst [vmem:[#allocation153_spill] sm:$0xff] %v14706_v18  ;;  %v8727_v34 = vmul.f32 %v14273_v20, %v20183_v41  ;;  %4070 = vmatpush2.msra.mxu1 %v19593_v37  ;;  %v20186_v20 = vld [vmem:[#allocation204_spill] sm:$0xff]  ;;  %v20188_v41 = vld [vmem:[#allocation29_spill] sm:$0xff]  ;;  %v1490_v7 = vadd.f32 %v20189_v50, %v1238_v13  ;;  %v14738_v33 = vrot.slane %v14682_v10, %v20000_v8  ;;  %v20191_v50 = vld [vmem:[#allocation123_spill] sm:$0xff] }
 0x1e3   :  { %3853 = vmatprep.subr.mxu0 %v20181_v35  ;;  %20184 = vst [vmem:[#allocation96_spill] sm:$0xff] %v14722_v44  ;;  %v8766_v35 = vmul.f32 %v14277_v60, %v20185_v4  ;;  %v20187_v2 = vand.u32 4294901760, %v20186_v20  ;;  %4072 = vmatprep.subr.mxu1 %v20188_v41  ;;  %v8787_v60 = vadd.f32 %v8771_v59, %v8732_v25  ;;  %v20192_v20 = vld [vmem:[#allocation68_spill] sm:$0xff]  ;;  %v20193_v4 = vld [vmem:[#allocation53_spill] sm:$0xff]  ;;  %v20194_v25 = vld [vmem:[#allocation207_spill] sm:$0xff] }
 0x1e4   :  { %3857 = vmatpush2.msra.mxu0 %v19593_v37  ;;  %8850 = vrot.lane.b32.xlu1 %v14560_v19, %s11163_s23  ;;  %v14748_v41 = vrot.slane %v14717_v58, %v20178_v52  ;;  %v8998_v13 = vmul.f32 %v14715_v6, %v20191_v50  ;;  %v8736_v43 = vmul.f32 %v14650_v30, %v20192_v20  ;;  %v20195_v59 = vand.u32 4294901760, %v20194_v25 }
 0x1e5   :  { %3861 = vmatprep.subr.mxu0 %v20187_v2  ;;  %v8959_v2 = vmul.f32 %v14703_v48, %v20190_v9  ;;  %4074 = vmatpush2.msra.mxu1 %v19593_v37  ;;  %v8775_v19 = vmul.f32 %v14654_v21, %v20193_v4  ;;  %v8782_v38 = vadd.f32 %v8766_v35, %v8727_v34  ;;  %v14777_v34 = vand.u32 4294901760, %v14656_v57 }
 0x1e6   :  { %3865 = vmatpush2.msra.mxu0 %v19593_v37  ;;  %4076 = vmatprep.subr.mxu1 %v20196_v16  ;;  %v8821_v49 = vmul.f32 %v14295_v11, %v14722_v44  ;;  %v8960_v63 = vmul.f32 %v14728_v32, %v14065_v40  ;;  %v14768_v18 = vadd.f32 %v14636_v22, %v1490_v7  ;;  %v20200_v11 = vld [vmem:[#allocation32_spill] sm:$0xff]  ;;  %v20203_v44 = vld [vmem:[#allocation57_spill] sm:$0xff] }
 0x1e7   :  { %3869 = vmatprep.subr.mxu0 %v20195_v59  ;;  %4078 = vmatpush2.msra.mxu1 %v19593_v37  ;;  %v8999_v25 = vmul.f32 %v14738_v33, %v20198_v0  ;;  %v14774_v16 = vrot.slane %v14717_v58, %v20000_v8  ;;  %20199 = vst [vmem:[#allocation131_spill] sm:$0xff] %v14777_v34  ;;  %v20201_v35 = vand.u32 4294901760, %v20200_v11  ;;  %v20202_v59 = vld [vmem:[#allocation215_spill] sm:$0xff]  ;;  %v20205_v8 = vld [vmem:[#allocation133_spill] sm:$0xff] }
 0x1e8   :  { %3873 = vmatpush2.msra.mxu0 %v19593_v37  ;;  %20197 = vst [vmem:[#allocation155_spill] sm:$0xff] %v14768_v18  ;;  %4080 = vmatprep.subr.mxu1 %v20202_v59  ;;  %v8842_v40 = vadd.f32 %v8826_v46, %v8787_v60  ;;  %v8963_v7 = vmul.f32 %v14703_v48, %v20203_v44  ;;  %v20206_v59 = vld [vmem:[#allocation211_spill] sm:$0xff] }
 0x1e9   :  { %3877 = vmatprep.subr.mxu0 %v20201_v35  ;;  %v9002_v27 = vmul.f32 %v14715_v6, %v20204_v15  ;;  %8856 = vrot.lane.b32.xlu0 %v14565_v14, %s11163_s23  ;;  %v9014_v0 = vadd.f32 %v8998_v13, %v8959_v2  ;;  %v9053_v11 = vmul.f32 %v14748_v41, %v20205_v8  ;;  %v20208_v2 = vld [vmem:[#allocation217_spill] sm:$0xff] }
 0x1ea   :  { %8874 = vrot.lane.b32.xlu1 %v14610_v12, %s11163_s23  ;;  %v8791_v35 = vadd.f32 %v8775_v19, %v8736_v43  ;;  %3881 = vmatpush2.msra.mxu0 %v19593_v37  ;;  %v8837_v46 = vadd.f32 %v8821_v49, %v8782_v38  ;;  %v14796_v60 = vrot.slane %v14666_v53, %v20115_v26  ;;  %v20207_v12 = vand.u32 4294901760, %v20206_v59  ;;  %v20209_v19 = vld [vmem:[#allocation73_spill] sm:$0xff]  ;;  %v20211_v59 = vld [vmem:[#allocation44_spill] sm:$0xff] }
 0x1eb   :  { %4082 = vmatpush2.msra.mxu1 %v19593_v37  ;;  %v14800_v14 = vrot.slane %v14682_v10, %v20115_v26  ;;  %v8830_v13 = vmul.f32 %v14693_v17, %v14768_v18  ;;  %v9015_v43 = vadd.f32 %v8999_v25, %v8960_v63  ;;  %v9054_v49 = vmul.f32 %v14774_v16, %v20209_v19  ;;  %v20214_v19 = vld [vmem:[#allocation138_spill] sm:$0xff]  ;;  %v20216_v10 = vld [vmem:[#allocation220_spill] sm:$0xff] }
 0x1ec   :  { %3885 = vmatprep.subr.mxu0 %v20207_v12  ;;  %4084 = vmatprep.subr.mxu1 %v20208_v2  ;;  %v14811_v38 = vsub.f32 %v14656_v57, %v14777_v34  ;;  %v9018_v8 = vadd.f32 %v9002_v27, %v8963_v7  ;;  %v9057_v12 = vmul.f32 %v14748_v41, %v20211_v59  ;;  %v20215_v34 = vand.u32 4294901760, %v20214_v19  ;;  %v20230_v59 = vld [vmem:[#allocation80_spill] sm:$0xff] }
 0x1ed   :  { %3889 = vmatpush2.msra.mxu0 %v19593_v37  ;;  %4086 = vmatpush2.msra.mxu1 %v19593_v37  ;;  %v20212_v2 = vmax.f32 %v20167_v24, %v14606_v28  ;;  %v20213_v25 = vmax.f32 %v20168_v47, %v14626_v3  ;;  %v14832_v27 = vrot.slane %v14717_v58, %v20115_v26  ;;  %v14840_v47 = vld [vmem:[#allocation10 + $0x27] ss:$8 sm:$0xf] }
 0x1ee   :  { %20210 = vst [vmem:[#allocation43_spill] sm:$0xff] %v14811_v38  ;;  %3893 = vmatprep.subr.mxu0 %v20215_v34  ;;  %4088 = vmatprep.subr.mxu1 %v20216_v10  ;;  %v9069_v28 = vadd.f32 %v9053_v11, %v9014_v0  ;;  %v8961_v24 = vmul.f32 %v14796_v60, %v20177_v31  ;;  %v20217_v0 = vld [vmem:[#allocation214_spill] sm:$0xff]  ;;  %v20219_v11 = vld [vmem:[#allocation135_spill] sm:$0xff]  ;;  %v20231_v31 = vld [vmem:[#allocation81_spill] sm:$0xff] }
 0x1ef   :  { %v14821_v63 = vmax.f32 %v20212_v2, %v14676_v55  ;;  %v2375_v57 = vmax.f32 %v20213_v25, %v14671_v36  ;;  %8868 = vrot.lane.b32.xlu0 %v8842_v40, %s11163_s23  ;;  %8858 = vrot.lane.b32.xlu1 %v8837_v46, %s11163_s23  ;;  %v9000_v3 = vmul.f32 %v14800_v14, %v14646_v39  ;;  %v14844_v55 = vld [vmem:[#allocation10 + $0x20] ss:$8 sm:$0xf]  ;;  %v20218_v7 = vand.u32 4294901760, %v20217_v0 }
 0x1f0   :  { %3897 = vmatpush2.msra.mxu0 %v19593_v37  ;;  %4090 = vmatpush2.msra.mxu1 %v19593_v37  ;;  %v8846_v10 = vadd.f32 %v8830_v13, %v8791_v35  ;;  %v9070_v36 = vadd.f32 %v9054_v49, %v9015_v43  ;;  %v10943_v40 = vld [vmem:[#allocation3 + $0x10] sm:$0xff]  ;;  %v9073_v46 = vadd.f32 %v9057_v12, %v9018_v8  ;;  %v20220_v35 = vld [vmem:[#allocation223_spill] sm:$0xff]  ;;  %v20222_v8 = vld [vmem:[#allocation216_spill] sm:$0xff] }
 0x1f1   :  { %v928_v34 = vmul.f32 %v10943_v40, %v14504_v62  ;;  %3901 = vmatprep.subr.mxu0 %v20218_v7  ;;  %4094 = vmatmul.mubr.f32.vlgmr.msra.gmra.mxu1 %v20219_v11  ;;  %v8964_v19 = vmul.f32 %v14728_v32, %v14148_v42  ;;  %v9003_v2 = vmul.f32 %v14738_v33, %v14126_v5  ;;  %v20223_v12 = vand.u32 4294901760, %v20222_v8  ;;  %v10944_v39 = vld [vmem:[#allocation3 + $0x30] sm:$0xff] }
 0x1f2   :  { %3905 = vmatpush2.msra.mxu0 %v19593_v37  ;;  %4100 = vmatprep.mubr.f32.mxu1 %v20220_v35  ;;  %v9055_v13 = vmul.f32 %v14832_v27, %v14689_v61  ;;  %v9058_v43 = vmul.f32 %v14774_v16, %v14414_v56  ;;  %v14862_v49 = vrot.slane %v14840_v47, %v20178_v52  ;;  %v20225_v61 = vld [vmem:[#allocation88_spill] sm:$0xff]  ;;  %v14964_v5 = vand.u32 4294901760, %v14613_v29 }
 0x1f3   :  { %3909 = vmatprep.subr.mxu0 %v20223_v12  ;;  %9081 = vrot.lane.b32.xlu0 %v9069_v28, %s11170_s9  ;;  %v9016_v25 = vadd.f32 %v9000_v3, %v8961_v24  ;;  %v14869_v40 = vrot.slane %v14844_v55, %v20178_v52  ;;  %v8965_v0 = vmul.f32 %v14796_v60, %v20192_v20  ;;  %v20226_v12 = vld [vmem:[#allocation36_spill] sm:$0xff]  ;;  %v14880_v24 = vand.u32 4294901760, %v2375_v57  ;;  %v20228_v3 = vld [vmem:[#allocation219_spill] sm:$0xff] }
 0x1f4   :  { %20221 = vst [vmem:[#allocation157_spill] sm:$0xff] %v14862_v49  ;;  %8870 = vrot.lane.b32.xlu1 %v8846_v10, %s11163_s23  ;;  %3913 = vmatpush2.msra.mxu0 %v19593_v37  ;;  %v9004_v7 = vmul.f32 %v14800_v14, %v20193_v4  ;;  %v1226_v8 = vadd.f32 %v20225_v61, %v928_v34  ;;  %v20229_v56 = vand.u32 4294901760, %v20228_v3  ;;  %v14889_v4 = vand.u32 4294901760, %v14821_v63 }
 0x1f5   :  { %20224 = vst [vmem:[#allocation49_spill] sm:$0xff] %v14869_v40  ;;  %v1462_v28 = vmul.f32 %v19972_v51, %v20226_v12  ;;  %20227 = vst [vmem:[#allocation149_spill] sm:$0xff] %v14880_v24  ;;  %4102 = vmatmul.mubr.f32.gmra.mxu1 %v20230_v59  ;;  %v9019_v20 = vadd.f32 %v9003_v2, %v8964_v19  ;;  %v932_v10 = vmul.f32 %v10944_v39, %v14504_v62  ;;  %v20233_v51 = vld [vmem:[#allocation45_spill] sm:$0xff]  ;;  %v20237_v39 = vld [vmem:[#allocation222_spill] sm:$0xff] }
 0x1f6   :  { %3917 = vmatprep.subr.mxu0 %v20229_v56  ;;  %v1214_v26 = vmul.f32 %v20160_v1, %v20231_v31  ;;  %20232 = vst [vmem:[#allocation161_spill] sm:$0xff] %v14889_v4  ;;  %4108 = vmatprep.mubr.f32.mxu1 %v20233_v51  ;;  %v9188_v61 = vmul.f32 %v14862_v49, %v20190_v9  ;;  %v20234_v56 = vld [vmem:[#allocation91_spill] sm:$0xff]  ;;  %v20238_v1 = vand.u32 4294901760, %v20237_v39  ;;  %v20239_v2 = vld [vmem:[#allocation86_spill] sm:$0xff]  ;;  %20255 = vst [vmem:[#allocation165_spill] sm:$0xff] %v14964_v5 }
 0x1f7   :  { %3921 = vmatpush2.msra.mxu0 %v19593_v37  ;;  %v14897_v34 = vrot.slane %v14840_v47, %v20234_v56  ;;  %v14901_v62 = vrot.slane %v14844_v55, %v20234_v56  ;;  %9089 = vrot.lane.b32.xlu0 %v9070_v36, %s11170_s9  ;;  %v9071_v31 = vadd.f32 %v9055_v13, %v9016_v25  ;;  %v20242_v36 = vld [vmem:[#allocation227_spill] sm:$0xff] }
 0x1f8   :  { %3925 = vmatprep.subr.mxu0 %v20238_v1  ;;  %v9227_v19 = vmul.f32 %v14869_v40, %v20191_v50  ;;  %v14910_v12 = vadd.f32 %v20164_v54, %v20239_v2  ;;  %9083 = vrot.lane.b32.xlu1 %v9073_v46, %s11170_s9  ;;  %v9020_v3 = vadd.f32 %v9004_v7, %v8965_v0  ;;  %v14922_v54 = vand.u32 4294901760, %v14589_v23  ;;  %v20245_v0 = vld [vmem:[#allocation97_spill] sm:$0xff]  ;;  %v20246_v7 = vld [vmem:[#allocation70_spill] sm:$0xff] }
 0x1f9   :  { %20235 = vst [vmem:[#allocation240_spill] sm:$0xff] %v14897_v34  ;;  %20236 = vst [vmem:[#allocation167_spill] sm:$0xff] %v14901_v62  ;;  %3929 = vmatpush2.msra.mxu0 %v19593_v37  ;;  %v9059_v9 = vmul.f32 %v14832_v27, %v14768_v18  ;;  %v1478_v39 = vadd.f32 %v1462_v28, %v1226_v8  ;;  %v14917_v1 = vsub.f32 %v2375_v57, %v14880_v24  ;;  %v20247_v28 = vld [vmem:[#allocation51_spill] sm:$0xff]  ;;  %v20254_v50 = vld [vmem:[#allocation102_spill] sm:$0xff] }
 0x1fa   :  { %20240 = vst [vmem:[#allocation158_spill] sm:$0xff] %v14910_v12  ;;  %3933 = vmatmul.mubr.f32.vlgmr.msra.gmra.mxu0 %v20219_v11  ;;  %4110 = vmatmul.mubr.f32.gmra.mxu1 %v20242_v36  ;;  %v9074_v13 = vadd.f32 %v9058_v43, %v9019_v20  ;;  %20243 = vst [vmem:[#allocation160_spill] sm:$0xff] %v14922_v54  ;;  %v1230_v25 = vadd.f32 %v1214_v26, %v932_v10  ;;  %v20248_v26 = vld [vmem:[#allocation111_spill] sm:$0xff]  ;;  %v20253_v11 = vld [vmem:[#allocation60_spill] sm:$0xff] }
 0x1fb   :  { %20241 = vst [vmem:[#allocation243_spill] sm:$0xff] %v14917_v1  ;;  %v14926_v46 = vsub.f32 %v14821_v63, %v14889_v4  ;;  %4185 = vmatprep.subr.mxu0 %v19593_v37  ;;  %3939 = vmatprep.mubr.f32.mxu0 %v20220_v35  ;;  %v9191_v57 = vmul.f32 %v14897_v34, %v20245_v0  ;;  %v14948_v35 = vand.u32 4294901760, %v14592_v45 }
 0x1fc   :  { %v9230_v8 = vmul.f32 %v14901_v62, %v20246_v7  ;;  %4116 = vmatprep.mubr.f32.mxu1 %v20247_v28  ;;  %4187 = vmatpush1.msra.mxu0 %v19593_v37  ;;  %v9243_v20 = vadd.f32 %v9227_v19, %v9188_v61  ;;  %v8724_v43 = vmul.f32 %v14650_v30, %v20248_v26 }
 0x1fd   :  { %20244 = vst [vmem:[#allocation154_spill] sm:$0xff] %v14926_v46  ;;  %v8763_v63 = vmul.f32 %v14654_v21, %v14910_v12  ;;  %4502 = vmatprep.subr.mxu1 %v19593_v37  ;;  %9097 = vrot.lane.b32.xlu0 %v9071_v31, %s11170_s9  ;;  %v9075_v10 = vadd.f32 %v9059_v9, %v9020_v3  ;;  %20250 = vst [vmem:[#allocation159_spill] sm:$0xff] %v14948_v35  ;;  %v20251_v9 = vld [vmem:[#allocation89_spill] sm:$0xff]  ;;  %v20252_v3 = vld [vmem:[#allocation54_spill] sm:$0xff] }
 0x1fe   :  { %v9192_v2 = vmul.f32 %v14862_v49, %v20203_v44  ;;  %v14945_v18 = vadd.f32 %v14636_v22, %v1478_v39  ;;  %9091 = vrot.lane.b32.xlu1 %v9074_v13, %s11170_s9  ;;  %4508 = vmatpush1.msra.mxu1 %v19593_v37  ;;  %v9231_v61 = vmul.f32 %v14869_v40, %v20204_v15  ;;  %v20256_v15 = vld [vmem:[#allocation127_spill] sm:$0xff]  ;;  %v20265_v40 = vld [vmem:[#allocation153_spill] sm:$0xff] }
 0x1ff   :  { %v4255_v31 = vsub.f32 %v14589_v23, %v14922_v54  ;;  %v1482_v19 = vadd.f32 %v20251_v9, %v1230_v25  ;;  %3941 = vmatmul.mubr.f32.gmra.mxu0 %v20230_v59  ;;  %4118 = vmatmul.mubr.f32.gmra.mxu1 %v20252_v3  ;;  %v9246_v39 = vadd.f32 %v9230_v8, %v9191_v57  ;;  %v20257_v25 = vld [vmem:[#allocation39_spill] sm:$0xff]  ;;  %v20258_v59 = vld [vmem:[#allocation62_spill] sm:$0xff] }
 0x200   :  { %20249 = vst [vmem:[#allocation118_spill] sm:$0xff] %v14945_v18  ;;  %v9195_v44 = vmul.f32 %v14897_v34, %v20253_v11  ;;  %v9234_v13 = vmul.f32 %v14901_v62, %v20254_v50  ;;  %3947 = vmatprep.mubr.f32.mxu0 %v20233_v51  ;;  %4702 = vmatprep.mubr.f32.mxu1 %v20256_v15  ;;  %v20259_v62 = vld [vmem:[#allocation95_spill] sm:$0xff]  ;;  %v20260_v34 = vld [vmem:[#allocation92_spill] sm:$0xff] }
 0x201   :  { %v8779_v42 = vadd.f32 %v8763_v63, %v8724_v43  ;;  %v8951_v9 = vmul.f32 %v14703_v48, %v20257_v25  ;;  %v8990_v57 = vmul.f32 %v14715_v6, %v20258_v59  ;;  %9255 = vrot.lane.b32.xlu0 %v9243_v20, %s11172_s15  ;;  %v8818_v8 = vmul.f32 %v14693_v17, %v14945_v18  ;;  %v20261_v63 = vld [vmem:[#allocation236_spill] sm:$0xff]  ;;  %v20270_v49 = vld [vmem:[#allocation199_spill] sm:$0xff] }
 0x202   :  { %4826 = vmatprep.subr.mxu0 %v19593_v37  ;;  %v8728_v51 = vmul.f32 %v14650_v30, %v20259_v62  ;;  %v8767_v43 = vmul.f32 %v14654_v21, %v20260_v34  ;;  %v14981_v15 = vand.u32 4294901760, %v20261_v63  ;;  %9099 = vrot.lane.b32.xlu1 %v9075_v10, %s11170_s9  ;;  %v9247_v52 = vadd.f32 %v9231_v61, %v9192_v2  ;;  %v20264_v30 = vld [vmem:[#allocation234_spill] sm:$0xff]  ;;  %v20268_v61 = vld [vmem:[#allocation72_spill] sm:$0xff] }
 0x203   :  { %v4261_v20 = vsub.f32 %v14592_v45, %v14948_v35  ;;  %5028 = vmatprep.subr.mxu1 %v19593_v37  ;;  %v14988_v23 = vadd.f32 %v14636_v22, %v1482_v19  ;;  %3949 = vmatmul.mubr.f32.gmra.mxu0 %v20242_v36  ;;  %v4271_v21 = vsub.f32 %v14613_v29, %v14964_v5  ;;  %v14995_v59 = vand.u32 4294901760, %v20265_v40  ;;  %v20267_v10 = vld [vmem:[#allocation134_spill] sm:$0xff]  ;;  %v20269_v22 = vld [vmem:[#allocation144_spill] sm:$0xff] }
 0x204   :  { %20262 = vst [vmem:[#allocation162_spill] sm:$0xff] %v14981_v15  ;;  %4704 = vmatmul.mubr.f32.vlgmr.msra.gmra.mxu1 %v20264_v30  ;;  %v8952_v2 = vmul.f32 %v14728_v32, %v20267_v10  ;;  %v8991_v45 = vmul.f32 %v14738_v33, %v20268_v61  ;;  %3955 = vmatprep.mubr.f32.mxu0 %v20247_v28  ;;  %v15006_v29 = vand.u32 4294901760, %v14811_v38  ;;  %v15013_v28 = vand.u32 4294901760, %v14917_v1 }
 0x205   :  { %20263 = vst [vmem:[#allocation166_spill] sm:$0xff] %v14988_v23  ;;  %20266 = vst [vmem:[#allocation163_spill] sm:$0xff] %v14995_v59  ;;  %4710 = vmatprep.mubr.f32.mxu1 %v20269_v22  ;;  %v9250_v19 = vadd.f32 %v9234_v13, %v9195_v44  ;;  %v9006_v36 = vadd.f32 %v8990_v57, %v8951_v9  ;;  %v9045_v30 = vmul.f32 %v14748_v41, %v20270_v49  ;;  %v20274_v9 = vld [vmem:[#allocation110_spill] sm:$0xff]  ;;  %v20276_v57 = vld [vmem:[#allocation229_spill] sm:$0xff] }
 0x206   :  { %20271 = vst [vmem:[#allocation170_spill] sm:$0xff] %v15006_v29  ;;  %9279 = vrot.lane.b32.xlu0 %v9246_v39, %s11172_s15  ;;  %v8834_v25 = vadd.f32 %v8818_v8, %v8779_v42  ;;  %v8783_v5 = vadd.f32 %v8767_v43, %v8728_v51  ;;  %5030 = vmatpush1.msra.mxu1 %v19593_v37  ;;  %20272 = vst [vmem:[#allocation30_spill] sm:$0xff] %v15013_v28  ;;  %v15016_v44 = vand.u32 4294901760, %v4255_v31  ;;  %v20275_v42 = vld [vmem:[#allocation107_spill] sm:$0xff]  ;;  %v20278_v31 = vld [vmem:[#allocation74_spill] sm:$0xff] }
 0x207   :  { %v4277_v61 = vsub.f32 %v20261_v63, %v14981_v15  ;;  %9257 = vrot.lane.b32.xlu1 %v9247_v52, %s11172_s15  ;;  %v8822_v13 = vmul.f32 %v14693_v17, %v14988_v23  ;;  %v8955_v39 = vmul.f32 %v14703_v48, %v20274_v9  ;;  %v8994_v51 = vmul.f32 %v14715_v6, %v20275_v42  ;;  %v20279_v48 = vld [vmem:[#allocation151_spill] sm:$0xff] }
 0x208   :  { %20273 = vst [vmem:[#allocation31_spill] sm:$0xff] %v15016_v44  ;;  %5494 = vmatprep.subr.mxu1 %v19593_v37  ;;  %3957 = vmatmul.mubr.f32.gmra.mxu0 %v20252_v3  ;;  %v15027_v8 = vand.u32 4294901760, %v4261_v20  ;;  %v9007_v52 = vadd.f32 %v8991_v45, %v8952_v2  ;;  %v9046_v43 = vmul.f32 %v14774_v16, %v20278_v31  ;;  %v15035_v6 = vand.u32 4294901760, %v4271_v21  ;;  %v20281_v3 = vld [vmem:[#allocation104_spill] sm:$0xff]  ;;  %v20283_v21 = vld [vmem:[#allocation233_spill] sm:$0xff] }
 0x209   :  { %4712 = vmatmul.mubr.f32.gmra.mxu1 %v20276_v57  ;;  %v8953_v17 = vmul.f32 %v14796_v60, %v20248_v26  ;;  %4257 = vmatprep.mubr.f32.mxu0 %v15016_v44  ;;  %v8992_v49 = vmul.f32 %v14800_v14, %v14910_v12  ;;  %v8956_v20 = vmul.f32 %v14728_v32, %v20281_v3  ;;  %v20282_v57 = vld [vmem:[#allocation99_spill] sm:$0xff]  ;;  %v20284_v3 = vld [vmem:[#allocation61_spill] sm:$0xff] }
 0x20a   :  { %20277 = vst [vmem:[#allocation164_spill] sm:$0xff] %v15027_v8  ;;  %4718 = vmatprep.mubr.f32.mxu1 %v20279_v48  ;;  %20280 = vst [vmem:[#allocation172_spill] sm:$0xff] %v15035_v6  ;;  %v8995_v45 = vmul.f32 %v14738_v33, %v20282_v57  ;;  %8864 = vrot.lane.b32.xlu0 %v8834_v25, %s11163_s23  ;;  %v9061_v2 = vadd.f32 %v9045_v30, %v9006_v36  ;;  %v20285_v25 = vld [vmem:[#allocation131_spill] sm:$0xff] }
 0x20b   :  { %v4287_v31 = vsub.f32 %v20265_v40, %v14995_v59  ;;  %v15048_v44 = vrot.slane %v14666_v53, %v20234_v56  ;;  %v15052_v26 = vrot.slane %v20283_v21, %v20234_v56  ;;  %9281 = vrot.lane.b32.xlu1 %v9250_v19, %s11172_s15  ;;  %v8838_v32 = vadd.f32 %v8822_v13, %v8783_v5  ;;  %v20286_v19 = vld [vmem:[#allocation96_spill] sm:$0xff] }
 0x20c   :  { %v9010_v12 = vadd.f32 %v8994_v51, %v8955_v39  ;;  %v9049_v33 = vmul.f32 %v14748_v41, %v20284_v3  ;;  %v4293_v36 = vsub.f32 %v14811_v38, %v15006_v29  ;;  %4263 = vmatmul.mubr.f32.vlgmr.msra.gmra.mxu0 %v15027_v8  ;;  %v9062_v53 = vadd.f32 %v9046_v43, %v9007_v52  ;;  %v20301_v3 = vld [vmem:[#allocation62_spill] sm:$0xff] }
 0x20d   :  { %4720 = vmatmul.mubr.f32.gmra.mxu1 %v20285_v25  ;;  %v4303_v30 = vsub.f32 %v14917_v1, %v15013_v28  ;;  %v9047_v21 = vmul.f32 %v14832_v27, %v14945_v18  ;;  %4273 = vmatprep.mubr.f32.mxu0 %v15035_v6  ;;  %v9008_v5 = vadd.f32 %v8992_v49, %v8953_v17  ;;  %v15070_v39 = vand.u32 4294901760, %v14926_v46 }
 0x20e   :  { %4726 = vmatprep.mubr.f32.mxu1 %v14880_v24  ;;  %v9011_v41 = vadd.f32 %v8995_v45, %v8956_v20  ;;  %v9050_v13 = vmul.f32 %v14774_v16, %v20286_v19  ;;  %4829 = vmatpush1.msra.mxu0 %v19593_v37  ;;  %v15074_v51 = vand.u32 4294901760, %v4277_v61  ;;  %v8962_v52 = vmul.f32 %v15048_v44, %v20245_v0 }
 0x20f   :  { %20287 = vst [vmem:[#allocation90_spill] sm:$0xff] %v15070_v39  ;;  %9077 = vrot.lane.b32.xlu0 %v9061_v2, %s11170_s9  ;;  %v9001_v43 = vmul.f32 %v15052_v26, %v20246_v7  ;;  %v15082_v49 = vrot.slane %v14717_v58, %v20234_v56  ;;  %8866 = vrot.lane.b32.xlu1 %v8838_v32, %s11163_s23  ;;  %v15085_v16 = vand.u32 4294901760, %v4287_v31  ;;  %v15094_v45 = vand.u32 4294901760, %v4293_v36  ;;  %v20292_v2 = vld [vmem:[#allocation67_spill] sm:$0xff] }
 0x210   :  { %20288 = vst [vmem:[#allocation82_spill] sm:$0xff] %v15074_v51  ;;  %v9065_v17 = vadd.f32 %v9049_v33, %v9010_v12  ;;  %v8957_v20 = vmul.f32 %v14796_v60, %v20259_v62  ;;  %v8996_v61 = vmul.f32 %v14800_v14, %v20260_v34  ;;  %5267 = vmatprep.subr.mxu0 %v19593_v37  ;;  %v15098_v58 = vand.u32 4294901760, %v4303_v30  ;;  %v20293_v33 = vld [vmem:[#allocation41_spill] sm:$0xff] }
 0x211   :  { %20289 = vst [vmem:[#allocation168_spill] sm:$0xff] %v15085_v16  ;;  %4279 = vmatmul.mubr.f32.gmra.mxu0 %v15074_v51  ;;  %4728 = vmatmul.mubr.f32.gmra.mxu1 %v14889_v4  ;;  %20290 = vst [vmem:[#allocation173_spill] sm:$0xff] %v15094_v45  ;;  %v9063_v12 = vadd.f32 %v9047_v21, %v9008_v5  ;;  %v9066_v31 = vadd.f32 %v9050_v13, %v9011_v41  ;;  %v20294_v41 = vld [vmem:[#allocation165_spill] sm:$0xff] }
 0x212   :  { %4289 = vmatprep.mubr.f32.mxu0 %v15085_v16  ;;  %5098 = vmatprep.mubr.f32.mxu1 %v14922_v54  ;;  %20291 = vst [vmem:[#allocation94_spill] sm:$0xff] %v15098_v58  ;;  %v4309_v60 = vsub.f32 %v14926_v46, %v15070_v39  ;;  %v9017_v14 = vadd.f32 %v9001_v43, %v8962_v52  ;;  %v20310_v54 = vld [vmem:[#allocation231_spill] sm:$0xff] }
 0x213   :  { %9085 = vrot.lane.b32.xlu0 %v9062_v53, %s11170_s9  ;;  %v9056_v32 = vmul.f32 %v15082_v49, %v20292_v2  ;;  %v15107_v36 = vrot.slane %v14840_v47, %v20293_v33  ;;  %v15111_v18 = vrot.slane %v14844_v55, %v20293_v33  ;;  %9079 = vrot.lane.b32.xlu1 %v9065_v17, %s11170_s9  ;;  %v20297_v17 = vld [vmem:[#allocation64_spill] sm:$0xff] }
 0x214   :  { %v9012_v30 = vadd.f32 %v8996_v61, %v8957_v20  ;;  %v9051_v21 = vmul.f32 %v14832_v27, %v14988_v23  ;;  %v8966_v53 = vmul.f32 %v15048_v44, %v20253_v11  ;;  %v9005_v5 = vmul.f32 %v15052_v26, %v20254_v50  ;;  %v20296_v27 = vld [vmem:[#allocation120_spill] sm:$0xff]  ;;  %v20298_v23 = vld [vmem:[#allocation69_spill] sm:$0xff] }
 0x215   :  { %4295 = vmatmul.mubr.f32.gmra.mxu0 %v15094_v45  ;;  %5102 = vmatmul.mubr.f32.vlgmr.msra.gmra.mxu1 %v14948_v35  ;;  %v15125_v13 = vand.u32 4294901760, %v4309_v60  ;;  %v9072_v52 = vadd.f32 %v9056_v32, %v9017_v14  ;;  %v9189_v43 = vmul.f32 %v15107_v36, %v20296_v27  ;;  %v9228_v20 = vmul.f32 %v15111_v18, %v20297_v17  ;;  %v20299_v60 = vld [vmem:[#allocation39_spill] sm:$0xff]  ;;  %v20300_v14 = vld [vmem:[#allocation157_spill] sm:$0xff] }
 0x216   :  { %4305 = vmatprep.mubr.f32.mxu0 %v15098_v58  ;;  %5110 = vmatprep.mubr.f32.mxu1 %v20294_v41  ;;  %v9067_v61 = vadd.f32 %v9051_v21, %v9012_v30  ;;  %v9021_v2 = vadd.f32 %v9005_v5, %v8966_v53  ;;  %v9060_v19 = vmul.f32 %v15082_v49, %v20298_v23  ;;  %v20303_v21 = vld [vmem:[#allocation146_spill] sm:$0xff]  ;;  %v20304_v5 = vld [vmem:[#allocation59_spill] sm:$0xff] }
 0x217   :  { %9093 = vrot.lane.b32.xlu0 %v9063_v12, %s11170_s9  ;;  %20295 = vst [vmem:[#allocation169_spill] sm:$0xff] %v15125_v13  ;;  %5496 = vmatpush1.msra.mxu1 %v19593_v37  ;;  %v2632_v12 = vld [vmem:[%s18456_s6] sm:$0xf]  ;;  %v9180_v32 = vmul.f32 %v20300_v14, %v20299_v60  ;;  %v9244_v53 = vadd.f32 %v9228_v20, %v9189_v43 }
 0x218   :  { %9087 = vrot.lane.b32.xlu1 %v9066_v31, %s11170_s9  ;;  %5972 = vmatprep.subr.mxu1 %v19593_v37  ;;  %v20302_v31 = vld [vmem:[#allocation49_spill] sm:$0xff]  ;;  %v15149_v23 = vrot.slane %v2632_v12, %v20304_v5  ;;  %v9076_v41 = vadd.f32 %v9060_v19, %v9021_v2  ;;  %v20307_v45 = vld [vmem:[#allocation147_spill] sm:$0xff]  ;;  %v15161_v20 = vrot.slane %v2632_v12, %v20293_v33 }
 0x219   :  { %4311 = vmatmul.mubr.f32.gmra.mxu0 %v15125_v13  ;;  %5114 = vmatmul.mubr.f32.gmra.mxu1 %v14981_v15  ;;  %v9219_v30 = vmul.f32 %v20302_v31, %v20301_v3  ;;  %v20305_v15 = vld [vmem:[#allocation126_spill] sm:$0xff]  ;;  %v20306_v13 = vld [vmem:[#allocation125_spill] sm:$0xff]  ;;  %v20311_v19 = vld [vmem:[#allocation75_spill] sm:$0xff]  ;;  %v9184_v16 = vmul.f32 %v20300_v14, %v20274_v9 }
 0x21a   :  { %4928 = vmatprep.mubr.f32.mxu0 %v20303_v21  ;;  %5122 = vmatprep.mubr.f32.mxu1 %v14995_v59  ;;  %v9193_v35 = vmul.f32 %v15107_v36, %v20305_v15  ;;  %v9232_v58 = vmul.f32 %v15111_v18, %v20306_v13  ;;  %v20308_v21 = vld [vmem:[#allocation50_spill] sm:$0xff]  ;;  %v20312_v2 = vld [vmem:[#allocation167_spill] sm:$0xff] }
 0x21b   :  { %9105 = vrot.lane.b32.xlu0 %v9072_v52, %s11170_s9  ;;  %v9235_v59 = vadd.f32 %v9219_v30, %v9180_v32  ;;  %v20309_v52 = vld [vmem:[#allocation240_spill] sm:$0xff]  ;;  %v2794_v32 = vpop.f32.mrf.mxu0  ;;  %v8954_v12 = vmul.f32 %v15048_v44, %v20308_v21  ;;  %v8993_v30 = vmul.f32 %v15052_v26, %v20311_v19 }
 0x21c   :  { %9095 = vrot.lane.b32.xlu1 %v9067_v61, %s11170_s9  ;;  %v9183_v43 = vmul.f32 %v20309_v52, %v20308_v21  ;;  %v9222_v61 = vmul.f32 %v20312_v2, %v20311_v19  ;;  %v15373_v19 = vld [vmem:[#allocation12 + $0x10] sm:$0xff] }
 0x21d   :  { %4931 = vmatmul.mubr.f32.vlgmr.msra.gmra.mxu0 %v20307_v45  ;;  %5126 = vmatmul.mubr.f32.gmra.mxu1 %v15006_v29  ;;  %v9223_v29 = vmul.f32 %v20302_v31, %v20275_v42  ;;  %v2796_v14 = vpop.f32.mrf.mxu0  ;;  %v3235_v31 = vpop.f32.mrf.mxu1  ;;  %v20313_v45 = vld [vmem:[#allocation127_spill] sm:$0xff] }
 0x21e   :  { %4938 = vmatprep.mubr.f32.mxu0 %v20310_v54  ;;  %5134 = vmatprep.mubr.f32.mxu1 %v15013_v28  ;;  %v2795_v28 = vadd.f32 %v2794_v32, %v15149_v23  ;;  %v9248_v54 = vadd.f32 %v9232_v58, %v9193_v35  ;;  %v9238_v51 = vadd.f32 %v9222_v61, %v9183_v43  ;;  %v15219_v61 = vld [vmem:[#allocation10 + $0x43] ss:$8 sm:$0xf] }
 0x21f   :  { %5271 = vmatpush1.msra.mxu0 %v19593_v37  ;;  %9263 = vrot.lane.b32.xlu0 %v9244_v53, %s11172_s15  ;;  %v2797_v53 = vadd.f32 %v2796_v14, %v15161_v20  ;;  %v9239_v35 = vadd.f32 %v9223_v29, %v9184_v16  ;;  %v9009_v58 = vadd.f32 %v8993_v30, %v8954_v12  ;;  %v3237_v8 = vpop.f32.mrf.mxu1  ;;  %v20317_v14 = vld [vmem:[#allocation113_spill] sm:$0xff]  ;;  %v20319_v16 = vld [vmem:[#allocation234_spill] sm:$0xff] }
 0x220   :  { %9107 = vrot.lane.b32.xlu1 %v9076_v41, %s11170_s9  ;;  %5655 = vmatprep.subr.mxu0 %v19593_v37  ;;  %v15185_v6 = vadd.f32 %v3235_v31, %v2795_v28  ;;  %v20315_v41 = vld [vmem:[#allocation76_spill] sm:$0xff] }
 0x221   :  { %4941 = vmatmul.mubr.f32.gmra.mxu0 %v20261_v63  ;;  %5138 = vmatmul.mubr.f32.gmra.mxu1 %v15070_v39  ;;  %v9048_v32 = vmul.f32 %v15082_v49, %v20315_v41  ;;  %v20316_v63 = vld [vmem:[#allocation115_spill] sm:$0xff]  ;;  %v15199_v29 = vadd.f32 %v3237_v8, %v2797_v53  ;;  %v9224_v41 = vmul.f32 %v15111_v18, %v20282_v57 }
 0x222   :  { %4948 = vmatprep.mubr.f32.mxu0 %v20265_v40  ;;  %5562 = vmatprep.mubr.f32.mxu1 %v20313_v45  ;;  %20314 = vst [vmem:[#allocation174_spill] sm:$0xff] %v15185_v6  ;;  %v9187_v39 = vmul.f32 %v20309_v52, %v20316_v63  ;;  %v9226_v40 = vmul.f32 %v20312_v2, %v20317_v14  ;;  %v20320_v52 = vld [vmem:[#allocation72_spill] sm:$0xff] }
 0x223   :  { %9251 = vrot.lane.b32.xlu0 %v9235_v59, %s11172_s15  ;;  %v8958_v28 = vmul.f32 %v15048_v44, %v20316_v63  ;;  %v8997_v59 = vmul.f32 %v15052_v26, %v20317_v14  ;;  %20318 = vst [vmem:[#allocation46_spill] sm:$0xff] %v15199_v29  ;;  %v9220_v43 = vmul.f32 %v15111_v18, %v20320_v52  ;;  %v20321_v26 = vld [vmem:[#allocation71_spill] sm:$0xff] }
 0x224   :  { %9265 = vrot.lane.b32.xlu1 %v9248_v54, %s11172_s15  ;;  %v9181_v54 = vmul.f32 %v15107_v36, %v20267_v10  ;;  %v9064_v44 = vadd.f32 %v9048_v32, %v9009_v58  ;;  %v15213_v8 = vrot.slane %v14840_v47, %v20321_v26  ;;  %v15217_v2 = vrot.slane %v14844_v55, %v20321_v26  ;;  %v15221_v12 = vld [vmem:[#allocation10 + $0x24] ss:$8 sm:$0xf] }
 0x225   :  { %4951 = vmatmul.mubr.f32.gmra.mxu0 %v14811_v38  ;;  %5564 = vmatmul.mubr.f32.vlgmr.msra.gmra.mxu1 %v20319_v16  ;;  %v9242_v30 = vadd.f32 %v9226_v40, %v9187_v39  ;;  %v9013_v31 = vadd.f32 %v8997_v59, %v8958_v28  ;;  %v20323_v47 = vld [vmem:[#allocation229_spill] sm:$0xff]  ;;  %v15233_v55 = vrot.slane %v15219_v61, %v20304_v5  ;;  %v20325_v58 = vld [vmem:[#allocation148_spill] sm:$0xff]  ;;  %v20334_v29 = vld [vmem:[#allocation135_spill] sm:$0xff] }
 0x226   :  { %4958 = vmatprep.mubr.f32.mxu0 %v14917_v1  ;;  %5570 = vmatprep.mubr.f32.mxu1 %v20269_v22  ;;  %v15237_v40 = vrot.slane %v15221_v12, %v20304_v5  ;;  %v9236_v39 = vadd.f32 %v9220_v43, %v9181_v54  ;;  %v9229_v32 = vmul.f32 %v15217_v2, %v20325_v58  ;;  %v20326_v59 = vld [vmem:[#allocation104_spill] sm:$0xff]  ;;  %v20327_v54 = vld [vmem:[#allocation121_spill] sm:$0xff] }
 0x227   :  { %9275 = vrot.lane.b32.xlu0 %v9238_v51, %s11172_s15  ;;  %5978 = vmatpush1.msra.mxu1 %v19593_v37  ;;  %v20322_v51 = vld [vmem:[#allocation136_spill] sm:$0xff]  ;;  %v9375_v43 = vmul.f32 %v15233_v55, %v20327_v54  ;;  %v15261_v18 = vrot.slane %v15219_v61, %v20293_v33  ;;  %v20330_v38 = vld [vmem:[#allocation53_spill] sm:$0xff] }
 0x228   :  { %9253 = vrot.lane.b32.xlu1 %v9239_v35, %s11172_s15  ;;  %v9052_v53 = vmul.f32 %v15082_v49, %v20322_v51  ;;  %6498 = vmatprep.subr.mxu1 %v19593_v37  ;;  %v20324_v49 = vld [vmem:[#allocation66_spill] sm:$0xff]  ;;  %v9185_v51 = vmul.f32 %v15107_v36, %v20326_v59 }
 0x229   :  { %4961 = vmatmul.mubr.f32.gmra.mxu0 %v14926_v46  ;;  %5572 = vmatmul.mubr.f32.gmra.mxu1 %v20323_v47  ;;  %v9190_v35 = vmul.f32 %v15213_v8, %v20324_v49  ;;  %v20329_v46 = vld [vmem:[#allocation68_spill] sm:$0xff] }
 0x22a   :  { %5401 = vmatprep.mubr.f32.mxu0 %v20313_v45  ;;  %5578 = vmatprep.mubr.f32.mxu1 %v20279_v48  ;;  %v9068_v28 = vadd.f32 %v9052_v53, %v9013_v31  ;;  %v15265_v31 = vrot.slane %v15221_v12, %v20293_v33  ;;  %v9240_v53 = vadd.f32 %v9224_v41, %v9185_v51  ;;  %v20333_v51 = vld [vmem:[#allocation56_spill] sm:$0xff] }
 0x22b   :  { %9101 = vrot.lane.b32.xlu0 %v9064_v44, %s11170_s9  ;;  %v20328_v44 = vld [vmem:[#allocation123_spill] sm:$0xff]  ;;  %v9245_v36 = vadd.f32 %v9229_v32, %v9190_v35  ;;  %v9194_v1 = vmul.f32 %v15213_v8, %v20329_v46  ;;  %v20332_v32 = vld [vmem:[#allocation57_spill] sm:$0xff] }
 0x22c   :  { %9277 = vrot.lane.b32.xlu1 %v9242_v30, %s11172_s15  ;;  %v9414_v30 = vmul.f32 %v15237_v40, %v20328_v44  ;;  %v9233_v44 = vmul.f32 %v15217_v2, %v20330_v38  ;;  %v9379_v41 = vmul.f32 %v15233_v55, %v20332_v32 }
 0x22d   :  { %5403 = vmatmul.mubr.f32.vlgmr.msra.gmra.mxu0 %v20319_v16  ;;  %5580 = vmatmul.mubr.f32.gmra.mxu1 %v20285_v25  ;;  %v9376_v16 = vmul.f32 %v15261_v18, %v20296_v27 }
 0x22e   :  { %5409 = vmatprep.mubr.f32.mxu0 %v20269_v22  ;;  %5586 = vmatprep.mubr.f32.mxu1 %v14880_v24  ;;  %v9430_v35 = vadd.f32 %v9414_v30, %v9375_v43  ;;  %v2810_v22 = vpop.f32.mrf.mxu0  ;;  %v15292_v43 = vrot.slane %v15221_v12, %v20321_v26  ;;  %v9249_v30 = vadd.f32 %v9233_v44, %v9194_v1  ;;  %v3243_v44 = vpop.f32.mrf.mxu1 }
 0x22f   :  { %5657 = vmatpush1.msra.mxu0 %v19593_v37  ;;  %9259 = vrot.lane.b32.xlu0 %v9236_v39, %s11172_s15  ;;  %v20331_v39 = vld [vmem:[#allocation213_spill] sm:$0xff] }
 0x230   :  { %9103 = vrot.lane.b32.xlu1 %v9068_v28, %s11170_s9  ;;  %6296 = vmatprep.subr.mxu0 %v19593_v37  ;;  %v9418_v28 = vmul.f32 %v15237_v40, %v20333_v51  ;;  %v2811_v51 = vadd.f32 %v2810_v22, %v15149_v23  ;;  %v9416_v22 = vmul.f32 %v15292_v43, %v20325_v58  ;;  %v20339_v58 = vld [vmem:[#allocation40_spill] sm:$0xff] }
 0x231   :  { %5411 = vmatmul.mubr.f32.gmra.mxu0 %v20323_v47  ;;  %5588 = vmatmul.mubr.f32.gmra.mxu1 %v14889_v4  ;;  %v9415_v47 = vmul.f32 %v15265_v31, %v20297_v17  ;;  %v20335_v17 = vld [vmem:[#allocation223_spill] sm:$0xff] }
 0x232   :  { %5417 = vmatprep.mubr.f32.mxu0 %v20279_v48  ;;  %6172 = vmatprep.mubr.f32.mxu1 %v20331_v39  ;;  %v15288_v48 = vrot.slane %v15219_v61, %v20321_v26  ;;  %v9434_v6 = vadd.f32 %v9418_v28, %v9379_v41  ;;  %v9419_v41 = vmul.f32 %v15265_v31, %v20306_v13  ;;  %v15312_v28 = vld [vmem:[#allocation10 + $0x26] ss:$8 sm:$0xf] }
 0x233   :  { %9271 = vrot.lane.b32.xlu0 %v9245_v36, %s11172_s15  ;;  %v2812_v36 = vpop.f32.mrf.mxu0  ;;  %v9431_v26 = vadd.f32 %v9415_v47, %v9376_v16  ;;  %v15315_v16 = vadd.f32 %v3243_v44, %v2811_v51  ;;  %v20337_v47 = vld [vmem:[#allocation156_spill] sm:$0xff]  ;;  %v15329_v51 = vrot.slane %v15312_v28, %v20304_v5  ;;  %v20350_v5 = vld [vmem:[#allocation145_spill] sm:$0xff] }
 0x234   :  { %9261 = vrot.lane.b32.xlu1 %v9240_v53, %s11172_s15  ;;  %v2813_v14 = vadd.f32 %v2812_v36, %v15161_v20  ;;  %v9377_v1 = vmul.f32 %v15288_v48, %v20324_v49  ;;  %v9380_v53 = vmul.f32 %v15261_v18, %v20305_v15  ;;  %v20338_v36 = vld [vmem:[#allocation80_spill] sm:$0xff]  ;;  %v15336_v49 = vld [vmem:[#allocation12 + $0x70] sm:$0xff]  ;;  %v20357_v15 = vld [vmem:[#allocation34_spill] sm:$0xff] }
 0x235   :  { %5419 = vmatmul.mubr.f32.gmra.mxu0 %v20285_v25  ;;  %6174 = vmatmul.mubr.f32.vlgmr.msra.gmra.mxu1 %v20334_v29  ;;  %20336 = vst [vmem:[#allocation42_spill] sm:$0xff] %v15315_v16  ;;  %20342 = vst [vmem:[#allocation178_spill] sm:$0xff] %v15329_v51  ;;  %v20352_v16 = vld [vmem:[#allocation111_spill] sm:$0xff]  ;;  %v2826_v21 = vpop.f32.mrf.mxu0 }
 0x236   :  { %5425 = vmatprep.mubr.f32.mxu0 %v14880_v24  ;;  %6180 = vmatprep.mubr.f32.mxu1 %v20335_v17  ;;  %v20340_v24 = vld [vmem:[#allocation45_spill] sm:$0xff]  ;;  %v9432_v13 = vadd.f32 %v9416_v22, %v9377_v1  ;;  %v9435_v44 = vadd.f32 %v9419_v41, %v9380_v53  ;;  %v15341_v1 = vld [vmem:[#allocation12 + $0x50] sm:$0xff]  ;;  %v20345_v22 = vld [vmem:[#allocation124_spill] sm:$0xff]  ;;  %v9561_v53 = vmul.f32 %v15329_v51, %v20327_v54 }
 0x237   :  { %9442 = vrot.lane.b32.xlu0 %v9430_v35, %s11172_s15  ;;  %6500 = vmatpush1.msra.mxu1 %v19593_v37  ;;  %v15318_v35 = vadd.s32 256, %v20337_v47  ;;  %v15351_v41 = vrot.slane %v15312_v28, %v20234_v56  ;;  %v15363_v54 = vld [vmem:[#allocation12 + $0x30] sm:$0xff] }
 0x238   :  { %9273 = vrot.lane.b32.xlu1 %v9249_v30, %s11172_s15  ;;  %6964 = vmatprep.subr.mxu1 %v19593_v37  ;;  %v3245_v30 = vpop.f32.mrf.mxu1 }
 0x239   :  { %5427 = vmatmul.mubr.f32.gmra.mxu0 %v14889_v4  ;;  %6182 = vmatmul.mubr.f32.gmra.mxu1 %v20338_v36  ;;  %v15324_v25 = vadd.f32 %v3245_v30, %v2813_v14  ;;  %v9381_v4 = vmul.f32 %v15288_v48, %v20329_v46  ;;  %vm661_vm3 = vcmp.ge.s32.totalorder %v15318_v35, 352  ;;  %v20343_v14 = vld [vmem:[#allocation38_spill] sm:$0xff]  ;;  %20347 = vst [vmem:[#allocation228_spill] sm:$0xff] %v15351_v41  ;;  %vm617_vm4 = vcmp.ge.s32.totalorder %v15318_v35, 320 }
 0x23a   :  { %5727 = vmatprep.mubr.f32.mxu0 %v20339_v58  ;;  %6188 = vmatprep.mubr.f32.mxu1 %v20340_v24  ;;  %v9420_v58 = vmul.f32 %v15292_v43, %v20330_v38  ;;  %v685_v30 = vsel %vm661_vm3, %v15336_v49, 0.0  ;;  %v20349_v38 = vld [vmem:[#allocation54_spill] sm:$0xff]  ;;  %v3251_v46 = vpop.f32.mrf.mxu1  ;;  %vm621_vm5 = vcmp.lt.s32.totalorder %v15318_v35, 352  ;;  %vm573_vm10 = vcmp.ge.s32.totalorder %v15318_v35, 288 }
 0x23b   :  { %20341 = vst [vmem:[#allocation171_spill] sm:$0xff] %v15324_v25  ;;  %9450 = vrot.lane.b32.xlu0 %v9431_v26, %s11172_s15  ;;  %v20344_v26 = vld [vmem:[#allocation227_spill] sm:$0xff]  ;;  %v20351_v25 = vld [vmem:[#allocation33_spill] sm:$0xff]  ;;  %v15371_v63 = vand.u32 4294901760, %v685_v30  ;;  %vm15409_vm6 = vmand %vm617_vm4, %vm621_vm5  ;;  %vm577_vm11 = vcmp.lt.s32.totalorder %v15318_v35, 320  ;;  %vm533_vm9 = vcmp.lt.s32.totalorder %v15318_v35, 288 }
 0x23c   :  { %9444 = vrot.lane.b32.xlu1 %v9434_v6, %s11172_s15  ;;  %v20346_v6 = vld [vmem:[#allocation51_spill] sm:$0xff]  ;;  %v3253_v47 = vpop.f32.mrf.mxu1  ;;  %vm15541_vm7 = vmand %vm573_vm10, %vm577_vm11 }
 0x23d   :  { %5733 = vmatmul.mubr.f32.vlgmr.msra.gmra.mxu0 %v20343_v14  ;;  %6190 = vmatmul.mubr.f32.gmra.mxu1 %v20344_v26  ;;  %v9436_v14 = vadd.f32 %v9420_v58, %v9381_v4  ;;  %v9182_v4 = vmul.f32 %v15213_v8, %v20352_v16  ;;  %20354 = vst [vmem:[#allocation175_spill] sm:$0xff] %v15371_v63 }
 0x23e   :  { %5743 = vmatprep.mubr.f32.mxu0 %v20345_v22  ;;  %6196 = vmatprep.mubr.f32.mxu1 %v20346_v6  ;;  %v20348_v22 = vld [vmem:[#allocation55_spill] sm:$0xff]  ;;  %v2827_v6 = vadd.f32 %v2826_v21, %v15149_v23 }
 0x23f   :  { %6299 = vmatpush1.msra.mxu0 %v19593_v37  ;;  %9458 = vrot.lane.b32.xlu0 %v9432_v13, %s11172_s15  ;;  %v681_v13 = vsel %vm661_vm3, %v15341_v1, 0.0  ;;  %v15398_v27 = vpop.permute.xlu0 %8852  ;;  %v20410_v21 = vld [vmem:[#allocation227_spill] sm:$0xff] }
 0x240   :  { %9452 = vrot.lane.b32.xlu1 %v9435_v44, %s11172_s15  ;;  %6737 = vmatprep.subr.mxu0 %v19593_v37  ;;  %v20353_v44 = vld [vmem:[#allocation158_spill] sm:$0xff]  ;;  %v15378_v45 = vand.u32 4294901760, %v681_v13  ;;  %20360 = vst [vmem:[#allocation176_spill] sm:$0xff] %v15398_v27  ;;  %v20368_v27 = vld [vmem:[#allocation117_spill] sm:$0xff] }
 0x241   :  { %5749 = vmatmul.mubr.f32.gmra.mxu0 %v20348_v22  ;;  %6198 = vmatmul.mubr.f32.gmra.mxu1 %v20349_v38  ;;  %v9221_v58 = vmul.f32 %v15217_v2, %v20353_v44  ;;  %v9564_v22 = vmul.f32 %v15351_v41, %v20245_v0  ;;  %v9367_v38 = vmul.f32 %v15233_v55, %v20299_v60  ;;  %v2828_v60 = vpop.f32.mrf.mxu0 }
 0x242   :  { %5759 = vmatprep.mubr.f32.mxu0 %v20350_v5  ;;  %6568 = vmatprep.mubr.f32.mxu1 %v20351_v25  ;;  %20355 = vst [vmem:[#allocation179_spill] sm:$0xff] %v15378_v45  ;;  %v9565_v25 = vmul.f32 %v15329_v51, %v20332_v32  ;;  %v677_v5 = vsel %vm661_vm3, %v15363_v54, 0.0  ;;  %v20358_v32 = vld [vmem:[#allocation150_spill] sm:$0xff]  ;;  %v20359_v51 = vld [vmem:[#allocation84_spill] sm:$0xff] }
 0x243   :  { %9573 = vrot.lane.b32.xlu0 %v9561_v53, %s11170_s9  ;;  %v20356_v53 = vld [vmem:[#allocation242_spill] sm:$0xff]  ;;  %v9237_v26 = vadd.f32 %v9221_v58, %v9182_v4  ;;  %v15421_v4 = vadd.f32 %v3251_v46, %v2827_v6  ;;  %v9568_v58 = vmul.f32 %v15351_v41, %v20253_v11  ;;  %v9368_v46 = vmul.f32 %v15261_v18, %v20267_v10  ;;  %v15453_v10 = vpop.permute.xlu1 %8854 }
 0x244   :  { %9460 = vrot.lane.b32.xlu1 %v9436_v14, %s11172_s15  ;;  %v673_v14 = vsel %vm661_vm3, %v15373_v19, 0.0  ;;  %v9407_v6 = vmul.f32 %v15265_v31, %v20320_v52  ;;  %20373 = vst [vmem:[#allocation105_spill] sm:$0xff] %v15453_v10  ;;  %v20378_v10 = vld [vmem:[#allocation237_spill] sm:$0xff] }
 0x245   :  { %5765 = vmatmul.mubr.f32.gmra.mxu0 %v20356_v53  ;;  %6572 = vmatmul.mubr.f32.vlgmr.msra.gmra.mxu1 %v20357_v15  ;;  %v9406_v15 = vmul.f32 %v15237_v40, %v20301_v3  ;;  %v15403_v53 = vsub.f32 %v685_v30, %v15371_v63  ;;  %v2829_v30 = vadd.f32 %v2828_v60, %v15161_v20  ;;  %v20369_v60 = vld [vmem:[#allocation226_spill] sm:$0xff]  ;;  %v15451_v52 = vpop.permute.xlu0 %8876 }
 0x246   :  { %5775 = vmatprep.mubr.f32.mxu0 %v20358_v32  ;;  %6580 = vmatprep.mubr.f32.mxu1 %v20359_v51  ;;  %v15416_v32 = vsub.f32 %v681_v13, %v15378_v45  ;;  %v15418_v51 = vand.u32 4294901760, %v677_v5  ;;  %20366 = vst [vmem:[#allocation182_spill] sm:$0xff] %v15421_v4  ;;  %v9186_v3 = vmul.f32 %v15213_v8, %v20259_v62  ;;  %v15431_v13 = vand.u32 4294901760, %v673_v14  ;;  %v20371_v4 = vld [vmem:[#allocation235_spill] sm:$0xff] }
 0x247   :  { %20361 = vst [vmem:[#allocation103_spill] sm:$0xff] %v15403_v53  ;;  %9597 = vrot.lane.b32.xlu0 %v9564_v22, %s11170_s9  ;;  %6966 = vmatpush1.msra.mxu1 %v19593_v37  ;;  %v9225_v22 = vmul.f32 %v15217_v2, %v20260_v34  ;;  %v641_v8 = vsel %vm15409_vm6, %v15336_v49, 0.0  ;;  %v20370_v2 = vld [vmem:[#allocation218_spill] sm:$0xff]  ;;  %v9422_v41 = vadd.f32 %v9406_v15, %v9367_v38  ;;  %20372 = vst [vmem:[#allocation130_spill] sm:$0xff] %v15451_v52 }
 0x248   :  { %20364 = vst [vmem:[#allocation129_spill] sm:$0xff] %v15416_v32  ;;  %20365 = vst [vmem:[#allocation27_spill] sm:$0xff] %v15418_v51  ;;  %9575 = vrot.lane.b32.xlu1 %v9565_v25, %s11170_s9  ;;  %7262 = vmatprep.subr.mxu1 %v19593_v37  ;;  %v15442_v25 = vadd.f32 %v3253_v47, %v2829_v30  ;;  %v9371_v47 = vmul.f32 %v15233_v55, %v20274_v9 }
 0x249   :  { %20367 = vst [vmem:[#allocation177_spill] sm:$0xff] %v15431_v13  ;;  %5781 = vmatmul.mubr.f32.gmra.mxu0 %v20368_v27  ;;  %6584 = vmatmul.mubr.f32.gmra.mxu1 %v20369_v60  ;;  %v637_v60 = vsel %vm15409_vm6, %v15341_v1, 0.0  ;;  %v9410_v30 = vmul.f32 %v15237_v40, %v20275_v42  ;;  %v15461_v15 = vsub.f32 %v677_v5, %v15418_v51  ;;  %v20377_v27 = vld [vmem:[#allocation35_spill] sm:$0xff] }
 0x24a   :  { %6398 = vmatprep.mubr.f32.mxu0 %v20370_v2  ;;  %6592 = vmatprep.mubr.f32.mxu1 %v20371_v4  ;;  %v9241_v4 = vadd.f32 %v9225_v22, %v9186_v3  ;;  %v15467_v2 = vand.u32 4294901760, %v641_v8  ;;  %v9423_v55 = vadd.f32 %v9407_v6, %v9368_v46  ;;  %v9369_v40 = vmul.f32 %v15288_v48, %v20352_v16  ;;  %v20380_v5 = vld [vmem:[#allocation83_spill] sm:$0xff] }
 0x24b   :  { %9267 = vrot.lane.b32.xlu0 %v9237_v26, %s11172_s15  ;;  %20374 = vst [vmem:[#allocation195_spill] sm:$0xff] %v15461_v15  ;;  %v15465_v26 = vsub.f32 %v673_v14, %v15431_v13  ;;  %v15473_v38 = vand.u32 4294901760, %v637_v60  ;;  %v20381_v42 = vld [vmem:[#allocation47_spill] sm:$0xff]  ;;  %v20382_v3 = vand.u32 4294901760, %v15403_v53  ;;  %v633_v22 = vsel %vm15409_vm6, %v15363_v54, 0.0 }
 0x24c   :  { %9599 = vrot.lane.b32.xlu1 %v9568_v58, %s11170_s9  ;;  %20376 = vst [vmem:[#allocation180_spill] sm:$0xff] %v15467_v2  ;;  %v9408_v58 = vmul.f32 %v15292_v43, %v20353_v44  ;;  %v20383_v46 = vand.u32 4294901760, %v15416_v32 }
 0x24d   :  { %20375 = vst [vmem:[#allocation183_spill] sm:$0xff] %v15465_v26  ;;  %6401 = vmatmul.mubr.f32.vlgmr.msra.gmra.mxu0 %v20377_v27  ;;  %6596 = vmatmul.mubr.f32.gmra.mxu1 %v20378_v10  ;;  %20379 = vst [vmem:[#allocation221_spill] sm:$0xff] %v15473_v38  ;;  %v7266_v14 = vsub.f32 %v15403_v53, %v20382_v3  ;;  %v15484_v10 = vrot.slane %v15219_v61, %v20234_v56  ;;  %v15497_v61 = vpop.permute.xlu0 %8860  ;;  %v15517_v27 = vand.u32 4294901760, %v633_v22  ;;  %v15713_v53 = vld [vmem:[#allocation12 + $0x58] sm:$0xff] }
 0x24e   :  { %6408 = vmatprep.mubr.f32.mxu0 %v20380_v5  ;;  %6604 = vmatprep.mubr.f32.mxu1 %v20381_v42  ;;  %v9426_v42 = vadd.f32 %v9410_v30, %v9371_v47  ;;  %v7278_v6 = vsub.f32 %v15416_v32, %v20383_v46  ;;  %20384 = vst [vmem:[#allocation186_spill] sm:$0xff] %v15497_v61  ;;  %v15499_v5 = vpop.permute.xlu1 %8878  ;;  %v20387_v30 = vld [vmem:[#allocation224_spill] sm:$0xff] }
 0x24f   :  { %6741 = vmatpush1.msra.mxu0 %v19593_v37  ;;  %9438 = vrot.lane.b32.xlu0 %v9422_v41, %s11172_s15  ;;  %20385 = vst [vmem:[#allocation202_spill] sm:$0xff] %v15499_v5  ;;  %v15504_v41 = vrot.slane %v15221_v12, %v20234_v56  ;;  %v15508_v47 = vsub.f32 %v641_v8, %v15467_v2  ;;  %20389 = vst [vmem:[#allocation187_spill] sm:$0xff] %v15517_v27  ;;  %v20390_v12 = vld [vmem:[#allocation230_spill] sm:$0xff]  ;;  %v7267_v8 = vand.u32 4294901760, %v7266_v14 }
 0x250   :  { %9269 = vrot.lane.b32.xlu1 %v9241_v4, %s11172_s15  ;;  %7065 = vmatprep.subr.mxu0 %v19593_v37  ;;  %v20388_v4 = vld [vmem:[#allocation116_spill] sm:$0xff]  ;;  %v9372_v46 = vmul.f32 %v15261_v18, %v20326_v59  ;;  %v9411_v3 = vmul.f32 %v15265_v31, %v20282_v57  ;;  %v9424_v44 = vadd.f32 %v9408_v58, %v9369_v40  ;;  %v20391_v18 = vand.u32 4294901760, %v15461_v15 }
 0x251   :  { %20386 = vst [vmem:[#allocation181_spill] sm:$0xff] %v15508_v47  ;;  %6411 = vmatmul.mubr.f32.gmra.mxu0 %v20387_v30  ;;  %6608 = vmatmul.mubr.f32.gmra.mxu1 %v20388_v4  ;;  %v9378_v56 = vmul.f32 %v15484_v10, %v20245_v0  ;;  %v629_v30 = vsel %vm15409_vm6, %v15373_v19, 0.0  ;;  %v9373_v4 = vmul.f32 %v15288_v48, %v20259_v62  ;;  %v20395_v58 = vand.u32 4294901760, %v15465_v26  ;;  %v15554_v0 = vpop.permute.xlu0 %8848  ;;  %v15792_v62 = vld [vmem:[#allocation12 + $0x18] sm:$0xff] }
 0x252   :  { %6418 = vmatprep.mubr.f32.mxu0 %v20390_v12  ;;  %7032 = vmatprep.mubr.f32.mxu1 %v20331_v39  ;;  %v7290_v31 = vsub.f32 %v15461_v15, %v20391_v18  ;;  %v9412_v14 = vmul.f32 %v15292_v43, %v20260_v34  ;;  %v15535_v40 = vsub.f32 %v637_v60, %v15473_v38  ;;  %v3259_v12 = vpop.f32.mrf.mxu1  ;;  %v20396_v18 = vld [vmem:[#allocation232_spill] sm:$0xff]  ;;  %v15556_v5 = vpop.permute.xlu1 %8862 }
 0x253   :  { %9446 = vrot.lane.b32.xlu0 %v9423_v55, %s11172_s15  ;;  %v7279_v55 = vand.u32 4294901760, %v7278_v6  ;;  %v7302_v48 = vsub.f32 %v15465_v26, %v20395_v58  ;;  %v9417_v43 = vmul.f32 %v15504_v41, %v20246_v7  ;;  %v9427_v34 = vadd.f32 %v9411_v3, %v9372_v46  ;;  %20397 = vst [vmem:[#allocation184_spill] sm:$0xff] %v15554_v0  ;;  %v2842_v60 = vpop.f32.mrf.mxu0  ;;  %v20427_v15 = vld [vmem:[#allocation228_spill] sm:$0xff] }
 0x254   :  { %20392 = vst [vmem:[#allocation188_spill] sm:$0xff] %v15535_v40  ;;  %9440 = vrot.lane.b32.xlu1 %v9426_v42, %s11172_s15  ;;  %20398 = vst [vmem:[#allocation37_spill] sm:$0xff] %v15556_v5  ;;  %v20399_v42 = vld [vmem:[#allocation122_spill] sm:$0xff]  ;;  %v15559_v6 = vand.u32 4294901760, %v629_v30  ;;  %v597_v58 = vsel %vm15541_vm7, %v15336_v49, 0.0  ;;  %v19101_v3 = vand.u32 4294901760, %v15535_v40  ;;  %v15568_v46 = vsub.f32 %v633_v22, %v15517_v27  ;;  %v3261_v26 = vpop.f32.mrf.mxu1 }
 0x255   :  { %6421 = vmatmul.mubr.f32.gmra.mxu0 %v20396_v18  ;;  %7034 = vmatmul.mubr.f32.vlgmr.msra.gmra.mxu1 %v20334_v29  ;;  %v7291_v18 = vand.u32 4294901760, %v7290_v31  ;;  %v9433_v7 = vadd.f32 %v9417_v43, %v9378_v56  ;;  %v9428_v57 = vadd.f32 %v9412_v14, %v9373_v4  ;;  %v20402_v0 = vand.u32 4294901760, %v15508_v47  ;;  %v2844_v52 = vpop.f32.mrf.mxu0  ;;  %v20404_v31 = vld [vmem:[#allocation128_spill] sm:$0xff] }
 0x256   :  { %7268 = vmatpush1.msra.mxu1 %v7267_v8  ;;  %6428 = vmatprep.mubr.f32.mxu0 %v20399_v42  ;;  %20400 = vst [vmem:[#allocation48_spill] sm:$0xff] %v15559_v6  ;;  %20401 = vst [vmem:[#allocation140_spill] sm:$0xff] %v15568_v46  ;;  %v2843_v8 = vadd.f32 %v2842_v60, %v15149_v23  ;;  %v7303_v42 = vand.u32 4294901760, %v7302_v48  ;;  %v15577_v22 = vand.u32 4294901760, %v597_v58  ;;  %v593_v23 = vsel %vm15541_vm7, %v15341_v1, 0.0  ;;  %v8851_v4 = vpop.permute.xlu1 %8850 }
 0x257   :  { %7040 = vmatprep.mubr.f32.mxu1 %v20335_v17  ;;  %7274 = vmatprep.subr.mxu1 %v19593_v37  ;;  %v7314_v61 = vsub.f32 %v15508_v47, %v20402_v0  ;;  %v15587_v0 = vpop.permute.xlu0 %8872  ;;  %v9382_v14 = vmul.f32 %v15484_v10, %v20253_v11  ;;  %v19102_v48 = vand.u32 4294901760, %v15568_v46  ;;  %v15609_v60 = vand.u32 4294901760, %v593_v23  ;;  %v20426_v47 = vld [vmem:[#allocation50_spill] sm:$0xff] }
 0x258   :  { %7280 = vmatpush1.msra.mxu1 %v7279_v55  ;;  %9454 = vrot.lane.b32.xlu0 %v9424_v44, %s11172_s15  ;;  %20403 = vst [vmem:[#allocation189_spill] sm:$0xff] %v15577_v22  ;;  %v2845_v44 = vadd.f32 %v2844_v52, %v15161_v20  ;;  %v15583_v56 = vadd.f32 %v3259_v12, %v2843_v8  ;;  %20405 = vst [vmem:[#allocation185_spill] sm:$0xff] %v15587_v0  ;;  %v585_v12 = vsel %vm15541_vm7, %v15373_v19, 0.0 }
 0x259   :  { %9448 = vrot.lane.b32.xlu1 %v9427_v34, %s11172_s15  ;;  %7286 = vmatprep.subr.mxu1 %v19593_v37  ;;  %v15591_v34 = vrot.slane %v15312_v28, %v20293_v33  ;;  %v15596_v55 = vsub.f32 %v629_v30, %v15559_v6  ;;  %v7326_v20 = vsub.f32 %v15535_v40, %v19101_v3  ;;  %v7315_v30 = vand.u32 4294901760, %v7314_v61  ;;  %v20409_v61 = vld [vmem:[#allocation120_spill] sm:$0xff] }
 0x25a   :  { %6431 = vmatmul.mubr.f32.gmra.mxu0 %v20404_v31  ;;  %7042 = vmatmul.mubr.f32.gmra.mxu1 %v20338_v36  ;;  %v9421_v52 = vmul.f32 %v15504_v41, %v20254_v50  ;;  %v15605_v43 = vadd.f32 %v3261_v26, %v2845_v44  ;;  %20407 = vst [vmem:[#allocation106_spill] sm:$0xff] %v15609_v60  ;;  %v15638_v31 = vand.u32 4294901760, %v585_v12  ;;  %v553_v11 = vsel %vm533_vm9, %v15336_v49, 0.0 }
 0x25b   :  { %20406 = vst [vmem:[#allocation109_spill] sm:$0xff] %v15596_v55  ;;  %7292 = vmatpush1.msra.mxu1 %v7291_v18  ;;  %6871 = vmatprep.mubr.f32.mxu0 %v20331_v39  ;;  %v589_v39 = vsel %vm15541_vm7, %v15363_v54, 0.0  ;;  %v15619_v26 = vsub.f32 %v597_v58, %v15577_v22  ;;  %v9562_v18 = vmul.f32 %v15591_v34, %v20409_v61  ;;  %v15632_v58 = vpop.permute.xlu0 %8856  ;;  %v15728_v35 = vpop.f32.mrf.mxu1 }
 0x25c   :  { %7048 = vmatprep.mubr.f32.mxu1 %v20340_v24  ;;  %7298 = vmatprep.subr.mxu1 %v19593_v37  ;;  %20411 = vst [vmem:[#allocation209_spill] sm:$0xff] %v15632_v58  ;;  %v15636_v44 = vand.u32 4294901760, %v589_v39  ;;  %v9437_v3 = vadd.f32 %v9421_v52, %v9382_v14  ;;  %v15647_v8 = vsub.f32 %v593_v23, %v15609_v60  ;;  %v549_v14 = vsel %vm533_vm9, %v15341_v1, 0.0 }
 0x25d   :  { %7304 = vmatpush1.msra.mxu1 %v7303_v42  ;;  %9466 = vrot.lane.b32.xlu0 %v9433_v7, %s11172_s15  ;;  %20408 = vst [vmem:[#allocation210_spill] sm:$0xff] %v15619_v26  ;;  %v7327_v42 = vand.u32 4294901760, %v7326_v20  ;;  %v7338_v7 = vsub.f32 %v15568_v46, %v19102_v48  ;;  %v20415_v48 = vld [vmem:[#allocation51_spill] sm:$0xff]  ;;  %v20416_v23 = vand.u32 4294901760, %v15596_v55  ;;  %v15668_v49 = vsub.f32 %v585_v12, %v15638_v31  ;;  %v20421_v12 = vld [vmem:[#allocation178_spill] sm:$0xff] }
 0x25e   :  { %9456 = vrot.lane.b32.xlu1 %v9428_v57, %s11172_s15  ;;  %7310 = vmatprep.subr.mxu1 %v19593_v37  ;;  %v15634_v57 = vpop.permute.xlu1 %8874  ;;  %20414 = vst [vmem:[#allocation190_spill] sm:$0xff] %v15647_v8  ;;  %v20425_v46 = vld [vmem:[#allocation126_spill] sm:$0xff]  ;;  %v15699_v32 = vmul.f32 %v20427_v15, %v20426_v47 }
 0x25f   :  { %6873 = vmatmul.mubr.f32.vlgmr.msra.gmra.mxu0 %v20334_v29  ;;  %7050 = vmatmul.mubr.f32.gmra.mxu1 %v20410_v21  ;;  %v15644_v20 = vsel %vm179_vm8, %v15634_v57, %v8851_v4  ;;  %v7339_v52 = vand.u32 4294901760, %v7338_v7  ;;  %20418 = vst [vmem:[#allocation85_spill] sm:$0xff] %v15668_v49  ;;  %v9566_v40 = vmul.f32 %v15591_v34, %v20425_v46 }
 0x260   :  { %7067 = vmatpush1.msra.mxu0 %v15371_v63  ;;  %7316 = vmatpush1.msra.mxu1 %v7315_v30  ;;  %20413 = vst [vmem:[#allocation87_spill] sm:$0xff] %v15644_v20  ;;  %v15665_v30 = vsub.f32 %v589_v39, %v15636_v44  ;;  %v15677_v20 = vand.u32 4294901760, %v553_v11  ;;  %v20420_v39 = vld [vmem:[#allocation39_spill] sm:$0xff] }
 0x261   :  { %6879 = vmatprep.mubr.f32.mxu0 %v20335_v17  ;;  %7056 = vmatprep.mubr.f32.mxu1 %v20415_v48  ;;  %v7350_v17 = vsub.f32 %v15596_v55, %v20416_v23  ;;  %v15672_v1 = vpop.permute.xlu0 %8868  ;;  %v9553_v7 = vmul.f32 %v20421_v12, %v20420_v39  ;;  %v20424_v23 = vld [vmem:[#allocation54_spill] sm:$0xff] }
 0x262   :  { %7069 = vmatprep.subr.mxu0 %v19593_v37  ;;  %7322 = vmatprep.subr.mxu1 %v19593_v37  ;;  %20417 = vst [vmem:[#allocation137_spill] sm:$0xff] %v15665_v30  ;;  %20419 = vst [vmem:[#allocation78_spill] sm:$0xff] %v15672_v1  ;;  %v15674_v50 = vpop.permute.xlu1 %8858 }
 0x263   :  { %7071 = vmatpush1.msra.mxu0 %v15378_v45  ;;  %7328 = vmatpush1.msra.mxu1 %v7327_v42  ;;  %v15679_v42 = vand.u32 4294901760, %v549_v14  ;;  %v15691_v1 = vsel %vm179_vm8, %v8851_v4, %v15674_v50  ;;  %v7351_v55 = vand.u32 4294901760, %v7350_v17  ;;  %v541_v17 = vsel %vm533_vm9, %v15373_v19, 0.0 }
 0x264   :  { %9581 = vrot.lane.b32.xlu0 %v9562_v18, %s11170_s9  ;;  %9468 = vrot.lane.b32.xlu1 %v9437_v3, %s11172_s15  ;;  %v20422_v18 = vand.u32 4294901760, %v15619_v26  ;;  %20423 = vst [vmem:[#allocation192_spill] sm:$0xff] %v15691_v1  ;;  %v15710_v1 = vld [vmem:[#allocation12 + $0x78] sm:$0xff] }
 0x265   :  { %7073 = vmatprep.subr.mxu0 %v19593_v37  ;;  %7334 = vmatprep.subr.mxu1 %v19593_v37  ;;  %v15720_v4 = vpop.permute.xlu0 %9081  ;;  %v15726_v19 = vsub.f32 %v549_v14, %v15679_v42 }
 0x266   :  { %v7362_v3 = vsub.f32 %v15619_v26, %v20422_v18  ;;  %6881 = vmatmul.mubr.f32.gmra.mxu0 %v20338_v36  ;;  %7058 = vmatmul.mubr.f32.gmra.mxu1 %v20424_v23  ;;  %v545_v18 = vsel %vm533_vm9, %v15363_v54, 0.0  ;;  %v20428_v26 = vld [vmem:[#allocation58_spill] sm:$0xff]  ;;  %v20429_v54 = vand.u32 4294901760, %v15647_v8  ;;  %20430 = vst [vmem:[#allocation79_spill] sm:$0xff] %v15720_v4  ;;  %v15723_v36 = vsub.f32 %v553_v11, %v15677_v20  ;;  %v15732_v45 = vpop.permute.xlu1 %8870 }
 0x267   :  { %7075 = vmatpush1.msra.mxu0 %v15418_v51  ;;  %7340 = vmatpush1.msra.mxu1 %v7339_v52  ;;  %vm838_vm0 = vcmp.ge.s32.totalorder %v20428_v26, 480  ;;  %20432 = vst [vmem:[#allocation98_spill] sm:$0xff] %v15726_v19  ;;  %v20433_v51 = vld [vmem:[#allocation127_spill] sm:$0xff]  ;;  %20434 = vst [vmem:[#allocation191_spill] sm:$0xff] %v15732_v45  ;;  %v15738_v11 = vand.u32 4294901760, %v545_v18  ;;  %v15745_v14 = vsel %vm179_vm8, %v15556_v5, %v15732_v45  ;;  %v20439_v45 = vand.u32 4294901760, %v15665_v30 }
 0x268   :  { %6887 = vmatprep.mubr.f32.mxu0 %v20340_v24  ;;  %7077 = vmatprep.subr.mxu0 %v19593_v37  ;;  %v7374_v52 = vsub.f32 %v15647_v8, %v20429_v54  ;;  %20431 = vst [vmem:[#allocation139_spill] sm:$0xff] %v15723_v36  ;;  %v7363_v24 = vand.u32 4294901760, %v7362_v3  ;;  %v9370_v54 = vmul.f32 %v15484_v10, %v20426_v47  ;;  %v20435_v8 = vld [vmem:[#allocation75_spill] sm:$0xff]  ;;  %20437 = vst [vmem:[#allocation193_spill] sm:$0xff] %v15745_v14 }
 0x269   :  { %7346 = vmatprep.subr.mxu1 %v19593_v37  ;;  %7642 = vmatprep.mubr.f32.mxu1 %v20433_v51  ;;  %v9409_v63 = vmul.f32 %v15504_v41, %v20435_v8  ;;  %20436 = vst [vmem:[#allocation197_spill] sm:$0xff] %v15738_v11  ;;  %v15747_v3 = vand.u32 4294901760, %v541_v17  ;;  %v862_v47 = vsel %vm838_vm0, %v15710_v1, 0.0  ;;  %v858_v8 = vsel %vm838_vm0, %v15713_v53, 0.0 }
 0x26a   :  { %7079 = vmatpush1.msra.mxu0 %v15431_v13  ;;  %7352 = vmatpush1.msra.mxu1 %v7351_v55  ;;  %v9557_v55 = vmul.f32 %v20421_v12, %v20274_v9  ;;  %v7386_v14 = vsub.f32 %v15665_v30, %v20439_v45  ;;  %v20440_v5 = vand.u32 4294901760, %v15668_v49  ;;  %v7375_v13 = vand.u32 4294901760, %v7374_v52  ;;  %v9090_v9 = vpop.permute.xlu0 %9089  ;;  %v3635_v45 = vpop.f32.mrf.mxu1  ;;  %v15790_v30 = vld [vmem:[#allocation12 + $0x38] sm:$0xff] }
 0x26b   :  { %20438 = vst [vmem:[#allocation198_spill] sm:$0xff] %v15747_v3  ;;  %9569 = vrot.lane.b32.xlu0 %v9553_v7, %s11170_s9  ;;  %9583 = vrot.lane.b32.xlu1 %v9566_v40, %s11170_s9  ;;  %v20441_v7 = vld [vmem:[#allocation115_spill] sm:$0xff]  ;;  %v15784_v52 = vsub.f32 %v545_v18, %v15738_v11  ;;  %v15788_v12 = vand.u32 4294901760, %v858_v8  ;;  %v15801_v18 = vsub.f32 %v541_v17, %v15747_v3  ;;  %vm794_vm3 = vcmp.ge.s32.totalorder %v20428_v26, 448 }
 0x26c   :  { %v15765_v51 = vsub.f32 %v15668_v49, %v20440_v5  ;;  %7081 = vmatprep.subr.mxu0 %v19593_v37  ;;  %7358 = vmatprep.subr.mxu1 %v19593_v37  ;;  %v15771_v40 = vmul.f32 %v20427_v15, %v20441_v7  ;;  %v15779_v5 = vsel %vm267_vm13, %v15720_v4, %v9090_v9  ;;  %v15781_v49 = vpop.permute.xlu1 %9083  ;;  %v15786_v15 = vand.u32 4294901760, %v862_v47  ;;  %vm15845_vm4 = vmand %vm794_vm3, %vm798_vm1 }
 0x26d   :  { %6889 = vmatmul.mubr.f32.gmra.mxu0 %v20410_v21  ;;  %7364 = vmatpush1.msra.mxu1 %v7363_v24  ;;  %20442 = vst [vmem:[#allocation114_spill] sm:$0xff] %v15779_v5  ;;  %20443 = vst [vmem:[#allocation141_spill] sm:$0xff] %v15781_v49  ;;  %v9425_v21 = vadd.f32 %v9409_v63, %v9370_v54  ;;  %v20446_v24 = vld [vmem:[#allocation134_spill] sm:$0xff]  ;;  %v7387_v39 = vand.u32 4294901760, %v7386_v14  ;;  %v20448_v63 = vld [vmem:[#allocation113_spill] sm:$0xff]  ;;  %v20449_v17 = vand.u32 4294901760, %v15723_v36 }
 0x26e   :  { %20444 = vst [vmem:[#allocation112_spill] sm:$0xff] %v15784_v52  ;;  %20445 = vst [vmem:[#allocation241_spill] sm:$0xff] %v15788_v12  ;;  %7083 = vmatpush1.msra.mxu0 %v15467_v2  ;;  %6895 = vmatprep.mubr.f32.mxu0 %v20415_v48  ;;  %v15798_v5 = vmul.f32 %v15591_v34, %v20446_v24  ;;  %v7399_v16 = vand.u32 4294901760, %v15765_v51  ;;  %v9374_v48 = vmul.f32 %v15484_v10, %v20441_v7  ;;  %v3462_v2 = vpop.f32.mrf.mxu0  ;;  %v3645_v51 = vpop.f32.mrf.mxu1  ;;  %v20450_v7 = vld [vmem:[#allocation174_spill] sm:$0xff] }
 0x26f   :  { %20447 = vst [vmem:[#allocation28_spill] sm:$0xff] %v15801_v18  ;;  %7085 = vmatprep.subr.mxu0 %v19593_v37  ;;  %7370 = vmatprep.subr.mxu1 %v19593_v37  ;;  %v9413_v54 = vmul.f32 %v15504_v41, %v20448_v63  ;;  %v15815_v24 = vsub.f32 %v15723_v36, %v20449_v17  ;;  %v854_v14 = vsel %vm838_vm0, %v15790_v30, 0.0  ;;  %v850_v10 = vsel %vm838_vm0, %v15792_v62, 0.0  ;;  %v15833_v36 = vpop.permute.xlu0 %9097 }
 0x270   :  { %7087 = vmatpush1.msra.mxu0 %v15473_v38  ;;  %7376 = vmatpush1.msra.mxu1 %v7375_v13  ;;  %v3463_v41 = vadd.f32 %v3462_v2, %v20450_v7  ;;  %v20451_v13 = vand.u32 4294901760, %v15726_v19  ;;  %v15836_v38 = vsub.f32 %v862_v47, %v15786_v15  ;;  %v15839_v4 = vsub.f32 %v858_v8, %v15788_v12  ;;  %v3464_v2 = vpop.f32.mrf.mxu0  ;;  %v9092_v8 = vpop.permute.xlu1 %9091  ;;  %v20457_v7 = vld [vmem:[#allocation46_spill] sm:$0xff] }
 0x271   :  { %9593 = vrot.lane.b32.xlu0 %v15699_v32, %s11170_s9  ;;  %9571 = vrot.lane.b32.xlu1 %v9557_v55, %s11170_s9  ;;  %v15854_v47 = vsel %vm267_vm13, %v9090_v9, %v15833_v36  ;;  %v15867_v12 = vsel %vm267_vm13, %v15781_v49, %v9092_v8  ;;  %v15869_v9 = vand.u32 4294901760, %v854_v14  ;;  %v20467_v55 = vld [vmem:[#allocation42_spill] sm:$0xff]  ;;  %vm750_vm5 = vcmp.ge.s32.totalorder %v20428_v26, 416 }
 0x272   :  { %v15830_v17 = vsub.f32 %v15726_v19, %v20451_v13  ;;  %20452 = vst [vmem:[#allocation239_spill] sm:$0xff] %v15836_v38  ;;  %20453 = vst [vmem:[#allocation194_spill] sm:$0xff] %v15839_v4  ;;  %7089 = vmatprep.subr.mxu0 %v19593_v37  ;;  %7382 = vmatprep.subr.mxu1 %v19593_v37  ;;  %v3465_v13 = vadd.f32 %v3464_v2, %v20457_v7  ;;  %v20461_v2 = vld [vmem:[#allocation31_spill] sm:$0xff]  ;;  %v7411_v7 = vand.u32 4294901760, %v15815_v24 }
 0x273   :  { %20456 = vst [vmem:[#allocation132_spill] sm:$0xff] %v15854_v47  ;;  %v15859_v63 = vadd.f32 %v15728_v35, %v3463_v41  ;;  %6897 = vmatmul.mubr.f32.gmra.mxu0 %v20424_v23  ;;  %7388 = vmatpush1.msra.mxu1 %v7387_v39  ;;  %v15862_v19 = vadd.f32 %v9413_v54, %v9374_v48  ;;  %20459 = vst [vmem:[#allocation238_spill] sm:$0xff] %v15867_v12  ;;  %v15871_v47 = vand.u32 4294901760, %v850_v10  ;;  %v20462_v35 = vld [vmem:[#allocation71_spill] sm:$0xff]  ;;  %v3647_v39 = vpop.f32.mrf.mxu1  ;;  %v15898_v12 = vpop.permute.xlu0 %9255 }
 0x274   :  { %20460 = vst [vmem:[#allocation119_spill] sm:$0xff] %v15869_v9  ;;  %7091 = vmatpush1.msra.mxu0 %v15517_v27  ;;  %7197 = vmatprep.mubr.f32.mxu0 %v20461_v2  ;;  %v15877_v41 = vrot.slane %v15312_v28, %v20462_v35  ;;  %v15881_v23 = vmul.f32 %v15591_v34, %v20326_v59  ;;  %v818_v48 = vsel %vm15845_vm4, %v15710_v1, 0.0  ;;  %v7423_v28 = vand.u32 4294901760, %v15830_v17  ;;  %v15906_v24 = vpop.permute.xlu1 %9099 }
 0x275   :  { %20458 = vst [vmem:[#allocation225_spill] sm:$0xff] %v15859_v63  ;;  %v15886_v54 = vadd.f32 %v3635_v45, %v3465_v13  ;;  %7093 = vmatprep.subr.mxu0 %v19593_v37  ;;  %7394 = vmatprep.subr.mxu1 %v19593_v37  ;;  %v20464_v2 = vand.u32 4294901760, %v15784_v52  ;;  %v3472_v63 = vpop.f32.mrf.mxu0  ;;  %v20465_v45 = vand.u32 4294901760, %v15801_v18  ;;  %20466 = vst [vmem:[#allocation201_spill] sm:$0xff] %v15906_v24  ;;  %vm754_vm6 = vcmp.lt.s32.totalorder %v20428_v26, 448 }
 0x276   :  { %7095 = vmatpush1.msra.mxu0 %v15559_v6  ;;  %7400 = vmatpush1.msra.mxu1 %v7399_v16  ;;  %v15919_v16 = vsel %vm267_vm13, %v9092_v8, %v15906_v24  ;;  %v15925_v17 = vsub.f32 %v850_v10, %v15871_v47  ;;  %v20474_v8 = vld [vmem:[#allocation66_spill] sm:$0xff]  ;;  %v20475_v6 = vand.u32 4294901760, %v15836_v38  ;;  %vm15982_vm10 = vmand %vm750_vm5, %vm754_vm6  ;;  %vm710_vm11 = vcmp.lt.s32.totalorder %v20428_v26, 416 }
 0x277   :  { %20463 = vst [vmem:[#allocation196_spill] sm:$0xff] %v15886_v54  ;;  %v15895_v34 = vsub.f32 %v15784_v52, %v20464_v2  ;;  %v15904_v13 = vsub.f32 %v15801_v18, %v20465_v45  ;;  %v814_v2 = vsel %vm15845_vm4, %v15713_v53, 0.0  ;;  %v3473_v52 = vadd.f32 %v3472_v63, %v20467_v55  ;;  %9462 = vrot.lane.b32.xlu0 %v9425_v21, %s11172_s15  ;;  %v3474_v54 = vpop.f32.mrf.mxu0  ;;  %v15931_v21 = vld [vmem:[#allocation10 + $0x44] ss:$8 sm:$0xf] }
 0x278   :  { %9595 = vrot.lane.b32.xlu1 %v15771_v40, %s11170_s9  ;;  %20468 = vst [vmem:[#allocation142_spill] sm:$0xff] %v15919_v16  ;;  %v15922_v45 = vsub.f32 %v854_v14, %v15869_v9  ;;  %20470 = vst [vmem:[#allocation205_spill] sm:$0xff] %v15925_v17  ;;  %v15927_v18 = vand.u32 4294901760, %v818_v48  ;;  %7097 = vmatprep.subr.mxu0 %v19593_v37  ;;  %v3657_v40 = vpop.f32.mrf.mxu1  ;;  %v20472_v63 = vld [vmem:[#allocation171_spill] sm:$0xff]  ;;  %v9563_v16 = vmul.f32 %v15877_v41, %v20474_v8  ;;  %v15945_v59 = vpop.permute.xlu0 %9279 }
 0x279   :  { %7406 = vmatprep.subr.mxu1 %v19593_v37  ;;  %v3475_v55 = vadd.f32 %v3474_v54, %v20472_v63  ;;  %v15936_v14 = vadd.f32 %v3645_v51, %v3473_v52  ;;  %7099 = vmatpush1.msra.mxu0 %v15577_v22  ;;  %v7435_v10 = vand.u32 4294901760, %v15895_v34  ;;  %v7452_v27 = vsub.f32 %v15836_v38, %v20475_v6  ;;  %v15957_v51 = vpop.permute.xlu1 %9257  ;;  %v20480_v38 = vld [vmem:[#allocation59_spill] sm:$0xff] }
 0x27a   :  { %20469 = vst [vmem:[#allocation77_spill] sm:$0xff] %v15922_v45  ;;  %20471 = vst [vmem:[#allocation65_spill] sm:$0xff] %v15927_v18  ;;  %7412 = vmatpush1.msra.mxu1 %v7411_v7  ;;  %v15947_v54 = vand.u32 4294901760, %v814_v2  ;;  %7101 = vmatprep.subr.mxu0 %v19593_v37  ;;  %v15955_v52 = vsel %vm223_vm14, %v15945_v59, %v15898_v12  ;;  %v810_v6 = vsel %vm15845_vm4, %v15790_v30, 0.0  ;;  %v806_v7 = vsel %vm15845_vm4, %v15792_v62, 0.0 }
 0x27b   :  { %20473 = vst [vmem:[#allocation108_spill] sm:$0xff] %v15936_v14  ;;  %20476 = vst [vmem:[#allocation143_spill] sm:$0xff] %v15945_v59  ;;  %7418 = vmatprep.subr.mxu1 %v19593_v37  ;;  %v15965_v34 = vadd.f32 %v3647_v39, %v3475_v55  ;;  %7103 = vmatpush1.msra.mxu0 %v15609_v60  ;;  %v7447_v63 = vand.u32 4294901760, %v15904_v13  ;;  %v20481_v14 = vld [vmem:[#allocation68_spill] sm:$0xff]  ;;  %v3482_v39 = vpop.f32.mrf.mxu0  ;;  %v15995_v59 = vsub.f32 %v818_v48, %v15927_v18 }
 0x27c   :  { %20477 = vst [vmem:[#allocation101_spill] sm:$0xff] %v15947_v54  ;;  %20478 = vst [vmem:[#allocation52_spill] sm:$0xff] %v15955_v52  ;;  %7424 = vmatpush1.msra.mxu1 %v7423_v28  ;;  %v15971_v52 = vrot.slane %v15931_v21, %v20480_v38  ;;  %v15975_v22 = vmul.f32 %v15877_v41, %v20481_v14  ;;  %9577 = vrot.lane.b32.xlu0 %v15798_v5, %s11170_s9  ;;  %v20484_v28 = vand.u32 4294901760, %v15839_v4  ;;  %v3659_v38 = vpop.f32.mrf.mxu1  ;;  %v8865_v49 = vpop.permute.xlu0 %8864 }
 0x27d   :  { %20479 = vst [vmem:[#allocation26_spill] sm:$0xff] %v15965_v34  ;;  %9464 = vrot.lane.b32.xlu1 %v15862_v19, %s11172_s15  ;;  %20485 = vst [vmem:[#allocation200_spill] sm:$0xff] %v15995_v59  ;;  %v20486_v34 = vld [vmem:[#allocation182_spill] sm:$0xff]  ;;  %7105 = vmatprep.subr.mxu0 %v19593_v37  ;;  %v7453_v5 = vand.u32 4294901760, %v7452_v27  ;;  %v16001_v19 = vsub.f32 %v814_v2, %v15947_v54  ;;  %v16003_v24 = vand.u32 4294901760, %v810_v6  ;;  %v3484_v55 = vpop.f32.mrf.mxu0  ;;  %v16018_v2 = vpop.permute.xlu1 %9281 }
 0x27e   :  { %v7464_v13 = vsub.f32 %v15839_v4, %v20484_v28  ;;  %v3483_v60 = vadd.f32 %v3482_v39, %v20486_v34  ;;  %7430 = vmatprep.subr.mxu1 %v19593_v37  ;;  %v16005_v28 = vand.u32 4294901760, %v806_v7  ;;  %7107 = vmatpush1.msra.mxu0 %v15636_v44  ;;  %v16011_v48 = vsel %vm179_vm8, %v8865_v49, %v15587_v0  ;;  %v3669_v4 = vpop.f32.mrf.mxu1 }
 0x27f   :  { %20487 = vst [vmem:[#allocation206_spill] sm:$0xff] %v16001_v19  ;;  %20488 = vst [vmem:[#allocation93_spill] sm:$0xff] %v16003_v24  ;;  %7436 = vmatpush1.msra.mxu1 %v7435_v10  ;;  %v16016_v27 = vsel %vm179_vm8, %v15632_v58, %v8865_v49  ;;  %v774_v34 = vsel %vm15982_vm10, %v15710_v1, 0.0  ;;  %v3485_v39 = vadd.f32 %v3484_v55, %v15442_v25  ;;  %7109 = vmatprep.subr.mxu0 %v19593_v37 }
 0x280   :  { %20489 = vst [vmem:[#allocation203_spill] sm:$0xff] %v16005_v28  ;;  %20490 = vst [vmem:[#allocation208_spill] sm:$0xff] %v16011_v48  ;;  %7442 = vmatprep.subr.mxu1 %v19593_v37  ;;  %v20492_v10 = vand.u32 4294901760, %v15922_v45  ;;  %v16033_v49 = vsel %vm223_vm14, %v16018_v2, %v15957_v51  ;;  %7111 = vmatpush1.msra.mxu0 %v15638_v31  ;;  %v7465_v25 = vand.u32 4294901760, %v7464_v13  ;;  %v20494_v55 = vand.u32 4294901760, %v15925_v17 }
 0x281   :  { %20491 = vst [vmem:[#allocation204_spill] sm:$0xff] %v16016_v27  ;;  %20493 = vst [vmem:[#allocation29_spill] sm:$0xff] %v16033_v49  ;;  %v16035_v27 = vadd.f32 %v3657_v40, %v3483_v60  ;;  %7448 = vmatpush1.msra.mxu1 %v7447_v63  ;;  %9589 = vrot.lane.b32.xlu0 %v9563_v16, %s11170_s9  ;;  %v16048_v60 = vsub.f32 %v810_v6, %v16003_v24  ;;  %v16050_v40 = vpop.permute.xlu0 %9077  ;;  %v16052_v63 = vand.u32 4294901760, %v774_v34 }
 0x282   :  { %v7476_v48 = vsub.f32 %v15922_v45, %v20492_v10  ;;  %v7488_v58 = vsub.f32 %v15925_v17, %v20494_v55  ;;  %v3492_v10 = vpop.f32.mrf.mxu0  ;;  %v16042_v45 = vadd.f32 %v3659_v38, %v3485_v39  ;;  %9579 = vrot.lane.b32.xlu1 %v15881_v23, %s11170_s9  ;;  %v770_v13 = vsel %vm15982_vm10, %v15713_v53, 0.0  ;;  %7113 = vmatprep.subr.mxu0 %v19593_v37  ;;  %v20497_v38 = vld [vmem:[#allocation121_spill] sm:$0xff]  ;;  %v8867_v39 = vpop.permute.xlu1 %8866 }
 0x283   :  { %20495 = vst [vmem:[#allocation100_spill] sm:$0xff] %v16048_v60  ;;  %20496 = vst [vmem:[#allocation207_spill] sm:$0xff] %v16052_v63  ;;  %v3493_v55 = vadd.f32 %v3492_v10, %v15583_v56  ;;  %7454 = vmatprep.subr.mxu1 %v7453_v5  ;;  %v9692_v16 = vmul.f32 %v15971_v52, %v20497_v38  ;;  %v16063_v23 = vrot.slane %v15931_v21, %v20293_v33 }
 0x284   :  { %v16067_v0 = vsub.f32 %v806_v7, %v16005_v28  ;;  %v3494_v49 = vpop.f32.mrf.mxu0  ;;  %7115 = vmatpush1.msra.mxu0 %v15677_v20  ;;  %7460 = vmatpush2.msra.mxu1 %v19593_v37  ;;  %v7477_v56 = vand.u32 4294901760, %v7476_v48  ;;  %v16074_v5 = vsel %vm179_vm8, %v8867_v39, %v15634_v57  ;;  %v16079_v10 = vsel %vm179_vm8, %v15674_v50, %v8867_v39  ;;  %v3671_v48 = vpop.f32.mrf.mxu1 }
 0x285   :  { %20499 = vst [vmem:[#allocation32_spill] sm:$0xff] %v16074_v5  ;;  %20500 = vst [vmem:[#allocation215_spill] sm:$0xff] %v16079_v10  ;;  %v3495_v6 = vadd.f32 %v3494_v49, %v15605_v43  ;;  %7117 = vmatprep.subr.mxu0 %v19593_v37  ;;  %7466 = vmatprep.subr.mxu1 %v7465_v25  ;;  %v20501_v7 = vand.u32 4294901760, %v15995_v59  ;;  %v16086_v33 = vand.u32 4294901760, %v770_v13  ;;  %v766_v57 = vsel %vm15982_vm10, %v15790_v30, 0.0  ;;  %v9086_v25 = vpop.permute.xlu0 %9085 }
 0x286   :  { %20498 = vst [vmem:[#allocation212_spill] sm:$0xff] %v16067_v0  ;;  %v16091_v5 = vadd.f32 %v3669_v4, %v3493_v55  ;;  %7119 = vmatpush1.msra.mxu0 %v15679_v42  ;;  %7472 = vmatpush2.msra.mxu1 %v19593_v37  ;;  %v7489_v50 = vand.u32 4294901760, %v7488_v58  ;;  %v16097_v49 = vsub.f32 %v774_v34, %v16052_v63  ;;  %v20504_v4 = vand.u32 4294901760, %v16001_v19 }
 0x287   :  { %v7500_v38 = vsub.f32 %v15995_v59, %v20501_v7  ;;  %20502 = vst [vmem:[#allocation211_spill] sm:$0xff] %v16086_v33  ;;  %v16099_v39 = vadd.f32 %v3671_v48, %v3495_v6  ;;  %9704 = vrot.lane.b32.xlu0 %v9692_v16, %s11163_s23  ;;  %9591 = vrot.lane.b32.xlu1 %v15975_v22, %s11170_s9  ;;  %v16112_v7 = vpop.permute.xlu1 %9079  ;;  %v762_v34 = vsel %vm15982_vm10, %v15792_v62, 0.0  ;;  %v20506_v16 = vld [vmem:[#allocation57_spill] sm:$0xff]  ;;  %v20509_v10 = vand.u32 4294901760, %v16048_v60 }
 0x288   :  { %20503 = vst [vmem:[#allocation217_spill] sm:$0xff] %v16097_v49  ;;  %v7512_v55 = vsub.f32 %v16001_v19, %v20504_v4  ;;  %v16110_v58 = vsel %vm267_vm13, %v16050_v40, %v9086_v25  ;;  %7121 = vmatprep.subr.mxu0 %v19593_v37  ;;  %7478 = vmatprep.subr.mxu1 %v7477_v56  ;;  %v16124_v4 = vand.u32 4294901760, %v766_v57 }
 0x289   :  { %20505 = vst [vmem:[#allocation138_spill] sm:$0xff] %v16110_v58  ;;  %v9693_v22 = vmul.f32 %v16063_v23, %v20409_v61  ;;  %v9696_v6 = vmul.f32 %v15971_v52, %v20506_v16  ;;  %7123 = vmatpush1.msra.mxu0 %v15738_v11  ;;  %7484 = vmatpush2.msra.mxu1 %v19593_v37  ;;  %v7501_v32 = vand.u32 4294901760, %v7500_v38  ;;  %v16140_v58 = vpop.permute.xlu0 %9093  ;;  %v16142_v61 = vand.u32 4294901760, %v762_v34 }
 0x28a   :  { %20507 = vst [vmem:[#allocation220_spill] sm:$0xff] %v16124_v4  ;;  %v16130_v43 = vrot.slane %v15931_v21, %v20462_v35  ;;  %v16133_v56 = vsub.f32 %v770_v13, %v16086_v33  ;;  %7125 = vmatprep.subr.mxu0 %v19593_v37  ;;  %7490 = vmatprep.subr.mxu1 %v7489_v50  ;;  %v730_v21 = vsel %vm710_vm11, %v15710_v1, 0.0  ;;  %v7513_v13 = vand.u32 4294901760, %v7512_v55 }
 0x28b   :  { %v7524_v48 = vsub.f32 %v16048_v60, %v20509_v10  ;;  %20510 = vst [vmem:[#allocation216_spill] sm:$0xff] %v16142_v61  ;;  %7127 = vmatpush1.msra.mxu0 %v15747_v3  ;;  %7496 = vmatpush2.msra.mxu1 %v19593_v37  ;;  %v16152_v38 = vsel %vm267_vm13, %v9086_v25, %v16140_v58  ;;  %v9088_v10 = vpop.permute.xlu1 %9087  ;;  %v20512_v50 = vand.u32 4294901760, %v16067_v0  ;;  %v726_v25 = vsel %vm710_vm11, %v15713_v53, 0.0 }
 0x28c   :  { %20508 = vst [vmem:[#allocation214_spill] sm:$0xff] %v16133_v56  ;;  %20511 = vst [vmem:[#allocation88_spill] sm:$0xff] %v16152_v38  ;;  %9712 = vrot.lane.b32.xlu0 %v9693_v22, %s11163_s23  ;;  %9706 = vrot.lane.b32.xlu1 %v9696_v6, %s11163_s23  ;;  %v16160_v1 = vsub.f32 %v766_v57, %v16124_v4  ;;  %v16165_v55 = vsel %vm267_vm13, %v16112_v7, %v9088_v10  ;;  %v20516_v53 = vand.u32 4294901760, %v16097_v49  ;;  %v20518_v38 = vld [vmem:[#allocation241_spill] sm:$0xff] }
 0x28d   :  { %v7536_v16 = vsub.f32 %v16067_v0, %v20512_v50  ;;  %20514 = vst [vmem:[#allocation219_spill] sm:$0xff] %v16165_v55  ;;  %7129 = vmatprep.subr.mxu0 %v15786_v15  ;;  %7502 = vmatprep.subr.mxu1 %v7501_v32  ;;  %v9694_v22 = vmul.f32 %v16130_v43, %v20474_v8  ;;  %v16176_v50 = vand.u32 4294901760, %v730_v21  ;;  %v7525_v35 = vand.u32 4294901760, %v7524_v48  ;;  %v9106_v8 = vpop.permute.xlu0 %9105 }
 0x28e   :  { %20513 = vst [vmem:[#allocation36_spill] sm:$0xff] %v16160_v1  ;;  %v9697_v6 = vmul.f32 %v16063_v23, %v20425_v46  ;;  %7131 = vmatpush2.msra.mxu0 %v19593_v37  ;;  %7508 = vmatpush2.msra.mxu1 %v19593_v37  ;;  %v7548_v55 = vsub.f32 %v16097_v49, %v20516_v53  ;;  %v20520_v46 = vld [vmem:[#allocation79_spill] sm:$0xff]  ;;  %v16199_v53 = vand.u32 4294901760, %v726_v25 }
 0x28f   :  { %20515 = vst [vmem:[#allocation81_spill] sm:$0xff] %v16176_v50  ;;  %v16184_v32 = vsub.f32 %v762_v34, %v16142_v61  ;;  %7133 = vmatprep.subr.mxu0 %v20518_v38  ;;  %7514 = vmatprep.subr.mxu1 %v7513_v13  ;;  %v16190_v57 = vsel %vm267_vm13, %v15833_v36, %v9106_v8  ;;  %v16197_v0 = vpop.permute.xlu1 %9095  ;;  %v722_v34 = vsel %vm710_vm11, %v15790_v30, 0.0  ;;  %v7537_v13 = vand.u32 4294901760, %v7536_v16 }
 0x290   :  { %20519 = vst [vmem:[#allocation86_spill] sm:$0xff] %v16190_v57  ;;  %v16195_v48 = vsel %vm267_vm13, %v9106_v8, %v20520_v46  ;;  %20522 = vst [vmem:[#allocation233_spill] sm:$0xff] %v16199_v53  ;;  %7135 = vmatpush2.msra.mxu0 %v19593_v37  ;;  %7520 = vmatpush2.msra.mxu1 %v19593_v37  ;;  %v16210_v46 = vsel %vm267_vm13, %v9088_v10, %v16197_v0  ;;  %v20524_v8 = vand.u32 4294901760, %v16133_v56  ;;  %v20526_v10 = vld [vmem:[#allocation111_spill] sm:$0xff] }
 0x291   :  { %20517 = vst [vmem:[#allocation222_spill] sm:$0xff] %v16184_v32  ;;  %20521 = vst [vmem:[#allocation89_spill] sm:$0xff] %v16195_v48  ;;  %9720 = vrot.lane.b32.xlu0 %v9694_v22, %s11163_s23  ;;  %9714 = vrot.lane.b32.xlu1 %v9697_v6, %s11163_s23  ;;  %v16218_v57 = vsub.f32 %v730_v21, %v16176_v50  ;;  %v718_v16 = vsel %vm710_vm11, %v15792_v62, 0.0  ;;  %v9555_v36 = vmul.f32 %v15877_v41, %v20526_v10 }
 0x292   :  { %20523 = vst [vmem:[#allocation157_spill] sm:$0xff] %v16210_v46  ;;  %v7560_v30 = vsub.f32 %v16133_v56, %v20524_v8  ;;  %7137 = vmatprep.subr.mxu0 %v15869_v9  ;;  %7526 = vmatprep.subr.mxu1 %v7525_v35  ;;  %v9698_v22 = vmul.f32 %v16130_v43, %v20481_v14  ;;  %v16229_v48 = vand.u32 4294901760, %v722_v34  ;;  %v16231_v8 = vpop.permute.xlu0 %9263  ;;  %v7549_v62 = vand.u32 4294901760, %v7548_v55  ;;  %v20531_v46 = vld [vmem:[#allocation201_spill] sm:$0xff] }
 0x293   :  { %20525 = vst [vmem:[#allocation49_spill] sm:$0xff] %v16218_v57  ;;  %7139 = vmatpush2.msra.mxu0 %v19593_v37  ;;  %7532 = vmatpush2.msra.mxu1 %v19593_v37  ;;  %v16236_v21 = vsub.f32 %v726_v25, %v16199_v53  ;;  %v16242_v35 = vsel %vm223_vm14, %v15898_v12, %v16231_v8  ;;  %v9108_v14 = vpop.permute.xlu1 %9107  ;;  %v20530_v6 = vand.u32 4294901760, %v16160_v1  ;;  %v20533_v25 = vld [vmem:[#allocation141_spill] sm:$0xff]  ;;  %v16258_v12 = vand.u32 4294901760, %v718_v16 }
 0x294   :  { %20527 = vst [vmem:[#allocation240_spill] sm:$0xff] %v16229_v48  ;;  %20529 = vst [vmem:[#allocation213_spill] sm:$0xff] %v16242_v35  ;;  %7141 = vmatprep.subr.mxu0 %v15871_v47  ;;  %7538 = vmatprep.subr.mxu1 %v7537_v13  ;;  %v16251_v55 = vsel %vm267_vm13, %v20531_v46, %v9108_v14  ;;  %v16256_v56 = vsel %vm267_vm13, %v9108_v14, %v20533_v25  ;;  %v7561_v13 = vand.u32 4294901760, %v7560_v30 }
 0x295   :  { %20528 = vst [vmem:[#allocation167_spill] sm:$0xff] %v16236_v21  ;;  %v7572_v26 = vsub.f32 %v16160_v1, %v20530_v6  ;;  %20532 = vst [vmem:[#allocation135_spill] sm:$0xff] %v16251_v55  ;;  %7143 = vmatpush2.msra.mxu0 %v19593_v37  ;;  %7544 = vmatpush2.msra.mxu1 %v19593_v37  ;;  %v20536_v46 = vand.u32 4294901760, %v16184_v32  ;;  %v16269_v14 = vsub.f32 %v722_v34, %v16229_v48  ;;  %v20538_v55 = vld [vmem:[#allocation39_spill] sm:$0xff] }
 0x296   :  { %20534 = vst [vmem:[#allocation223_spill] sm:$0xff] %v16256_v56  ;;  %20535 = vst [vmem:[#allocation80_spill] sm:$0xff] %v16258_v12  ;;  %9585 = vrot.lane.b32.xlu0 %v9555_v36, %s11170_s9  ;;  %9722 = vrot.lane.b32.xlu1 %v9698_v22, %s11163_s23  ;;  %v9252_v25 = vpop.permute.xlu0 %9251  ;;  %v9684_v30 = vmul.f32 %v15971_v52, %v20538_v55  ;;  %v20539_v56 = vld [vmem:[#allocation95_spill] sm:$0xff] }
 0x297   :  { %v7584_v6 = vsub.f32 %v16184_v32, %v20536_v46  ;;  %20537 = vst [vmem:[#allocation40_spill] sm:$0xff] %v16269_v14  ;;  %7145 = vmatprep.subr.mxu0 %v15927_v18  ;;  %7550 = vmatprep.subr.mxu1 %v7549_v62  ;;  %v9559_v35 = vmul.f32 %v15877_v41, %v20539_v56  ;;  %v16277_v22 = vpop.permute.xlu1 %9265  ;;  %v7573_v34 = vand.u32 4294901760, %v7572_v26  ;;  %v20542_v41 = vand.u32 4294901760, %v16218_v57 }
 0x298   :  { %7147 = vmatpush2.msra.mxu0 %v19593_v37  ;;  %7556 = vmatpush2.msra.mxu1 %v19593_v37  ;;  %v16282_v46 = vsub.f32 %v718_v16, %v16258_v12  ;;  %v16288_v62 = vsel %vm223_vm14, %v15957_v51, %v16277_v22  ;;  %v20543_v51 = vand.u32 4294901760, %v16236_v21 }
 0x299   :  { %20541 = vst [vmem:[#allocation38_spill] sm:$0xff] %v16288_v62  ;;  %7149 = vmatprep.subr.mxu0 %v15947_v54  ;;  %7562 = vmatprep.subr.mxu1 %v7561_v13  ;;  %v7596_v36 = vsub.f32 %v16218_v57, %v20542_v41  ;;  %v7585_v26 = vand.u32 4294901760, %v7584_v6  ;;  %v20545_v6 = vld [vmem:[#allocation134_spill] sm:$0xff] }
 0x29a   :  { %20540 = vst [vmem:[#allocation45_spill] sm:$0xff] %v16282_v46  ;;  %7151 = vmatpush2.msra.mxu0 %v19593_v37  ;;  %7568 = vmatpush2.msra.mxu1 %v19593_v37  ;;  %v16297_v55 = vpop.permute.xlu0 %9275  ;;  %v7608_v13 = vsub.f32 %v16236_v21, %v20543_v51  ;;  %v9685_v16 = vmul.f32 %v16063_v23, %v20545_v6  ;;  %v20546_v57 = vld [vmem:[#allocation110_spill] sm:$0xff] }
 0x29b   :  { %9700 = vrot.lane.b32.xlu0 %v9684_v30, %s11163_s23  ;;  %9587 = vrot.lane.b32.xlu1 %v9559_v35, %s11170_s9  ;;  %v16307_v41 = vsel %vm223_vm14, %v16297_v55, %v9252_v25  ;;  %v9254_v62 = vpop.permute.xlu1 %9253  ;;  %v9688_v30 = vmul.f32 %v15971_v52, %v20546_v57  ;;  %v7597_v51 = vand.u32 4294901760, %v7596_v36 }
 0x29c   :  { %20544 = vst [vmem:[#allocation124_spill] sm:$0xff] %v16307_v41  ;;  %7153 = vmatprep.subr.mxu0 %v16003_v24  ;;  %7574 = vmatprep.subr.mxu1 %v7573_v34  ;;  %v20547_v41 = vand.u32 4294901760, %v16269_v14  ;;  %v7609_v52 = vand.u32 4294901760, %v7608_v13 }
 0x29d   :  { %7155 = vmatpush2.msra.mxu0 %v19593_v37  ;;  %7580 = vmatpush2.msra.mxu1 %v19593_v37 }
 0x29e   :  { %7157 = vmatprep.subr.mxu0 %v16005_v28  ;;  %7586 = vmatprep.subr.mxu1 %v7585_v26  ;;  %v7620_v34 = vsub.f32 %v16269_v14, %v20547_v41  ;;  %v9102_v21 = vpop.permute.xlu0 %9101  ;;  %v20550_v41 = vand.u32 4294901760, %v16282_v46 }
 0x29f   :  { %7159 = vmatpush2.msra.mxu0 %v19593_v37  ;;  %7592 = vmatpush2.msra.mxu1 %v19593_v37  ;;  %v16326_v35 = vsel %vm267_vm13, %v16140_v58, %v9102_v21  ;;  %v16331_v36 = vsel %vm267_vm13, %v9102_v21, %v16050_v40  ;;  %v16333_v26 = vpop.permute.xlu1 %9277  ;;  %v9686_v40 = vmul.f32 %v16130_v43, %v20526_v10  ;;  %v20552_v21 = vld [vmem:[#allocation104_spill] sm:$0xff]  ;;  %v20574_v10 = vld [vmem:[#allocation177_spill] sm:$0xff] }
 0x2a0   :  { %20548 = vst [vmem:[#allocation55_spill] sm:$0xff] %v16326_v35  ;;  %20549 = vst [vmem:[#allocation145_spill] sm:$0xff] %v16331_v36  ;;  %9708 = vrot.lane.b32.xlu0 %v9685_v16, %s11163_s23  ;;  %9702 = vrot.lane.b32.xlu1 %v9688_v30, %s11163_s23  ;;  %v7632_v13 = vsub.f32 %v16282_v46, %v20550_v41  ;;  %v16343_v58 = vsel %vm223_vm14, %v16333_v26, %v9254_v62  ;;  %v7621_v30 = vand.u32 4294901760, %v7620_v34  ;;  %v20577_v36 = vld [vmem:[#allocation131_spill] sm:$0xff]  ;;  %v20607_v46 = vld [vmem:[#allocation189_spill] sm:$0xff] }
 0x2a1   :  { %20551 = vst [vmem:[#allocation33_spill] sm:$0xff] %v16343_v58  ;;  %7161 = vmatprep.subr.mxu0 %v16052_v63  ;;  %7598 = vmatprep.subr.mxu1 %v7597_v51  ;;  %v9689_v16 = vmul.f32 %v16063_v23, %v20552_v21  ;;  %v20589_v58 = vld [vmem:[#allocation161_spill] sm:$0xff] }
 0x2a2   :  { %7163 = vmatpush2.msra.mxu0 %v19593_v37  ;;  %7604 = vmatpush2.msra.mxu1 %v19593_v37  ;;  %v16352_v41 = vpop.permute.xlu0 %9259  ;;  %v7633_v23 = vand.u32 4294901760, %v7632_v13 }
 0x2a3   :  { %7165 = vmatprep.subr.mxu0 %v16086_v33  ;;  %7610 = vmatprep.subr.mxu1 %v7609_v52  ;;  %v16358_v51 = vsel %vm223_vm14, %v9252_v25, %v16352_v41  ;;  %v9104_v35 = vpop.permute.xlu1 %9103  ;;  %v9690_v25 = vmul.f32 %v16130_v43, %v20539_v56 }
 0x2a4   :  { %20553 = vst [vmem:[#allocation242_spill] sm:$0xff] %v16358_v51  ;;  %7167 = vmatpush2.msra.mxu0 %v19593_v37  ;;  %7616 = vmatpush2.msra.mxu1 %v19593_v37  ;;  %v16365_v34 = vsel %vm267_vm13, %v16197_v0, %v9104_v35  ;;  %v16370_v52 = vsel %vm267_vm13, %v9104_v35, %v16112_v7  ;;  %v20556_v0 = vld [vmem:[#allocation143_spill] sm:$0xff] }
 0x2a5   :  { %20554 = vst [vmem:[#allocation34_spill] sm:$0xff] %v16365_v34  ;;  %20555 = vst [vmem:[#allocation150_spill] sm:$0xff] %v16370_v52  ;;  %9716 = vrot.lane.b32.xlu0 %v9686_v40, %s11163_s23  ;;  %9710 = vrot.lane.b32.xlu1 %v9689_v16, %s11163_s23  ;;  %v20561_v16 = vld [vmem:[#allocation234_spill] sm:$0xff]  ;;  %v20594_v51 = vld [vmem:[#allocation187_spill] sm:$0xff] }
 0x2a6   :  { %7169 = vmatprep.subr.mxu0 %v16124_v4  ;;  %7622 = vmatprep.subr.mxu1 %v7621_v30  ;;  %v9272_v13 = vpop.permute.xlu0 %9271 }
 0x2a7   :  { %7171 = vmatpush2.msra.mxu0 %v19593_v37  ;;  %7628 = vmatpush2.msra.mxu1 %v19593_v37  ;;  %v16382_v7 = vsel %vm223_vm14, %v9272_v13, %v20556_v0  ;;  %v16387_v35 = vsel %vm223_vm14, %v16231_v8, %v9272_v13  ;;  %v16389_v40 = vpop.permute.xlu1 %9261  ;;  %v20565_v13 = vld [vmem:[#allocation175_spill] sm:$0xff] }
 0x2a8   :  { %20557 = vst [vmem:[#allocation84_spill] sm:$0xff] %v16382_v7  ;;  %20558 = vst [vmem:[#allocation117_spill] sm:$0xff] %v16387_v35  ;;  %7173 = vmatprep.subr.mxu0 %v16142_v61  ;;  %7634 = vmatprep.subr.mxu1 %v7633_v23  ;;  %v16395_v43 = vsel %vm223_vm14, %v9254_v62, %v16389_v40  ;;  %v20562_v23 = vld [vmem:[#allocation144_spill] sm:$0xff]  ;;  %v20566_v7 = vld [vmem:[#allocation179_spill] sm:$0xff] }
 0x2a9   :  { %20559 = vst [vmem:[#allocation226_spill] sm:$0xff] %v16395_v43  ;;  %7175 = vmatpush2.msra.mxu0 %v19593_v37  ;;  %7640 = vmatpush2.msra.mxu1 %v19593_v37 }
 0x2aa   :  { %9718 = vrot.lane.b32.xlu1 %v9690_v25, %s11163_s23  ;;  %7177 = vmatprep.subr.mxu0 %v16176_v50  ;;  %v16401_v8 = vpop.permute.xlu0 %9442 }
 0x2ab   :  { %20560 = vst [vmem:[#allocation218_spill] sm:$0xff] %v16401_v8  ;;  %7644 = vmatmul.mubr.f32.vlgmr.msra.gmra.mxu1 %v20561_v16  ;;  %7908 = vmatprep.subr.mxu1 %v19593_v37  ;;  %v9274_v30 = vpop.permute.xlu1 %9273 }
 0x2ac   :  { %7179 = vmatpush2.msra.mxu0 %v19593_v37  ;;  %7650 = vmatprep.mubr.f32.mxu1 %v20562_v23  ;;  %v16410_v62 = vsel %vm223_vm14, %v9274_v30, %v16018_v2  ;;  %v16415_v25 = vsel %vm223_vm14, %v16277_v22, %v9274_v30  ;;  %v20569_v30 = vld [vmem:[#allocation229_spill] sm:$0xff]  ;;  %v20581_v23 = vld [vmem:[#allocation103_spill] sm:$0xff] }
 0x2ad   :  { %20563 = vst [vmem:[#allocation235_spill] sm:$0xff] %v16410_v62  ;;  %20564 = vst [vmem:[#allocation35_spill] sm:$0xff] %v16415_v25  ;;  %7910 = vmatpush1.msra.mxu1 %v20565_v13  ;;  %7181 = vmatprep.subr.mxu0 %v16199_v53  ;;  %v20570_v62 = vld [vmem:[#allocation151_spill] sm:$0xff] }
 0x2ae   :  { %7912 = vmatprep.subr.mxu1 %v19593_v37  ;;  %7183 = vmatpush2.msra.mxu0 %v19593_v37  ;;  %v9451_v0 = vpop.permute.xlu0 %9450  ;;  %v20571_v25 = vld [vmem:[#allocation27_spill] sm:$0xff] }
 0x2af   :  { %7914 = vmatpush1.msra.mxu1 %v20566_v7  ;;  %7185 = vmatprep.subr.mxu0 %v16229_v48  ;;  %v16426_v2 = vsel %vm223_vm14, %v16401_v8, %v9451_v0  ;;  %v16428_v22 = vpop.permute.xlu1 %9444  ;;  %v20575_v8 = vld [vmem:[#allocation164_spill] sm:$0xff] }
 0x2b0   :  { %20567 = vst [vmem:[#allocation237_spill] sm:$0xff] %v16426_v2  ;;  %20568 = vst [vmem:[#allocation83_spill] sm:$0xff] %v16428_v22  ;;  %7652 = vmatmul.mubr.f32.gmra.mxu1 %v20569_v30  ;;  %7916 = vmatprep.subr.mxu1 %v19593_v37  ;;  %v20578_v30 = vld [vmem:[#allocation172_spill] sm:$0xff] }
 0x2b1   :  { %7187 = vmatpush2.msra.mxu0 %v19593_v37  ;;  %7658 = vmatprep.mubr.f32.mxu1 %v20570_v62  ;;  %v4095_v62 = vpop.f32.mrf.mxu1  ;;  %v20592_v2 = vld [vmem:[#allocation168_spill] sm:$0xff] }
 0x2b2   :  { %7918 = vmatpush1.msra.mxu1 %v20571_v25  ;;  %7189 = vmatprep.subr.mxu0 %v16258_v12  ;;  %v16436_v35 = vpop.permute.xlu0 %9458 }
 0x2b3   :  { %20572 = vst [vmem:[#allocation47_spill] sm:$0xff] %v16436_v35  ;;  %7920 = vmatprep.subr.mxu1 %v19593_v37  ;;  %7191 = vmatpush2.msra.mxu0 %v19593_v37  ;;  %v16443_v34 = vsel %vm223_vm14, %v9451_v0, %v16436_v35  ;;  %v9453_v56 = vpop.permute.xlu1 %9452  ;;  %v20580_v35 = vld [vmem:[#allocation149_spill] sm:$0xff]  ;;  %v4097_v16 = vpop.f32.mrf.mxu1 }
 0x2b4   :  { %20573 = vst [vmem:[#allocation224_spill] sm:$0xff] %v16443_v34  ;;  %7922 = vmatpush1.msra.mxu1 %v20574_v10  ;;  %7203 = vmatmul.mubr.f32.vlgmr.msra.gmra.mxu0 %v20575_v8  ;;  %v16450_v52 = vsel %vm223_vm14, %v16428_v22, %v9453_v56  ;;  %v20583_v22 = vld [vmem:[#allocation180_spill] sm:$0xff] }
 0x2b5   :  { %20576 = vst [vmem:[#allocation116_spill] sm:$0xff] %v16450_v52  ;;  %7660 = vmatmul.mubr.f32.gmra.mxu1 %v20577_v36  ;;  %7676 = vmatprep.subr.mxu0 %v19593_v37  ;;  %v4103_v43 = vpop.f32.mrf.mxu1  ;;  %v20587_v52 = vld [vmem:[#allocation82_spill] sm:$0xff] }
 0x2b6   :  { %7924 = vmatprep.subr.mxu1 %v19593_v37  ;;  %7213 = vmatprep.mubr.f32.mxu0 %v20578_v30  ;;  %v16456_v0 = vpop.permute.xlu0 %9573  ;;  %v20585_v30 = vld [vmem:[#allocation129_spill] sm:$0xff] }
 0x2b7   :  { %20579 = vst [vmem:[#allocation230_spill] sm:$0xff] %v16456_v0  ;;  %7666 = vmatprep.mubr.f32.mxu1 %v20580_v35  ;;  %7679 = vmatpush1.msra.mxu0 %v20581_v23  ;;  %v16460_v8 = vpop.permute.xlu1 %9460  ;;  %v20586_v35 = vld [vmem:[#allocation221_spill] sm:$0xff]  ;;  %v20601_v23 = vld [vmem:[#allocation48_spill] sm:$0xff] }
 0x2b8   :  { %20582 = vst [vmem:[#allocation232_spill] sm:$0xff] %v16460_v8  ;;  %7926 = vmatpush1.msra.mxu1 %v20583_v22  ;;  %7682 = vmatprep.subr.mxu0 %v19593_v37  ;;  %v16467_v36 = vsel %vm223_vm14, %v9453_v56, %v16460_v8  ;;  %v20596_v22 = vld [vmem:[#allocation225_spill] sm:$0xff] }
 0x2b9   :  { %20584 = vst [vmem:[#allocation122_spill] sm:$0xff] %v16467_v36  ;;  %7928 = vmatprep.subr.mxu1 %v19593_v37  ;;  %7685 = vmatpush1.msra.mxu0 %v20585_v30  ;;  %v4105_v36 = vpop.f32.mrf.mxu1  ;;  %v20595_v30 = vld [vmem:[#allocation160_spill] sm:$0xff] }
 0x2ba   :  { %7930 = vmatpush1.msra.mxu1 %v20586_v35  ;;  %7219 = vmatmul.mubr.f32.gmra.mxu0 %v20587_v52  ;;  %v16473_v34 = vpop.permute.xlu0 %9597  ;;  %v20593_v52 = vld [vmem:[#allocation195_spill] sm:$0xff] }
 0x2bb   :  { %20588 = vst [vmem:[#allocation128_spill] sm:$0xff] %v16473_v34  ;;  %7668 = vmatmul.mubr.f32.gmra.mxu1 %v20589_v58  ;;  %7688 = vmatprep.subr.mxu0 %v19593_v37  ;;  %v16481_v56 = vsel %vm267_vm13, %v16473_v34, %v16456_v0  ;;  %v16483_v8 = vpop.permute.xlu1 %9575  ;;  %v3934_v58 = vpop.f32.mrf.mxu0 }
 0x2bc   :  { %20590 = vst [vmem:[#allocation227_spill] sm:$0xff] %v16481_v56  ;;  %20591 = vst [vmem:[#allocation156_spill] sm:$0xff] %v16483_v8  ;;  %7932 = vmatprep.subr.mxu1 %v19593_v37  ;;  %7229 = vmatprep.mubr.f32.mxu0 %v20592_v2  ;;  %v4111_v35 = vpop.f32.mrf.mxu1  ;;  %v3935_v34 = vadd.f32 %v3934_v58, %v20596_v22  ;;  %v20597_v56 = vld [vmem:[#allocation183_spill] sm:$0xff]  ;;  %v20602_v58 = vld [vmem:[#allocation173_spill] sm:$0xff] }
 0x2bd   :  { %7691 = vmatpush1.msra.mxu0 %v20593_v52  ;;  %7934 = vmatpush1.msra.mxu1 %v20594_v51  ;;  %v3936_v52 = vpop.f32.mrf.mxu0 }
 0x2be   :  { %8038 = vmatprep.mubr.f32.mxu1 %v20595_v30  ;;  %7694 = vmatprep.subr.mxu0 %v19593_v37  ;;  %v9268_v0 = vpop.permute.xlu0 %9267  ;;  %v4096_v10 = vadd.f32 %v4095_v62, %v3935_v34  ;;  %v20609_v34 = vld [vmem:[#allocation188_spill] sm:$0xff] }
 0x2bf   :  { %7936 = vmatprep.subr.mxu1 %v19593_v37  ;;  %7697 = vmatpush1.msra.mxu0 %v20597_v56  ;;  %v16497_v2 = vsel %vm223_vm14, %v9268_v0, %v16297_v55  ;;  %v16502_v51 = vsel %vm223_vm14, %v16352_v41, %v9268_v0  ;;  %v16504_v30 = vpop.permute.xlu1 %9599  ;;  %v20604_v55 = vld [vmem:[#allocation196_spill] sm:$0xff]  ;;  %v4113_v56 = vpop.f32.mrf.mxu1  ;;  %v20605_v41 = vld [vmem:[#allocation94_spill] sm:$0xff]  ;;  %v20606_v0 = vld [vmem:[#allocation181_spill] sm:$0xff] }
 0x2c0   :  { %20598 = vst [vmem:[#allocation51_spill] sm:$0xff] %v16497_v2  ;;  %20599 = vst [vmem:[#allocation178_spill] sm:$0xff] %v16502_v51  ;;  %7938 = vmatpush1.msra.mxu1 %v20601_v23  ;;  %7235 = vmatmul.mubr.f32.gmra.mxu0 %v20602_v58  ;;  %v16512_v22 = vsel %vm267_vm13, %v16504_v30, %v16483_v8  ;;  %v3937_v2 = vadd.f32 %v3936_v52, %v20604_v55  ;;  %v3942_v51 = vpop.f32.mrf.mxu0 }
 0x2c1   :  { %20600 = vst [vmem:[#allocation54_spill] sm:$0xff] %v16504_v30  ;;  %20603 = vst [vmem:[#allocation228_spill] sm:$0xff] %v16512_v22  ;;  %7700 = vmatprep.subr.mxu0 %v19593_v37  ;;  %7940 = vmatprep.subr.mxu1 %v19593_v37  ;;  %v4119_v58 = vpop.f32.mrf.mxu1  ;;  %v20608_v30 = vld [vmem:[#allocation108_spill] sm:$0xff] }
 0x2c2   :  { %7245 = vmatprep.mubr.f32.mxu0 %v20605_v41  ;;  %7703 = vmatpush1.msra.mxu0 %v20606_v0  ;;  %v4098_v23 = vadd.f32 %v4097_v16, %v3937_v2  ;;  %v3943_v8 = vadd.f32 %v3942_v51, %v20608_v30  ;;  %v3944_v2 = vpop.f32.mrf.mxu0  ;;  %v20612_v41 = vld [vmem:[#allocation106_spill] sm:$0xff]  ;;  %v20613_v51 = vld [vmem:[#allocation169_spill] sm:$0xff] }
 0x2c3   :  { %7942 = vmatpush1.msra.mxu1 %v20607_v46  ;;  %7706 = vmatprep.subr.mxu0 %v19593_v37  ;;  %v9270_v52 = vpop.permute.xlu1 %9269  ;;  %v4121_v55 = vpop.f32.mrf.mxu1  ;;  %v20614_v30 = vld [vmem:[#allocation26_spill] sm:$0xff] }
 0x2c4   :  { %7944 = vmatprep.subr.mxu1 %v19593_v37  ;;  %7709 = vmatpush1.msra.mxu0 %v20609_v34  ;;  %v16527_v62 = vsel %vm223_vm14, %v9270_v52, %v16333_v26  ;;  %v16532_v16 = vsel %vm223_vm14, %v16389_v40, %v9270_v52  ;;  %v3945_v22 = vadd.f32 %v3944_v2, %v20614_v30  ;;  %v3950_v26 = vpop.f32.mrf.mxu0  ;;  %v20615_v34 = vld [vmem:[#allocation140_spill] sm:$0xff]  ;;  %v20616_v0 = vld [vmem:[#allocation146_spill] sm:$0xff] }
 0x2c5   :  { %20610 = vst [vmem:[#allocation174_spill] sm:$0xff] %v16527_v62  ;;  %20611 = vst [vmem:[#allocation46_spill] sm:$0xff] %v16532_v16  ;;  %7946 = vmatpush1.msra.mxu1 %v20612_v41  ;;  %7251 = vmatmul.mubr.f32.gmra.mxu0 %v20613_v51  ;;  %v4104_v46 = vadd.f32 %v4103_v43, %v3943_v8  ;;  %v4705_v62 = vpop.f32.mrf.mxu1  ;;  %v3951_v40 = vadd.f32 %v3950_v26, %v16035_v27  ;;  %v20617_v43 = vld [vmem:[#allocation109_spill] sm:$0xff] }
 0x2c6   :  { %7712 = vmatprep.subr.mxu0 %v19593_v37  ;;  %7948 = vmatprep.subr.mxu1 %v19593_v37  ;;  %v4106_v52 = vadd.f32 %v4105_v36, %v3945_v22  ;;  %v3952_v51 = vpop.f32.mrf.mxu0  ;;  %v20618_v36 = vld [vmem:[#allocation210_spill] sm:$0xff] }
 0x2c7   :  { %7715 = vmatpush1.msra.mxu0 %v20615_v34  ;;  %7868 = vmatprep.mubr.f32.mxu0 %v20616_v0  ;;  %v4707_v2 = vpop.f32.mrf.mxu1  ;;  %v3953_v8 = vadd.f32 %v3952_v51, %v16042_v45  ;;  %v4112_v30 = vadd.f32 %v4111_v35, %v3951_v40  ;;  %v20619_v45 = vld [vmem:[#allocation190_spill] sm:$0xff] }
 0x2c8   :  { %7950 = vmatpush1.msra.mxu1 %v15636_v44  ;;  %7718 = vmatprep.subr.mxu0 %v19593_v37  ;;  %v3958_v0 = vpop.f32.mrf.mxu0 }
 0x2c9   :  { %7952 = vmatprep.subr.mxu1 %v19593_v37  ;;  %7721 = vmatpush1.msra.mxu0 %v20617_v43  ;;  %v4713_v27 = vpop.f32.mrf.mxu1  ;;  %v3959_v22 = vadd.f32 %v3958_v0, %v16091_v5  ;;  %v4114_v26 = vadd.f32 %v4113_v56, %v3953_v8  ;;  %v20620_v5 = vld [vmem:[#allocation137_spill] sm:$0xff] }
 0x2ca   :  { %7954 = vmatpush1.msra.mxu1 %v15638_v31  ;;  %7724 = vmatprep.subr.mxu0 %v19593_v37  ;;  %v3960_v16 = vpop.f32.mrf.mxu0 }
 0x2cb   :  { %7956 = vmatprep.subr.mxu1 %v19593_v37  ;;  %7727 = vmatpush1.msra.mxu0 %v20618_v36  ;;  %v3961_v35 = vadd.f32 %v3960_v16, %v16099_v39  ;;  %v4715_v40 = vpop.f32.mrf.mxu1  ;;  %v4120_v51 = vadd.f32 %v4119_v58, %v3959_v22  ;;  %v20621_v39 = vld [vmem:[#allocation85_spill] sm:$0xff] }
 0x2cc   :  { %7958 = vmatpush1.msra.mxu1 %v15677_v20  ;;  %7730 = vmatprep.subr.mxu0 %v19593_v37  ;;  %v4264_v36 = vpop.f32.mrf.mxu0 }
 0x2cd   :  { %7960 = vmatprep.subr.mxu1 %v19593_v37  ;;  %7733 = vmatpush1.msra.mxu0 %v20619_v45  ;;  %v4265_v56 = vadd.f32 %v4264_v36, %v4096_v10  ;;  %v4721_v8 = vpop.f32.mrf.mxu1  ;;  %v4122_v0 = vadd.f32 %v4121_v55, %v3961_v35  ;;  %v20622_v10 = vld [vmem:[#allocation139_spill] sm:$0xff] }
 0x2ce   :  { %7962 = vmatpush1.msra.mxu1 %v15679_v42  ;;  %7736 = vmatprep.subr.mxu0 %v19593_v37  ;;  %v4266_v45 = vpop.f32.mrf.mxu0 }
 0x2cf   :  { %7964 = vmatprep.subr.mxu1 %v19593_v37  ;;  %7739 = vmatpush1.msra.mxu0 %v20620_v5  ;;  %v4267_v58 = vadd.f32 %v4266_v45, %v4098_v23  ;;  %v4723_v16 = vpop.f32.mrf.mxu1  ;;  %v4706_v5 = vadd.f32 %v4705_v62, %v4265_v56  ;;  %v20623_v23 = vld [vmem:[#allocation98_spill] sm:$0xff] }
 0x2d0   :  { %7966 = vmatpush1.msra.mxu1 %v15738_v11  ;;  %7742 = vmatprep.subr.mxu0 %v19593_v37 }
 0x2d1   :  { %7968 = vmatprep.subr.mxu1 %v19593_v37  ;;  %7745 = vmatpush1.msra.mxu0 %v20621_v39  ;;  %v4280_v22 = vpop.f32.mrf.mxu0  ;;  %v4729_v36 = vpop.f32.mrf.mxu1  ;;  %v4708_v35 = vadd.f32 %v4707_v2, %v4267_v58 }
 0x2d2   :  { %7970 = vmatpush1.msra.mxu1 %v15747_v3  ;;  %7748 = vmatprep.subr.mxu0 %v19593_v37  ;;  %v4281_v55 = vadd.f32 %v4280_v22, %v4104_v46  ;;  %v20624_v46 = vld [vmem:[#allocation112_spill] sm:$0xff] }
 0x2d3   :  { %7972 = vmatprep.subr.mxu1 %v15786_v15  ;;  %7751 = vmatpush1.msra.mxu0 %v20622_v10  ;;  %v4282_v39 = vpop.f32.mrf.mxu0  ;;  %v4731_v3 = vpop.f32.mrf.mxu1 }
 0x2d4   :  { %7974 = vmatpush2.msra.mxu1 %v19593_v37  ;;  %7754 = vmatprep.subr.mxu0 %v19593_v37  ;;  %v4283_v45 = vadd.f32 %v4282_v39, %v4106_v52  ;;  %v4714_v11 = vadd.f32 %v4713_v27, %v4281_v55  ;;  %v20625_v52 = vld [vmem:[#allocation28_spill] sm:$0xff]  ;;  %v20626_v55 = vld [vmem:[#allocation239_spill] sm:$0xff] }
 0x2d5   :  { %7976 = vmatprep.subr.mxu1 %v20518_v38  ;;  %7757 = vmatpush1.msra.mxu0 %v20623_v23  ;;  %v4296_v62 = vpop.f32.mrf.mxu0  ;;  %v5103_v58 = vpop.f32.mrf.mxu1 }
 0x2d6   :  { %7978 = vmatpush2.msra.mxu1 %v19593_v37  ;;  %7760 = vmatprep.subr.mxu0 %v19593_v37  ;;  %v4297_v2 = vadd.f32 %v4296_v62, %v4112_v30  ;;  %v4716_v56 = vadd.f32 %v4715_v40, %v4283_v45  ;;  %v20627_v45 = vld [vmem:[#allocation194_spill] sm:$0xff] }
 0x2d7   :  { %7980 = vmatprep.subr.mxu1 %v15869_v9  ;;  %7763 = vmatpush1.msra.mxu0 %v20624_v46  ;;  %v4298_v22 = vpop.f32.mrf.mxu0  ;;  %v5105_v9 = vpop.f32.mrf.mxu1 }
 0x2d8   :  { %7982 = vmatpush2.msra.mxu1 %v19593_v37  ;;  %7766 = vmatprep.subr.mxu0 %v19593_v37  ;;  %v4299_v27 = vadd.f32 %v4298_v22, %v4114_v26  ;;  %v4722_v39 = vadd.f32 %v4721_v8, %v4297_v2  ;;  %v20628_v2 = vld [vmem:[#allocation77_spill] sm:$0xff] }
 0x2d9   :  { %7984 = vmatprep.subr.mxu1 %v15871_v47  ;;  %7769 = vmatpush1.msra.mxu0 %v20625_v52  ;;  %v4312_v46 = vpop.f32.mrf.mxu0  ;;  %v5115_v62 = vpop.f32.mrf.mxu1 }
 0x2da   :  { %7986 = vmatpush2.msra.mxu1 %v19593_v37  ;;  %7772 = vmatprep.subr.mxu0 %v20626_v55  ;;  %v4313_v30 = vadd.f32 %v4312_v46, %v4120_v51  ;;  %v4724_v40 = vadd.f32 %v4723_v16, %v4299_v27 }
 0x2db   :  { %7988 = vmatprep.subr.mxu1 %v15927_v18  ;;  %7775 = vmatpush2.msra.mxu0 %v19593_v37  ;;  %v4314_v52 = vpop.f32.mrf.mxu0  ;;  %v5117_v51 = vpop.f32.mrf.mxu1  ;;  %v20664_v18 = vld [vmem:[#allocation56_spill] sm:$0xff] }
 0x2dc   :  { %7990 = vmatpush2.msra.mxu1 %v19593_v37  ;;  %7778 = vmatprep.subr.mxu0 %v20627_v45  ;;  %v4315_v26 = vadd.f32 %v4314_v52, %v4122_v0  ;;  %v4730_v8 = vadd.f32 %v4729_v36, %v4313_v30 }
 0x2dd   :  { %7992 = vmatprep.subr.mxu1 %v15947_v54  ;;  %7781 = vmatpush2.msra.mxu0 %v19593_v37  ;;  %v4932_v16 = vpop.f32.mrf.mxu0  ;;  %v5127_v0 = vpop.f32.mrf.mxu1  ;;  %v20654_v54 = vld [vmem:[#allocation121_spill] sm:$0xff] }
 0x2de   :  { %7994 = vmatpush2.msra.mxu1 %v19593_v37  ;;  %7784 = vmatprep.subr.mxu0 %v20628_v2  ;;  %v16593_v46 = vadd.f32 %v4731_v3, %v4315_v26  ;;  %v4933_v22 = vadd.f32 %v4932_v16, %v4706_v5 }
 0x2df   :  { %7996 = vmatprep.subr.mxu1 %v16003_v24  ;;  %7787 = vmatpush2.msra.mxu0 %v19593_v37  ;;  %v4934_v36 = vpop.f32.mrf.mxu0  ;;  %v5129_v3 = vpop.f32.mrf.mxu1 }
 0x2e0   :  { %7998 = vmatpush2.msra.mxu1 %v19593_v37  ;;  %7790 = vmatprep.subr.mxu0 %v15925_v17  ;;  %v4935_v52 = vadd.f32 %v4934_v36, %v4708_v35  ;;  %v16601_v27 = vadd.f32 %v5103_v58, %v4933_v22  ;;  %v20629_v36 = vld [vmem:[#allocation212_spill] sm:$0xff] }
 0x2e1   :  { %8000 = vmatprep.subr.mxu1 %v16005_v28  ;;  %7793 = vmatpush2.msra.mxu0 %v19593_v37  ;;  %v4942_v30 = vpop.f32.mrf.mxu0  ;;  %v5139_v35 = vpop.f32.mrf.mxu1 }
 0x2e2   :  { %8002 = vmatpush2.msra.mxu1 %v19593_v37  ;;  %7796 = vmatprep.subr.mxu0 %v15995_v59  ;;  %v4943_v5 = vadd.f32 %v4942_v30, %v4714_v11  ;;  %v16607_v26 = vadd.f32 %v5105_v9, %v4935_v52  ;;  %v20644_v59 = vld [vmem:[#allocation72_spill] sm:$0xff] }
 0x2e3   :  { %8004 = vmatprep.subr.mxu1 %v16052_v63  ;;  %7799 = vmatpush2.msra.mxu0 %v19593_v37  ;;  %v4944_v58 = vpop.f32.mrf.mxu0  ;;  %v5141_v11 = vpop.f32.mrf.mxu1  ;;  %v20643_v63 = vld [vmem:[#allocation74_spill] sm:$0xff] }
 0x2e4   :  { %8006 = vmatpush2.msra.mxu1 %v19593_v37  ;;  %7802 = vmatprep.subr.mxu0 %v16001_v19  ;;  %v4945_v16 = vadd.f32 %v4944_v58, %v4716_v56  ;;  %v16613_v22 = vadd.f32 %v5115_v62, %v4943_v5  ;;  %v8535_v5 = vld [vmem:[#allocation10 + $0x3] ss:$8 sm:$0xf] }
 0x2e5   :  { %8008 = vmatprep.subr.mxu1 %v16086_v33  ;;  %7805 = vmatpush2.msra.mxu0 %v19593_v37  ;;  %v4952_v9 = vpop.f32.mrf.mxu0  ;;  %v5565_v56 = vpop.f32.mrf.mxu1 }
 0x2e6   :  { %8010 = vmatpush2.msra.mxu1 %v19593_v37  ;;  %7808 = vmatprep.subr.mxu0 %v16048_v60  ;;  %v4953_v52 = vadd.f32 %v4952_v9, %v4722_v39  ;;  %v16619_v30 = vadd.f32 %v5117_v51, %v4945_v16  ;;  %v8645_v60 = vld [vmem:[#allocation10 + $0x41] ss:$8 sm:$0xf] }
 0x2e7   :  { %8012 = vmatprep.subr.mxu1 %v16124_v4  ;;  %7811 = vmatpush2.msra.mxu0 %v19593_v37  ;;  %v4954_v62 = vpop.f32.mrf.mxu0  ;;  %v8590_v4 = vld [vmem:[#allocation10 + $0x22] ss:$8 sm:$0xf] }
 0x2e8   :  { %8014 = vmatpush2.msra.mxu1 %v19593_v37  ;;  %7814 = vmatprep.subr.mxu0 %v20629_v36  ;;  %v4955_v58 = vadd.f32 %v4954_v62, %v4724_v40  ;;  %v16625_v33 = vadd.f32 %v5127_v0, %v4953_v52  ;;  %v20630_v51 = vld [vmem:[#allocation214_spill] sm:$0xff]  ;;  %v20631_v9 = vld [vmem:[#allocation59_spill] sm:$0xff]  ;;  %v5567_v40 = vpop.f32.mrf.mxu1 }
 0x2e9   :  { %8016 = vmatprep.subr.mxu1 %v16142_v61  ;;  %7817 = vmatpush2.msra.mxu0 %v19593_v37  ;;  %v4962_v39 = vpop.f32.mrf.mxu0  ;;  %v16632_v61 = vrot.slane %v8535_v5, %v20631_v9  ;;  %v16639_v52 = vrot.slane %v8590_v4, %v20631_v9  ;;  %v16642_v62 = vrot.slane %v8645_v60, %v20631_v9 }
 0x2ea   :  { %8018 = vmatpush2.msra.mxu1 %v19593_v37  ;;  %7820 = vmatprep.subr.mxu0 %v16097_v49  ;;  %v4963_v16 = vadd.f32 %v4962_v39, %v4730_v8  ;;  %v16634_v36 = vadd.f32 %v5129_v3, %v4955_v58  ;;  %v20633_v39 = vld [vmem:[#allocation176_spill] sm:$0xff]  ;;  %v20635_v49 = vld [vmem:[#allocation186_spill] sm:$0xff] }
 0x2eb   :  { %8020 = vmatprep.subr.mxu1 %v16176_v50  ;;  %7823 = vmatpush2.msra.mxu0 %v19593_v37  ;;  %v4964_v0 = vpop.f32.mrf.mxu0  ;;  %v20632_v50 = vld [vmem:[#allocation41_spill] sm:$0xff]  ;;  %v16743_v45 = vmul.f32 %v16642_v62, %v20654_v54 }
 0x2ec   :  { %8022 = vmatpush2.msra.mxu1 %v19593_v37  ;;  %7826 = vmatprep.subr.mxu0 %v20630_v51  ;;  %v16645_v51 = vrot.slane %v8535_v5, %v20632_v50  ;;  %v4965_v8 = vadd.f32 %v4964_v0, %v16593_v46  ;;  %v16651_v3 = vrot.slane %v8590_v4, %v20632_v50  ;;  %v20636_v46 = vld [vmem:[#allocation184_spill] sm:$0xff]  ;;  %v20638_v0 = vld [vmem:[#allocation209_spill] sm:$0xff] }
 0x2ed   :  { %8024 = vmatprep.subr.mxu1 %v16199_v53  ;;  %7829 = vmatpush2.msra.mxu0 %v19593_v37  ;;  %v16653_v58 = vadd.f32 %v5139_v35, %v4963_v16  ;;  %v20634_v53 = vld [vmem:[#allocation130_spill] sm:$0xff]  ;;  %v16665_v5 = vsel %vm179_vm8, %v20633_v39, %v20635_v49  ;;  %v16670_v4 = vrot.slane %v8645_v60, %v20632_v50  ;;  %v20637_v35 = vld [vmem:[#allocation185_spill] sm:$0xff]  ;;  %v20639_v49 = vld [vmem:[#allocation199_spill] sm:$0xff]  ;;  %v5573_v50 = vpop.f32.mrf.mxu1 }
 0x2ee   :  { %8026 = vmatpush2.msra.mxu1 %v19593_v37  ;;  %7832 = vmatprep.subr.mxu0 %v16160_v1  ;;  %v16659_v9 = vsel %vm179_vm8, %v20634_v53, %v20633_v39  ;;  %v8892_v16 = vsel %vm179_vm8, %v20637_v35, %v20636_v46  ;;  %v16680_v53 = vsel %vm179_vm8, %v20636_v46, %v20638_v0  ;;  %v5404_v39 = vpop.f32.mrf.mxu0  ;;  %v20641_v0 = vld [vmem:[#allocation49_spill] sm:$0xff] }
 0x2ef   :  { %8028 = vmatprep.subr.mxu1 %v16229_v48  ;;  %7835 = vmatpush2.msra.mxu0 %v19593_v37  ;;  %v8557_v60 = vmul.f32 %v16632_v61, %v20639_v49  ;;  %v5405_v35 = vadd.f32 %v5404_v39, %v16601_v27  ;;  %v20640_v48 = vld [vmem:[#allocation62_spill] sm:$0xff]  ;;  %v16691_v46 = vadd.f32 %v5141_v11, %v4965_v8  ;;  %v20645_v27 = vld [vmem:[#allocation159_spill] sm:$0xff]  ;;  %v20647_v39 = vld [vmem:[#allocation61_spill] sm:$0xff] }
 0x2f0   :  { %8030 = vmatpush2.msra.mxu1 %v19593_v37  ;;  %7838 = vmatprep.subr.mxu0 %v16184_v32  ;;  %v8612_v1 = vmul.f32 %v16639_v52, %v20640_v48  ;;  %v20642_v32 = vld [vmem:[#allocation39_spill] sm:$0xff]  ;;  %v5406_v49 = vpop.f32.mrf.mxu0  ;;  %v8613_v28 = vmul.f32 %v16651_v3, %v20644_v59  ;;  %v8668_v8 = vmul.f32 %v16670_v4, %v20545_v6 }
 0x2f1   :  { %8032 = vmatprep.subr.mxu1 %v16258_v12  ;;  %7841 = vmatpush2.msra.mxu0 %v19593_v37  ;;  %v8667_v19 = vmul.f32 %v16642_v62, %v20642_v32  ;;  %v8558_v12 = vmul.f32 %v16645_v51, %v20643_v63  ;;  %v5566_v48 = vadd.f32 %v5565_v56, %v5405_v35  ;;  %v20646_v32 = vld [vmem:[#allocation165_spill] sm:$0xff]  ;;  %v5575_v56 = vpop.f32.mrf.mxu1  ;;  %v20650_v35 = vld [vmem:[#allocation96_spill] sm:$0xff] }
 0x2f2   :  { %8034 = vmatpush2.msra.mxu1 %v19593_v37  ;;  %7844 = vmatprep.subr.mxu0 %v20641_v0  ;;  %v5407_v11 = vadd.f32 %v5406_v49, %v16607_v26  ;;  %v8561_v63 = vmul.f32 %v16632_v61, %v20647_v39  ;;  %v20648_v0 = vld [vmem:[#allocation107_spill] sm:$0xff]  ;;  %v5412_v6 = vpop.f32.mrf.mxu0  ;;  %v8562_v49 = vmul.f32 %v16645_v51, %v20650_v35  ;;  %v16728_v39 = vpop.permute.xlu0 %9438 }
 0x2f3   :  { %8042 = vmatmul.mubr.f32.vlgmr.msra.gmra.mxu1 %v20645_v27  ;;  %8374 = vmatprep.subr.mxu1 %v19593_v37  ;;  %v8616_v59 = vmul.f32 %v16639_v52, %v20648_v0  ;;  %v16714_v27 = vmul.f32 %v16642_v62, %v20546_v57  ;;  %v20649_v26 = vld [vmem:[#allocation167_spill] sm:$0xff]  ;;  %v16726_v0 = vmul.f32 %v16670_v4, %v20552_v21 }
 0x2f4   :  { %7847 = vmatpush2.msra.mxu0 %v19593_v37  ;;  %8050 = vmatprep.mubr.f32.mxu1 %v20646_v32  ;;  %v20651_v32 = vld [vmem:[#allocation99_spill] sm:$0xff]  ;;  %v8573_v57 = vadd.f32 %v8557_v60, %v5566_v48  ;;  %v5414_v35 = vpop.f32.mrf.mxu0  ;;  %v20655_v60 = vld [vmem:[#allocation162_spill] sm:$0xff]  ;;  %v8896_v48 = vsel %vm219_vm2, %v8892_v16, 0.0 }
 0x2f5   :  { %8376 = vmatpush1.msra.mxu1 %v20565_v13  ;;  %7850 = vmatprep.subr.mxu0 %v20649_v26  ;;  %v16722_v17 = vmul.f32 %v16651_v3, %v20651_v32  ;;  %v5568_v13 = vadd.f32 %v5567_v40, %v5407_v11  ;;  %v5413_v26 = vadd.f32 %v5412_v6, %v16613_v22  ;;  %v20652_v32 = vld [vmem:[#allocation133_spill] sm:$0xff]  ;;  %v20653_v21 = vld [vmem:[#allocation123_spill] sm:$0xff]  ;;  %v5581_v6 = vpop.f32.mrf.mxu1 }
 0x2f6   :  { %8378 = vmatprep.subr.mxu1 %v19593_v37  ;;  %7853 = vmatpush2.msra.mxu0 %v19593_v37  ;;  %v8565_v24 = vmul.f32 %v16632_v61, %v20652_v32  ;;  %v16739_v2 = vmul.f32 %v16639_v52, %v20653_v21  ;;  %v8628_v22 = vadd.f32 %v8612_v1, %v8573_v57  ;;  %v20656_v11 = vld [vmem:[#allocation163_spill] sm:$0xff]  ;;  %v20657_v21 = vld [vmem:[#allocation73_spill] sm:$0xff]  ;;  %v16758_v1 = vpop.permute.xlu1 %9440  ;;  %v5420_v16 = vpop.f32.mrf.mxu0 }
 0x2f7   :  { %8380 = vmatpush1.msra.mxu1 %v20566_v7  ;;  %7856 = vmatprep.subr.mxu0 %v16269_v14  ;;  %v8574_v7 = vadd.f32 %v8558_v12, %v5568_v13  ;;  %v5574_v40 = vadd.f32 %v5573_v50, %v5413_v26  ;;  %v5415_v32 = vadd.f32 %v5414_v35, %v16619_v30  ;;  %v20658_v14 = vld [vmem:[#allocation64_spill] sm:$0xff]  ;;  %v20659_v50 = vld [vmem:[#allocation45_spill] sm:$0xff] }
 0x2f8   :  { %8054 = vmatmul.mubr.f32.gmra.mxu1 %v20655_v60  ;;  %8382 = vmatprep.subr.mxu1 %v19593_v37  ;;  %v8566_v54 = vmul.f32 %v16645_v51, %v20657_v21  ;;  %v16756_v60 = vmul.f32 %v16651_v3, %v20658_v14  ;;  %v8683_v12 = vadd.f32 %v8667_v19, %v8628_v22  ;;  %v20660_v26 = vld [vmem:[#allocation120_spill] sm:$0xff]  ;;  %v20662_v21 = vld [vmem:[#allocation177_spill] sm:$0xff]  ;;  %v20663_v19 = vld [vmem:[#allocation147_spill] sm:$0xff] }
 0x2f9   :  { %7859 = vmatpush2.msra.mxu0 %v19593_v37  ;;  %8062 = vmatprep.mubr.f32.mxu1 %v20656_v11  ;;  %v16764_v57 = vmul.f32 %v16670_v4, %v20660_v26  ;;  %v20661_v30 = vld [vmem:[#allocation44_spill] sm:$0xff]  ;;  %v8629_v14 = vadd.f32 %v8613_v28, %v8574_v7  ;;  %v8577_v35 = vadd.f32 %v8561_v63, %v5574_v40  ;;  %v20666_v63 = vld [vmem:[#allocation170_spill] sm:$0xff]  ;;  %v5583_v7 = vpop.f32.mrf.mxu1 }
 0x2fa   :  { %8384 = vmatpush1.msra.mxu1 %v20571_v25  ;;  %7862 = vmatprep.subr.mxu0 %v20659_v50  ;;  %v16768_v13 = vmul.f32 %v16632_v61, %v20661_v30  ;;  %v5576_v11 = vadd.f32 %v5575_v56, %v5415_v32  ;;  %v16772_v25 = vpop.permute.xlu0 %9446  ;;  %v8912_v22 = vadd.f32 %v8896_v48, %v8683_v12  ;;  %v5422_v50 = vpop.f32.mrf.mxu0  ;;  %v20665_v30 = vld [vmem:[#allocation87_spill] sm:$0xff]  ;;  %v20667_v48 = vld [vmem:[#allocation124_spill] sm:$0xff] }
 0x2fb   :  { %8386 = vmatprep.subr.mxu1 %v19593_v37  ;;  %7865 = vmatpush2.msra.mxu0 %v19593_v37  ;;  %v5421_v26 = vadd.f32 %v5420_v16, %v16625_v33  ;;  %v16779_v61 = vmul.f32 %v16639_v52, %v20664_v18  ;;  %v8900_v28 = vsel %vm219_vm2, %v20665_v30, 0.0  ;;  %v8684_v56 = vadd.f32 %v8668_v8, %v8629_v14  ;;  %v20668_v18 = vld [vmem:[#allocation231_spill] sm:$0xff]  ;;  %v20669_v16 = vld [vmem:[#allocation138_spill] sm:$0xff]  ;;  %v20674_v30 = vld [vmem:[#allocation129_spill] sm:$0xff] }
 0x2fc   :  { %8388 = vmatpush1.msra.mxu1 %v20662_v21  ;;  %7871 = vmatmul.mubr.f32.vlgmr.msra.gmra.mxu0 %v20663_v19  ;;  %v8632_v40 = vadd.f32 %v8616_v59, %v8577_v35  ;;  %v8578_v32 = vadd.f32 %v8562_v49, %v5576_v11  ;;  %v9312_v33 = vsel %vm263_vm15, %v20667_v48, 0.0  ;;  %v5423_v12 = vadd.f32 %v5422_v50, %v16634_v36  ;;  %v20670_v59 = vld [vmem:[#allocation30_spill] sm:$0xff]  ;;  %v20671_v49 = vld [vmem:[#allocation103_spill] sm:$0xff]  ;;  %v5428_v19 = vpop.f32.mrf.mxu0  ;;  %v20673_v36 = vld [vmem:[#allocation180_spill] sm:$0xff] }
 0x2fd   :  { %8066 = vmatmul.mubr.f32.gmra.mxu1 %v20666_v63  ;;  %8087 = vmatprep.subr.mxu0 %v19593_v37  ;;  %v5582_v52 = vadd.f32 %v5581_v6, %v5421_v26  ;;  %v9141_v21 = vadd.f32 %v20669_v16, %v8912_v22  ;;  %v9478_v8 = vsel %vm223_vm14, %v16728_v39, %v16772_v25  ;;  %v20672_v14 = vand.u32 4294901760, %v20671_v49  ;;  %v16802_v6 = vpop.permute.xlu1 %9448  ;;  %v20676_v16 = vld [vmem:[#allocation221_spill] sm:$0xff] }
 0x2fe   :  { %8390 = vmatprep.subr.mxu1 %v19593_v37  ;;  %7878 = vmatprep.mubr.f32.mxu0 %v20668_v18  ;;  %v8913_v35 = vadd.f32 %v16680_v53, %v8684_v56  ;;  %v8687_v11 = vadd.f32 %v16714_v27, %v8632_v40  ;;  %v8633_v50 = vadd.f32 %v16722_v17, %v8578_v32  ;;  %v20675_v63 = vand.u32 4294901760, %v20674_v30  ;;  %v5589_v53 = vpop.f32.mrf.mxu1  ;;  %v5430_v56 = vpop.f32.mrf.mxu0  ;;  %v20678_v32 = vld [vmem:[#allocation90_spill] sm:$0xff]  ;;  %v20688_v30 = vld [vmem:[#allocation57_spill] sm:$0xff] }
 0x2ff   :  { %8074 = vmatprep.mubr.f32.mxu1 %v20670_v59  ;;  %8091 = vmatpush1.msra.mxu0 %v20672_v14  ;;  %v8581_v22 = vadd.f32 %v8565_v24, %v5582_v52  ;;  %v5584_v26 = vadd.f32 %v5583_v7, %v5423_v12  ;;  %v5429_v27 = vadd.f32 %v5428_v19, %v16653_v58  ;;  %v16813_v18 = vpop.permute.xlu0 %9454  ;;  %v20677_v59 = vld [vmem:[#allocation236_spill] sm:$0xff]  ;;  %v20679_v12 = vld [vmem:[#allocation105_spill] sm:$0xff]  ;;  %v20683_v14 = vld [vmem:[#allocation63_spill] sm:$0xff] }
 0x300   :  { %8392 = vmatpush1.msra.mxu1 %v20673_v36  ;;  %8095 = vmatprep.subr.mxu0 %v19593_v37  ;;  %v16810_v48 = vadd.f32 %v8900_v28, %v8687_v11  ;;  %v9328_v40 = vadd.f32 %v9312_v33, %v9141_v21  ;;  %v8688_v24 = vadd.f32 %v16726_v0, %v8633_v50  ;;  %v8904_v33 = vsel %vm219_vm2, %v16659_v9, 0.0  ;;  %v20680_v21 = vld [vmem:[#allocation202_spill] sm:$0xff]  ;;  %v20686_v19 = vld [vmem:[#allocation187_spill] sm:$0xff]  ;;  %v5591_v9 = vpop.f32.mrf.mxu1 }
 0x301   :  { %8394 = vmatprep.subr.mxu1 %v19593_v37  ;;  %8099 = vmatpush1.msra.mxu0 %v20675_v63  ;;  %v8636_v17 = vadd.f32 %v16739_v2, %v8581_v22  ;;  %v8582_v7 = vadd.f32 %v8566_v54, %v5584_v26  ;;  %v5590_v28 = vadd.f32 %v5589_v53, %v5429_v27  ;;  %v20681_v2 = vld [vmem:[#allocation153_spill] sm:$0xff]  ;;  %v20682_v54 = vld [vmem:[#allocation192_spill] sm:$0xff]  ;;  %v20687_v26 = vld [vmem:[#allocation127_spill] sm:$0xff] }
 0x302   :  { %8396 = vmatpush1.msra.mxu1 %v20676_v16  ;;  %7881 = vmatmul.mubr.f32.gmra.mxu0 %v20677_v59  ;;  %v5431_v58 = vadd.f32 %v5430_v56, %v16691_v46  ;;  %v16822_v52 = vadd.f32 %v9478_v8, %v9328_v40  ;;  %v8895_v0 = vsel %vm179_vm8, %v20680_v21, %v20679_v12  ;;  %v20684_v8 = vld [vmem:[#allocation195_spill] sm:$0xff]  ;;  %v20689_v53 = vld [vmem:[#allocation125_spill] sm:$0xff]  ;;  %v16850_v56 = vpop.permute.xlu1 %9456  ;;  %v20692_v59 = vld [vmem:[#allocation52_spill] sm:$0xff] }
 0x303   :  { %8078 = vmatmul.mubr.f32.gmra.mxu1 %v20678_v32  ;;  %8103 = vmatprep.subr.mxu0 %v19593_v37  ;;  %v16834_v49 = vadd.f32 %v20682_v54, %v8688_v24  ;;  %v8570_v46 = vmul.f32 %v16645_v51, %v20683_v14  ;;  %v20685_v11 = vand.u32 4294901760, %v20684_v8  ;;  %v8691_v36 = vadd.f32 %v16743_v45, %v8636_v17  ;;  %v20690_v45 = vld [vmem:[#allocation183_spill] sm:$0xff]  ;;  %v16860_v24 = vpop.permute.xlu0 %9466  ;;  %v20693_v17 = vld [vmem:[#allocation48_spill] sm:$0xff]  ;;  %v20699_v14 = vld [vmem:[#allocation181_spill] sm:$0xff] }
 0x304   :  { %8398 = vmatprep.subr.mxu1 %v19593_v37  ;;  %7888 = vmatprep.mubr.f32.mxu0 %v20681_v2  ;;  %v8637_v50 = vadd.f32 %v16756_v60, %v8582_v7  ;;  %v8585_v22 = vadd.f32 %v16768_v13, %v5590_v28  ;;  %v8679_v63 = vmul.f32 %v16642_v62, %v20688_v30  ;;  %v20691_v40 = vand.u32 4294901760, %v20690_v45  ;;  %v20695_v32 = vld [vmem:[#allocation88_spill] sm:$0xff]  ;;  %v20698_v54 = vld [vmem:[#allocation243_spill] sm:$0xff]  ;;  %v20707_v45 = vld [vmem:[#allocation242_spill] sm:$0xff] }
 0x305   :  { %8107 = vmatpush1.msra.mxu0 %v20685_v11  ;;  %8400 = vmatpush1.msra.mxu1 %v20686_v19  ;;  %v5592_v51 = vadd.f32 %v5591_v9, %v5431_v58  ;;  %v8625_v27 = vmul.f32 %v16651_v3, %v20689_v53  ;;  %v8920_v60 = vadd.f32 %v8904_v33, %v8691_v36  ;;  %v9320_v62 = vsel %vm263_vm15, %v20692_v59, 0.0  ;;  %v20694_v3 = vld [vmem:[#allocation43_spill] sm:$0xff]  ;;  %v20697_v33 = vld [vmem:[#allocation126_spill] sm:$0xff]  ;;  %v16876_v11 = vpop.f32.mrf.mxu0  ;;  %v20702_v9 = vld [vmem:[#allocation189_spill] sm:$0xff] }
 0x306   :  { %8502 = vmatprep.mubr.f32.mxu1 %v20687_v26  ;;  %8111 = vmatprep.subr.mxu0 %v19593_v37  ;;  %v8692_v13 = vadd.f32 %v16764_v57, %v8637_v50  ;;  %v8640_v16 = vadd.f32 %v16779_v61, %v8585_v22  ;;  %v9142_v28 = vadd.f32 %v20695_v32, %v8913_v35  ;;  %v8908_v58 = vsel %vm219_vm2, %v8895_v0, 0.0  ;;  %v20696_v57 = vld [vmem:[#allocation114_spill] sm:$0xff]  ;;  %v20701_v0 = vld [vmem:[#allocation37_spill] sm:$0xff]  ;;  %v20703_v50 = vld [vmem:[#allocation227_spill] sm:$0xff] }
 0x307   :  { %8402 = vmatprep.subr.mxu1 %v19593_v37  ;;  %8115 = vmatpush1.msra.mxu0 %v20691_v40  ;;  %v8586_v7 = vadd.f32 %v8570_v46, %v5592_v51  ;;  %v9149_v61 = vadd.f32 %v20696_v57, %v8920_v60  ;;  %v8680_v2 = vmul.f32 %v16670_v4, %v20697_v33  ;;  %v20700_v8 = vand.u32 4294901760, %v20699_v14  ;;  %v20708_v40 = vld [vmem:[#allocation29_spill] sm:$0xff]  ;;  %v20714_v57 = vld [vmem:[#allocation238_spill] sm:$0xff]  ;;  %v5736_v33 = vpop.f32.mrf.mxu0 }
 0x308   :  { %8404 = vmatpush1.msra.mxu1 %v20693_v17  ;;  %7891 = vmatmul.mubr.f32.gmra.mxu0 %v20694_v3  ;;  %v8921_v46 = vadd.f32 %v16665_v5, %v8692_v13  ;;  %v8695_v35 = vadd.f32 %v8679_v63, %v8640_v16  ;;  %v8891_v19 = vsel %vm179_vm8, %v20679_v12, %v20701_v0  ;;  %v9637_v22 = vsel %vm307_vm12, %v20703_v50, 0.0  ;;  %v20704_v5 = vld [vmem:[#allocation188_spill] sm:$0xff]  ;;  %v20709_v13 = vld [vmem:[#allocation154_spill] sm:$0xff]  ;;  %v20710_v16 = vld [vmem:[#allocation237_spill] sm:$0xff] }
 0x309   :  { %8119 = vmatprep.subr.mxu0 %v19593_v37  ;;  %8406 = vmatprep.subr.mxu1 %v19593_v37  ;;  %v9336_v4 = vadd.f32 %v9320_v62, %v9149_v61  ;;  %v8641_v36 = vadd.f32 %v8625_v27, %v8586_v7  ;;  %v20705_v30 = vand.u32 4294901760, %v20704_v5  ;;  %v20706_v63 = vld [vmem:[#allocation132_spill] sm:$0xff]  ;;  %v16892_v12 = vadd.f32 %v20707_v45, %v9142_v28  ;;  %v16897_v27 = vpop.permute.xlu1 %9468  ;;  %v20711_v17 = vld [vmem:[#allocation219_spill] sm:$0xff]  ;;  %v20712_v7 = vld [vmem:[#allocation33_spill] sm:$0xff]  ;;  %v16907_v28 = vpop.permute.xlu0 %9581 }
 0x30a   :  { %7898 = vmatprep.mubr.f32.mxu0 %v20698_v54  ;;  %8123 = vmatpush1.msra.mxu0 %v20700_v8  ;;  %v9150_v51 = vadd.f32 %v20706_v63, %v8921_v46  ;;  %v8924_v53 = vadd.f32 %v8908_v58, %v8695_v35  ;;  %v9324_v60 = vsel %vm263_vm15, %v20708_v40, 0.0  ;;  %v9145_v3 = vadd.f32 %v20711_v17, %v16810_v48  ;;  %v20713_v58 = vld [vmem:[#allocation213_spill] sm:$0xff]  ;;  %v16924_v46 = vpop.f32.mrf.mxu1  ;;  %v20717_v35 = vld [vmem:[#allocation224_spill] sm:$0xff]  ;;  %v5750_v63 = vpop.f32.mrf.mxu0  ;;  %v20724_v45 = vld [vmem:[#allocation38_spill] sm:$0xff] }
 0x30b   :  { %8408 = vmatpush1.msra.mxu1 %v20702_v9  ;;  %8127 = vmatprep.subr.mxu0 %v19593_v37  ;;  %v9522_v59 = vadd.f32 %v20710_v16, %v9336_v4  ;;  %v8696_v62 = vadd.f32 %v8680_v2, %v8641_v36  ;;  %v9316_v32 = vsel %vm263_vm15, %v20712_v7, 0.0  ;;  %v20715_v2 = vld [vmem:[#allocation230_spill] sm:$0xff]  ;;  %v20716_v54 = vand.u32 4294901760, %v20615_v34  ;;  %v20718_v4 = vld [vmem:[#allocation228_spill] sm:$0xff] }
 0x30c   :  { %8410 = vmatprep.subr.mxu1 %v19593_v37  ;;  %8131 = vmatpush1.msra.mxu0 %v20705_v30  ;;  %v9153_v61 = vadd.f32 %v20714_v57, %v8924_v53  ;;  %v9611_v48 = vsel %vm267_vm13, %v20715_v2, %v16907_v28  ;;  %v9641_v36 = vsel %vm307_vm12, %v20718_v4, 0.0  ;;  %v20719_v34 = vand.u32 4294901760, %v20617_v43  ;;  %v20721_v5 = vld [vmem:[#allocation116_spill] sm:$0xff]  ;;  %v20722_v43 = vld [vmem:[#allocation210_spill] sm:$0xff]  ;;  %v20731_v57 = vld [vmem:[#allocation197_spill] sm:$0xff] }
 0x30d   :  { %8412 = vmatpush1.msra.mxu1 %v20612_v41  ;;  %7901 = vmatmul.mubr.f32.gmra.mxu0 %v20709_v13  ;;  %v9337_v41 = vadd.f32 %v20713_v58, %v9150_v51  ;;  %v16920_v14 = vadd.f32 %v9637_v22, %v9522_v59  ;;  %v8925_v8 = vadd.f32 %v8891_v19, %v8696_v62  ;;  %v16943_v51 = vpop.permute.xlu1 %9583  ;;  %v20723_v53 = vand.u32 4294901760, %v20722_v43  ;;  %v6177_v13 = vpop.f32.mrf.mxu1  ;;  %v20726_v59 = vld [vmem:[#allocation190_spill] sm:$0xff]  ;;  %v10945_v2 = vld [vmem:[%s18456_s6] sm:$0xf] }
 0x30e   :  { %8135 = vmatprep.subr.mxu0 %v19593_v37  ;;  %8414 = vmatprep.subr.mxu1 %v19593_v37  ;;  %v9340_v9 = vadd.f32 %v9324_v60, %v9153_v61  ;;  %v9332_v50 = vadd.f32 %v9316_v32, %v9145_v3  ;;  %v20725_v60 = vld [vmem:[#allocation156_spill] sm:$0xff]  ;;  %v20727_v62 = vand.u32 4294901760, %v20726_v59  ;;  %v20728_v17 = vld [vmem:[#allocation122_spill] sm:$0xff]  ;;  %v5752_v32 = vpop.f32.mrf.mxu0  ;;  %v20741_v43 = vld [vmem:[#allocation119_spill] sm:$0xff] }
 0x30f   :  { %8139 = vmatpush1.msra.mxu0 %v20716_v54  ;;  %8341 = vmatprep.mubr.f32.mxu0 %v20687_v26  ;;  %v9523_v0 = vadd.f32 %v20717_v35, %v9337_v41  ;;  %v20720_v26 = vld [vmem:[#allocation142_spill] sm:$0xff]  ;;  %v6183_v61 = vpop.f32.mrf.mxu1  ;;  %v20733_v54 = vld [vmem:[#allocation85_spill] sm:$0xff]  ;;  %v20735_v35 = vld [vmem:[#allocation91_spill] sm:$0xff] }
 0x310   :  { %8416 = vmatpush1.msra.mxu1 %v15636_v44  ;;  %8143 = vmatprep.subr.mxu0 %v19593_v37  ;;  %v9154_v19 = vadd.f32 %v20720_v26, %v8925_v8  ;;  %v9479_v44 = vsel %vm223_vm14, %v16758_v1, %v16802_v6  ;;  %v9526_v30 = vadd.f32 %v20721_v5, %v9340_v9  ;;  %v20734_v8 = vand.u32 4294901760, %v20733_v54  ;;  %v20736_v9 = vld [vmem:[#allocation198_spill] sm:$0xff]  ;;  %v5766_v4 = vpop.f32.mrf.mxu0 }
 0x311   :  { %8418 = vmatprep.subr.mxu1 %v19593_v37  ;;  %8147 = vmatpush1.msra.mxu0 %v20719_v34  ;;  %v16940_v22 = vadd.f32 %v9611_v48, %v9523_v0  ;;  %v16961_v7 = vadd.f32 %v9479_v44, %v9332_v50  ;;  %v16982_v0 = vrot.slane %v10945_v2, %v20735_v35  ;;  %v6185_v34 = vpop.f32.mrf.mxu1  ;;  %v20739_v44 = vand.u32 4294901760, %v20623_v23  ;;  %v20740_v5 = vld [vmem:[#allocation226_spill] sm:$0xff] }
 0x312   :  { %8420 = vmatpush1.msra.mxu1 %v15638_v31  ;;  %8151 = vmatprep.subr.mxu0 %v19593_v37  ;;  %v9341_v40 = vadd.f32 %v20724_v45, %v9154_v19  ;;  %v9612_v31 = vsel %vm267_vm13, %v20725_v60, %v16943_v51  ;;  %v16955_v16 = vadd.f32 %v9641_v36, %v9526_v30  ;;  %v20737_v36 = vand.u32 4294901760, %v20622_v10  ;;  %v20738_v19 = vld [vmem:[#allocation157_spill] sm:$0xff]  ;;  %v20744_v45 = vld [vmem:[#allocation28_spill] sm:$0xff] }
 0x313   :  { %8422 = vmatprep.subr.mxu1 %v19593_v37  ;;  %8155 = vmatpush1.msra.mxu0 %v20723_v53  ;;  %v9146_v50 = vadd.f32 %v20738_v19, %v16834_v49  ;;  %v20742_v49 = vld [vmem:[#allocation112_spill] sm:$0xff]  ;;  %v5753_v23 = vadd.f32 %v5752_v32, %v16982_v0  ;;  %v20764_v19 = vld [vmem:[#allocation211_spill] sm:$0xff] }
 0x314   :  { %8424 = vmatpush1.msra.mxu1 %v15677_v20  ;;  %8159 = vmatprep.subr.mxu0 %v19593_v37  ;;  %v9527_v3 = vadd.f32 %v20728_v17, %v9341_v40  ;;  %v20729_v20 = vld [vmem:[#allocation137_spill] sm:$0xff]  ;;  %v20743_v53 = vand.u32 4294901760, %v20742_v49  ;;  %v20745_v40 = vand.u32 4294901760, %v20744_v45 }
 0x315   :  { %8426 = vmatprep.subr.mxu1 %v19593_v37  ;;  %8163 = vmatpush1.msra.mxu0 %v20727_v62  ;;  %v20730_v58 = vand.u32 4294901760, %v20729_v20  ;;  %v17003_v30 = vadd.f32 %v20740_v5, %v9146_v50  ;;  %v20746_v62 = vand.u32 4294901760, %v20626_v55  ;;  %v20747_v17 = vld [vmem:[#allocation65_spill] sm:$0xff]  ;;  %v17031_v32 = vadd.f32 %v6185_v34, %v5753_v23  ;;  %v20762_v34 = vld [vmem:[#allocation206_spill] sm:$0xff]  ;;  %v20765_v50 = vld [vmem:[#allocation100_spill] sm:$0xff] }
 0x316   :  { %8428 = vmatpush1.msra.mxu1 %v15679_v42  ;;  %8167 = vmatprep.subr.mxu0 %v19593_v37  ;;  %v16968_v41 = vadd.f32 %v9612_v31, %v9527_v3  ;;  %v20732_v42 = vld [vmem:[#allocation71_spill] sm:$0xff] }
 0x317   :  { %8430 = vmatprep.subr.mxu1 %v19593_v37  ;;  %8171 = vmatpush1.msra.mxu0 %v20730_v58  ;;  %v16976_v48 = vrot.slane %v10945_v2, %v20732_v42  ;;  %v20753_v58 = vld [vmem:[#allocation77_spill] sm:$0xff] }
 0x318   :  { %8432 = vmatpush1.msra.mxu1 %v20731_v57  ;;  %8175 = vmatprep.subr.mxu0 %v19593_v37  ;;  %v20754_v57 = vand.u32 4294901760, %v20753_v58  ;;  %v20756_v2 = vld [vmem:[#allocation205_spill] sm:$0xff] }
 0x319   :  { %8434 = vmatprep.subr.mxu1 %v19593_v37  ;;  %8179 = vmatpush1.msra.mxu0 %v20734_v8  ;;  %v5735_v26 = vadd.f32 %v16876_v11, %v16976_v48  ;;  %v5751_v10 = vadd.f32 %v5750_v63, %v16976_v48  ;;  %v5768_v11 = vpop.f32.mrf.mxu0  ;;  %v20757_v54 = vand.u32 4294901760, %v20756_v2  ;;  %v20758_v8 = vld [vmem:[#allocation203_spill] sm:$0xff]  ;;  %v20786_v2 = vld [vmem:[#allocation60_spill] sm:$0xff] }
 0x31a   :  { %8436 = vmatpush1.msra.mxu1 %v20736_v9  ;;  %8183 = vmatprep.subr.mxu0 %v19593_v37  ;;  %v5769_v60 = vadd.f32 %v5768_v11, %v16982_v0  ;;  %v20759_v9 = vld [vmem:[#allocation200_spill] sm:$0xff] }
 0x31b   :  { %8438 = vmatprep.subr.mxu1 %v15786_v15  ;;  %8187 = vmatpush1.msra.mxu0 %v20737_v36  ;;  %v5737_v15 = vadd.f32 %v5736_v33, %v16982_v0  ;;  %v5767_v33 = vadd.f32 %v5766_v4, %v16976_v48  ;;  %v17013_v63 = vadd.f32 %v16924_v46, %v5735_v26  ;;  %v20760_v4 = vand.u32 4294901760, %v20759_v9  ;;  %v20761_v36 = vld [vmem:[#allocation207_spill] sm:$0xff]  ;;  %v20770_v11 = vld [vmem:[#allocation216_spill] sm:$0xff] }
 0x31c   :  { %8440 = vmatpush2.msra.mxu1 %v19593_v37  ;;  %8191 = vmatprep.subr.mxu0 %v19593_v37  ;;  %v17021_v59 = vadd.f32 %v6183_v61, %v5751_v10  ;;  %v20755_v61 = vld [vmem:[#allocation93_spill] sm:$0xff]  ;;  %v20763_v26 = vand.u32 4294901760, %v20762_v34  ;;  %v20768_v10 = vld [vmem:[#allocation212_spill] sm:$0xff]  ;;  %v20791_v34 = vld [vmem:[#allocation50_spill] sm:$0xff] }
 0x31d   :  { %8442 = vmatprep.subr.mxu1 %v20518_v38  ;;  %8195 = vmatpush1.msra.mxu0 %v20739_v44  ;;  %v6191_v38 = vpop.f32.mrf.mxu1  ;;  %v17019_v31 = vadd.f32 %v6177_v13, %v5737_v15  ;;  %v20750_v13 = vld [vmem:[#allocation101_spill] sm:$0xff]  ;;  %v20766_v44 = vand.u32 4294901760, %v20765_v50  ;;  %v20767_v15 = vld [vmem:[#allocation220_spill] sm:$0xff]  ;;  %v20769_v5 = vand.u32 4294901760, %v20768_v10 }
 0x31e   :  { %8444 = vmatpush2.msra.mxu1 %v19593_v37  ;;  %8199 = vmatprep.subr.mxu0 %v19593_v37  ;;  %v17035_v20 = vadd.f32 %v6191_v38, %v5767_v33  ;;  %v20774_v38 = vld [vmem:[#allocation214_spill] sm:$0xff]  ;;  %v20776_v33 = vld [vmem:[#allocation233_spill] sm:$0xff]  ;;  %v20788_v9 = vld [vmem:[#allocation144_spill] sm:$0xff] }
 0x31f   :  { %8446 = vmatprep.subr.mxu1 %v20741_v43  ;;  %8203 = vmatpush1.msra.mxu0 %v20743_v53  ;;  %v6193_v3 = vpop.f32.mrf.mxu1  ;;  %v20771_v43 = vld [vmem:[#allocation217_spill] sm:$0xff]  ;;  %v20775_v23 = vand.u32 4294901760, %v20774_v38 }
 0x320   :  { %8448 = vmatpush2.msra.mxu1 %v19593_v37  ;;  %8207 = vmatprep.subr.mxu0 %v19593_v37  ;;  %20751 = vst [vmem:[#allocation31_spill] sm:$0xff] %v17035_v20  ;;  %v17037_v55 = vadd.f32 %v6193_v3, %v5769_v60  ;;  %v20772_v49 = vand.u32 4294901760, %v20771_v43  ;;  %v20773_v53 = vld [vmem:[#allocation81_spill] sm:$0xff]  ;;  %v20777_v60 = vld [vmem:[#allocation36_spill] sm:$0xff] }
 0x321   :  { %8450 = vmatprep.subr.mxu1 %v15871_v47  ;;  %8211 = vmatpush1.msra.mxu0 %v20745_v40  ;;  %v20748_v47 = vld [vmem:[#allocation194_spill] sm:$0xff]  ;;  %v20782_v3 = vld [vmem:[#allocation80_spill] sm:$0xff]  ;;  %v20795_v10 = vld [vmem:[#allocation229_spill] sm:$0xff] }
 0x322   :  { %8452 = vmatpush2.msra.mxu1 %v19593_v37  ;;  %8215 = vmatprep.subr.mxu0 %v20746_v62  ;;  %v20749_v46 = vand.u32 4294901760, %v20748_v47  ;;  %20752 = vst [vmem:[#allocation42_spill] sm:$0xff] %v17037_v55  ;;  %v10946_v45 = vld [vmem:[#allocation10 + $0x44] ss:$8 sm:$0xf]  ;;  %v20778_v62 = vand.u32 4294901760, %v20777_v60 }
 0x323   :  { %8454 = vmatprep.subr.mxu1 %v20747_v17  ;;  %8219 = vmatpush2.msra.mxu0 %v19593_v37  ;;  %v9679_v40 = vrot.slane %v10946_v45, %v20735_v35  ;;  %v20779_v17 = vld [vmem:[#allocation240_spill] sm:$0xff]  ;;  %v20780_v47 = vld [vmem:[#allocation222_spill] sm:$0xff]  ;;  %v20801_v38 = vld [vmem:[#allocation161_spill] sm:$0xff] }
 0x324   :  { %8456 = vmatpush2.msra.mxu1 %v19593_v37  ;;  %8223 = vmatprep.subr.mxu0 %v20749_v46  ;;  %v20781_v46 = vand.u32 4294901760, %v20780_v47  ;;  %v20833_v55 = vld [vmem:[#allocation59_spill] sm:$0xff] }
 0x325   :  { %8458 = vmatprep.subr.mxu1 %v20750_v13  ;;  %8227 = vmatpush2.msra.mxu0 %v19593_v37  ;;  %v20783_v13 = vld [vmem:[#allocation97_spill] sm:$0xff] }
 0x326   :  { %8460 = vmatpush2.msra.mxu1 %v19593_v37  ;;  %8231 = vmatprep.subr.mxu0 %v20754_v57  ;;  %v9695_v58 = vmul.f32 %v9679_v40, %v20783_v13  ;;  %v20784_v57 = vld [vmem:[#allocation49_spill] sm:$0xff] }
 0x327   :  { %8462 = vmatprep.subr.mxu1 %v20755_v61  ;;  %8235 = vmatpush2.msra.mxu0 %v19593_v37  ;;  %v20785_v61 = vand.u32 4294901760, %v20784_v57 }
 0x328   :  { %8464 = vmatpush2.msra.mxu1 %v19593_v37  ;;  %8239 = vmatprep.subr.mxu0 %v20757_v54  ;;  %v9699_v54 = vmul.f32 %v9679_v40, %v20786_v2 }
 0x329   :  { %8466 = vmatprep.subr.mxu1 %v20758_v8  ;;  %8243 = vmatpush2.msra.mxu0 %v19593_v37  ;;  %v20787_v8 = vld [vmem:[#allocation234_spill] sm:$0xff] }
 0x32a   :  { %8468 = vmatpush2.msra.mxu1 %v19593_v37  ;;  %8247 = vmatprep.subr.mxu0 %v20760_v4  ;;  %v20789_v4 = vld [vmem:[#allocation167_spill] sm:$0xff] }
 0x32b   :  { %8470 = vmatprep.subr.mxu1 %v20761_v36  ;;  %8251 = vmatpush2.msra.mxu0 %v19593_v37  ;;  %v20790_v36 = vand.u32 4294901760, %v20789_v4 }
 0x32c   :  { %8472 = vmatpush2.msra.mxu1 %v19593_v37  ;;  %8255 = vmatprep.subr.mxu0 %v20763_v26  ;;  %v9687_v26 = vmul.f32 %v9679_v40, %v20791_v34 }
 0x32d   :  { %8474 = vmatprep.subr.mxu1 %v20764_v19  ;;  %8259 = vmatpush2.msra.mxu0 %v19593_v37  ;;  %v20792_v19 = vld [vmem:[#allocation40_spill] sm:$0xff] }
 0x32e   :  { %8476 = vmatpush2.msra.mxu1 %v19593_v37  ;;  %8263 = vmatprep.subr.mxu0 %v20766_v44  ;;  %v20793_v50 = vand.u32 4294901760, %v20792_v19  ;;  %v20794_v44 = vld [vmem:[#allocation115_spill] sm:$0xff] }
 0x32f   :  { %8478 = vmatprep.subr.mxu1 %v20767_v15  ;;  %8267 = vmatpush2.msra.mxu0 %v19593_v37  ;;  %v9691_v15 = vmul.f32 %v9679_v40, %v20794_v44 }
 0x330   :  { %8480 = vmatpush2.msra.mxu1 %v19593_v37  ;;  %8271 = vmatprep.subr.mxu0 %v20769_v5  ;;  %v20796_v5 = vld [vmem:[#allocation151_spill] sm:$0xff] }
 0x331   :  { %8482 = vmatprep.subr.mxu1 %v20770_v11  ;;  %8275 = vmatpush2.msra.mxu0 %v19593_v37  ;;  %v20797_v11 = vld [vmem:[#allocation45_spill] sm:$0xff] }
 0x332   :  { %8484 = vmatpush2.msra.mxu1 %v19593_v37  ;;  %8279 = vmatprep.subr.mxu0 %v20772_v49  ;;  %v20798_v43 = vand.u32 4294901760, %v20797_v11  ;;  %v20799_v49 = vld [vmem:[#allocation131_spill] sm:$0xff] }
 0x333   :  { %8486 = vmatprep.subr.mxu1 %v20773_v53  ;;  %8283 = vmatpush2.msra.mxu0 %v19593_v37  ;;  %v20800_v53 = vld [vmem:[#allocation149_spill] sm:$0xff] }
 0x334   :  { %8488 = vmatpush2.msra.mxu1 %v19593_v37  ;;  %8287 = vmatprep.subr.mxu0 %v20775_v23  ;;  %v17127_v23 = vpop.permute.xlu0 %9569 }
 0x335   :  { %8490 = vmatprep.subr.mxu1 %v20776_v33  ;;  %8291 = vmatpush2.msra.mxu0 %v19593_v37  ;;  %v17129_v33 = vpop.f32.mrf.mxu1 }
 0x336   :  { %8492 = vmatpush2.msra.mxu1 %v19593_v37  ;;  %8295 = vmatprep.subr.mxu0 %v20778_v62  ;;  %20802 = vst [vmem:[#allocation171_spill] sm:$0xff] %v17129_v33  ;;  %v17137_v62 = vpop.f32.mrf.mxu0 }
 0x337   :  { %8494 = vmatprep.subr.mxu1 %v20779_v17  ;;  %8299 = vmatpush2.msra.mxu0 %v19593_v37  ;;  %v17135_v60 = vpop.f32.mrf.mxu1 }
 0x338   :  { %8496 = vmatpush2.msra.mxu1 %v19593_v37  ;;  %8303 = vmatprep.subr.mxu0 %v20781_v46  ;;  %v17133_v40 = vpop.permute.xlu0 %9593  ;;  %20804 = vst [vmem:[#allocation241_spill] sm:$0xff] %v17135_v60 }
 0x339   :  { %8498 = vmatprep.subr.mxu1 %v20782_v3  ;;  %8307 = vmatpush2.msra.mxu0 %v19593_v37  ;;  %v17141_v47 = vpop.f32.mrf.mxu1  ;;  %v17145_v3 = vpop.f32.mrf.mxu0 }
 0x33a   :  { %8500 = vmatpush2.msra.mxu1 %v19593_v37  ;;  %8311 = vmatprep.subr.mxu0 %v20785_v61  ;;  %20805 = vst [vmem:[#allocation79_spill] sm:$0xff] %v17141_v47 }
 0x33b   :  { %8504 = vmatmul.mubr.f32.vlgmr.msra.gmra.mxu1 %v20787_v8  ;;  %8315 = vmatpush2.msra.mxu0 %v19593_v37  ;;  %v17151_v61 = vpop.f32.mrf.mxu0 }
 0x33c   :  { %8510 = vmatprep.mubr.f32.mxu1 %v20788_v9  ;;  %8319 = vmatprep.subr.mxu0 %v20790_v36  ;;  %v17143_v46 = vpop.permute.xlu0 %9462 }
 0x33d   :  { %8323 = vmatpush2.msra.mxu0 %v19593_v37  ;;  %9728 = vrot.lane.b32.xlu0 %v9695_v58, %s11163_s23  ;;  %v17147_v58 = vpop.f32.mrf.mxu1 }
 0x33e   :  { %8327 = vmatprep.subr.mxu0 %v20793_v50  ;;  %9730 = vrot.lane.b32.xlu1 %v9699_v54, %s11163_s23  ;;  %20806 = vst [vmem:[#allocation201_spill] sm:$0xff] %v17147_v58 }
 0x33f   :  { %8512 = vmatmul.mubr.f32.gmra.mxu1 %v20795_v10  ;;  %8331 = vmatpush2.msra.mxu0 %v19593_v37 }
 0x340   :  { %8518 = vmatprep.mubr.f32.mxu1 %v20796_v5  ;;  %8335 = vmatprep.subr.mxu0 %v20798_v43  ;;  %v17153_v54 = vpop.permute.xlu0 %9577 }
 0x341   :  { %8339 = vmatpush2.msra.mxu0 %v19593_v37  ;;  %9724 = vrot.lane.b32.xlu0 %v9687_v26, %s11163_s23  ;;  %v17125_v37 = vpop.permute.xlu1 %9571 }
 0x342   :  { %8343 = vmatmul.mubr.f32.vlgmr.msra.gmra.mxu0 %v20787_v8  ;;  %9726 = vrot.lane.b32.xlu1 %v9691_v15, %s11163_s23  ;;  %v17155_v8 = vpop.f32.mrf.mxu1 }
 0x343   :  { %8520 = vmatmul.mubr.f32.gmra.mxu1 %v20799_v49  ;;  %8349 = vmatprep.mubr.f32.mxu0 %v20788_v9  ;;  %20807 = vst [vmem:[#allocation141_spill] sm:$0xff] %v17155_v8  ;;  %v17157_v9 = vpop.f32.mrf.mxu0 }
 0x344   :  { %8526 = vmatprep.mubr.f32.mxu1 %v20800_v53  ;;  %v17161_v36 = vpop.f32.mrf.mxu1  ;;  %v17163_v26 = vpop.permute.xlu0 %9589 }
 0x345   :  { %v17131_v45 = vpop.permute.xlu1 %9595  ;;  %20808 = vst [vmem:[#allocation134_spill] sm:$0xff] %v17161_v36  ;;  %v17165_v19 = vpop.f32.mrf.mxu0 }
 0x346   :  { %8351 = vmatmul.mubr.f32.gmra.mxu0 %v20795_v10  ;;  %20803 = vst [vmem:[#allocation182_spill] sm:$0xff] %v17131_v45  ;;  %v17167_v50 = vpop.f32.mrf.mxu1 }
 0x347   :  { %8528 = vmatmul.mubr.f32.gmra.mxu1 %v20801_v38  ;;  %8357 = vmatprep.mubr.f32.mxu0 %v20796_v5  ;;  %20809 = vst [vmem:[#allocation110_spill] sm:$0xff] %v17167_v50  ;;  %v17171_v10 = vpop.f32.mrf.mxu0 }
 0x348   :  { %v17173_v5 = vpop.permute.xlu0 %9704  ;;  %v17175_v11 = vpop.f32.mrf.mxu1 }
 0x349   :  { %v17139_v17 = vpop.permute.xlu1 %9464  ;;  %20811 = vst [vmem:[#allocation143_spill] sm:$0xff] %v17173_v5  ;;  %20812 = vst [vmem:[#allocation175_spill] sm:$0xff] %v17175_v11  ;;  %v17177_v43 = vpop.f32.mrf.mxu0 }
 0x34a   :  { %8359 = vmatmul.mubr.f32.gmra.mxu0 %v20799_v49  ;;  %20813 = vst [vmem:[#allocation179_spill] sm:$0xff] %v17177_v43 }
 0x34b   :  { %8365 = vmatprep.mubr.f32.mxu0 %v20800_v53  ;;  %v17179_v53 = vpop.f32.mrf.mxu1  ;;  %v17181_v2 = vpop.f32.mrf.mxu0 }
 0x34c   :  { %20814 = vst [vmem:[#allocation27_spill] sm:$0xff] %v17179_v53  ;;  %20815 = vst [vmem:[#allocation164_spill] sm:$0xff] %v17181_v2 }
 0x34d   :  { %v17149_v57 = vpop.permute.xlu1 %9579  ;;  %v17183_v13 = vpop.f32.mrf.mxu1 }
 0x34e   :  { %8367 = vmatmul.mubr.f32.gmra.mxu0 %v20801_v38  ;;  %v9713_v38 = vpop.permute.xlu0 %9712  ;;  %20816 = vst [vmem:[#allocation172_spill] sm:$0xff] %v17183_v13  ;;  %v17187_v34 = vpop.f32.mrf.mxu0 }
 0x34f   :  { %20818 = vst [vmem:[#allocation168_spill] sm:$0xff] %v17187_v34  ;;  %v17191_v42 = vpop.f32.mrf.mxu1 }
 0x350   :  { %20820 = vst [vmem:[#allocation225_spill] sm:$0xff] %v17191_v42  ;;  %v17193_v50 = vpop.f32.mrf.mxu0  ;;  %v9614_v42 = vsel %vm267_vm13, %v17131_v45, %v17125_v37 }
 0x351   :  { %v17159_v4 = vpop.permute.xlu1 %9591  ;;  %20821 = vst [vmem:[#allocation173_spill] sm:$0xff] %v17193_v50  ;;  %v17197_v36 = vpop.f32.mrf.mxu1 }
 0x352   :  { %v17189_v35 = vpop.permute.xlu0 %9720  ;;  %20823 = vst [vmem:[#allocation94_spill] sm:$0xff] %v17197_v36  ;;  %v17201_v8 = vpop.f32.mrf.mxu0 }
 0x353   :  { %20819 = vst [vmem:[#allocation160_spill] sm:$0xff] %v17189_v35  ;;  %20824 = vst [vmem:[#allocation108_spill] sm:$0xff] %v17201_v8  ;;  %v17203_v58 = vpop.f32.mrf.mxu1 }
 0x354   :  { %20825 = vst [vmem:[#allocation106_spill] sm:$0xff] %v17203_v58  ;;  %v17207_v47 = vpop.f32.mrf.mxu0 }
 0x355   :  { %v17169_v15 = vpop.permute.xlu1 %9706  ;;  %20827 = vst [vmem:[#allocation26_spill] sm:$0xff] %v17207_v47  ;;  %v17211_v60 = vpop.f32.mrf.mxu1  ;;  %v9475_v47 = vsel %vm223_vm14, %v16802_v6, %v16850_v56  ;;  %v9474_v6 = vsel %vm223_vm14, %v16772_v25, %v16813_v18  ;;  %v9610_v25 = vsel %vm267_vm13, %v17125_v37, %v17149_v57  ;;  %v9609_v37 = vsel %vm267_vm13, %v17127_v23, %v17153_v54 }
 0x356   :  { %20810 = vst [vmem:[#allocation104_spill] sm:$0xff] %v17169_v15  ;;  %v17199_v53 = vpop.permute.xlu0 %9585  ;;  %20829 = vst [vmem:[#allocation146_spill] sm:$0xff] %v17211_v60  ;;  %v17217_v36 = vpop.f32.mrf.mxu0  ;;  %v9613_v60 = vsel %vm267_vm13, %v17133_v40, %v17127_v23  ;;  %v9519_v43 = vadd.f32 %v9475_v47, %v17003_v30 }
 0x357   :  { %20830 = vst [vmem:[#allocation109_spill] sm:$0xff] %v17217_v36  ;;  %v17222_v50 = vpop.f32.mrf.mxu1  ;;  %v17235_v36 = vld [vmem:[%s18454_s4] sm:$0xf]  ;;  %s18255_s4 = sld [smem:[#allocation15 + $0x1]] }
 0x358   :  { %20831 = vst [vmem:[#allocation139_spill] sm:$0xff] %v17222_v50  ;;  %20832 = vst [vmem:[#allocation98_spill] sm:$0xff] %v17235_v36  ;;  %v9742_v50 = vsel %vm179_vm8, %v17173_v5, %v9713_v38  ;;  %v17250_v2 = vpop.f32.mrf.mxu0  ;;  %v9797_v5 = vrot.slane %v17235_v36, %v20833_v55 }
 0x359   :  { %v9715_v49 = vpop.permute.xlu1 %9714  ;;  %v17257_v20 = vpop.f32.mrf.mxu1 }
 0x35a   :  { %v17209_v34 = vpop.permute.xlu0 %9700  ;;  %v9743_v8 = vsel %vm179_vm8, %v17169_v15, %v9715_v49  ;;  %v9633_v15 = vsel %vm307_vm12, %v9614_v42, 0.0  ;;  %v9629_v42 = vsel %vm307_vm12, %v9613_v60, 0.0  ;;  %20834 = vst [vmem:[#allocation239_spill] sm:$0xff] %v17257_v20  ;;  %vm9958_vm12 = vcmask 1041409  }
 0x35b   :  { %20828 = vst [vmem:[#allocation140_spill] sm:$0xff] %v17209_v34  ;;  %v9788_v33 = vadd.f32 %v9743_v8, %v16955_v16  ;;  %v9738_v16 = vsel %vm179_vm8, %v9713_v38, %v17189_v35  ;;  %v9784_v8 = vadd.f32 %v9742_v50, %v16920_v14  ;;  %v9649_v60 = vadd.f32 %v9633_v15, %v16961_v7  ;;  %v17280_v50 = vpop.f32.mrf.mxu0 }
 0x35c   :  { %v9645_v38 = vadd.f32 %v9629_v42, %v16822_v52  ;;  %20836 = vst [vmem:[#allocation184_spill] sm:$0xff] %v17280_v50  ;;  %v9785_v7 = vadd.f32 %v9738_v16, %v16940_v22 }
 0x35d   :  { %v17185_v44 = vpop.permute.xlu1 %9722  ;;  %v9826_v14 = vadd.f32 %v9797_v5, %v9788_v33  ;;  %v9822_v23 = vadd.f32 %v9797_v5, %v9784_v8 }
 0x35e   :  { %20817 = vst [vmem:[#allocation82_spill] sm:$0xff] %v17185_v44  ;;  %v9739_v45 = vsel %vm179_vm8, %v9715_v49, %v17185_v44  ;;  %v9515_v44 = vadd.f32 %v9474_v6, %v16892_v12  ;;  %v9650_v6 = vadd.f32 %v9610_v25, %v9519_v43 }
 0x35f   :  { %v9789_v49 = vadd.f32 %v9739_v45, %v16968_v41  ;;  %v20837_v41 = vld [vmem:[#allocation41_spill] sm:$0xff]  ;;  %v9842_v16 = vmul.f32 0.25, %v9826_v14  ;;  %v9838_v8 = vmul.f32 0.25, %v9822_v23  ;;  %v10948_v14 = vld [vmem:[#allocation3 + $0x40] sm:$0xff] }
 0x360   :  { %v9801_v45 = vrot.slane %v17235_v36, %v20837_v41  ;;  %v9646_v33 = vadd.f32 %v9609_v37, %v9515_v44  ;;  %v17298_v36 = vpop.f32.mrf.mxu0 }
 0x361   :  { %v17195_v11 = vpop.permute.xlu1 %9587 }
 0x362   :  { %20822 = vst [vmem:[#allocation196_spill] sm:$0xff] %v17195_v11  ;;  %v9709_v11 = vpop.permute.xlu0 %9708  ;;  %v9827_v22 = vadd.f32 %v9801_v45, %v9789_v49  ;;  %v9823_v20 = vadd.f32 %v9801_v45, %v9785_v7  ;;  %v17306_v37 = vpop.f32.mrf.mxu0 }
 0x363   :  { %v9740_v12 = vsel %vm179_vm8, %v17209_v34, %v9709_v11 }
 0x364   :  { %v9776_v42 = vadd.f32 %v9740_v12, %v9645_v38  ;;  %v9839_v38 = vmul.f32 0.25, %v9823_v20  ;;  %v17308_v12 = vadd.f32 %v10948_v14, %v9838_v8  ;;  %v10953_v14 = vld [vmem:[#allocation3 + $0x28] sm:$0xff] }
 0x365   :  { %v17205_v13 = vpop.permute.xlu1 %9702 }
 0x366   :  { %20826 = vst [vmem:[#allocation169_spill] sm:$0xff] %v17205_v13  ;;  %v17288_v15 = vpop.permute.xlu0 %9716  ;;  %v9814_v44 = vadd.f32 %v9797_v5, %v9776_v42  ;;  %20843 = vst [vmem:[#allocation74_spill] sm:$0xff] %v17308_v12 }
 0x367   :  { %20838 = vst [vmem:[#allocation185_spill] sm:$0xff] %v17288_v15  ;;  %v9736_v34 = vsel %vm179_vm8, %v9709_v11, %v17288_v15  ;;  %v17396_v15 = vld [vmem:[#allocation13 + $0x6] ss:$8 sm:$0xf] }
 0x368   :  { %20877 = vst [vmem:[#allocation30_spill] sm:$0xff] %v17396_v15 }
 0x369   :  { %v9711_v58 = vpop.permute.xlu1 %9710 }
 0x36a   :  { %v9741_v30 = vsel %vm179_vm8, %v17205_v13, %v9711_v58  ;;  %v17290_v13 = vpop.f32.mrf.mxu1 }
 0x36b   :  { %20839 = vst [vmem:[#allocation209_spill] sm:$0xff] %v17290_v13  ;;  %v9780_v35 = vadd.f32 %v9741_v30, %v9649_v60  ;;  %v9777_v30 = vadd.f32 %v9736_v34, %v9646_v33  ;;  %v9843_v13 = vmul.f32 0.25, %v9827_v22  ;;  %v9830_v34 = vmul.f32 0.25, %v9814_v44  ;;  %v17316_v33 = vpop.f32.mrf.mxu0  ;;  %v10950_v22 = vld [vmem:[#allocation3 + $0x48] sm:$0xff] }
 0x36c   :  { %v17300_v25 = vpop.f32.mrf.mxu1  ;;  %v17318_v42 = vadd.f32 %v10950_v22, %v9839_v38 }
 0x36d   :  { %v17273_v47 = vpop.permute.xlu1 %9718  ;;  %20840 = vst [vmem:[#allocation199_spill] sm:$0xff] %v17300_v25  ;;  %v9818_v60 = vadd.f32 %v9797_v5, %v9780_v35 }
 0x36e   :  { %20835 = vst [vmem:[#allocation176_spill] sm:$0xff] %v17273_v47  ;;  %v9737_v52 = vsel %vm179_vm8, %v9711_v58, %v17273_v47  ;;  %v17302_v50 = vpop.f32.mrf.mxu1  ;;  %v10947_v58 = vld [vmem:[#allocation3 + $0x60] sm:$0xff]  ;;  %20846 = vst [vmem:[#allocation165_spill] sm:$0xff] %v17318_v42  ;;  %v20872_v47 = vld [vmem:[#allocation186_spill] sm:$0xff] }
 0x36f   :  { %v9781_v43 = vadd.f32 %v9737_v52, %v9650_v6  ;;  %20841 = vst [vmem:[#allocation62_spill] sm:$0xff] %v17302_v50  ;;  %v17304_v49 = vadd.f32 %v10947_v58, %v9842_v16  ;;  %v9834_v7 = vmul.f32 0.25, %v9818_v60  ;;  %v9815_v6 = vadd.f32 %v9801_v45, %v9777_v30  ;;  %v10949_v52 = vld [vmem:[#allocation3 + $0x68] sm:$0xff]  ;;  %v10951_v16 = vld [vmem:[#allocation3 + $0x20] sm:$0xff] }
 0x370   :  { %v17310_v23 = vadd.f32 %v10949_v52, %v9843_v13  ;;  %v17312_v35 = vpop.f32.mrf.mxu1  ;;  %v10952_v30 = vld [vmem:[#allocation3] sm:$0xff]  ;;  %v17434_v50 = vrot.slane %v17396_v15, %v20833_v55 }
 0x371   :  { %20842 = vst [vmem:[#allocation39_spill] sm:$0xff] %v17304_v49  ;;  %v9819_v11 = vadd.f32 %v9801_v45, %v9781_v43  ;;  %20845 = vst [vmem:[#allocation159_spill] sm:$0xff] %v17312_v35  ;;  %v9890_v5 = vadd.f32 %v17304_v49, %v17308_v12  ;;  %v17320_v43 = vadd.f32 %v10951_v16, %v9834_v7  ;;  %v9831_v45 = vmul.f32 0.25, %v9815_v6  ;;  %v10954_v7 = vld [vmem:[#allocation3 + $0x8] sm:$0xff] }
 0x372   :  { %20844 = vst [vmem:[#allocation72_spill] sm:$0xff] %v17310_v23  ;;  %v9897_v13 = vadd.f32 %v17310_v23, %v17318_v42  ;;  %v17326_v60 = vpop.f32.mrf.mxu1  ;;  %v17328_v44 = vadd.f32 %v10952_v30, %v9830_v34  ;;  %v20855_v23 = vld [vmem:[#allocation89_spill] sm:$0xff]  ;;  %v20858_v30 = vld [vmem:[#allocation223_spill] sm:$0xff] }
 0x373   :  { %v9835_v20 = vmul.f32 0.25, %v9819_v11  ;;  %20847 = vst [vmem:[#allocation61_spill] sm:$0xff] %v17320_v43  ;;  %20849 = vst [vmem:[#allocation96_spill] sm:$0xff] %v17326_v60  ;;  %v9891_v58 = vrot.slane %v9890_v5, 4  ;;  %v17336_v22 = vadd.f32 %v10954_v7, %v9831_v45  ;;  %v17343_v34 = vsel %vm798_vm1, %v20855_v23, 0.0 }
 0x374   :  { %v17322_v8 = vpop.f32.mrf.mxu0  ;;  %20850 = vst [vmem:[#allocation99_spill] sm:$0xff] %v17328_v44  ;;  %v9862_v38 = vadd.f32 %v17320_v43, %v17328_v44  ;;  %v9898_v6 = vrot.slane %v9897_v13, 4  ;;  %v17338_v16 = vpop.f32.mrf.mxu1  ;;  %20857 = vst [vmem:[#allocation163_spill] sm:$0xff] %v17343_v34  ;;  %v17350_v42 = vld [vmem:[#allocation13 + $0x1] ss:$8 sm:$0xf] }
 0x375   :  { %20848 = vst [vmem:[#allocation107_spill] sm:$0xff] %v17322_v8  ;;  %v17330_v52 = vadd.f32 %v10953_v14, %v9835_v20  ;;  %20853 = vst [vmem:[#allocation121_spill] sm:$0xff] %v17336_v22  ;;  %v17348_v20 = vsel %vm798_vm1, %v20858_v30, 0.0  ;;  %v9892_v14 = vadd.f32 %v9891_v58, %v9890_v5  ;;  %v17354_v7 = vld [vmem:[#allocation13] ss:$8 sm:$0xf] }
 0x376   :  { %v17334_v11 = vpop.f32.mrf.mxu0  ;;  %20854 = vst [vmem:[#allocation162_spill] sm:$0xff] %v17338_v16  ;;  %20859 = vst [vmem:[#allocation73_spill] sm:$0xff] %v17348_v20  ;;  %v17356_v12 = vld [vmem:[#allocation13 + $0x4] ss:$8 sm:$0xf] }
 0x377   :  { %20851 = vst [vmem:[#allocation133_spill] sm:$0xff] %v17330_v52  ;;  %20852 = vst [vmem:[#allocation123_spill] sm:$0xff] %v17334_v11  ;;  %v9869_v45 = vadd.f32 %v17330_v52, %v17336_v22  ;;  %v20863_v43 = vld [vmem:[#allocation130_spill] sm:$0xff]  ;;  %v20866_v34 = vld [vmem:[#allocation145_spill] sm:$0xff]  ;;  %v9863_v52 = vrot.slane %v9862_v38, 4  ;;  %v9893_v60 = vrot.slane %v9892_v14, 2 }
 0x378   :  { %20860 = vst [vmem:[#allocation64_spill] sm:$0xff] %v17350_v42  ;;  %20861 = vst [vmem:[#allocation120_spill] sm:$0xff] %v17354_v7  ;;  %v20864_v44 = vld [vmem:[#allocation78_spill] sm:$0xff]  ;;  %v17367_v30 = vsel %vm798_vm1, %v20866_v34, 0.0 }
 0x379   :  { %20862 = vst [vmem:[#allocation44_spill] sm:$0xff] %v17356_v12  ;;  %v17362_v23 = vsel %vm179_vm8, %v20864_v44, %v20863_v43  ;;  %20867 = vst [vmem:[#allocation147_spill] sm:$0xff] %v17367_v30  ;;  %v20868_v5 = vld [vmem:[#allocation150_spill] sm:$0xff]  ;;  %v17382_v43 = vsel %vm179_vm8, %v20872_v47, %v20864_v44  ;;  %v9899_v30 = vadd.f32 %v9898_v6, %v9897_v13  ;;  %v9870_v6 = vrot.slane %v9869_v45, 4 }
 0x37a   :  { %20865 = vst [vmem:[#allocation177_spill] sm:$0xff] %v17362_v23  ;;  %v17372_v58 = vsel %vm798_vm1, %v20868_v5, 0.0  ;;  %v17374_v22 = vpop.f32.mrf.mxu0  ;;  %v17376_v20 = vld [vmem:[#allocation13 + $0x2] ss:$8 sm:$0xf]  ;;  %20873 = vst [vmem:[#allocation124_spill] sm:$0xff] %v17382_v43  ;;  %v17390_v5 = vpop.f32.mrf.mxu1  ;;  %v17402_v47 = vrot.slane %v17350_v42, %v20837_v41  ;;  %v17410_v13 = vrot.slane %v17356_v12, %v20833_v55  ;;  %v9864_v43 = vadd.f32 %v9863_v52, %v9862_v38 }
 0x37b   :  { %20869 = vst [vmem:[#allocation56_spill] sm:$0xff] %v17372_v58  ;;  %20870 = vst [vmem:[#allocation87_spill] sm:$0xff] %v17374_v22  ;;  %v20874_v23 = vld [vmem:[#allocation191_spill] sm:$0xff]  ;;  %v17394_v58 = vrot.slane %v17350_v42, %v20833_v55  ;;  %v17424_v42 = vrot.slane %v17376_v20, %v20833_v55  ;;  %v17430_v35 = vrot.slane %v17376_v20, %v20837_v41  ;;  %v20882_v22 = vld [vmem:[#allocation218_spill] sm:$0xff]  ;;  %v9900_v38 = vrot.slane %v9899_v30, 2 }
 0x37c   :  { %20871 = vst [vmem:[#allocation170_spill] sm:$0xff] %v17376_v20  ;;  %v17388_v34 = vsel %vm179_vm8, %v20874_v23, %v20680_v21  ;;  %20876 = vst [vmem:[#allocation138_spill] sm:$0xff] %v17390_v5  ;;  %v17398_v16 = vld [vmem:[#allocation13 + $0x3] ss:$8 sm:$0xf]  ;;  %v17406_v21 = vrot.slane %v17354_v7, %v20833_v55  ;;  %v17416_v23 = vrot.slane %v17354_v7, %v20837_v41  ;;  %v17426_v5 = vpop.f32.mrf.mxu0 }
 0x37d   :  { %20875 = vst [vmem:[#allocation231_spill] sm:$0xff] %v17388_v34  ;;  %20878 = vst [vmem:[#allocation103_spill] sm:$0xff] %v17398_v16  ;;  %v17412_v44 = vld [vmem:[#allocation13 + $0x5] ss:$8 sm:$0xf]  ;;  %v17420_v34 = vrot.slane %v17356_v12, %v20837_v41  ;;  %v17438_v7 = vrot.slane %v17396_v15, %v20837_v41  ;;  %v9484_v52 = vsel %vm223_vm14, %v16860_v24, %v20882_v22 }
 0x37e   :  { %20879 = vst [vmem:[#allocation180_spill] sm:$0xff] %v17412_v44  ;;  %20880 = vst [vmem:[#allocation129_spill] sm:$0xff] %v17426_v5  ;;  %v17440_v12 = vld [vmem:[#allocation13 + $0x7] ss:$8 sm:$0xf]  ;;  %v17446_v5 = vpop.f32.mrf.mxu1  ;;  %v17450_v20 = vrot.slane %v17398_v16, %v20833_v55  ;;  %v17454_v11 = vrot.slane %v17412_v44, %v20833_v55  ;;  %v9894_v25 = vadd.f32 %v9893_v60, %v9892_v14 }
 0x37f   :  { %20881 = vst [vmem:[#allocation221_spill] sm:$0xff] %v17440_v12  ;;  %20883 = vst [vmem:[#allocation236_spill] sm:$0xff] %v17446_v5  ;;  %v20886_v15 = vld [vmem:[#allocation83_spill] sm:$0xff]  ;;  %v17462_v22 = vrot.slane %v17398_v16, %v20837_v41  ;;  %v17466_v5 = vrot.slane %v17412_v44, %v20837_v41  ;;  %v17478_v60 = vrot.slane %v17440_v12, %v20833_v55  ;;  %v17488_v16 = vsel %vm754_vm6, %v9484_v52, 0.0 }
 0x380   :  { %20884 = vst [vmem:[#allocation90_spill] sm:$0xff] %v17450_v20  ;;  %20885 = vst [vmem:[#allocation105_spill] sm:$0xff] %v17454_v11  ;;  %v9485_v8 = vsel %vm223_vm14, %v16897_v27, %v20886_v15  ;;  %v9482_v20 = vsel %vm223_vm14, %v17143_v46, %v16728_v39  ;;  %v9483_v11 = vsel %vm223_vm14, %v17139_v17, %v16758_v1  ;;  %v20888_v14 = vld [vmem:[#allocation47_spill] sm:$0xff]  ;;  %v9865_v39 = vrot.slane %v9864_v43, 2  ;;  %v17512_v55 = vpop.f32.mrf.mxu1 }
 0x381   :  { %20887 = vst [vmem:[#allocation202_spill] sm:$0xff] %v17466_v5  ;;  %v9871_v15 = vadd.f32 %v9870_v6, %v9869_v45  ;;  %v17484_v44 = vsel %vm223_vm14, %v20888_v14, %v16860_v24  ;;  %20890 = vst [vmem:[#allocation192_spill] sm:$0xff] %v17488_v16  ;;  %v17490_v5 = vpop.f32.mrf.mxu0  ;;  %v17494_v1 = vrot.slane %v17440_v12, %v20837_v41  ;;  %v20891_v45 = vld [vmem:[#allocation232_spill] sm:$0xff]  ;;  %v17504_v24 = vsel %vm754_vm6, %v9485_v8, 0.0 }
 0x382   :  { %20889 = vst [vmem:[#allocation153_spill] sm:$0xff] %v17484_v44  ;;  %v17500_v6 = vsel %vm223_vm14, %v20891_v45, %v16897_v27  ;;  %20893 = vst [vmem:[#allocation195_spill] sm:$0xff] %v17504_v24  ;;  %v17510_v52 = vsel %vm223_vm14, %v16813_v18, %v17143_v46  ;;  %v9901_v14 = vadd.f32 %v9900_v38, %v9899_v30  ;;  %v17516_v41 = vsel %vm754_vm6, %v9482_v20, 0.0  ;;  %v20898_v18 = vld [vmem:[#allocation128_spill] sm:$0xff] }
 0x383   :  { %20892 = vst [vmem:[#allocation63_spill] sm:$0xff] %v17500_v6  ;;  %20894 = vst [vmem:[#allocation187_spill] sm:$0xff] %v17510_v52  ;;  %v17522_v27 = vsel %vm223_vm14, %v16850_v56, %v17139_v17  ;;  %v17526_v8 = vsel %vm754_vm6, %v9483_v11, 0.0  ;;  %v9895_v45 = vrot.slane %v9894_v25, 1  ;;  %v17532_v46 = vsel %vm267_vm13, %v17163_v26, %v20898_v18  ;;  %v20901_v17 = vld [vmem:[#allocation54_spill] sm:$0xff] }
 0x384   :  { %20895 = vst [vmem:[#allocation127_spill] sm:$0xff] %v17516_v41  ;;  %20896 = vst [vmem:[#allocation57_spill] sm:$0xff] %v17522_v27  ;;  %v9872_v30 = vrot.slane %v9871_v15, 2  ;;  %v5783_v20 = vadd.f32 %v17137_v62, %v16976_v48  ;;  %v5785_v38 = vadd.f32 %v17145_v3, %v16982_v0  ;;  %v17542_v56 = vsel %vm267_vm13, %v16907_v28, %v17163_v26  ;;  %v17552_v48 = vpop.f32.mrf.mxu0  ;;  %v17568_v26 = vpop.f32.mrf.mxu1 }
 0x385   :  { %20897 = vst [vmem:[#allocation125_spill] sm:$0xff] %v17526_v8  ;;  %20899 = vst [vmem:[#allocation183_spill] sm:$0xff] %v17532_v46  ;;  %v17548_v11 = vsel %vm267_vm13, %v17159_v4, %v20901_v17  ;;  %v9866_v18 = vadd.f32 %v9865_v39, %v9864_v43  ;;  %v6403_v12 = vadd.f32 %v17151_v61, %v17013_v63  ;;  %v9902_v62 = vrot.slane %v9901_v14, 1  ;;  %v20906_v43 = vld [vmem:[#allocation179_spill] sm:$0xff] }
 0x386   :  { %20900 = vst [vmem:[#allocation52_spill] sm:$0xff] %v17542_v56  ;;  %20902 = vst [vmem:[#allocation48_spill] sm:$0xff] %v17548_v11  ;;  %v17558_v0 = vsel %vm267_vm13, %v16943_v51, %v17159_v4  ;;  %v17564_v28 = vsel %vm267_vm13, %v17199_v53, %v17133_v40  ;;  %v6405_v3 = vadd.f32 %v17157_v9, %v17019_v31  ;;  %v20905_v4 = vld [vmem:[#allocation31_spill] sm:$0xff]  ;;  %v20907_v40 = vld [vmem:[#allocation42_spill] sm:$0xff]  ;;  %vm9970_vm14 = vcmask 1041408  }
 0x387   :  { %20903 = vst [vmem:[#allocation43_spill] sm:$0xff] %v17558_v0  ;;  %20904 = vst [vmem:[#allocation88_spill] sm:$0xff] %v17564_v28  ;;  %v17570_v63 = vadd.f32 %v9895_v45, %v9894_v25  ;;  %v6413_v61 = vadd.f32 %v17165_v19, %v17021_v59  ;;  %v6415_v51 = vadd.f32 %v17171_v10, %v17031_v32  ;;  %v20908_v11 = vld [vmem:[#allocation164_spill] sm:$0xff]  ;;  %v20909_v0 = vld [vmem:[#allocation171_spill] sm:$0xff]  ;;  %v9867_v25 = vrot.slane %v9866_v18, 1 }
 0x388   :  { %v6423_v39 = vadd.f32 %v20906_v43, %v20905_v4  ;;  %v9873_v17 = vadd.f32 %v9872_v30, %v9871_v15  ;;  %v6425_v24 = vadd.f32 %v20908_v11, %v20907_v40  ;;  %v6200_v46 = vadd.f32 %v20909_v0, %v5783_v20  ;;  %v20910_v31 = vld [vmem:[#allocation241_spill] sm:$0xff]  ;;  %v20912_v32 = vld [vmem:[#allocation182_spill] sm:$0xff]  ;;  %v20913_v19 = vld [vmem:[#allocation196_spill] sm:$0xff]  ;;  %v17597_v30 = vpop.f32.mrf.mxu0 }
 0x389   :  { %v6202_v9 = vadd.f32 %v20910_v31, %v5785_v38  ;;  %v17588_v59 = vsel %vm267_vm13, %v17153_v54, %v17199_v53  ;;  %v17594_v10 = vsel %vm267_vm13, %v20913_v19, %v20912_v32  ;;  %v20915_v15 = vld [vmem:[#allocation79_spill] sm:$0xff]  ;;  %v17599_v20 = vadd.f32 %v9902_v62, %v9901_v14  ;;  %v20916_v38 = vld [vmem:[#allocation168_spill] sm:$0xff]  ;;  %v20917_v0 = vld [vmem:[#allocation173_spill] sm:$0xff] }
 0x38a   :  { %20911 = vst [vmem:[#allocation114_spill] sm:$0xff] %v17588_v59  ;;  %20914 = vst [vmem:[#allocation126_spill] sm:$0xff] %v17594_v10  ;;  %v6574_v45 = vadd.f32 %v20915_v15, %v6403_v12  ;;  %v6433_v11 = vadd.f32 %v20916_v38, %v6200_v46  ;;  %v20918_v43 = vld [vmem:[#allocation201_spill] sm:$0xff]  ;;  %v20919_v53 = vld [vmem:[#allocation108_spill] sm:$0xff]  ;;  %v10063_v44 = vmul.f32 %v17394_v58, %v17570_v63  ;;  %v9874_v12 = vrot.slane %v9873_v17, 1 }
 0x38b   :  { %v6435_v4 = vadd.f32 %v20917_v0, %v6202_v9  ;;  %v6576_v54 = vadd.f32 %v20918_v43, %v6405_v3  ;;  %v20920_v31 = vld [vmem:[#allocation141_spill] sm:$0xff]  ;;  %v20921_v56 = vld [vmem:[#allocation134_spill] sm:$0xff]  ;;  %v20924_v8 = vld [vmem:[#allocation175_spill] sm:$0xff]  ;;  %v17618_v3 = vsel %vm267_vm13, %v17149_v57, %v20913_v19 }
 0x38c   :  { %v6875_v40 = vadd.f32 %v20919_v53, %v6574_v45  ;;  %v6586_v16 = vadd.f32 %v20920_v31, %v6413_v61  ;;  %v6588_v32 = vadd.f32 %v20921_v56, %v6415_v51  ;;  %v20922_v15 = vld [vmem:[#allocation26_spill] sm:$0xff]  ;;  %v6600_v46 = vadd.f32 %v20924_v8, %v6425_v24  ;;  %20925 = vst [vmem:[#allocation243_spill] sm:$0xff] %v17618_v3  ;;  %v20926_v61 = vld [vmem:[#allocation109_spill] sm:$0xff]  ;;  %v17624_v45 = vpop.f32.mrf.mxu0  ;;  %v20928_v8 = vld [vmem:[#allocation27_spill] sm:$0xff] }
 0x38d   :  { %v6877_v10 = vadd.f32 %v20922_v15, %v6576_v54  ;;  %v20923_v14 = vld [vmem:[#allocation110_spill] sm:$0xff]  ;;  %v17620_v56 = vadd.f32 %v9867_v25, %v9866_v18  ;;  %v6610_v43 = vadd.f32 %v20928_v8, %v6433_v11  ;;  %v10064_v54 = vmul.f32 %v17402_v47, %v17599_v20  ;;  %v20929_v53 = vld [vmem:[#allocation172_spill] sm:$0xff]  ;;  %v20930_v31 = vld [vmem:[#allocation225_spill] sm:$0xff] }
 0x38e   :  { %v6598_v62 = vadd.f32 %v20923_v14, %v6423_v39  ;;  %v6883_v51 = vadd.f32 %v20926_v61, %v6586_v16  ;;  %v6885_v9 = vadd.f32 %v17250_v2, %v6588_v32  ;;  %v20927_v39 = vld [vmem:[#allocation184_spill] sm:$0xff]  ;;  %v6893_v24 = vadd.f32 %v17298_v36, %v6600_v46  ;;  %v20931_v11 = vld [vmem:[#allocation94_spill] sm:$0xff] }
 0x38f   :  { %v6612_v57 = vadd.f32 %v20929_v53, %v6435_v4  ;;  %v10075_v18 = vrot.slane %v10063_v44, 7  ;;  %v9945_v16 = vmul.f32 %v17406_v21, %v17570_v63  ;;  %v9946_v2 = vmul.f32 %v17416_v23, %v17599_v20  ;;  %v20932_v14 = vld [vmem:[#allocation106_spill] sm:$0xff] }
 0x390   :  { %v6891_v0 = vadd.f32 %v20927_v39, %v6598_v62  ;;  %v17638_v25 = vadd.f32 %v9874_v12, %v9873_v17  ;;  %v17641_v36 = vadd.f32 %v20930_v31, %v6875_v40  ;;  %v17644_v32 = vadd.f32 %v20931_v11, %v6877_v10  ;;  %v20933_v46 = vld [vmem:[#allocation146_spill] sm:$0xff]  ;;  %v20934_v40 = vld [vmem:[#allocation139_spill] sm:$0xff] }
 0x391   :  { %v10352_v4 = vmul.f32 %v17420_v34, %v17599_v20  ;;  %v6899_v44 = vadd.f32 %v17306_v37, %v6610_v43  ;;  %v17652_v62 = vadd.f32 %v20932_v14, %v6883_v51  ;;  %v17655_v61 = vadd.f32 %v20933_v46, %v6885_v9  ;;  %v20935_v10 = vld [vmem:[#allocation239_spill] sm:$0xff]  ;;  %v20936_v14 = vld [vmem:[#allocation209_spill] sm:$0xff]  ;;  %v20938_v28 = vld [vmem:[#allocation90_spill] sm:$0xff] }
 0x392   :  { %v10059_v17 = vmul.f32 %v17394_v58, %v17620_v56  ;;  %v17660_v12 = vadd.f32 %v20934_v40, %v6891_v0  ;;  %v17663_v39 = vadd.f32 %v20935_v10, %v6893_v24  ;;  %v10077_v8 = vrot.slane %v10064_v54, 7 }
 0x393   :  { %v10351_v53 = vmul.f32 %v17410_v13, %v17570_v63  ;;  %v6901_v37 = vadd.f32 %v17316_v33, %v6612_v57  ;;  %v9957_v43 = vrot.slane %v9945_v16, 7  ;;  %v9960_v31 = vrot.slane %v9946_v2, 7 }
 0x394   :  { %v10076_v9 = vsel %vm9958_vm12, %v10075_v18, %v10059_v17  ;;  %v10060_v58 = vmul.f32 %v17402_v47, %v17638_v25  ;;  %v10365_v0 = vrot.slane %v10352_v4, 7  ;;  %v10159_v24 = vmul.f32 %v17424_v42, %v17570_v63 }
 0x395   :  { %v10160_v54 = vmul.f32 %v17430_v35, %v17599_v20  ;;  %v17680_v33 = vadd.f32 %v20936_v14, %v6899_v44  ;;  %v9941_v57 = vmul.f32 %v17406_v21, %v17620_v56  ;;  %v10543_v18 = vmul.f32 %v17434_v50, %v17570_v63  ;;  %v20937_v44 = vld [vmem:[#allocation199_spill] sm:$0xff] }
 0x396   :  { %v10544_v16 = vmul.f32 %v17438_v7, %v17599_v20  ;;  %v10078_v47 = vsel %vm9958_vm12, %v10077_v8, %v10060_v58  ;;  %v9942_v2 = vmul.f32 %v17416_v23, %v17638_v25  ;;  %v10348_v4 = vmul.f32 %v17420_v34, %v17638_v25 }
 0x397   :  { %v10363_v46 = vrot.slane %v10351_v53, 7  ;;  %v17694_v17 = vadd.f32 %v20937_v44, %v6901_v37  ;;  %v10087_v21 = vsel %vm9970_vm14, %v10076_v9, 0.0  ;;  %v9959_v10 = vsel %vm9958_vm12, %v9957_v43, %v9941_v57 }
 0x398   :  { %v10347_v14 = vmul.f32 %v17410_v13, %v17620_v56  ;;  %v9961_v23 = vsel %vm9958_vm12, %v9960_v31, %v9942_v2  ;;  %v10366_v58 = vsel %vm9958_vm12, %v10365_v0, %v10348_v4  ;;  %v10171_v34 = vrot.slane %v10159_v24, 7 }
 0x399   :  { %v10173_v53 = vrot.slane %v10160_v54, 7  ;;  %v10088_v37 = vsel %vm9970_vm14, %v10078_v47, 0.0  ;;  %v10555_v44 = vrot.slane %v10543_v18, 7  ;;  %v10557_v3 = vrot.slane %v10544_v16, 7 }
 0x39a   :  { %v10255_v9 = vmul.f32 %v20938_v28, %v17570_v63  ;;  %v10364_v43 = vsel %vm9958_vm12, %v10363_v46, %v10347_v14  ;;  %v10155_v13 = vmul.f32 %v17424_v42, %v17620_v56  ;;  %v10156_v57 = vmul.f32 %v17430_v35, %v17638_v25 }
 0x39b   :  { %v10256_v31 = vmul.f32 %v17462_v22, %v17599_v20  ;;  %v9972_v24 = vsel %vm9970_vm14, %v9961_v23, 0.0  ;;  %v10376_v54 = vsel %vm9970_vm14, %v10366_v58, 0.0  ;;  %v10539_v18 = vmul.f32 %v17434_v50, %v17620_v56 }
 0x39c   :  { %v10540_v16 = vmul.f32 %v17438_v7, %v17638_v25  ;;  %v17726_v42 = vadd.f32 %v10088_v37, %v10087_v21  ;;  %v9971_v35 = vsel %vm9970_vm14, %v9959_v10, 0.0  ;;  %v10172_v2 = vsel %vm9958_vm12, %v10171_v34, %v10155_v13  ;;  %v20942_v21 = vld [vmem:[#allocation202_spill] sm:$0xff] }
 0x39d   :  { %v10174_v4 = vsel %vm9958_vm12, %v10173_v53, %v10156_v57  ;;  %v10375_v46 = vsel %vm9970_vm14, %v10364_v43, 0.0  ;;  %v10556_v14 = vsel %vm9958_vm12, %v10555_v44, %v10539_v18  ;;  %v10267_v50 = vrot.slane %v10255_v9, 7  ;;  %v20948_v57 = vld [vmem:[#allocation105_spill] sm:$0xff] }
 0x39e   :  { %20939 = vst [vmem:[#allocation181_spill] sm:$0xff] %v17726_v42  ;;  %v10558_v23 = vsel %vm9958_vm12, %v10557_v3, %v10540_v16  ;;  %v17734_v58 = vadd.f32 %v9972_v24, %v9971_v35  ;;  %v17736_v7 = vadd.f32 %v10376_v54, %v10375_v46  ;;  %v10269_v27 = vrot.slane %v10256_v31, 7  ;;  %v20955_v16 = vld [vmem:[#allocation107_spill] sm:$0xff]  ;;  %v20966_v42 = vld [vmem:[#allocation96_spill] sm:$0xff] }
 0x39f   :  { %v17740_v37 = vmul.f32 %v20942_v21, %v17599_v20  ;;  %v17745_v34 = vsel %vm9970_vm14, %v10172_v2, 0.0  ;;  %v17748_v53 = vsel %vm9970_vm14, %v10174_v4, 0.0  ;;  %v10251_v3 = vmul.f32 %v20938_v28, %v17620_v56  ;;  %v20956_v2 = vld [vmem:[#allocation123_spill] sm:$0xff] }
 0x3a0   :  { %20940 = vst [vmem:[#allocation37_spill] sm:$0xff] %v17734_v58  ;;  %20941 = vst [vmem:[#allocation189_spill] sm:$0xff] %v17736_v7  ;;  %v10252_v44 = vmul.f32 %v17462_v22, %v17638_v25  ;;  %v17757_v43 = vsel %vm9970_vm14, %v10556_v14, 0.0  ;;  %v17760_v13 = vsel %vm9970_vm14, %v10558_v23, 0.0  ;;  %v17764_v31 = vmul.f32 %v20948_v57, %v17620_v56  ;;  %v20958_v23 = vld [vmem:[#allocation87_spill] sm:$0xff] }
 0x3a1   :  { %20943 = vst [vmem:[#allocation227_spill] sm:$0xff] %v17740_v37  ;;  %20944 = vst [vmem:[#allocation188_spill] sm:$0xff] %v17745_v34  ;;  %v17768_v24 = vmul.f32 %v20942_v21, %v17638_v25  ;;  %v17771_v28 = vsel %vm9958_vm12, %v10267_v50, %v10251_v3  ;;  %v17775_v22 = vmul.f32 %v20948_v57, %v17570_v63  ;;  %v20960_v57 = vld [vmem:[#allocation71_spill] sm:$0xff] }
 0x3a2   :  { %20945 = vst [vmem:[#allocation132_spill] sm:$0xff] %v17748_v53  ;;  %20946 = vst [vmem:[#allocation242_spill] sm:$0xff] %v17757_v43  ;;  %v17779_v54 = vmul.f32 %v17478_v60, %v17620_v56  ;;  %v17783_v18 = vmul.f32 %v17494_v1, %v17638_v25  ;;  %v7205_v35 = vadd.f32 %v20955_v16, %v17641_v36  ;;  %v20959_v56 = vld [vmem:[#allocation129_spill] sm:$0xff]  ;;  %v20965_v14 = vld [vmem:[#allocation159_spill] sm:$0xff] }
 0x3a3   :  { %20947 = vst [vmem:[#allocation29_spill] sm:$0xff] %v17760_v13  ;;  %20949 = vst [vmem:[#allocation154_spill] sm:$0xff] %v17764_v31  ;;  %v7207_v4 = vadd.f32 %v20956_v2, %v17644_v32  ;;  %v17790_v46 = vsel %vm9958_vm12, %v10269_v27, %v10252_v44  ;;  %v7221_v50 = vadd.f32 %v20958_v23, %v17652_v62  ;;  %v10955_v44 = vld [vmem:[#allocation10 + $0x3] ss:$8 sm:$0xf] }
 0x3a4   :  { %20950 = vst [vmem:[#allocation237_spill] sm:$0xff] %v17768_v24  ;;  %20951 = vst [vmem:[#allocation219_spill] sm:$0xff] %v17771_v28  ;;  %v7223_v21 = vadd.f32 %v20959_v56, %v17655_v61  ;;  %v7237_v25 = vadd.f32 %v17490_v5, %v17660_v12  ;;  %v7239_v36 = vadd.f32 %v17552_v48, %v17663_v39  ;;  %v10956_v62 = vld [vmem:[#allocation10 + $0x22] ss:$8 sm:$0xf] }
 0x3a5   :  { %20952 = vst [vmem:[#allocation33_spill] sm:$0xff] %v17775_v22  ;;  %20953 = vst [vmem:[#allocation213_spill] sm:$0xff] %v17779_v54  ;;  %v7253_v27 = vadd.f32 %v17597_v30, %v17680_v33  ;;  %v8548_v16 = vrot.slane %v10955_v44, %v20960_v57  ;;  %v8603_v2 = vrot.slane %v10956_v62, %v20960_v57  ;;  %v10957_v48 = vld [vmem:[#allocation10 + $0x41] ss:$8 sm:$0xf] }
 0x3a6   :  { %20954 = vst [vmem:[#allocation238_spill] sm:$0xff] %v17783_v18  ;;  %20957 = vst [vmem:[#allocation230_spill] sm:$0xff] %v17790_v46  ;;  %v17811_v61 = vmul.f32 %v17478_v60, %v17570_v63  ;;  %v7255_v5 = vadd.f32 %v17624_v45, %v17694_v17  ;;  %v8658_v12 = vrot.slane %v10957_v48, %v20960_v57  ;;  %v20962_v39 = vld [vmem:[#allocation91_spill] sm:$0xff]  ;;  %v20964_v23 = vld [vmem:[#allocation62_spill] sm:$0xff] }
 0x3a7   :  { %v8552_v30 = vrot.slane %v10955_v44, %v20962_v39  ;;  %v17819_v33 = vmul.f32 %v17494_v1, %v17599_v20  ;;  %v7646_v56 = vadd.f32 %v20964_v23, %v7205_v35  ;;  %v7648_v7 = vadd.f32 %v20965_v14, %v7207_v4  ;;  %v20967_v17 = vld [vmem:[#allocation162_spill] sm:$0xff]  ;;  %v20969_v44 = vld [vmem:[#allocation236_spill] sm:$0xff]  ;;  %v20972_v54 = vld [vmem:[#allocation111_spill] sm:$0xff] }
 0x3a8   :  { %20961 = vst [vmem:[#allocation224_spill] sm:$0xff] %v17811_v61  ;;  %v8607_v60 = vrot.slane %v10956_v62, %v20962_v39  ;;  %v8662_v63 = vrot.slane %v10957_v48, %v20962_v39  ;;  %v7654_v45 = vadd.f32 %v20966_v42, %v7221_v50  ;;  %v7656_v13 = vadd.f32 %v20967_v17, %v7223_v21  ;;  %v20968_v43 = vld [vmem:[#allocation138_spill] sm:$0xff]  ;;  %v20973_v50 = vld [vmem:[#allocation76_spill] sm:$0xff]  ;;  %v20982_v28 = vld [vmem:[#allocation115_spill] sm:$0xff] }
 0x3a9   :  { %20963 = vst [vmem:[#allocation228_spill] sm:$0xff] %v17819_v33  ;;  %v7662_v53 = vadd.f32 %v20968_v43, %v7237_v25  ;;  %v7664_v34 = vadd.f32 %v20969_v44, %v7239_v36  ;;  %v7670_v20 = vadd.f32 %v17512_v55, %v7253_v27  ;;  %v20970_v4 = vld [vmem:[#allocation118_spill] sm:$0xff]  ;;  %v7672_v48 = vadd.f32 %v17568_v26, %v7255_v5  ;;  %v20975_v55 = vld [vmem:[#allocation75_spill] sm:$0xff]  ;;  %v20983_v33 = vld [vmem:[#allocation148_spill] sm:$0xff] }
 0x3aa   :  { %v8559_v14 = vmul.f32 %v8548_v16, %v20970_v4  ;;  %v20971_v23 = vld [vmem:[#allocation158_spill] sm:$0xff]  ;;  %v17835_v42 = vmul.f32 %v8658_v12, %v20972_v54  ;;  %v8560_v21 = vmul.f32 %v8552_v30, %v20973_v50  ;;  %v8615_v27 = vmul.f32 %v8607_v60, %v20975_v55  ;;  %v20977_v4 = vld [vmem:[#allocation92_spill] sm:$0xff]  ;;  %v20978_v54 = vld [vmem:[#allocation95_spill] sm:$0xff] }
 0x3ab   :  { %v8614_v62 = vmul.f32 %v8603_v2, %v20971_v23  ;;  %v20974_v43 = vld [vmem:[#allocation166_spill] sm:$0xff]  ;;  %v17847_v23 = vmul.f32 %v8603_v2, %v20977_v4  ;;  %v17850_v5 = vmul.f32 %v8658_v12, %v20978_v54  ;;  %v20979_v50 = vld [vmem:[#allocation136_spill] sm:$0xff]  ;;  %v17864_v4 = vmul.f32 %v8662_v63, %v20982_v28 }
 0x3ac   :  { %v17839_v25 = vmul.f32 %v8548_v16, %v20974_v43  ;;  %v20976_v17 = vld [vmem:[#allocation50_spill] sm:$0xff]  ;;  %v17853_v31 = vmul.f32 %v8552_v30, %v20979_v50  ;;  %v20980_v43 = vld [vmem:[#allocation113_spill] sm:$0xff]  ;;  %v17867_v61 = vmul.f32 %v8603_v2, %v20983_v33 }
 0x3ad   :  { %v17844_v44 = vmul.f32 %v8662_v63, %v20976_v17  ;;  %v17856_v46 = vmul.f32 %v8607_v60, %v20980_v43  ;;  %v20985_v50 = vld [vmem:[#allocation66_spill] sm:$0xff]  ;;  %v20987_v43 = vld [vmem:[#allocation67_spill] sm:$0xff] }
 0x3ae   :  { %20984 = vst [vmem:[#allocation142_spill] sm:$0xff] %v17867_v61  ;;  %v17870_v24 = vmul.f32 %v8658_v12, %v20985_v50  ;;  %v17873_v22 = vmul.f32 %v8552_v30, %v20987_v43  ;;  %v20994_v43 = vld [vmem:[#allocation68_spill] sm:$0xff] }
 0x3af   :  { %v21058_v49 = vld [vmem:[#allocation224_spill] sm:$0xff] }
 0x3b0   :  { %20986 = vst [vmem:[#allocation116_spill] sm:$0xff] %v17870_v24  ;;  %20988 = vst [vmem:[#allocation210_spill] sm:$0xff] %v17873_v22  ;;  %v20993_v24 = vld [vmem:[#allocation53_spill] sm:$0xff]  ;;  %v17890_v22 = vmul.f32 %v8658_v12, %v20994_v43 }
 0x3b1   :  { %v17887_v61 = vmul.f32 %v8603_v2, %v20993_v24 }
 0x3b3   :  { %v17582_v6 = vpop.f32.mrf.mxu1 }
 0x3b5   :  { %v17612_v38 = vpop.f32.mrf.mxu1 }
 0x3b8   :  { %v17646_v15 = vpop.f32.mrf.mxu1 }
 0x3ba   :  { %v17671_v11 = vpop.f32.mrf.mxu1 }
 0x3bc   :  { %v17632_v19 = vpop.f32.mrf.mxu0 }
 0x3bd   :  { %v17702_v8 = vpop.f32.mrf.mxu1  ;;  %v7873_v1 = vadd.f32 %v17632_v19, %v7646_v56  ;;  %v9729_v56 = vpop.permute.xlu0 %9728 }
 0x3be   :  { %v17668_v51 = vpop.f32.mrf.mxu0 }
 0x3bf   :  { %v17724_v47 = vpop.f32.mrf.mxu1  ;;  %v7875_v36 = vadd.f32 %v17668_v51, %v7648_v7  ;;  %v20981_v51 = vld [vmem:[#allocation152_spill] sm:$0xff]  ;;  %v8044_v17 = vadd.f32 %v17582_v6, %v7873_v1  ;;  %v20992_v1 = vld [vmem:[#allocation97_spill] sm:$0xff] }
 0x3c0   :  { %v17859_v7 = vmul.f32 %v8548_v16, %v20981_v51  ;;  %v20989_v51 = vld [vmem:[#allocation70_spill] sm:$0xff]  ;;  %v17884_v41 = vmul.f32 %v8662_v63, %v20992_v1 }
 0x3c1   :  { %v17876_v59 = vmul.f32 %v8607_v60, %v20989_v51  ;;  %v8046_v33 = vadd.f32 %v17612_v38, %v7875_v36  ;;  %v9725_v52 = vpop.permute.xlu0 %9724  ;;  %v20995_v51 = vld [vmem:[#allocation69_spill] sm:$0xff]  ;;  %v20997_v36 = vld [vmem:[#allocation60_spill] sm:$0xff]  ;;  %v20998_v1 = vld [vmem:[#allocation98_spill] sm:$0xff] }
 0x3c2   :  { %v17696_v40 = vpop.f32.mrf.mxu0 }
 0x3c3   :  { %v17754_v9 = vpop.f32.mrf.mxu1  ;;  %v7883_v55 = vadd.f32 %v17696_v40, %v7654_v45  ;;  %20990 = vst [vmem:[#allocation38_spill] sm:$0xff] %v17876_v59  ;;  %v20991_v40 = vld [vmem:[#allocation155_spill] sm:$0xff]  ;;  %v17893_v59 = vmul.f32 %v8552_v30, %v20995_v51  ;;  %v17907_v30 = vrot.slane %v20998_v1, %v20960_v57 }
 0x3c4   :  { %v17716_v0 = vpop.f32.mrf.mxu0  ;;  %v17879_v45 = vmul.f32 %v8548_v16, %v20991_v40  ;;  %v20996_v16 = vld [vmem:[#allocation102_spill] sm:$0xff]  ;;  %v21001_v51 = vld [vmem:[#allocation143_spill] sm:$0xff] }
 0x3c5   :  { %v17805_v32 = vpop.f32.mrf.mxu1  ;;  %v7885_v6 = vadd.f32 %v17716_v0, %v7656_v13  ;;  %v17896_v40 = vmul.f32 %v8607_v60, %v20996_v16  ;;  %v8056_v13 = vadd.f32 %v17646_v15, %v7883_v55  ;;  %v17911_v60 = vrot.slane %v20998_v1, %v20962_v39 }
 0x3c6   :  { %v17926_v16 = vsel %vm179_vm8, %v9729_v56, %v21001_v51 }
 0x3c8   :  { %v17742_v10 = vpop.f32.mrf.mxu0 }
 0x3c9   :  { %v7893_v24 = vadd.f32 %v17742_v10, %v7662_v53 }
 0x3ca   :  { %v17801_v3 = vpop.f32.mrf.mxu0 }
 0x3cb   :  { %v7895_v10 = vadd.f32 %v17801_v3, %v7664_v34  ;;  %v8068_v34 = vadd.f32 %v17702_v8, %v7893_v24  ;;  %v21002_v3 = vld [vmem:[#allocation185_spill] sm:$0xff] }
 0x3cc   :  { %v21003_v24 = vld [vmem:[#allocation169_spill] sm:$0xff] }
 0x3cd   :  { %v7902_v18 = vpop.f32.mrf.mxu0 }
 0x3ce   :  { %v7903_v53 = vadd.f32 %v7902_v18, %v7670_v20  ;;  %v9732_v20 = vsel %vm179_vm8, %v21002_v3, %v9725_v52 }
 0x3cf   :  { %v7904_v26 = vpop.f32.mrf.mxu0 }
 0x3d0   :  { %v8080_v8 = vadd.f32 %v17754_v9, %v7903_v53 }
 0x3fb   :  { %v8505_v58 = vpop.f32.mrf.mxu1 }
 0x3fd   :  { %v8507_v35 = vpop.f32.mrf.mxu1 }
 0x3ff   :  { %v8513_v19 = vpop.f32.mrf.mxu1 }
 0x401   :  { %v8515_v54 = vpop.f32.mrf.mxu1 }
 0x402   :  { %v8344_v37 = vpop.f32.mrf.mxu0 }
 0x403   :  { %v8345_v28 = vadd.f32 %v8344_v37, %v8044_v17  ;;  %v17898_v37 = vpop.permute.xlu1 %9730  ;;  %v17902_v17 = vmul.f32 %v8662_v63, %v20997_v36  ;;  %v8521_v2 = vpop.f32.mrf.mxu1 }
 0x404   :  { %v8346_v50 = vpop.f32.mrf.mxu0 }
 0x405   :  { %v8506_v0 = vadd.f32 %v8505_v58, %v8345_v28  ;;  %v8347_v38 = vadd.f32 %v8346_v50, %v8046_v33  ;;  %v20999_v58 = vld [vmem:[#allocation140_spill] sm:$0xff]  ;;  %v8058_v33 = vadd.f32 %v17671_v11, %v7885_v6  ;;  %v7905_v11 = vadd.f32 %v7904_v26, %v7672_v48  ;;  %v8523_v6 = vpop.f32.mrf.mxu1 }
 0x406   :  { %v8352_v12 = vpop.f32.mrf.mxu0  ;;  %v9744_v28 = vsel %vm179_vm8, %v9725_v52, %v20999_v58  ;;  %v21000_v50 = vld [vmem:[#allocation160_spill] sm:$0xff]  ;;  %v8070_v48 = vadd.f32 %v17724_v47, %v7895_v10 }
 0x407   :  { %v8575_v15 = vadd.f32 %v8559_v14, %v8506_v0  ;;  %v8508_v55 = vadd.f32 %v8507_v35, %v8347_v38  ;;  %v8353_v63 = vadd.f32 %v8352_v12, %v8056_v13  ;;  %v17921_v43 = vsel %vm179_vm8, %v21000_v50, %v9729_v56  ;;  %v9727_v38 = vpop.permute.xlu1 %9726  ;;  %v21004_v58 = vld [vmem:[#allocation204_spill] sm:$0xff] }
 0x408   :  { %v8354_v36 = vpop.f32.mrf.mxu0  ;;  %v17934_v13 = vsel %vm710_vm11, %v9744_v28, 0.0  ;;  %v9745_v52 = vsel %vm179_vm8, %v9727_v38, %v21003_v24  ;;  %v8082_v47 = vadd.f32 %v17805_v32, %v7905_v11  ;;  %v21006_v10 = vld [vmem:[#allocation208_spill] sm:$0xff] }
 0x409   :  { %v8630_v1 = vadd.f32 %v8614_v62, %v8575_v15  ;;  %v8576_v14 = vadd.f32 %v8560_v21, %v8508_v55  ;;  %v8514_v35 = vadd.f32 %v8513_v19, %v8353_v63  ;;  %v8355_v0 = vadd.f32 %v8354_v36, %v8058_v33  ;;  %v21005_v33 = vld [vmem:[#allocation176_spill] sm:$0xff] }
 0x40a   :  { %v8360_v18 = vpop.f32.mrf.mxu0  ;;  %v9733_v9 = vsel %vm179_vm8, %v21005_v33, %v9727_v38  ;;  %v9767_v32 = vsel %vm710_vm11, %v9745_v52, 0.0  ;;  %v21015_v24 = vld [vmem:[#allocation116_spill] sm:$0xff]  ;;  %v21016_v52 = vld [vmem:[#allocation38_spill] sm:$0xff] }
 0x40b   :  { %v8685_v56 = vadd.f32 %v17835_v42, %v8630_v1  ;;  %v8631_v62 = vadd.f32 %v8615_v27, %v8576_v14  ;;  %v8579_v21 = vadd.f32 %v17839_v25, %v8514_v35  ;;  %v8516_v19 = vadd.f32 %v8515_v54, %v8355_v0  ;;  %v8529_v25 = vpop.f32.mrf.mxu1  ;;  %v21008_v14 = vld [vmem:[#allocation215_spill] sm:$0xff] }
 0x40c   :  { %v8361_v12 = vadd.f32 %v8360_v18, %v8068_v34  ;;  %v8362_v26 = vpop.f32.mrf.mxu0 }
 0x40d   :  { %v8914_v15 = vadd.f32 %v21004_v58, %v8685_v56  ;;  %v8686_v28 = vadd.f32 %v17844_v44, %v8631_v62  ;;  %v8634_v42 = vadd.f32 %v17847_v23, %v8579_v21  ;;  %v8580_v27 = vadd.f32 %v17853_v31, %v8516_v19  ;;  %v8531_v34 = vpop.f32.mrf.mxu1  ;;  %v21011_v56 = vld [vmem:[#allocation147_spill] sm:$0xff]  ;;  %v21013_v21 = vld [vmem:[#allocation32_spill] sm:$0xff] }
 0x40e   :  { %v8522_v54 = vadd.f32 %v8521_v2, %v8361_v12  ;;  %v8363_v55 = vadd.f32 %v8362_v26, %v8070_v48  ;;  %v8368_v63 = vpop.f32.mrf.mxu0  ;;  %v21007_v2 = vld [vmem:[#allocation55_spill] sm:$0xff]  ;;  %v21014_v26 = vld [vmem:[#allocation34_spill] sm:$0xff] }
 0x40f   :  { %v8915_v53 = vadd.f32 %v21006_v10, %v8686_v28  ;;  %v8689_v50 = vadd.f32 %v17850_v5, %v8634_v42  ;;  %v8635_v44 = vadd.f32 %v17856_v46, %v8580_v27  ;;  %v8369_v51 = vadd.f32 %v8368_v63, %v8080_v8  ;;  %v21009_v5 = vld [vmem:[#allocation142_spill] sm:$0xff]  ;;  %v21018_v42 = vld [vmem:[#allocation187_spill] sm:$0xff] }
 0x410   :  { %v8583_v23 = vadd.f32 %v17859_v7, %v8522_v54  ;;  %v8524_v31 = vadd.f32 %v8523_v6, %v8363_v55  ;;  %v8370_v36 = vpop.f32.mrf.mxu0  ;;  %v9143_v1 = vadd.f32 %v21007_v2, %v8914_v15  ;;  %v21010_v46 = vld [vmem:[#allocation210_spill] sm:$0xff]  ;;  %v21017_v15 = vld [vmem:[#allocation51_spill] sm:$0xff]  ;;  %v21019_v55 = vld [vmem:[#allocation56_spill] sm:$0xff] }
 0x411   :  { %v8918_v35 = vadd.f32 %v21008_v14, %v8689_v50  ;;  %v8690_v0 = vadd.f32 %v17864_v4, %v8635_v44  ;;  %v8530_v38 = vadd.f32 %v8529_v25, %v8369_v51  ;;  %v8371_v11 = vadd.f32 %v8370_v36, %v8082_v47  ;;  %v21012_v6 = vld [vmem:[#allocation178_spill] sm:$0xff]  ;;  %v21022_v50 = vld [vmem:[#allocation127_spill] sm:$0xff] }
 0x412   :  { %v8638_v18 = vadd.f32 %v21009_v5, %v8583_v23  ;;  %v8584_v3 = vadd.f32 %v21010_v46, %v8524_v31  ;;  %v9144_v7 = vadd.f32 %v21011_v56, %v8915_v53  ;;  %v9330_v62 = vadd.f32 %v21012_v6, %v9143_v1  ;;  %v21020_v47 = vld [vmem:[#allocation46_spill] sm:$0xff]  ;;  %v21025_v1 = vld [vmem:[#allocation57_spill] sm:$0xff] }
 0x413   :  { %v8919_v19 = vadd.f32 %v21013_v21, %v8690_v0  ;;  %v8587_v12 = vadd.f32 %v17879_v45, %v8530_v38  ;;  %v8532_v48 = vadd.f32 %v8531_v34, %v8371_v11  ;;  %v9147_v8 = vadd.f32 %v21014_v26, %v8918_v35  ;;  %v21021_v45 = vld [vmem:[#allocation124_spill] sm:$0xff]  ;;  %v21023_v51 = vld [vmem:[#allocation114_spill] sm:$0xff]  ;;  %v21027_v0 = vld [vmem:[#allocation177_spill] sm:$0xff] }
 0x414   :  { %v8693_v4 = vadd.f32 %v21015_v24, %v8638_v18  ;;  %v8639_v58 = vadd.f32 %v21016_v52, %v8584_v3  ;;  %v9331_v28 = vadd.f32 %v21017_v15, %v9144_v7  ;;  %v9516_v27 = vadd.f32 %v21018_v42, %v9330_v62  ;;  %v21024_v2 = vld [vmem:[#allocation174_spill] sm:$0xff]  ;;  %v21028_v11 = vld [vmem:[#allocation88_spill] sm:$0xff]  ;;  %v21030_v3 = vld [vmem:[#allocation125_spill] sm:$0xff] }
 0x415   :  { %v8642_v25 = vadd.f32 %v17887_v61, %v8587_v12  ;;  %v8588_v54 = vadd.f32 %v17893_v59, %v8532_v48  ;;  %v9148_v63 = vadd.f32 %v21019_v55, %v8919_v19  ;;  %v9334_v33 = vadd.f32 %v21020_v47, %v9147_v8  ;;  %v21026_v14 = vld [vmem:[#allocation86_spill] sm:$0xff]  ;;  %v21033_v62 = vld [vmem:[#allocation163_spill] sm:$0xff]  ;;  %v21038_v15 = vld [vmem:[#allocation84_spill] sm:$0xff] }
 0x416   :  { %v8922_v10 = vadd.f32 %v21021_v45, %v8693_v4  ;;  %v8694_v53 = vadd.f32 %v17884_v41, %v8639_v58  ;;  %v9517_v44 = vadd.f32 %v21022_v50, %v9331_v28  ;;  %v9647_v23 = vadd.f32 %v21023_v51, %v9516_v27  ;;  %v21029_v41 = vld [vmem:[#allocation193_spill] sm:$0xff]  ;;  %v21034_v48 = vld [vmem:[#allocation135_spill] sm:$0xff]  ;;  %v21036_v24 = vld [vmem:[#allocation126_spill] sm:$0xff] }
 0x417   :  { %v8697_v31 = vadd.f32 %v17890_v22, %v8642_v25  ;;  %v8643_v36 = vadd.f32 %v17896_v40, %v8588_v54  ;;  %v9335_v61 = vadd.f32 %v21024_v2, %v9148_v63  ;;  %v9520_v59 = vadd.f32 %v21025_v1, %v9334_v33  ;;  %v21031_v22 = vld [vmem:[#allocation243_spill] sm:$0xff]  ;;  %v21032_v40 = vld [vmem:[#allocation117_spill] sm:$0xff]  ;;  %v21041_v45 = vld [vmem:[#allocation52_spill] sm:$0xff] }
 0x418   :  { %v9151_v35 = vadd.f32 %v21026_v14, %v8922_v10  ;;  %v8923_v38 = vadd.f32 %v21027_v0, %v8694_v53  ;;  %v9648_v34 = vadd.f32 %v21028_v11, %v9517_v44  ;;  %v9778_v5 = vadd.f32 %v9732_v20, %v9647_v23  ;;  %v21035_v8 = vld [vmem:[#allocation231_spill] sm:$0xff]  ;;  %v21040_v55 = vld [vmem:[#allocation73_spill] sm:$0xff]  ;;  %v21042_v10 = vld [vmem:[#allocation192_spill] sm:$0xff] }
 0x419   :  { %v8926_v18 = vadd.f32 %v21029_v41, %v8697_v31  ;;  %v8698_v46 = vadd.f32 %v17902_v17, %v8643_v36  ;;  %v9521_v56 = vadd.f32 %v21030_v3, %v9335_v61  ;;  %v9651_v7 = vadd.f32 %v21031_v22, %v9520_v59  ;;  %v21037_v17 = vld [vmem:[#allocation153_spill] sm:$0xff]  ;;  %v21039_v25 = vld [vmem:[#allocation35_spill] sm:$0xff]  ;;  %v21045_v61 = vld [vmem:[#allocation104_spill] sm:$0xff] }
 0x41a   :  { %v9338_v6 = vadd.f32 %v21032_v40, %v9151_v35  ;;  %v9152_v21 = vadd.f32 %v21033_v62, %v8923_v38  ;;  %v9779_v19 = vadd.f32 %v17934_v13, %v9648_v34  ;;  %v9816_v12 = vadd.f32 %v17907_v30, %v9778_v5  ;;  %v21043_v44 = vld [vmem:[#allocation63_spill] sm:$0xff]  ;;  %v18017_v14 = vld [vmem:[#allocation3 + $0x10] sm:$0xff]  ;;  %v18034_v22 = vld [vmem:[#allocation3 + $0x18] sm:$0xff] }
 0x41b   :  { %v9155_v26 = vadd.f32 %v21034_v48, %v8926_v18  ;;  %v8927_v20 = vadd.f32 %v21035_v8, %v8698_v46  ;;  %v9652_v4 = vadd.f32 %v21036_v24, %v9521_v56  ;;  %v9782_v52 = vadd.f32 %v9733_v9, %v9651_v7  ;;  %v21044_v23 = vld [vmem:[#allocation235_spill] sm:$0xff]  ;;  %v18024_v41 = vld [vmem:[#allocation3 + $0x30] sm:$0xff]  ;;  %v21050_v46 = vld [vmem:[#allocation82_spill] sm:$0xff]  ;;  %21051 = vst [vmem:[#allocation190_spill] sm:$0xff] %v18034_v22 }
 0x41c   :  { %v9524_v58 = vadd.f32 %v21037_v17, %v9338_v6  ;;  %v9339_v28 = vadd.f32 %v21038_v15, %v9152_v21  ;;  %v9817_v42 = vadd.f32 %v17911_v60, %v9779_v19  ;;  %v9832_v27 = vmul.f32 0.25, %v9816_v12  ;;  %v21047_v0 = vld [vmem:[#allocation43_spill] sm:$0xff]  ;;  %21049 = vst [vmem:[#allocation156_spill] sm:$0xff] %v18024_v41  ;;  %v21052_v6 = vld [vmem:[#allocation48_spill] sm:$0xff]  ;;  %v18040_v21 = vld [vmem:[#allocation3 + $0x38] sm:$0xff] }
 0x41d   :  { %v9342_v54 = vadd.f32 %v21039_v25, %v9155_v26  ;;  %v9156_v13 = vadd.f32 %v21040_v55, %v8927_v20  ;;  %v9783_v63 = vadd.f32 %v9767_v32, %v9652_v4  ;;  %v9820_v47 = vadd.f32 %v17907_v30, %v9782_v52  ;;  %v21048_v11 = vld [vmem:[#allocation195_spill] sm:$0xff]  ;;  %21053 = vst [vmem:[#allocation122_spill] sm:$0xff] %v18040_v21  ;;  %v21054_v26 = vld [vmem:[#allocation33_spill] sm:$0xff]  ;;  %v21059_v25 = vld [vmem:[#allocation228_spill] sm:$0xff] }
 0x41e   :  { %v9771_v33 = vsel %vm710_vm11, %v17926_v16, 0.0  ;;  %v9655_v9 = vadd.f32 %v21041_v45, %v9524_v58  ;;  %v9525_v53 = vadd.f32 %v21042_v10, %v9339_v28  ;;  %v9833_v50 = vmul.f32 0.25, %v9817_v42  ;;  %v21046_v16 = vld [vmem:[#allocation183_spill] sm:$0xff]  ;;  %v21055_v58 = vld [vmem:[#allocation237_spill] sm:$0xff]  ;;  %v21062_v10 = vld [vmem:[#allocation230_spill] sm:$0xff] }
 0x41f   :  { %v9528_v51 = vadd.f32 %v21043_v44, %v9342_v54  ;;  %v9343_v31 = vadd.f32 %v21044_v23, %v9156_v13  ;;  %v9821_v36 = vadd.f32 %v17911_v60, %v9783_v63  ;;  %v9836_v2 = vmul.f32 0.25, %v9820_v47  ;;  %v21056_v15 = vld [vmem:[#allocation227_spill] sm:$0xff]  ;;  %v18072_v23 = vld [vmem:[#allocation3 + $0x70] sm:$0xff] }
 0x420   :  { %v9747_v32 = vsel %vm179_vm8, %v17898_v37, %v21045_v61  ;;  %v9786_v1 = vadd.f32 %v17921_v43, %v9655_v9  ;;  %v9656_v59 = vadd.f32 %v21046_v16, %v9525_v53  ;;  %v18020_v35 = vadd.f32 %v18017_v14, %v9832_v27  ;;  %v21061_v45 = vld [vmem:[#allocation219_spill] sm:$0xff]  ;;  %21064 = vst [vmem:[#allocation197_spill] sm:$0xff] %v18072_v23 }
 0x421   :  { %v9659_v38 = vadd.f32 %v21047_v0, %v9528_v51  ;;  %v9529_v34 = vadd.f32 %v21048_v11, %v9343_v31  ;;  %v9837_v5 = vmul.f32 0.25, %v9821_v36  ;;  %v18027_v18 = vadd.f32 %v18024_v41, %v9836_v2  ;;  %v18077_v2 = vld [vmem:[#allocation3 + $0x58] sm:$0xff] }
 0x422   :  { %v9735_v43 = vsel %vm179_vm8, %v21050_v46, %v17898_v37  ;;  %v9787_v3 = vadd.f32 %v9771_v33, %v9656_v59  ;;  %v9824_v56 = vadd.f32 %v17907_v30, %v9786_v1  ;;  %v18037_v7 = vadd.f32 %v18034_v22, %v9833_v50  ;;  %v21063_v50 = vld [vmem:[#allocation154_spill] sm:$0xff]  ;;  %21065 = vst [vmem:[#allocation85_spill] sm:$0xff] %v18077_v2  ;;  %v21066_v1 = vld [vmem:[#allocation213_spill] sm:$0xff] }
 0x423   :  { %v9790_v40 = vadd.f32 %v9735_v43, %v9659_v38  ;;  %v9660_v62 = vadd.f32 %v21052_v6, %v9529_v34  ;;  %v18043_v19 = vadd.f32 %v18040_v21, %v9837_v5  ;;  %v9876_v29 = vadd.f32 %v18027_v18, %v18020_v35  ;;  %v21067_v59 = vld [vmem:[#allocation238_spill] sm:$0xff]  ;;  %v21069_v43 = vld [vmem:[#allocation188_spill] sm:$0xff]  ;;  %v21072_v6 = vld [vmem:[#allocation29_spill] sm:$0xff] }
 0x424   :  { %v9775_v37 = vsel %vm710_vm11, %v9747_v32, 0.0  ;;  %v9825_v12 = vadd.f32 %v17911_v60, %v9787_v3  ;;  %v9840_v48 = vmul.f32 0.25, %v9824_v56  ;;  %v10459_v8 = vrot.slane %v21054_v26, 7  ;;  %v18087_v38 = vld [vmem:[#allocation3 + $0x78] sm:$0xff]  ;;  %v21070_v3 = vld [vmem:[#allocation132_spill] sm:$0xff] }
 0x425   :  { %v9791_v20 = vadd.f32 %v9775_v37, %v9660_v62  ;;  %v9828_v24 = vadd.f32 %v17907_v30, %v9790_v40  ;;  %v9877_v4 = vrot.slane %v9876_v29, 4  ;;  %v9883_v52 = vadd.f32 %v18043_v19, %v18037_v7  ;;  %v18061_v30 = vld [vmem:[#allocation3 + $0x50] sm:$0xff]  ;;  %21068 = vst [vmem:[#allocation198_spill] sm:$0xff] %v18087_v38  ;;  %v21071_v40 = vld [vmem:[#allocation242_spill] sm:$0xff] }
 0x426   :  { %v9841_v17 = vmul.f32 0.25, %v9825_v12  ;;  %v21057_v28 = vrot.slane %v21056_v15, 7  ;;  %v10651_v27 = vrot.slane %v21058_v49, 7  ;;  %v10653_v54 = vrot.slane %v21059_v25, 7  ;;  %21060 = vst [vmem:[#allocation137_spill] sm:$0xff] %v18061_v30 }
 0x427   :  { %v9829_v55 = vadd.f32 %v17911_v60, %v9791_v20  ;;  %v9844_v13 = vmul.f32 0.25, %v9828_v24  ;;  %v9878_v63 = vadd.f32 %v9877_v4, %v9876_v29  ;;  %v9884_v47 = vrot.slane %v9883_v52, 4  ;;  %v21073_v20 = vld [vmem:[#allocation64_spill] sm:$0xff] }
 0x428   :  { %v10462_v42 = vsel %vm9958_vm12, %v21057_v28, %v21055_v58  ;;  %v18064_v33 = vadd.f32 %v18061_v30, %v9840_v48  ;;  %v10279_v9 = vsel %vm9970_vm14, %v21061_v45, 0.0  ;;  %v10280_v53 = vsel %vm9970_vm14, %v21062_v10, 0.0 }
 0x429   :  { %v10460_v44 = vsel %vm9958_vm12, %v10459_v8, %v21063_v50  ;;  %v9845_v51 = vmul.f32 0.25, %v9829_v55  ;;  %v18075_v60 = vadd.f32 %v18072_v23, %v9844_v13  ;;  %v9879_v31 = vrot.slane %v9878_v63, 2 }
 0x42a   :  { %v9885_v36 = vadd.f32 %v9884_v47, %v9883_v52  ;;  %v18080_v61 = vadd.f32 %v18077_v2, %v9841_v17  ;;  %v10472_v32 = vsel %vm9970_vm14, %v10462_v42, 0.0  ;;  %v10652_v16 = vsel %vm9958_vm12, %v10651_v27, %v21066_v1  ;;  %v21074_v42 = vld [vmem:[#allocation120_spill] sm:$0xff]  ;;  %v21078_v1 = vld [vmem:[#allocation103_spill] sm:$0xff] }
 0x42b   :  { %v10654_v0 = vsel %vm9958_vm12, %v10653_v54, %v21067_v59  ;;  %v18090_v11 = vadd.f32 %v18087_v38, %v9845_v51  ;;  %v9904_v34 = vadd.f32 %v18075_v60, %v18064_v33  ;;  %v9880_v5 = vadd.f32 %v9879_v31, %v9878_v63  ;;  %v21075_v54 = vld [vmem:[#allocation44_spill] sm:$0xff] }
 0x42c   :  { %v9886_v46 = vrot.slane %v9885_v36, 2  ;;  %v18096_v56 = vadd.f32 %v21070_v3, %v21069_v43  ;;  %v18100_v62 = vadd.f32 %v21072_v6, %v21071_v40  ;;  %v18102_v29 = vadd.f32 %v10280_v53, %v10279_v9  ;;  %v21076_v9 = vld [vmem:[#allocation170_spill] sm:$0xff]  ;;  %v21079_v59 = vld [vmem:[#allocation180_spill] sm:$0xff] }
 0x42d   :  { %v10471_v37 = vsel %vm9970_vm14, %v10460_v44, 0.0  ;;  %v9905_v12 = vrot.slane %v9904_v34, 4  ;;  %v9911_v48 = vadd.f32 %v18090_v11, %v18080_v61  ;;  %v9881_v26 = vrot.slane %v9880_v5, 1  ;;  %v21077_v44 = vld [vmem:[#allocation30_spill] sm:$0xff] }
 0x42e   :  { %v9887_v8 = vadd.f32 %v9886_v46, %v9885_v36  ;;  %v10050_v24 = vrot.slane %v21073_v20, %v20960_v57  ;;  %v18109_v4 = vadd.f32 %v10472_v32, %v10471_v37  ;;  %v18112_v52 = vsel %vm9970_vm14, %v10652_v16, 0.0  ;;  %v21080_v46 = vld [vmem:[#allocation221_spill] sm:$0xff] }
 0x42f   :  { %v18115_v17 = vsel %vm9970_vm14, %v10654_v0, 0.0  ;;  %v9906_v58 = vadd.f32 %v9905_v12, %v9904_v34  ;;  %v9912_v15 = vrot.slane %v9911_v48, 4  ;;  %v9932_v49 = vrot.slane %v21074_v42, %v20960_v57 }
 0x430   :  { %v9888_v28 = vrot.slane %v9887_v8, 1  ;;  %v10054_v27 = vrot.slane %v21073_v20, %v20962_v39  ;;  %v9936_v25 = vrot.slane %v21074_v42, %v20962_v39  ;;  %v10338_v55 = vrot.slane %v21075_v54, %v20960_v57 }
 0x431   :  { %v10342_v13 = vrot.slane %v21075_v54, %v20962_v39  ;;  %v9907_v63 = vrot.slane %v9906_v58, 2  ;;  %v9913_v47 = vadd.f32 %v9912_v15, %v9911_v48  ;;  %v18127_v45 = vadd.f32 %v9881_v26, %v9880_v5 }
 0x432   :  { %v10146_v10 = vrot.slane %v21076_v9, %v20960_v57  ;;  %v18131_v53 = vadd.f32 %v9888_v28, %v9887_v8  ;;  %v10150_v50 = vrot.slane %v21076_v9, %v20962_v39  ;;  %v10530_v51 = vrot.slane %v21077_v44, %v20960_v57 }
 0x433   :  { %v18139_v31 = vrot.slane %v21077_v44, %v20962_v39  ;;  %v9908_v36 = vadd.f32 %v9907_v63, %v9906_v58  ;;  %v9914_v32 = vrot.slane %v9913_v47, 2  ;;  %v10242_v16 = vrot.slane %v21078_v1, %v20960_v57 }
 0x434   :  { %v18145_v0 = vrot.slane %v21079_v59, %v20960_v57  ;;  %v18149_v34 = vrot.slane %v21078_v1, %v20962_v39  ;;  %v18153_v5 = vrot.slane %v21079_v59, %v20962_v39  ;;  %v18157_v43 = vrot.slane %v21080_v46, %v20960_v57 }
 0x435   :  { %v18161_v3 = vrot.slane %v21080_v46, %v20962_v39  ;;  %v9909_v40 = vrot.slane %v9908_v36, 1  ;;  %v9915_v6 = vadd.f32 %v9914_v32, %v9913_v47  ;;  %v10061_v37 = vmul.f32 %v10050_v24, %v18127_v45 }
 0x436   :  { %v9943_v12 = vmul.f32 %v9932_v49, %v18127_v45  ;;  %v10062_v48 = vmul.f32 %v10054_v27, %v18131_v53  ;;  %v10349_v26 = vmul.f32 %v10338_v55, %v18127_v45  ;;  %v10157_v8 = vmul.f32 %v10146_v10, %v18127_v45 }
 0x437   :  { %v10541_v20 = vmul.f32 %v10530_v51, %v18127_v45  ;;  %v18169_v58 = vadd.f32 %v9909_v40, %v9908_v36  ;;  %v9916_v15 = vrot.slane %v9915_v6, 1  ;;  %v9944_v28 = vmul.f32 %v9936_v25, %v18131_v53 }
 0x438   :  { %v10350_v42 = vmul.f32 %v10342_v13, %v18131_v53  ;;  %v10158_v54 = vmul.f32 %v10150_v50, %v18131_v53  ;;  %v10542_v63 = vmul.f32 %v18139_v31, %v18131_v53  ;;  %v10253_v47 = vmul.f32 %v10242_v16, %v18127_v45 }
 0x439   :  { %v10254_v9 = vmul.f32 %v18149_v34, %v18131_v53  ;;  %v18179_v44 = vadd.f32 %v9916_v15, %v9915_v6  ;;  %v10065_v36 = vmul.f32 %v10050_v24, %v18169_v58  ;;  %v9947_v32 = vmul.f32 %v9932_v49, %v18169_v58 }
 0x43a   :  { %v10353_v1 = vmul.f32 %v10338_v55, %v18169_v58  ;;  %v10161_v59 = vmul.f32 %v10146_v10, %v18169_v58  ;;  %v10545_v46 = vmul.f32 %v10530_v51, %v18169_v58  ;;  %v10257_v40 = vmul.f32 %v10242_v16, %v18169_v58 }
 0x43b   :  { %v18189_v38 = vmul.f32 %v18145_v0, %v18169_v58  ;;  %v10066_v23 = vmul.f32 %v10054_v27, %v18179_v44  ;;  %v10079_v6 = vrot.slane %v10065_v36, 7  ;;  %v9948_v15 = vmul.f32 %v9936_v25, %v18179_v44 }
 0x43c   :  { %v9962_v24 = vrot.slane %v9947_v32, 7  ;;  %v10354_v49 = vmul.f32 %v10342_v13, %v18179_v44  ;;  %v10367_v2 = vrot.slane %v10353_v1, 7  ;;  %v10162_v55 = vmul.f32 %v10150_v50, %v18179_v44  ;;  %v21081_v13 = vld [vmem:[#allocation181_spill] sm:$0xff] }
 0x43d   :  { %v10175_v10 = vrot.slane %v10161_v59, 7  ;;  %v10080_v51 = vsel %vm9958_vm12, %v10079_v6, %v10061_v37  ;;  %v10081_v30 = vrot.slane %v10066_v23, 7  ;;  %v9964_v21 = vrot.slane %v9948_v15, 7  ;;  %v21082_v59 = vld [vmem:[#allocation37_spill] sm:$0xff] }
 0x43e   :  { %v9963_v16 = vsel %vm9958_vm12, %v9962_v24, %v9943_v12  ;;  %v10090_v41 = vsel %vm9970_vm14, %v10080_v51, 0.0  ;;  %v10368_v36 = vsel %vm9958_vm12, %v10367_v2, %v10349_v26  ;;  %v10369_v25 = vrot.slane %v10354_v49, 7  ;;  %v21083_v2 = vld [vmem:[#allocation189_spill] sm:$0xff] }
 0x43f   :  { %v9974_v27 = vsel %vm9970_vm14, %v9963_v16, 0.0  ;;  %v10082_v32 = vsel %vm9958_vm12, %v10081_v30, %v10062_v48  ;;  %v10091_v1 = vadd.f32 %v10090_v41, %v21081_v13  ;;  %v9965_v50 = vsel %vm9958_vm12, %v9964_v21, %v9944_v28 }
 0x440   :  { %v9975_v22 = vadd.f32 %v9974_v27, %v21082_v59  ;;  %v10092_v23 = vsel %vm9970_vm14, %v10082_v32, 0.0  ;;  %v9976_v37 = vsel %vm9970_vm14, %v9965_v50, 0.0  ;;  %v10370_v12 = vsel %vm9958_vm12, %v10369_v25, %v10350_v42 }
 0x441   :  { %v10378_v6 = vsel %vm9970_vm14, %v10368_v36, 0.0  ;;  %v10093_v15 = vadd.f32 %v10092_v23, %v10091_v1  ;;  %v10380_v30 = vsel %vm9970_vm14, %v10370_v12, 0.0  ;;  %v10176_v41 = vsel %vm9958_vm12, %v10175_v10, %v10157_v8 }
 0x442   :  { %v9977_v24 = vadd.f32 %v9976_v37, %v9975_v22  ;;  %v10379_v26 = vadd.f32 %v10378_v6, %v21083_v2  ;;  %v10177_v48 = vrot.slane %v10162_v55, 7  ;;  %v10546_v21 = vmul.f32 %v18139_v31, %v18179_v44 }
 0x443   :  { %v10559_v28 = vrot.slane %v10545_v46, 7  ;;  %10094 = vadd.xlane.f32.xlu1 %v10093_v15  ;;  %v10186_v42 = vsel %vm9970_vm14, %v10176_v41, 0.0  ;;  %v10258_v51 = vmul.f32 %v18149_v34, %v18179_v44  ;;  %v10271_v22 = vrot.slane %v10257_v40, 7 }
 0x444   :  { %9978 = vadd.xlane.f32.xlu0 %v9977_v24  ;;  %v10381_v49 = vadd.f32 %v10380_v30, %v10379_v26  ;;  %v10178_v16 = vsel %vm9958_vm12, %v10177_v48, %v10158_v54  ;;  %v10187_v27 = vadd.f32 %v10186_v42, %v18096_v56  ;;  %v10561_v55 = vrot.slane %v10546_v21, 7  ;;  %v21085_v21 = vld [vmem:[#allocation41_spill] sm:$0xff] }
 0x445   :  { %v10560_v8 = vsel %vm9958_vm12, %v10559_v28, %v10541_v20  ;;  %v10188_v10 = vsel %vm9970_vm14, %v10178_v16, 0.0  ;;  %v10272_v46 = vsel %vm9958_vm12, %v10271_v22, %v10253_v47  ;;  %v10273_v36 = vrot.slane %v10258_v51, 7  ;;  %v18276_v51 = vld [vmem:[#allocation16 + $0x4] ss:$8 sm:$0xf] }
 0x446   :  { %v10570_v31 = vsel %vm9970_vm14, %v10560_v8, 0.0  ;;  %v10189_v25 = vadd.f32 %v10188_v10, %v10187_v27  ;;  %v10562_v32 = vsel %vm9958_vm12, %v10561_v55, %v10542_v63  ;;  %v10282_v40 = vsel %vm9970_vm14, %v10272_v46, 0.0 }
 0x447   :  { %v10571_v34 = vadd.f32 %v10570_v31, %v18100_v62  ;;  %10382 = vadd.xlane.f32.xlu1 %v10381_v49  ;;  %v10572_v56 = vsel %vm9970_vm14, %v10562_v32, 0.0  ;;  %v10274_v20 = vsel %vm9958_vm12, %v10273_v36, %v10254_v9  ;;  %v10283_v54 = vadd.f32 %v10282_v40, %v18102_v29  ;;  %v18294_v36 = vld [vmem:[#allocation16 + $0x2] ss:$8 sm:$0xf] }
 0x448   :  { %v10450_v13 = vmul.f32 %v18153_v5, %v18179_v44  ;;  %10190 = vadd.xlane.f32.xlu0 %v10189_v25  ;;  %v10284_v47 = vsel %vm9970_vm14, %v10274_v20, 0.0  ;;  %v10445_v63 = vmul.f32 %v18145_v0, %v18127_v45  ;;  %v10463_v62 = vrot.slane %v18189_v38, 7 }
 0x449   :  { %v10641_v1 = vmul.f32 %v18157_v43, %v18169_v58  ;;  %v10573_v50 = vadd.f32 %v10572_v56, %v10571_v34  ;;  %v10446_v9 = vmul.f32 %v18153_v5, %v18131_v53  ;;  %v10642_v29 = vmul.f32 %v18161_v3, %v18179_v44 }
 0x44a   :  { %v10465_v59 = vrot.slane %v10450_v13, 7  ;;  %v10285_v23 = vadd.f32 %v10284_v47, %v10283_v54  ;;  %v10464_v37 = vsel %vm9958_vm12, %v10463_v62, %v10445_v63  ;;  %v10637_v12 = vmul.f32 %v18157_v43, %v18127_v45  ;;  %v18304_v54 = vld [vmem:[#allocation16 + $0x6] ss:$8 sm:$0xf] }
 0x44b   :  { %v10655_v0 = vrot.slane %v10641_v1, 7  ;;  %10574 = vadd.xlane.f32.xlu1 %v10573_v50  ;;  %v10474_v58 = vsel %vm9970_vm14, %v10464_v37, 0.0  ;;  %v10638_v6 = vmul.f32 %v18161_v3, %v18131_v53  ;;  %v10657_v5 = vrot.slane %v10642_v29, 7  ;;  %v21084_v3 = vld [vmem:[#allocation59_spill] sm:$0xff] }
 0x44c   :  { %v10466_v38 = vsel %vm9958_vm12, %v10465_v59, %v10446_v9  ;;  %10286 = vadd.xlane.f32.xlu0 %v10285_v23  ;;  %v10475_v15 = vadd.f32 %v10474_v58, %v18109_v4  ;;  %v10665_v45 = vadd.f32 %v18115_v17, %v18112_v52  ;;  %v18259_v4 = vld [vmem:[#allocation16 + $0x1] ss:$8 sm:$0xf]  ;;  %v9985_v17 = vld [vmem:[#allocation16] ss:$8 sm:$0xf]  ;;  %v10098_v22 = vstv %s18255_s4 }
 0x44d   :  { %v10476_v44 = vsel %vm9970_vm14, %v10466_v38, 0.0  ;;  %v10656_v24 = vsel %vm9958_vm12, %v10655_v0, %v10637_v12  ;;  %v10658_v43 = vsel %vm9958_vm12, %v10657_v5, %v10638_v6  ;;  %v18264_v52 = vld [vmem:[%s18460_s10] sm:$0xf]  ;;  %v10107_v48 = vrot.slane %v18259_v4, %v21084_v3  ;;  %s18278_s10 = sld [smem:[#allocation15 + $0x2]] }
 0x44e   :  { %v10666_v2 = vsel %vm9970_vm14, %v10656_v24, 0.0  ;;  %v10477_v26 = vadd.f32 %v10476_v44, %v10475_v15  ;;  %v10668_v41 = vsel %vm9970_vm14, %v10658_v43, 0.0  ;;  %v10111_v28 = vrot.slane %v18259_v4, %v21085_v21  ;;  %v18310_v1 = vld [vmem:[#allocation16 + $0x3] ss:$8 sm:$0xf] }
 0x44f   :  { %v10667_v30 = vadd.f32 %v10666_v2, %v10665_v45  ;;  %v10115_v49 = vrot.slane %v18259_v4, %v20960_v57  ;;  %v10119_v42 = vrot.slane %v18259_v4, %v20962_v39  ;;  %v10015_v16 = vrot.slane %v18264_v52, %v21084_v3  ;;  %v18333_v44 = vld [vmem:[#allocation16 + $0x5] ss:$8 sm:$0xf] }
 0x450   :  { %10478 = vadd.xlane.f32.xlu0 %v10477_v26  ;;  %v10019_v27 = vrot.slane %v18264_v52, %v21085_v21  ;;  %v10023_v8 = vrot.slane %v18264_v52, %v20960_v57  ;;  %v9990_v55 = vrot.slane %v9985_v17, %v21084_v3  ;;  %v9994_v10 = vrot.slane %v9985_v17, %v21085_v21 }
 0x451   :  { %v10669_v53 = vadd.f32 %v10668_v41, %v10667_v30  ;;  %v9998_v31 = vrot.slane %v9985_v17, %v20960_v57  ;;  %v10027_v46 = vrot.slane %v18264_v52, %v20962_v39  ;;  %v9982_v32 = vstv %s18257_s20 }
 0x452   :  { %v10002_v34 = vrot.slane %v9985_v17, %v20962_v39  ;;  %v10395_v56 = vrot.slane %v18276_v51, %v21084_v3  ;;  %v10399_v20 = vrot.slane %v18276_v51, %v21085_v21  ;;  %v10403_v63 = vrot.slane %v18276_v51, %v20960_v57 }
 0x453   :  { %v10203_v50 = vrot.slane %v18294_v36, %v21084_v3  ;;  %v10207_v9 = vrot.slane %v18294_v36, %v21085_v21  ;;  %v10211_v59 = vrot.slane %v18294_v36, %v20960_v57  ;;  %v10215_v29 = vrot.slane %v18294_v36, %v20962_v39 }
 0x454   :  { %10670 = vadd.xlane.f32.xlu0 %v10669_v53  ;;  %v10386_v12 = vstv %s18266_s24  ;;  %v10299_v15 = vrot.slane %v18310_v1, %v21084_v3  ;;  %v10303_v2 = vrot.slane %v18310_v1, %v21085_v21  ;;  %v10307_v26 = vrot.slane %v18310_v1, %v20960_v57 }
 0x455   :  { %v10194_v30 = vstv %s18278_s10  ;;  %v10578_v53 = vstv %s18287_s25  ;;  %v10311_v52 = vrot.slane %v18310_v1, %v20962_v39 }
 0x4cc   :  { %v10095_v25 = vpop.xlane.xlu1 %10094 }
 0x4cd   :  { %v9979_v40 = vpop.xlane.xlu0 %9978  ;;  %v10096_v13 = vmul.f32 0.00390625, %v10095_v25  ;;  %v10495_v25 = vrot.slane %v18333_v44, %v21085_v21 }
 0x4ce   :  { %v9980_v47 = vmul.f32 0.00390625, %v9979_v40 }
 0x4cf   :  { %v10099_v23 = vadd.f32 %v10098_v22, %v10096_v13  ;;  %v10290_v22 = vstv %s18296_s26 }
 0x4d0   :  { %v9983_v37 = vadd.f32 %v9982_v32, %v9980_v47  ;;  %v10383_v38 = vpop.xlane.xlu1 %10382 }
 0x4d1   :  { %v10384_v45 = vmul.f32 0.00390625, %v10383_v38  ;;  %v10191_v43 = vpop.xlane.xlu0 %10190  ;;  %v10100_v17 = vmax.f32 %v10099_v23, 0.0  ;;  %v10499_v23 = vrot.slane %v18333_v44, %v20960_v57 }
 0x4d2   :  { %v9984_v24 = vmax.f32 %v9983_v37, 0.0  ;;  %v10192_v41 = vmul.f32 0.00390625, %v10191_v43 }
 0x4d3   :  { %v10387_v38 = vadd.f32 %v10386_v12, %v10384_v45  ;;  %v10126_v12 = vmul.f32 %v10115_v49, %v10100_v17 }
 0x4d4   :  { %v10007_v32 = vmul.f32 %v9990_v55, %v9984_v24  ;;  %v10008_v40 = vmul.f32 %v9994_v10, %v9984_v24  ;;  %v10009_v13 = vmul.f32 %v9998_v31, %v9984_v24  ;;  %v10010_v47 = vmul.f32 %v10002_v34, %v9984_v24  ;;  %v10575_v37 = vpop.xlane.xlu1 %10574 }
 0x4d5   :  { %v10195_v43 = vadd.f32 %v10194_v30, %v10192_v41  ;;  %v10576_v5 = vmul.f32 0.00390625, %v10575_v37  ;;  %v10287_v6 = vpop.xlane.xlu0 %10286  ;;  %v10124_v55 = vmul.f32 %v10107_v48, %v10100_v17  ;;  %v10125_v10 = vmul.f32 %v10111_v28, %v10100_v17  ;;  %v10678_v28 = vld [vmem:[#allocation16 + $0x7] ss:$8 sm:$0xf] }
 0x4d6   :  { %v10032_v58 = vadd.f32 %v10015_v16, %v10007_v32  ;;  %v10033_v36 = vadd.f32 %v10019_v27, %v10008_v40  ;;  %v10034_v0 = vadd.f32 %v10023_v8, %v10009_v13  ;;  %v10035_v62 = vadd.f32 %v10027_v46, %v10010_v47 }
 0x4d7   :  { %v10196_v31 = vmax.f32 %v10195_v43, 0.0  ;;  %v10288_v34 = vmul.f32 0.00390625, %v10287_v6  ;;  %v10127_v16 = vmul.f32 %v10119_v42, %v10100_v17  ;;  %v10482_v27 = vstv %s18331_s0 }
 0x4d8   :  { %v10503_v8 = vrot.slane %v18333_v44, %v20962_v39  ;;  %v10388_v46 = vmax.f32 %v10387_v38, 0.0  ;;  %v10128_v48 = vadd.f32 %v10124_v55, %v10032_v58  ;;  %v10129_v24 = vadd.f32 %v10125_v10, %v10033_v36 }
 0x4d9   :  { %v10579_v45 = vadd.f32 %v10578_v53, %v10576_v5  ;;  %v10479_v30 = vpop.xlane.xlu0 %10478  ;;  %v10130_v6 = vadd.f32 %v10126_v12, %v10034_v0  ;;  %v10131_v41 = vadd.f32 %v10127_v16, %v10035_v62  ;;  %v10220_v32 = vmul.f32 %v10203_v50, %v10196_v31 }
 0x4da   :  { %v10221_v40 = vmul.f32 %v10207_v9, %v10196_v31  ;;  %v10222_v49 = vmul.f32 %v10211_v59, %v10196_v31  ;;  %v10223_v13 = vmul.f32 %v10215_v29, %v10196_v31  ;;  %v10291_v47 = vadd.f32 %v10290_v22, %v10288_v34 }
 0x4db   :  { %v10480_v4 = vmul.f32 0.00390625, %v10479_v30  ;;  %v10683_v42 = vrot.slane %v10678_v28, %v21084_v3  ;;  %v10687_v17 = vrot.slane %v10678_v28, %v21085_v21  ;;  %v10691_v37 = vrot.slane %v10678_v28, %v20960_v57 }
 0x4dc   :  { %v10695_v58 = vrot.slane %v10678_v28, %v20962_v39  ;;  %v10412_v5 = vmul.f32 %v10395_v56, %v10388_v46  ;;  %v10413_v62 = vmul.f32 %v10399_v20, %v10388_v46  ;;  %v10580_v50 = vmax.f32 %v10579_v45, 0.0 }
 0x4dd   :  { %v10674_v9 = vstv %s18350_s27  ;;  %v10671_v59 = vpop.xlane.xlu0 %10670  ;;  %v10414_v29 = vmul.f32 %v10403_v63, %v10388_v46  ;;  %v10292_v0 = vmax.f32 %v10291_v47, 0.0  ;;  %v10483_v53 = vadd.f32 %v10482_v27, %v10480_v4 }
 0x4de   :  { %v10672_v22 = vmul.f32 0.00390625, %v10671_v59  ;;  %v10224_v36 = vadd.f32 %v10220_v32, %v10128_v48  ;;  %v10225_v38 = vadd.f32 %v10221_v40, %v10129_v24  ;;  %v10226_v43 = vadd.f32 %v10222_v49, %v10130_v6 }
 0x4df   :  { %v10227_v55 = vadd.f32 %v10223_v13, %v10131_v41  ;;  %v10316_v56 = vmul.f32 %v10299_v15, %v10292_v0  ;;  %v10317_v20 = vmul.f32 %v10303_v2, %v10292_v0  ;;  %v10318_v10 = vmul.f32 %v10307_v26, %v10292_v0 }
 0x4e0   :  { %v10319_v63 = vmul.f32 %v10311_v52, %v10292_v0  ;;  %v21086_v31 = vrot.slane %v18276_v51, %v20962_v39  ;;  %v21087_v12 = vrot.slane %v18304_v54, %v21084_v3  ;;  %v10484_v27 = vmax.f32 %v10483_v53, 0.0 }
 0x4e1   :  { %v10675_v48 = vadd.f32 %v10674_v9, %v10672_v22  ;;  %v10320_v15 = vadd.f32 %v10316_v56, %v10224_v36  ;;  %v10321_v24 = vadd.f32 %v10317_v20, %v10225_v38  ;;  %v10322_v45 = vadd.f32 %v10318_v10, %v10226_v43 }
 0x4e2   :  { %v10415_v34 = vmul.f32 %v21086_v31, %v10388_v46  ;;  %v10604_v16 = vmul.f32 %v21087_v12, %v10580_v50  ;;  %v10323_v30 = vadd.f32 %v10319_v63, %v10227_v55  ;;  %v21088_v2 = vrot.slane %v18333_v44, %v21084_v3 }
 0x4e3   :  { %v10509_v26 = vmul.f32 %v10495_v25, %v10484_v27  ;;  %v10510_v51 = vmul.f32 %v10499_v23, %v10484_v27  ;;  %v10511_v52 = vmul.f32 %v10503_v8, %v10484_v27  ;;  %v10416_v46 = vadd.f32 %v10412_v5, %v10320_v15 }
 0x4e4   :  { %v10508_v1 = vmul.f32 %v21088_v2, %v10484_v27  ;;  %v10417_v28 = vadd.f32 %v10413_v62, %v10321_v24  ;;  %v10418_v6 = vadd.f32 %v10414_v29, %v10322_v45  ;;  %v10419_v41 = vadd.f32 %v10415_v34, %v10323_v30  ;;  %v21092_v24 = vld [vmem:[#allocation25_spill] sm:$0xff] }
 0x4e5   :  { %v21089_v32 = vrot.slane %v18304_v54, %v21085_v21  ;;  %v21090_v49 = vrot.slane %v18304_v54, %v20960_v57  ;;  %v21091_v47 = vrot.slane %v18304_v54, %v20962_v39  ;;  %v10676_v44 = vmax.f32 %v10675_v48, 0.0 }
 0x4e6   :  { %v10512_v25 = vadd.f32 %v10508_v1, %v10416_v46  ;;  %v10513_v23 = vadd.f32 %v10509_v26, %v10417_v28  ;;  %v10514_v8 = vadd.f32 %v10510_v51, %v10418_v6  ;;  %v10515_v5 = vadd.f32 %v10511_v52, %v10419_v41 }
 0x4e7   :  { %v10605_v40 = vmul.f32 %v21089_v32, %v10580_v50  ;;  %v10606_v13 = vmul.f32 %v21090_v49, %v10580_v50  ;;  %v10607_v4 = vmul.f32 %v21091_v47, %v10580_v50  ;;  %v10700_v62 = vmul.f32 %v10683_v42, %v10676_v44 }
 0x4e8   :  { %v10701_v9 = vmul.f32 %v10687_v17, %v10676_v44  ;;  %v10702_v59 = vmul.f32 %v10691_v37, %v10676_v44  ;;  %v10703_v29 = vmul.f32 %v10695_v58, %v10676_v44  ;;  %v10608_v0 = vadd.f32 %v10604_v16, %v10512_v25 }
 0x4e9   :  { %v10609_v53 = vadd.f32 %v10605_v40, %v10513_v23  ;;  %v10610_v22 = vadd.f32 %v10606_v13, %v10514_v8  ;;  %v10611_v36 = vadd.f32 %v10607_v4, %v10515_v5  ;;  %v11173_v16 = vmov 1966171168   ;;  %v21093_v8 = vld [vmem:[#allocation99_spill] sm:$0xff] }
 0x4ea   :  { %v10704_v38 = vadd.f32 %v10700_v62, %v10608_v0  ;;  %v10739_v27 = vunpack.c.l.s4 %v11173_v16  ;;  %v21094_v62 = vld [vmem:[#allocation121_spill] sm:$0xff] }
 0x4eb   :  { %v10705_v43 = vadd.f32 %v10701_v9, %v10609_v53  ;;  %v10706_v55 = vadd.f32 %v10702_v59, %v10610_v22  ;;  %v10707_v56 = vadd.f32 %v10703_v29, %v10611_v36  ;;  %v21095_v0 = vld [vmem:[#allocation61_spill] sm:$0xff] }
 0x4ec   :  { %v10889_v20 = vmul.f32 -1.442695, %v10704_v38  ;;  %v10740_v48 = vunpack.c.0.s8 %v10739_v27  ;;  %v21096_v22 = vld [vmem:[#allocation133_spill] sm:$0xff]  ;;  %v21097_v38 = vld [vmem:[#allocation74_spill] sm:$0xff] }
 0x4ed   :  { %v10890_v54 = vmul.f32 -1.442695, %v10705_v43  ;;  %v10891_v50 = vmul.f32 -1.442695, %v10706_v55  ;;  %v10892_v10 = vmul.f32 -1.442695, %v10707_v56 }
 0x4ee   :  { %10908 = vpow2.f32 %v10889_v20  ;;  %v10743_v45 = vsub.s32 %v10740_v48, %v21092_v24  ;;  %v21098_v43 = vld [vmem:[#allocation165_spill] sm:$0xff]  ;;  %v21099_v20 = vld [vmem:[#allocation39_spill] sm:$0xff]  ;;  %v21103_v27 = vld [vmem:[#allocation122_spill] sm:$0xff] }
 0x4ef   :  { %10910 = vpow2.f32 %v10890_v54  ;;  %v21100_v54 = vld [vmem:[#allocation72_spill] sm:$0xff]  ;;  %v10970_v48 = vld [vmem:[#allocation3 + $0x40] sm:$0xff] }
 0x4f0   :  { %10912 = vpow2.f32 %v10891_v50 }
 0x4f1   :  { %10914 = vpow2.f32 %v10892_v10 }
 0x4fb   :  { %v10909_v42 = vpop.eup %10908 }
 0x4fc   :  { %v10911_v17 = vpop.eup %10910  ;;  %v10720_v37 = vadd.f32 1.0, %v10909_v42  ;;  %v10966_v42 = vld [vmem:[#allocation3] sm:$0xff] }
 0x4fd   :  { %v10913_v58 = vpop.eup %10912  ;;  %v10721_v63 = vadd.f32 1.0, %v10911_v17  ;;  %v10967_v17 = vld [vmem:[#allocation3 + $0x8] sm:$0xff] }
 0x4fe   :  { %v10915_v31 = vpop.eup %10914  ;;  %v10722_v34 = vadd.f32 1.0, %v10913_v58  ;;  %10916 = vrcp.f32 %v10720_v37  ;;  %v21101_v58 = vld [vmem:[#allocation190_spill] sm:$0xff] }
 0x4ff   :  { %v10723_v12 = vadd.f32 1.0, %v10915_v31  ;;  %10918 = vrcp.f32 %v10721_v63  ;;  %v10969_v31 = vld [vmem:[#allocation3 + $0x28] sm:$0xff] }
 0x500   :  { %10920 = vrcp.f32 %v10722_v34 }
 0x501   :  { %10922 = vrcp.f32 %v10723_v12  ;;  %v21102_v12 = vld [vmem:[#allocation156_spill] sm:$0xff] }
 0x50b   :  { %v10917_v15 = vpop.eup %10916 }
 0x50c   :  { %v10919_v30 = vpop.eup %10918 }
 0x50d   :  { %v10921_v2 = vpop.eup %10920  ;;  %v10736_v1 = vcombine.low %v10917_v15, %v10919_v30  ;;  %v10971_v15 = vld [vmem:[#allocation3 + $0x48] sm:$0xff] }
 0x50e   :  { %v10923_v26 = vpop.eup %10922 }
 0x50f   :  { %v10737_v51 = vcombine.low %v10921_v2, %v10923_v26  ;;  %v10744_v52 = vrot.slane %v10736_v1, %v10743_v45  ;;  %v21105_v2 = vld [vmem:[#allocation85_spill] sm:$0xff]  ;;  %v10972_v1 = vld [vmem:[#allocation3 + $0x60] sm:$0xff] }
 0x511   :  { %v10751_v46 = vrot.slane %v10737_v51, %v10743_v45  ;;  %v10973_v51 = vld [vmem:[#allocation3 + $0x68] sm:$0xff] }
 0x513   :  { %v10752_v28 = vcombine.low %v10744_v52, %v10751_v46  ;;  %v10753_v6 = vcombine.high %v10744_v52, %v10751_v46  ;;  %v21106_v46 = vld [vmem:[#allocation197_spill] sm:$0xff] }
 0x515   :  { %v10760_v41 = vrot.slane %v10752_v28, %v10743_v45  ;;  %v10767_v32 = vrot.slane %v10753_v6, %v10743_v45  ;;  %v21104_v45 = vld [vmem:[#allocation137_spill] sm:$0xff]  ;;  %v21107_v6 = vld [vmem:[#allocation198_spill] sm:$0xff] }
 0x517   :  { %v10771_v40 = vrot.slane %v10760_v41, %v21084_v3  ;;  %v10775_v49 = vrot.slane %v10760_v41, %v21085_v21  ;;  %v10779_v13 = vrot.slane %v10760_v41, %v20960_v57  ;;  %v10783_v47 = vrot.slane %v10760_v41, %v20962_v39 }
 0x518   :  { %v10787_v4 = vrot.slane %v10767_v32, %v21084_v3  ;;  %v10791_v44 = vrot.slane %v10767_v32, %v21085_v21  ;;  %v10795_v25 = vrot.slane %v10767_v32, %v20960_v57  ;;  %v10799_v23 = vrot.slane %v10767_v32, %v20962_v39 }
 0x519   :  { %v10808_v5 = vmul.f32 %v10771_v40, %v21093_v8  ;;  %v10809_v9 = vmul.f32 %v10775_v49, %v21094_v62  ;;  %v10810_v59 = vmul.f32 %v10779_v13, %v18020_v35  ;;  %v10811_v29 = vmul.f32 %v10783_v47, %v18037_v7 }
 0x51a   :  { %v10812_v53 = vmul.f32 %v10771_v40, %v21095_v0  ;;  %v10813_v36 = vmul.f32 %v10775_v49, %v21096_v22  ;;  %v10814_v3 = vmul.f32 %v10779_v13, %v18027_v18  ;;  %v10815_v21 = vmul.f32 %v10783_v47, %v18043_v19 }
 0x51b   :  { %v10816_v57 = vmul.f32 %v10787_v4, %v21097_v38  ;;  %v10817_v39 = vmul.f32 %v10791_v44, %v21098_v43  ;;  %v10818_v55 = vmul.f32 %v10795_v25, %v18064_v33  ;;  %v10819_v56 = vmul.f32 %v10799_v23, %v18080_v61  ;;  %v10968_v33 = vld [vmem:[#allocation3 + $0x20] sm:$0xff] }
 0x51c   :  { %v10820_v35 = vmul.f32 %v10787_v4, %v21099_v20  ;;  %v10821_v7 = vmul.f32 %v10791_v44, %v21100_v54  ;;  %v10822_v50 = vmul.f32 %v10795_v25, %v18075_v60  ;;  %v10823_v10 = vmul.f32 %v10799_v23, %v18090_v11 }
 0x51d   :  { %v10824_v18 = vadd.f32 %v10966_v42, %v10808_v5  ;;  %v10825_v19 = vadd.f32 %v10967_v17, %v10809_v9  ;;  %v10826_v37 = vadd.f32 %v18017_v14, %v10810_v59  ;;  %v10827_v63 = vadd.f32 %v21101_v58, %v10811_v29 }
 0x51e   :  { %v10828_v61 = vadd.f32 %v10968_v33, %v10812_v53  ;;  %v10829_v34 = vadd.f32 %v10969_v31, %v10813_v36  ;;  %v10830_v16 = vadd.f32 %v21102_v12, %v10814_v3  ;;  %v10831_v60 = vadd.f32 %v21103_v27, %v10815_v21 }
 0x51f   :  { %v10832_v11 = vadd.f32 %v10970_v48, %v10816_v57  ;;  %v10833_v24 = vadd.f32 %v10971_v15, %v10817_v39  ;;  %v10834_v30 = vadd.f32 %v21104_v45, %v10818_v55  ;;  %v10835_v14 = vadd.f32 %v21105_v2, %v10819_v56  ;;  %10840 = vst [vmem:[#allocation17] sm:$0xff] %v10824_v18 }
 0x520   :  { %10841 = vst [vmem:[#allocation17 + $0x8] sm:$0xff] %v10825_v19  ;;  %10842 = vst [vmem:[#allocation17 + $0x10] sm:$0xff] %v10826_v37  ;;  %v10836_v26 = vadd.f32 %v10972_v1, %v10820_v35  ;;  %v10837_v52 = vadd.f32 %v10973_v51, %v10821_v7  ;;  %v10838_v28 = vadd.f32 %v21106_v46, %v10822_v50 }
 0x521   :  { %10843 = vst [vmem:[#allocation17 + $0x18] sm:$0xff] %v10827_v63  ;;  %v10839_v41 = vadd.f32 %v21107_v6, %v10823_v10  ;;  %10844 = vst [vmem:[#allocation17 + $0x20] sm:$0xff] %v10828_v61 }
 0x522   :  { %10845 = vst [vmem:[#allocation17 + $0x28] sm:$0xff] %v10829_v34  ;;  %10846 = vst [vmem:[#allocation17 + $0x30] sm:$0xff] %v10830_v16 }
 0x523   :  { %10847 = vst [vmem:[#allocation17 + $0x38] sm:$0xff] %v10831_v60  ;;  %10848 = vst [vmem:[#allocation17 + $0x40] sm:$0xff] %v10832_v11 }
 0x524   :  { %10849 = vst [vmem:[#allocation17 + $0x48] sm:$0xff] %v10833_v24  ;;  %10850 = vst [vmem:[#allocation17 + $0x50] sm:$0xff] %v10834_v30 }
 0x525   :  { %10851 = vst [vmem:[#allocation17 + $0x58] sm:$0xff] %v10835_v14  ;;  %10852 = vst [vmem:[#allocation17 + $0x60] sm:$0xff] %v10836_v26 }
 0x526   :  { %10853 = vst [vmem:[#allocation17 + $0x68] sm:$0xff] %v10837_v52  ;;  %10854 = vst [vmem:[#allocation17 + $0x70] sm:$0xff] %v10838_v28 }
 0x527   :  { %10855 = vst [vmem:[#allocation17 + $0x78] sm:$0xff] %v10839_v41 }
 0x528   :  { %11137 = shalt.err (!%p11134_p2)
}
 0x529   :  { %10872 = dma.vmem_to_hbm [thread:$0]  %s10867_s29, 2048, %s18461_s11, [#allocation5], %s11162_s22, %s11162_s22, %s11163_s23  }
 0x52a   :  { %11158 = dma.done.wait [#allocation5], 2048  }
 0x52b   :  { %11159 = vsyncadd [#allocation5], 4294965248 }
 0x52c   :  { %10876 = vsyncpa [#allocation4], 1 }
 0x52d   :  { %10877 = vsyncpa [#allocation8], 1 }
 0x52e   :  { %10878 = vsyncpa [#allocation11], 1 }
 0x52f   :  { %10879 = vsyncpa [#allocation14], 1 }
 0x530   :  { %10880 = vsyncpa [#allocation5], 1 }
 0x531   :  { %10881 = vsyncpa [#allocation6], 1 }

</bundles_post_ra>
